<compile_context>
chip_gen: v7x
topology: tpu7x:2x2x1
jax: 0.10.0
libtpu: 0.0.40
codegen_flags: <defaults>
</compile_context>

<pallas_src>
import numpy as np
import jax
import jax.numpy as jnp
from jax.experimental import pallas as pl
from jax.experimental.pallas import tpu as pltpu

_VMEM_LIMIT = 64 * 1024 * 1024


def _round_up(x, m):
    return ((x + m - 1) // m) * m


def _row_tile(M, cands=(512, 256, 128, 64, 32, 16, 8)):
    for c in cands:
        if M % c == 0:
            return c
    return M


# ----------------------------------------------------------------------------
# Kernel 1: M-tiled fused matmul + per-output-channel affine + PReLU
#           (block-DCT and the recognizer linear head)
# ----------------------------------------------------------------------------
def _matmul_affine_prelu_kernel(a_ref, w_ref, aff_ref, o_ref):
    y = jnp.dot(a_ref[...], w_ref[...], preferred_element_type=jnp.float32)
    aff = aff_ref[...]
    scale, bias, alpha = aff[0:1, :], aff[1:2, :], aff[2:3, :]
    y = y * scale + bias
    o_ref[...] = jnp.where(y >= 0.0, y, alpha * y)


def matmul_affine_prelu(a, w, scale, bias, alpha):
    """(M,K)@(K,N) (operand dtypes as passed, f32 accumulate) + affine + PReLU."""
    M, K = a.shape
    Kw, N = w.shape
    assert K == Kw
    tm = _row_tile(M)

    def _row(v):
        return jnp.broadcast_to(jnp.asarray(v, jnp.float32).reshape(-1), (N,))

    aff = jnp.stack([_row(scale), _row(bias), _row(alpha)])          # packed (3, N)
    flops = 2 * M * K * N
    bytes_accessed = int(a.size * a.dtype.itemsize + w.size * w.dtype.itemsize
                         + M * N * 4 + aff.size * 4)
    return pl.pallas_call(
        _matmul_affine_prelu_kernel,
        out_shape=jax.ShapeDtypeStruct((M, N), jnp.float32),
        grid=(M // tm,),
        in_specs=[pl.BlockSpec((tm, K), lambda i: (i, 0)),
                  pl.BlockSpec((K, N), lambda i: (0, 0)),
                  pl.BlockSpec((3, N), lambda i: (0, 0))],
        out_specs=pl.BlockSpec((tm, N), lambda i: (i, 0)),
        compiler_params=pltpu.CompilerParams(
            dimension_semantics=("parallel",),
            vmem_limit_bytes=_VMEM_LIMIT),
        cost_estimate=pl.CostEstimate(flops=int(flops), transcendentals=0,
                                      bytes_accessed=bytes_accessed),
    )(a, w, aff)


# ----------------------------------------------------------------------------
# Kernel 2: fused 3x3 "same" conv with width taps packed into K = 3*Cin
#           + folded BN affine + PReLU/ReLU epilogue
# ----------------------------------------------------------------------------
def _make_conv3x3_kernel(H, Wp, Cout):
    HWp = H * Wp                                    # valid output rows per image

    def kernel(x_ref, w_ref, aff_ref, o_ref):
        # 3 row-shifted matmuls (one per kh); the 3 width taps are pre-packed
        # into K = 3*Cin, and every row offset is a multiple of 8 (sublane
        # aligned), so each tap load is a plain vld feeding the MXU.
        acc = jnp.dot(x_ref[0:HWp, :], w_ref[0],
                      preferred_element_type=jnp.float32)
        acc = acc + jnp.dot(x_ref[Wp:Wp + HWp, :], w_ref[1],
                            preferred_element_type=jnp.float32)
        acc = acc + jnp.dot(x_ref[2 * Wp:2 * Wp + HWp, :], w_ref[2],
                            preferred_element_type=jnp.float32)
        aff = aff_ref[...]
        scale, bias, alpha = aff[0:1, :], aff[1:2, :], aff[2:3, :]
        y = acc * scale + bias                                   # f32 epilogue
        y = jnp.where(y >= 0.0, y, alpha * y)                    # PReLU
        o_ref[...] = y.astype(o_ref.dtype)

    return kernel


def conv3x3_cl(x_cl, w3_bf16, aff, out_dtype=jnp.bfloat16):
    """3x3 'same' conv on a channels-last (B, H, W, Cin) activation.

    w3_bf16 : (3, 3*Cin, Cout) bf16, index [kh, kw*Cin + cin, cout]
    aff     : (3, Cout) f32 rows = (scale, bias, prelu_alpha)
    """
    B, H, W, C = x_cl.shape
    Cout = w3_bf16.shape[-1]
    Wp = _round_up(W, 8)                      # aligned row stride for the kernel
    xp = jnp.pad(x_cl.astype(jnp.bfloat16), ((0, 0), (1, 1), (1, 1), (0, 0)))
    # Pack the 3 width taps into the K dim: (B, H+2, W, 3*Cin), bf16.
    xw = jnp.concatenate([xp[:, :, 0:W, :], xp[:, :, 1:W + 1, :],
                          xp[:, :, 2:W + 2, :]], axis=-1)
    if Wp > W:
        xw = jnp.pad(xw, ((0, 0), (0, 0), (0, Wp - W), (0, 0)))
    a = xw.reshape(B * (H + 2) * Wp, 3 * C)

    HWp = H * Wp
    Rin = (H + 2) * Wp
    flops = 2 * B * HWp * (9 * C) * Cout
    bytes_accessed = int(a.size * 2 + w3_bf16.size * 2 + aff.size * 4
                         + B * HWp * Cout * jnp.dtype(out_dtype).itemsize)
    out = pl.pallas_call(
        _make_conv3x3_kernel(H, Wp, Cout),
        out_shape=jax.ShapeDtypeStruct((B * HWp, Cout), out_dtype),
        grid=(B,),                                   # one image per program
        in_specs=[pl.BlockSpec((Rin, 3 * C), lambda b: (b, 0)),
                  pl.BlockSpec((3, 3 * C, Cout), lambda b: (0, 0, 0)),
                  pl.BlockSpec((3, Cout), lambda b: (0, 0))],
        out_specs=pl.BlockSpec((HWp, Cout), lambda b: (b, 0)),
        compiler_params=pltpu.CompilerParams(
            dimension_semantics=("parallel",),       # >=2 programs -> both v7x TCs
            vmem_limit_bytes=_VMEM_LIMIT),
        cost_estimate=pl.CostEstimate(flops=int(flops), transcendentals=0,
                                      bytes_accessed=bytes_accessed),
    )(a, w3_bf16, aff)
    return out.reshape(B, H, Wp, Cout)[:, :, :W, :]  # drop alignment-pad columns


# ----------------------------------------------------------------------------
# Kernel 3: 2x2 stride-2 max-pool (4-way elementwise max, channels lane-dense)
# ----------------------------------------------------------------------------
def _max4_kernel(a_ref, b_ref, c_ref, d_ref, o_ref):
    a = a_ref[...].astype(jnp.float32)
    b = b_ref[...].astype(jnp.float32)
    c = c_ref[...].astype(jnp.float32)
    d = d_ref[...].astype(jnp.float32)
    o_ref[...] = jnp.maximum(jnp.maximum(a, b), jnp.maximum(c, d)).astype(o_ref.dtype)


def maxpool2x2_cl(x_cl):
    B, H, W, C = x_cl.shape
    Ho, Wo = H // 2, W // 2
    shape2 = (B * Ho * Wo, C)
    taps = [x_cl[:, di::2, dj::2, :].reshape(shape2)
            for di in range(2) for dj in range(2)]
    spec = pl.BlockSpec(shape2, lambda i: (0, 0))
    out = pl.pallas_call(
        _max4_kernel,
        out_shape=jax.ShapeDtypeStruct(shape2, x_cl.dtype),
        grid=(1,),
        in_specs=[spec, spec, spec, spec],
        out_specs=spec,
        compiler_params=pltpu.CompilerParams(vmem_limit_bytes=_VMEM_LIMIT),
    )(*taps)
    return out.reshape(B, Ho, Wo, C)


# ----------------------------------------------------------------------------
# Kernel 4: fused residue + double block-IDCT (+ the trailing *2-1 affine)
#           operates on (rows*3, 64) so the block-diagonal basis is exploited.
# ----------------------------------------------------------------------------
def _idct_residue_kernel(xup_ref, xenc_ref, w_ref, encpix_ref, respix_ref, res_ref):
    xup = xup_ref[...]
    xenc = xenc_ref[...]
    res = xup - xenc                                   # f32 subtraction, fused
    res_ref[...] = res
    w = w_ref[...]                                     # f32 64x64 IDCT basis
    enc = jnp.dot(xenc, w, preferred_element_type=jnp.float32)
    rsd = jnp.dot(res, w, preferred_element_type=jnp.float32)
    encpix_ref[...] = enc * 2.0 - 1.0
    respix_ref[...] = rsd * 2.0 - 1.0


def idct_and_residue(x_up64, x_enc64, m2_f32):
    R3, K = x_up64.shape                               # K = 64
    tm = _row_tile(R3)
    spec = pl.BlockSpec((tm, K), lambda i: (i, 0))
    wspec = pl.BlockSpec((K, K), lambda i: (0, 0))
    return pl.pallas_call(
        _idct_residue_kernel,
        out_shape=(jax.ShapeDtypeStruct((R3, K), jnp.float32),
                   jax.ShapeDtypeStruct((R3, K), jnp.float32),
                   jax.ShapeDtypeStruct((R3, K), jnp.float32)),
        grid=(R3 // tm,),
        in_specs=[spec, spec, wspec],
        out_specs=[spec, spec, spec],
        compiler_params=pltpu.CompilerParams(
            dimension_semantics=("parallel",),
            vmem_limit_bytes=_VMEM_LIMIT),
    )(x_up64.astype(jnp.float32), x_enc64.astype(jnp.float32), m2_f32)


# ----------------------------------------------------------------------------
# DCT / IDCT bases and boundary layout glue (f32 for reconstruction accuracy)
# ----------------------------------------------------------------------------
def dct_matrix_8():
    x = np.arange(8)[None, :]
    u = np.arange(8)[:, None]
    Dm = np.cos((2.0 * x + 1.0) * u * np.pi / 16.0) * np.sqrt(2.0 / 8.0)
    Dm[0, :] *= 1.0 / np.sqrt(2.0)
    return Dm.astype(np.float32)


def make_dct_bases():
    Dm = dct_matrix_8()
    M2 = np.kron(Dm, Dm)                     # 64x64 row-major 2-D DCT basis
    return (jnp.asarray(M2.T, jnp.float32),  # forward: pix_row @ M2.T
            jnp.asarray(M2, jnp.float32))    # inverse: coeff_row @ M2


def dct_rows64(x_nchw, m2t_f32):
    # NCHW image -> (B*h*w*3, 64) block-pixel rows (one boundary transpose),
    # then one f32 (R3,64)@(64,64) matmul kernel.
    B, C, H, W = x_nchw.shape
    h, w = H // 8, W // 8
    blocks = x_nchw.reshape(B, C, h, 8, w, 8).transpose(0, 2, 4, 1, 3, 5).reshape(
        B * h * w * C, 64)
    one = jnp.ones((64,), jnp.float32)
    zero = jnp.zeros((64,), jnp.float32)
    rows64 = matmul_affine_prelu(blocks.astype(jnp.float32), m2t_f32, one, zero, one)
    return rows64, (B, h, w)


def rows64_to_nchw(rows64, B, h, w):
    return rows64.reshape(B, h, w, 3, 8, 8).transpose(0, 3, 1, 4, 2, 5).reshape(
        B, 3, h * 8, w * 8)


# ----------------------------------------------------------------------------
# Parameters: synthetic UNet(192,192) generator + IR_18 stand-in recognizer
# ----------------------------------------------------------------------------
def bn_fold(gamma, beta, mean, var, eps=1e-5):
    scale = gamma / jnp.sqrt(var + eps)
    bias = beta - mean * scale
    return scale, bias


def init_params(key, feat_hw):
    ks = jax.random.split(key, 8)

    def conv_w(k, cout, cin):
        return jax.random.normal(k, (cout, cin, 3, 3), jnp.float32) * 0.05

    p = {}
    p['unet_e1_w'] = conv_w(ks[0], 32, 192)
    p['unet_e2_w'] = conv_w(ks[1], 64, 32)
    p['unet_d1_w'] = conv_w(ks[2], 32, 96)
    p['unet_out_w'] = conv_w(ks[3], 192, 32)
    p['unet_out_b'] = jax.random.normal(ks[4], (192,), jnp.float32) * 0.05
    for name, c in [('unet_e1', 32), ('unet_e2', 64), ('unet_d1', 32),
                    ('rec_in', 64), ('rec_fc', 512)]:
        p[name + '_bn'] = (jnp.ones((c,), jnp.float32), jnp.zeros((c,), jnp.float32),
                           jnp.zeros((c,), jnp.float32), jnp.ones((c,), jnp.float32))
    p['rec_in_w'] = conv_w(ks[5], 64, 192)
    p['rec_prelu'] = jnp.full((64,), 0.25, jnp.float32)      # PyTorch PReLU default
    p['rec_fc_w'] = jax.random.normal(ks[6], (512, 64 * feat_hw), jnp.float32) * 0.02
    p['rec_fc_b'] = jax.random.normal(ks[7], (512,), jnp.float32) * 0.02
    return p


def prepare_params(p):
    """Re-layout conv weights to (3, 3*Cin, Cout) bf16 and fold BN into affines."""
    def w3(weight):
        cout, cin = weight.shape[0], weight.shape[1]
        # (Cout, Cin, kh, kw) -> (kh, kw, Cin, Cout) -> (kh, kw*Cin+ci, Cout)
        return jnp.asarray(
            weight.transpose(2, 3, 1, 0).reshape(3, 3 * cin, cout), jnp.bfloat16)

    def aff(scale, bias, alpha):
        return jnp.stack([scale, bias, alpha]).astype(jnp.float32)

    q = {}
    s, b = bn_fold(*p['unet_e1_bn'])
    q['e1'] = (w3(p['unet_e1_w']), aff(s, b, jnp.zeros_like(s)))        # BN + ReLU
    s, b = bn_fold(*p['unet_e2_bn'])
    q['e2'] = (w3(p['unet_e2_w']), aff(s, b, jnp.zeros_like(s)))        # BN + ReLU
    s, b = bn_fold(*p['unet_d1_bn'])
    q['d1'] = (w3(p['unet_d1_w']), aff(s, b, jnp.zeros_like(s)))        # BN + ReLU
    one192 = jnp.ones((192,), jnp.float32)
    q['out'] = (w3(p['unet_out_w']), aff(one192, p['unet_out_b'], one192))  # linear
    s, b = bn_fold(*p['rec_in_bn'])
    q['rec_in'] = (w3(p['rec_in_w']), aff(s, b, p['rec_prelu']))        # BN + PReLU
    s2, b2 = bn_fold(*p['rec_fc_bn'])
    q['fc_w'] = jnp.asarray(p['rec_fc_w'].T, jnp.bfloat16)              # (K, 512)
    q['fc_scale'] = s2
    q['fc_bias'] = p['rec_fc_b'] * s2 + b2
    q['fc_alpha'] = jnp.ones((512,), jnp.float32)
    return q


# ----------------------------------------------------------------------------
# MinusBackbone.forward, mode='stage1'
# ----------------------------------------------------------------------------
def minus_backbone_forward(x, q, m2t_f32, m2_f32):
    # self.encoder: per-channel 8x8 block DCT (block-diagonal -> (R3,64) matmul)
    x_up64, (B, h, w) = dct_rows64(x, m2t_f32)
    x_up_cl = x_up64.reshape(B, h, w, 192)                  # channels-last f32

    # generator.backbone.encode  (channels-last, bf16 intermediates)
    e1 = conv3x3_cl(x_up_cl, *q['e1'])                      # (B, h, w, 32)
    pooled = maxpool2x2_cl(e1)                              # (B, h/2, w/2, 32)
    e2 = conv3x3_cl(pooled, *q['e2'])                       # (B, h/2, w/2, 64)

    # generator.backbone.decode
    up = jnp.repeat(jnp.repeat(e2, 2, axis=1), 2, axis=2)   # nearest 2x upsample (glue)
    cat = jnp.concatenate([up, e1], axis=-1)                # (B, h, w, 96)
    d1 = conv3x3_cl(cat, *q['d1'])                          # (B, h, w, 32)
    x_enc_cl = conv3x3_cl(d1, *q['out'], out_dtype=jnp.float32)   # (B, h, w, 192) f32
    x_enc64 = x_enc_cl.reshape(B * h * w * 3, 64)

    x_latent = e2.transpose(0, 3, 1, 2).astype(jnp.float32)       # NCHW, x_features[-1]

    # residue + decoder on both x_encode_up and x_residue_up (one fused kernel, *2-1 fused)
    enc_pix64, res_pix64, res64 = idct_and_residue(x_up64, x_enc64, m2_f32)
    x_encode = rows64_to_nchw(enc_pix64, B, h, w)
    x_residue = rows64_to_nchw(res_pix64, B, h, w)

    # recognizer(x_residue_up): replaced input_layer Conv(192->64)+BN+PReLU
    res_cl = res64.reshape(B, h, w, 192)
    f = conv3x3_cl(res_cl, *q['rec_in'])                    # (B, h, w, 64) bf16
    # TODO(synk): IR_18 residual body unavailable; flatten + Linear(512) + BN1d stands in.
    feat_in = f.transpose(0, 3, 1, 2).reshape(B, -1)        # torch NCHW flatten order
    x_feature = matmul_affine_prelu(feat_in, q['fc_w'], q['fc_scale'],
                                    q['fc_bias'], q['fc_alpha'])
    return x_encode, x_residue, x_feature, x_latent


if __name__ == "__main__":
    key = jax.random.PRNGKey(0)
    kx, kp = jax.random.split(key)
    B, H, W = 2, 32, 32
    # layout: NCHW input, matching the PyTorch module (H, W multiples of 16).
    x = jax.random.uniform(kx, (B, 3, H, W), jnp.float32)

    m2t, m2 = make_dct_bases()
    params = init_params(kp, feat_hw=(H // 8) * (W // 8))
    q = prepare_params(params)

    fwd = jax.jit(lambda xx: minus_backbone_forward(xx, q, m2t, m2))
    outs = jax.block_until_ready(fwd(x))
    x_encode, x_residue, x_feature, x_latent = outs
    assert x_encode.shape == (B, 3, H, W)
    assert x_residue.shape == (B, 3, H, W)
    assert x_feature.shape == (B, 512)
    assert x_latent.shape == (B, 64, H // 16, W // 16)
    assert bool(jnp.all(jnp.isfinite(x_encode)))
    assert bool(jnp.all(jnp.isfinite(x_residue)))
    assert bool(jnp.all(jnp.isfinite(x_feature)))
    print("KERNEL_OK")
</pallas_src>

<mosaic_0001>
module attributes {stable_mosaic.version = 11 : i64} {
  func.func @_matmul_affine_prelu_kernel(%arg0: i32, %arg1: memref<32x64xf32, #tpu.memory_space<vmem>>, %arg2: memref<64x64xf32, #tpu.memory_space<vmem>>, %arg3: memref<3x64xf32, #tpu.memory_space<vmem>>, %arg4: memref<32x64xf32, #tpu.memory_space<vmem>>) attributes {dimension_semantics = [#tpu.dimension_semantics<parallel>], iteration_bounds = array<i64: 3>, scalar_prefetch = 0 : i64, scratch_operands = 0 : i64, tpu.core_type = #tpu.core_type<tc>, window_params = [{transform_indices = @transform_0, window_bounds = array<i64: 32, 64>}, {pipeline_mode = #tpu.pipeline_mode<synchronous>, transform_indices = @transform_1, window_bounds = array<i64: 64, 64>}, {pipeline_mode = #tpu.pipeline_mode<synchronous>, transform_indices = @transform_2, window_bounds = array<i64: 3, 64>}, {transform_indices = @transform_3, window_bounds = array<i64: 32, 64>}]} {
    %c0 = arith.constant 0 : index
    %c0_0 = arith.constant 0 : index
    %0 = vector.load %arg1[%c0, %c0_0] : memref<32x64xf32, #tpu.memory_space<vmem>>, vector<32x64xf32>
    %c0_1 = arith.constant 0 : index
    %c0_2 = arith.constant 0 : index
    %1 = vector.load %arg2[%c0_1, %c0_2] : memref<64x64xf32, #tpu.memory_space<vmem>>, vector<64x64xf32>
    %cst = arith.constant dense<0.000000e+00> : vector<32x64xf32>
    %2 = tpu.matmul %0, %1, %cst {dimension_numbers = #tpu.dot_dimension_numbers<[1], [0], [0], [1], [0, 0, 1, 1], [], []>} : vector<32x64xf32>, vector<64x64xf32>, vector<32x64xf32> -> vector<32x64xf32>
    %c0_3 = arith.constant 0 : index
    %c0_4 = arith.constant 0 : index
    %3 = vector.load %arg3[%c0_3, %c0_4] : memref<3x64xf32, #tpu.memory_space<vmem>>, vector<3x64xf32>
    %4 = vector.extract_strided_slice %3 {offsets = [0, 0], sizes = [1, 64], strides = [1, 1]} : vector<3x64xf32> to vector<1x64xf32>
    %5 = vector.extract_strided_slice %3 {offsets = [1, 0], sizes = [1, 64], strides = [1, 1]} : vector<3x64xf32> to vector<1x64xf32>
    %6 = vector.extract_strided_slice %3 {offsets = [2, 0], sizes = [1, 64], strides = [1, 1]} : vector<3x64xf32> to vector<1x64xf32>
    %7 = vector.broadcast %4 : vector<1x64xf32> to vector<32x64xf32>
    %8 = arith.mulf %2, %7 : vector<32x64xf32>
    %9 = vector.broadcast %5 : vector<1x64xf32> to vector<32x64xf32>
    %10 = arith.addf %8, %9 : vector<32x64xf32>
    %cst_5 = arith.constant 0.000000e+00 : f32
    %11 = vector.broadcast %cst_5 : f32 to vector<32x64xf32>
    %12 = arith.cmpf oge, %10, %11 : vector<32x64xf32>
    %13 = vector.broadcast %6 : vector<1x64xf32> to vector<32x64xf32>
    %14 = arith.mulf %13, %10 : vector<32x64xf32>
    %15 = arith.select %12, %10, %14 : vector<32x64xi1>, vector<32x64xf32>
    %c0_6 = arith.constant 0 : index
    %c0_7 = arith.constant 0 : index
    %16 = vector.load %arg4[%c0_6, %c0_7] : memref<32x64xf32, #tpu.memory_space<vmem>>, vector<32x64xf32>
    tpu.vector_store %arg4[%c0_6, %c0_7], %15 {strides = array<i32>} : memref<32x64xf32, #tpu.memory_space<vmem>>, vector<32x64xf32>,
    return
  }
  func.func @transform_0(%arg0: i32) -> (i32, i32) {
    %c0_i32 = arith.constant 0 : i32
    %c0_i32_0 = arith.constant 0 : i32
    return %arg0, %c0_i32 : i32, i32
  }
  func.func @transform_1(%arg0: i32) -> (i32, i32) {
    %c0_i32 = arith.constant 0 : i32
    %c0_i32_0 = arith.constant 0 : i32
    %c0_i32_1 = arith.constant 0 : i32
    return %c0_i32, %c0_i32_0 : i32, i32
  }
  func.func @transform_2(%arg0: i32) -> (i32, i32) {
    %c0_i32 = arith.constant 0 : i32
    %c0_i32_0 = arith.constant 0 : i32
    %c0_i32_1 = arith.constant 0 : i32
    return %c0_i32, %c0_i32_0 : i32, i32
  }
  func.func @transform_3(%arg0: i32) -> (i32, i32) {
    %c0_i32 = arith.constant 0 : i32
    %c0_i32_0 = arith.constant 0 : i32
    return %arg0, %c0_i32 : i32, i32
  }
}

module attributes {stable_mosaic.version = 11 : i64} {
  func.func @kernel(%arg0: i32, %arg1: memref<48x576xbf16, #tpu.memory_space<vmem>>, %arg2: memref<3x576x32xbf16, #tpu.memory_space<vmem>>, %arg3: memref<3x32xf32, #tpu.memory_space<vmem>>, %arg4: memref<32x32xbf16, #tpu.memory_space<vmem>>) attributes {dimension_semantics = [#tpu.dimension_semantics<parallel>], iteration_bounds = array<i64: 2>, scalar_prefetch = 0 : i64, scratch_operands = 0 : i64, tpu.core_type = #tpu.core_type<tc>, window_params = [{transform_indices = @transform_0, window_bounds = array<i64: 48, 576>}, {pipeline_mode = #tpu.pipeline_mode<synchronous>, transform_indices = @transform_1, window_bounds = array<i64: 3, 576, 32>}, {pipeline_mode = #tpu.pipeline_mode<synchronous>, transform_indices = @transform_2, window_bounds = array<i64: 3, 32>}, {transform_indices = @transform_3, window_bounds = array<i64: 32, 32>}]} {
    %c0 = arith.constant 0 : index
    %c0_0 = arith.constant 0 : index
    %0 = vector.load %arg1[%c0, %c0_0] : memref<48x576xbf16, #tpu.memory_space<vmem>>, vector<32x576xbf16>
    %c0_1 = arith.constant 0 : index
    %c0_2 = arith.constant 0 : index
    %c0_3 = arith.constant 0 : index
    %1 = vector.load %arg2[%c0_1, %c0_2, %c0_3] : memref<3x576x32xbf16, #tpu.memory_space<vmem>>, vector<1x576x32xbf16>
    %2 = vector.shape_cast %1 : vector<1x576x32xbf16> to vector<576x32xbf16>
    %cst = arith.constant dense<0.000000e+00> : vector<32x32xf32>
    %3 = tpu.matmul %0, %2, %cst {dimension_numbers = #tpu.dot_dimension_numbers<[1], [0], [0], [1], [0, 0, 1, 1], [], []>} : vector<32x576xbf16>, vector<576x32xbf16>, vector<32x32xf32> -> vector<32x32xf32>
    %c8 = arith.constant 8 : index
    %c0_4 = arith.constant 0 : index
    %4 = vector.load %arg1[%c8, %c0_4] : memref<48x576xbf16, #tpu.memory_space<vmem>>, vector<32x576xbf16>
    %c1 = arith.constant 1 : index
    %c0_5 = arith.constant 0 : index
    %c0_6 = arith.constant 0 : index
    %5 = vector.load %arg2[%c1, %c0_5, %c0_6] : memref<3x576x32xbf16, #tpu.memory_space<vmem>>, vector<1x576x32xbf16>
    %6 = vector.shape_cast %5 : vector<1x576x32xbf16> to vector<576x32xbf16>
    %cst_7 = arith.constant dense<0.000000e+00> : vector<32x32xf32>
    %7 = tpu.matmul %4, %6, %cst_7 {dimension_numbers = #tpu.dot_dimension_numbers<[1], [0], [0], [1], [0, 0, 1, 1], [], []>} : vector<32x576xbf16>, vector<576x32xbf16>, vector<32x32xf32> -> vector<32x32xf32>
    %8 = arith.addf %3, %7 : vector<32x32xf32>
    %c16 = arith.constant 16 : index
    %c0_8 = arith.constant 0 : index
    %9 = vector.load %arg1[%c16, %c0_8] : memref<48x576xbf16, #tpu.memory_space<vmem>>, vector<32x576xbf16>
    %c2 = arith.constant 2 : index
    %c0_9 = arith.constant 0 : index
    %c0_10 = arith.constant 0 : index
    %10 = vector.load %arg2[%c2, %c0_9, %c0_10] : memref<3x576x32xbf16, #tpu.memory_space<vmem>>, vector<1x576x32xbf16>
    %11 = vector.shape_cast %10 : vector<1x576x32xbf16> to vector<576x32xbf16>
    %cst_11 = arith.constant dense<0.000000e+00> : vector<32x32xf32>
    %12 = tpu.matmul %9, %11, %cst_11 {dimension_numbers = #tpu.dot_dimension_numbers<[1], [0], [0], [1], [0, 0, 1, 1], [], []>} : vector<32x576xbf16>, vector<576x32xbf16>, vector<32x32xf32> -> vector<32x32xf32>
    %13 = arith.addf %8, %12 : vector<32x32xf32>
    %c0_12 = arith.constant 0 : index
    %c0_13 = arith.constant 0 : index
    %14 = vector.load %arg3[%c0_12, %c0_13] : memref<3x32xf32, #tpu.memory_space<vmem>>, vector<3x32xf32>
    %15 = vector.extract_strided_slice %14 {offsets = [0, 0], sizes = [1, 32], strides = [1, 1]} : vector<3x32xf32> to vector<1x32xf32>
    %16 = vector.extract_strided_slice %14 {offsets = [1, 0], sizes = [1, 32], strides = [1, 1]} : vector<3x32xf32> to vector<1x32xf32>
    %17 = vector.extract_strided_slice %14 {offsets = [2, 0], sizes = [1, 32], strides = [1, 1]} : vector<3x32xf32> to vector<1x32xf32>
    %18 = vector.broadcast %15 : vector<1x32xf32> to vector<32x32xf32>
    %19 = arith.mulf %13, %18 : vector<32x32xf32>
    %20 = vector.broadcast %16 : vector<1x32xf32> to vector<32x32xf32>
    %21 = arith.addf %19, %20 : vector<32x32xf32>
    %cst_14 = arith.constant 0.000000e+00 : f32
    %22 = vector.broadcast %cst_14 : f32 to vector<32x32xf32>
    %23 = arith.cmpf oge, %21, %22 : vector<32x32xf32>
    %24 = vector.broadcast %17 : vector<1x32xf32> to vector<32x32xf32>
    %25 = arith.mulf %24, %21 : vector<32x32xf32>
    %26 = arith.select %23, %21, %25 : vector<32x32xi1>, vector<32x32xf32>
    %27 = arith.truncf %26 : vector<32x32xf32> to vector<32x32xbf16>
    %c0_15 = arith.constant 0 : index
    %c0_16 = arith.constant 0 : index
    %28 = vector.load %arg4[%c0_15, %c0_16] : memref<32x32xbf16, #tpu.memory_space<vmem>>, vector<32x32xbf16>
    tpu.vector_store %arg4[%c0_15, %c0_16], %27 {strides = array<i32>} : memref<32x32xbf16, #tpu.memory_space<vmem>>, vector<32x32xbf16>,
    return
  }
  func.func @transform_0(%arg0: i32) -> (i32, i32) {
    %c0_i32 = arith.constant 0 : i32
    %c0_i32_0 = arith.constant 0 : i32
    return %arg0, %c0_i32 : i32, i32
  }
  func.func @transform_1(%arg0: i32) -> (i32, i32, i32) {
    %c0_i32 = arith.constant 0 : i32
    %c0_i32_0 = arith.constant 0 : i32
    %c0_i32_1 = arith.constant 0 : i32
    %c0_i32_2 = arith.constant 0 : i32
    return %c0_i32, %c0_i32_0, %c0_i32_1 : i32, i32, i32
  }
  func.func @transform_2(%arg0: i32) -> (i32, i32) {
    %c0_i32 = arith.constant 0 : i32
    %c0_i32_0 = arith.constant 0 : i32
    %c0_i32_1 = arith.constant 0 : i32
    return %c0_i32, %c0_i32_0 : i32, i32
  }
  func.func @transform_3(%arg0: i32) -> (i32, i32) {
    %c0_i32 = arith.constant 0 : i32
    %c0_i32_0 = arith.constant 0 : i32
    return %arg0, %c0_i32 : i32, i32
  }
}

module attributes {stable_mosaic.version = 11 : i64} {
  func.func @_max4_kernel(%arg0: i32, %arg1: memref<8x32xbf16, #tpu.memory_space<vmem>>, %arg2: memref<8x32xbf16, #tpu.memory_space<vmem>>, %arg3: memref<8x32xbf16, #tpu.memory_space<vmem>>, %arg4: memref<8x32xbf16, #tpu.memory_space<vmem>>, %arg5: memref<8x32xbf16, #tpu.memory_space<vmem>>) attributes {dimension_semantics = [#tpu.dimension_semantics<arbitrary>], iteration_bounds = array<i64: 1>, scalar_prefetch = 0 : i64, scratch_operands = 0 : i64, tpu.core_type = #tpu.core_type<tc>, window_params = [{pipeline_mode = #tpu.pipeline_mode<synchronous>, transform_indices = @transform_0, window_bounds = array<i64: 8, 32>}, {pipeline_mode = #tpu.pipeline_mode<synchronous>, transform_indices = @transform_1, window_bounds = array<i64: 8, 32>}, {pipeline_mode = #tpu.pipeline_mode<synchronous>, transform_indices = @transform_2, window_bounds = array<i64: 8, 32>}, {pipeline_mode = #tpu.pipeline_mode<synchronous>, transform_indices = @transform_3, window_bounds = array<i64: 8, 32>}, {pipeline_mode = #tpu.pipeline_mode<synchronous>, transform_indices = @transform_4, window_bounds = array<i64: 8, 32>}]} {
    %c0 = arith.constant 0 : index
    %c0_0 = arith.constant 0 : index
    %0 = vector.load %arg1[%c0, %c0_0] : memref<8x32xbf16, #tpu.memory_space<vmem>>, vector<8x32xbf16>
    %1 = arith.extf %0 : vector<8x32xbf16> to vector<8x32xf32>
    %c0_1 = arith.constant 0 : index
    %c0_2 = arith.constant 0 : index
    %2 = vector.load %arg2[%c0_1, %c0_2] : memref<8x32xbf16, #tpu.memory_space<vmem>>, vector<8x32xbf16>
    %3 = arith.extf %2 : vector<8x32xbf16> to vector<8x32xf32>
    %c0_3 = arith.constant 0 : index
    %c0_4 = arith.constant 0 : index
    %4 = vector.load %arg3[%c0_3, %c0_4] : memref<8x32xbf16, #tpu.memory_space<vmem>>, vector<8x32xbf16>
    %5 = arith.extf %4 : vector<8x32xbf16> to vector<8x32xf32>
    %c0_5 = arith.constant 0 : index
    %c0_6 = arith.constant 0 : index
    %6 = vector.load %arg4[%c0_5, %c0_6] : memref<8x32xbf16, #tpu.memory_space<vmem>>, vector<8x32xbf16>
    %7 = arith.extf %6 : vector<8x32xbf16> to vector<8x32xf32>
    %8 = arith.maximumf %1, %3 : vector<8x32xf32>
    %9 = arith.maximumf %5, %7 : vector<8x32xf32>
    %10 = arith.maximumf %8, %9 : vector<8x32xf32>
    %11 = arith.truncf %10 : vector<8x32xf32> to vector<8x32xbf16>
    %c0_7 = arith.constant 0 : index
    %c0_8 = arith.constant 0 : index
    %12 = vector.load %arg5[%c0_7, %c0_8] : memref<8x32xbf16, #tpu.memory_space<vmem>>, vector<8x32xbf16>
    tpu.vector_store %arg5[%c0_7, %c0_8], %11 {strides = array<i32>} : memref<8x32xbf16, #tpu.memory_space<vmem>>, vector<8x32xbf16>,
    return
  }
  func.func @transform_0(%arg0: i32) -> (i32, i32) {
    %c0_i32 = arith.constant 0 : i32
    %c0_i32_0 = arith.constant 0 : i32
    %c0_i32_1 = arith.constant 0 : i32
    return %c0_i32, %c0_i32_0 : i32, i32
  }
  func.func @transform_1(%arg0: i32) -> (i32, i32) {
    %c0_i32 = arith.constant 0 : i32
    %c0_i32_0 = arith.constant 0 : i32
    %c0_i32_1 = arith.constant 0 : i32
    return %c0_i32, %c0_i32_0 : i32, i32
  }
  func.func @transform_2(%arg0: i32) -> (i32, i32) {
    %c0_i32 = arith.constant 0 : i32
    %c0_i32_0 = arith.constant 0 : i32
    %c0_i32_1 = arith.constant 0 : i32
    return %c0_i32, %c0_i32_0 : i32, i32
  }
  func.func @transform_3(%arg0: i32) -> (i32, i32) {
    %c0_i32 = arith.constant 0 : i32
    %c0_i32_0 = arith.constant 0 : i32
    %c0_i32_1 = arith.constant 0 : i32
    return %c0_i32, %c0_i32_0 : i32, i32
  }
  func.func @transform_4(%arg0: i32) -> (i32, i32) {
    %c0_i32 = arith.constant 0 : i32
    %c0_i32_0 = arith.constant 0 : i32
    %c0_i32_1 = arith.constant 0 : i32
    return %c0_i32, %c0_i32_0 : i32, i32
  }
}

module attributes {stable_mosaic.version = 11 : i64} {
  func.func @kernel(%arg0: i32, %arg1: memref<32x96xbf16, #tpu.memory_space<vmem>>, %arg2: memref<3x96x64xbf16, #tpu.memory_space<vmem>>, %arg3: memref<3x64xf32, #tpu.memory_space<vmem>>, %arg4: memref<16x64xbf16, #tpu.memory_space<vmem>>) attributes {dimension_semantics = [#tpu.dimension_semantics<parallel>], iteration_bounds = array<i64: 2>, scalar_prefetch = 0 : i64, scratch_operands = 0 : i64, tpu.core_type = #tpu.core_type<tc>, window_params = [{transform_indices = @transform_0, window_bounds = array<i64: 32, 96>}, {pipeline_mode = #tpu.pipeline_mode<synchronous>, transform_indices = @transform_1, window_bounds = array<i64: 3, 96, 64>}, {pipeline_mode = #tpu.pipeline_mode<synchronous>, transform_indices = @transform_2, window_bounds = array<i64: 3, 64>}, {transform_indices = @transform_3, window_bounds = array<i64: 16, 64>}]} {
    %c0 = arith.constant 0 : index
    %c0_0 = arith.constant 0 : index
    %0 = vector.load %arg1[%c0, %c0_0] : memref<32x96xbf16, #tpu.memory_space<vmem>>, vector<16x96xbf16>
    %c0_1 = arith.constant 0 : index
    %c0_2 = arith.constant 0 : index
    %c0_3 = arith.constant 0 : index
    %1 = vector.load %arg2[%c0_1, %c0_2, %c0_3] : memref<3x96x64xbf16, #tpu.memory_space<vmem>>, vector<1x96x64xbf16>
    %2 = vector.shape_cast %1 : vector<1x96x64xbf16> to vector<96x64xbf16>
    %cst = arith.constant dense<0.000000e+00> : vector<16x64xf32>
    %3 = tpu.matmul %0, %2, %cst {dimension_numbers = #tpu.dot_dimension_numbers<[1], [0], [0], [1], [0, 0, 1, 1], [], []>} : vector<16x96xbf16>, vector<96x64xbf16>, vector<16x64xf32> -> vector<16x64xf32>
    %c8 = arith.constant 8 : index
    %c0_4 = arith.constant 0 : index
    %4 = vector.load %arg1[%c8, %c0_4] : memref<32x96xbf16, #tpu.memory_space<vmem>>, vector<16x96xbf16>
    %c1 = arith.constant 1 : index
    %c0_5 = arith.constant 0 : index
    %c0_6 = arith.constant 0 : index
    %5 = vector.load %arg2[%c1, %c0_5, %c0_6] : memref<3x96x64xbf16, #tpu.memory_space<vmem>>, vector<1x96x64xbf16>
    %6 = vector.shape_cast %5 : vector<1x96x64xbf16> to vector<96x64xbf16>
    %cst_7 = arith.constant dense<0.000000e+00> : vector<16x64xf32>
    %7 = tpu.matmul %4, %6, %cst_7 {dimension_numbers = #tpu.dot_dimension_numbers<[1], [0], [0], [1], [0, 0, 1, 1], [], []>} : vector<16x96xbf16>, vector<96x64xbf16>, vector<16x64xf32> -> vector<16x64xf32>
    %8 = arith.addf %3, %7 : vector<16x64xf32>
    %c16 = arith.constant 16 : index
    %c0_8 = arith.constant 0 : index
    %9 = vector.load %arg1[%c16, %c0_8] : memref<32x96xbf16, #tpu.memory_space<vmem>>, vector<16x96xbf16>
    %c2 = arith.constant 2 : index
    %c0_9 = arith.constant 0 : index
    %c0_10 = arith.constant 0 : index
    %10 = vector.load %arg2[%c2, %c0_9, %c0_10] : memref<3x96x64xbf16, #tpu.memory_space<vmem>>, vector<1x96x64xbf16>
    %11 = vector.shape_cast %10 : vector<1x96x64xbf16> to vector<96x64xbf16>
    %cst_11 = arith.constant dense<0.000000e+00> : vector<16x64xf32>
    %12 = tpu.matmul %9, %11, %cst_11 {dimension_numbers = #tpu.dot_dimension_numbers<[1], [0], [0], [1], [0, 0, 1, 1], [], []>} : vector<16x96xbf16>, vector<96x64xbf16>, vector<16x64xf32> -> vector<16x64xf32>
    %13 = arith.addf %8, %12 : vector<16x64xf32>
    %c0_12 = arith.constant 0 : index
    %c0_13 = arith.constant 0 : index
    %14 = vector.load %arg3[%c0_12, %c0_13] : memref<3x64xf32, #tpu.memory_space<vmem>>, vector<3x64xf32>
    %15 = vector.extract_strided_slice %14 {offsets = [0, 0], sizes = [1, 64], strides = [1, 1]} : vector<3x64xf32> to vector<1x64xf32>
    %16 = vector.extract_strided_slice %14 {offsets = [1, 0], sizes = [1, 64], strides = [1, 1]} : vector<3x64xf32> to vector<1x64xf32>
    %17 = vector.extract_strided_slice %14 {offsets = [2, 0], sizes = [1, 64], strides = [1, 1]} : vector<3x64xf32> to vector<1x64xf32>
    %18 = vector.broadcast %15 : vector<1x64xf32> to vector<16x64xf32>
    %19 = arith.mulf %13, %18 : vector<16x64xf32>
    %20 = vector.broadcast %16 : vector<1x64xf32> to vector<16x64xf32>
    %21 = arith.addf %19, %20 : vector<16x64xf32>
    %cst_14 = arith.constant 0.000000e+00 : f32
    %22 = vector.broadcast %cst_14 : f32 to vector<16x64xf32>
    %23 = arith.cmpf oge, %21, %22 : vector<16x64xf32>
    %24 = vector.broadcast %17 : vector<1x64xf32> to vector<16x64xf32>
    %25 = arith.mulf %24, %21 : vector<16x64xf32>
    %26 = arith.select %23, %21, %25 : vector<16x64xi1>, vector<16x64xf32>
    %27 = arith.truncf %26 : vector<16x64xf32> to vector<16x64xbf16>
    %c0_15 = arith.constant 0 : index
    %c0_16 = arith.constant 0 : index
    %28 = vector.load %arg4[%c0_15, %c0_16] : memref<16x64xbf16, #tpu.memory_space<vmem>>, vector<16x64xbf16>
    tpu.vector_store %arg4[%c0_15, %c0_16], %27 {strides = array<i32>} : memref<16x64xbf16, #tpu.memory_space<vmem>>, vector<16x64xbf16>,
    return
  }
  func.func @transform_0(%arg0: i32) -> (i32, i32) {
    %c0_i32 = arith.constant 0 : i32
    %c0_i32_0 = arith.constant 0 : i32
    return %arg0, %c0_i32 : i32, i32
  }
  func.func @transform_1(%arg0: i32) -> (i32, i32, i32) {
    %c0_i32 = arith.constant 0 : i32
    %c0_i32_0 = arith.constant 0 : i32
    %c0_i32_1 = arith.constant 0 : i32
    %c0_i32_2 = arith.constant 0 : i32
    return %c0_i32, %c0_i32_0, %c0_i32_1 : i32, i32, i32
  }
  func.func @transform_2(%arg0: i32) -> (i32, i32) {
    %c0_i32 = arith.constant 0 : i32
    %c0_i32_0 = arith.constant 0 : i32
    %c0_i32_1 = arith.constant 0 : i32
    return %c0_i32, %c0_i32_0 : i32, i32
  }
  func.func @transform_3(%arg0: i32) -> (i32, i32) {
    %c0_i32 = arith.constant 0 : i32
    %c0_i32_0 = arith.constant 0 : i32
    return %arg0, %c0_i32 : i32, i32
  }
}

module attributes {stable_mosaic.version = 11 : i64} {
  func.func @kernel(%arg0: i32, %arg1: memref<48x288xbf16, #tpu.memory_space<vmem>>, %arg2: memref<3x288x32xbf16, #tpu.memory_space<vmem>>, %arg3: memref<3x32xf32, #tpu.memory_space<vmem>>, %arg4: memref<32x32xbf16, #tpu.memory_space<vmem>>) attributes {dimension_semantics = [#tpu.dimension_semantics<parallel>], iteration_bounds = array<i64: 2>, scalar_prefetch = 0 : i64, scratch_operands = 0 : i64, tpu.core_type = #tpu.core_type<tc>, window_params = [{transform_indices = @transform_0, window_bounds = array<i64: 48, 288>}, {pipeline_mode = #tpu.pipeline_mode<synchronous>, transform_indices = @transform_1, window_bounds = array<i64: 3, 288, 32>}, {pipeline_mode = #tpu.pipeline_mode<synchronous>, transform_indices = @transform_2, window_bounds = array<i64: 3, 32>}, {transform_indices = @transform_3, window_bounds = array<i64: 32, 32>}]} {
    %c0 = arith.constant 0 : index
    %c0_0 = arith.constant 0 : index
    %0 = vector.load %arg1[%c0, %c0_0] : memref<48x288xbf16, #tpu.memory_space<vmem>>, vector<32x288xbf16>
    %c0_1 = arith.constant 0 : index
    %c0_2 = arith.constant 0 : index
    %c0_3 = arith.constant 0 : index
    %1 = vector.load %arg2[%c0_1, %c0_2, %c0_3] : memref<3x288x32xbf16, #tpu.memory_space<vmem>>, vector<1x288x32xbf16>
    %2 = vector.shape_cast %1 : vector<1x288x32xbf16> to vector<288x32xbf16>
    %cst = arith.constant dense<0.000000e+00> : vector<32x32xf32>
    %3 = tpu.matmul %0, %2, %cst {dimension_numbers = #tpu.dot_dimension_numbers<[1], [0], [0], [1], [0, 0, 1, 1], [], []>} : vector<32x288xbf16>, vector<288x32xbf16>, vector<32x32xf32> -> vector<32x32xf32>
    %c8 = arith.constant 8 : index
    %c0_4 = arith.constant 0 : index
    %4 = vector.load %arg1[%c8, %c0_4] : memref<48x288xbf16, #tpu.memory_space<vmem>>, vector<32x288xbf16>
    %c1 = arith.constant 1 : index
    %c0_5 = arith.constant 0 : index
    %c0_6 = arith.constant 0 : index
    %5 = vector.load %arg2[%c1, %c0_5, %c0_6] : memref<3x288x32xbf16, #tpu.memory_space<vmem>>, vector<1x288x32xbf16>
    %6 = vector.shape_cast %5 : vector<1x288x32xbf16> to vector<288x32xbf16>
    %cst_7 = arith.constant dense<0.000000e+00> : vector<32x32xf32>
    %7 = tpu.matmul %4, %6, %cst_7 {dimension_numbers = #tpu.dot_dimension_numbers<[1], [0], [0], [1], [0, 0, 1, 1], [], []>} : vector<32x288xbf16>, vector<288x32xbf16>, vector<32x32xf32> -> vector<32x32xf32>
    %8 = arith.addf %3, %7 : vector<32x32xf32>
    %c16 = arith.constant 16 : index
    %c0_8 = arith.constant 0 : index
    %9 = vector.load %arg1[%c16, %c0_8] : memref<48x288xbf16, #tpu.memory_space<vmem>>, vector<32x288xbf16>
    %c2 = arith.constant 2 : index
    %c0_9 = arith.constant 0 : index
    %c0_10 = arith.constant 0 : index
    %10 = vector.load %arg2[%c2, %c0_9, %c0_10] : memref<3x288x32xbf16, #tpu.memory_space<vmem>>, vector<1x288x32xbf16>
    %11 = vector.shape_cast %10 : vector<1x288x32xbf16> to vector<288x32xbf16>
    %cst_11 = arith.constant dense<0.000000e+00> : vector<32x32xf32>
    %12 = tpu.matmul %9, %11, %cst_11 {dimension_numbers = #tpu.dot_dimension_numbers<[1], [0], [0], [1], [0, 0, 1, 1], [], []>} : vector<32x288xbf16>, vector<288x32xbf16>, vector<32x32xf32> -> vector<32x32xf32>
    %13 = arith.addf %8, %12 : vector<32x32xf32>
    %c0_12 = arith.constant 0 : index
    %c0_13 = arith.constant 0 : index
    %14 = vector.load %arg3[%c0_12, %c0_13] : memref<3x32xf32, #tpu.memory_space<vmem>>, vector<3x32xf32>
    %15 = vector.extract_strided_slice %14 {offsets = [0, 0], sizes = [1, 32], strides = [1, 1]} : vector<3x32xf32> to vector<1x32xf32>
    %16 = vector.extract_strided_slice %14 {offsets = [1, 0], sizes = [1, 32], strides = [1, 1]} : vector<3x32xf32> to vector<1x32xf32>
    %17 = vector.extract_strided_slice %14 {offsets = [2, 0], sizes = [1, 32], strides = [1, 1]} : vector<3x32xf32> to vector<1x32xf32>
    %18 = vector.broadcast %15 : vector<1x32xf32> to vector<32x32xf32>
    %19 = arith.mulf %13, %18 : vector<32x32xf32>
    %20 = vector.broadcast %16 : vector<1x32xf32> to vector<32x32xf32>
    %21 = arith.addf %19, %20 : vector<32x32xf32>
    %cst_14 = arith.constant 0.000000e+00 : f32
    %22 = vector.broadcast %cst_14 : f32 to vector<32x32xf32>
    %23 = arith.cmpf oge, %21, %22 : vector<32x32xf32>
    %24 = vector.broadcast %17 : vector<1x32xf32> to vector<32x32xf32>
    %25 = arith.mulf %24, %21 : vector<32x32xf32>
    %26 = arith.select %23, %21, %25 : vector<32x32xi1>, vector<32x32xf32>
    %27 = arith.truncf %26 : vector<32x32xf32> to vector<32x32xbf16>
    %c0_15 = arith.constant 0 : index
    %c0_16 = arith.constant 0 : index
    %28 = vector.load %arg4[%c0_15, %c0_16] : memref<32x32xbf16, #tpu.memory_space<vmem>>, vector<32x32xbf16>
    tpu.vector_store %arg4[%c0_15, %c0_16], %27 {strides = array<i32>} : memref<32x32xbf16, #tpu.memory_space<vmem>>, vector<32x32xbf16>,
    return
  }
  func.func @transform_0(%arg0: i32) -> (i32, i32) {
    %c0_i32 = arith.constant 0 : i32
    %c0_i32_0 = arith.constant 0 : i32
    return %arg0, %c0_i32 : i32, i32
  }
  func.func @transform_1(%arg0: i32) -> (i32, i32, i32) {
    %c0_i32 = arith.constant 0 : i32
    %c0_i32_0 = arith.constant 0 : i32
    %c0_i32_1 = arith.constant 0 : i32
    %c0_i32_2 = arith.constant 0 : i32
    return %c0_i32, %c0_i32_0, %c0_i32_1 : i32, i32, i32
  }
  func.func @transform_2(%arg0: i32) -> (i32, i32) {
    %c0_i32 = arith.constant 0 : i32
    %c0_i32_0 = arith.constant 0 : i32
    %c0_i32_1 = arith.constant 0 : i32
    return %c0_i32, %c0_i32_0 : i32, i32
  }
  func.func @transform_3(%arg0: i32) -> (i32, i32) {
    %c0_i32 = arith.constant 0 : i32
    %c0_i32_0 = arith.constant 0 : i32
    return %arg0, %c0_i32 : i32, i32
  }
}

module attributes {stable_mosaic.version = 11 : i64} {
  func.func @kernel(%arg0: i32, %arg1: memref<48x96xbf16, #tpu.memory_space<vmem>>, %arg2: memref<3x96x192xbf16, #tpu.memory_space<vmem>>, %arg3: memref<3x192xf32, #tpu.memory_space<vmem>>, %arg4: memref<32x192xf32, #tpu.memory_space<vmem>>) attributes {dimension_semantics = [#tpu.dimension_semantics<parallel>], iteration_bounds = array<i64: 2>, scalar_prefetch = 0 : i64, scratch_operands = 0 : i64, tpu.core_type = #tpu.core_type<tc>, window_params = [{transform_indices = @transform_0, window_bounds = array<i64: 48, 96>}, {pipeline_mode = #tpu.pipeline_mode<synchronous>, transform_indices = @transform_1, window_bounds = array<i64: 3, 96, 192>}, {pipeline_mode = #tpu.pipeline_mode<synchronous>, transform_indices = @transform_2, window_bounds = array<i64: 3, 192>}, {transform_indices = @transform_3, window_bounds = array<i64: 32, 192>}]} {
    %c0 = arith.constant 0 : index
    %c0_0 = arith.constant 0 : index
    %0 = vector.load %arg1[%c0, %c0_0] : memref<48x96xbf16, #tpu.memory_space<vmem>>, vector<32x96xbf16>
    %c0_1 = arith.constant 0 : index
    %c0_2 = arith.constant 0 : index
    %c0_3 = arith.constant 0 : index
    %1 = vector.load %arg2[%c0_1, %c0_2, %c0_3] : memref<3x96x192xbf16, #tpu.memory_space<vmem>>, vector<1x96x192xbf16>
    %2 = vector.shape_cast %1 : vector<1x96x192xbf16> to vector<96x192xbf16>
    %cst = arith.constant dense<0.000000e+00> : vector<32x192xf32>
    %3 = tpu.matmul %0, %2, %cst {dimension_numbers = #tpu.dot_dimension_numbers<[1], [0], [0], [1], [0, 0, 1, 1], [], []>} : vector<32x96xbf16>, vector<96x192xbf16>, vector<32x192xf32> -> vector<32x192xf32>
    %c8 = arith.constant 8 : index
    %c0_4 = arith.constant 0 : index
    %4 = vector.load %arg1[%c8, %c0_4] : memref<48x96xbf16, #tpu.memory_space<vmem>>, vector<32x96xbf16>
    %c1 = arith.constant 1 : index
    %c0_5 = arith.constant 0 : index
    %c0_6 = arith.constant 0 : index
    %5 = vector.load %arg2[%c1, %c0_5, %c0_6] : memref<3x96x192xbf16, #tpu.memory_space<vmem>>, vector<1x96x192xbf16>
    %6 = vector.shape_cast %5 : vector<1x96x192xbf16> to vector<96x192xbf16>
    %cst_7 = arith.constant dense<0.000000e+00> : vector<32x192xf32>
    %7 = tpu.matmul %4, %6, %cst_7 {dimension_numbers = #tpu.dot_dimension_numbers<[1], [0], [0], [1], [0, 0, 1, 1], [], []>} : vector<32x96xbf16>, vector<96x192xbf16>, vector<32x192xf32> -> vector<32x192xf32>
    %8 = arith.addf %3, %7 : vector<32x192xf32>
    %c16 = arith.constant 16 : index
    %c0_8 = arith.constant 0 : index
    %9 = vector.load %arg1[%c16, %c0_8] : memref<48x96xbf16, #tpu.memory_space<vmem>>, vector<32x96xbf16>
    %c2 = arith.constant 2 : index
    %c0_9 = arith.constant 0 : index
    %c0_10 = arith.constant 0 : index
    %10 = vector.load %arg2[%c2, %c0_9, %c0_10] : memref<3x96x192xbf16, #tpu.memory_space<vmem>>, vector<1x96x192xbf16>
    %11 = vector.shape_cast %10 : vector<1x96x192xbf16> to vector<96x192xbf16>
    %cst_11 = arith.constant dense<0.000000e+00> : vector<32x192xf32>
    %12 = tpu.matmul %9, %11, %cst_11 {dimension_numbers = #tpu.dot_dimension_numbers<[1], [0], [0], [1], [0, 0, 1, 1], [], []>} : vector<32x96xbf16>, vector<96x192xbf16>, vector<32x192xf32> -> vector<32x192xf32>
    %13 = arith.addf %8, %12 : vector<32x192xf32>
    %c0_12 = arith.constant 0 : index
    %c0_13 = arith.constant 0 : index
    %14 = vector.load %arg3[%c0_12, %c0_13] : memref<3x192xf32, #tpu.memory_space<vmem>>, vector<3x192xf32>
    %15 = vector.extract_strided_slice %14 {offsets = [0, 0], sizes = [1, 192], strides = [1, 1]} : vector<3x192xf32> to vector<1x192xf32>
    %16 = vector.extract_strided_slice %14 {offsets = [1, 0], sizes = [1, 192], strides = [1, 1]} : vector<3x192xf32> to vector<1x192xf32>
    %17 = vector.extract_strided_slice %14 {offsets = [2, 0], sizes = [1, 192], strides = [1, 1]} : vector<3x192xf32> to vector<1x192xf32>
    %18 = vector.broadcast %15 : vector<1x192xf32> to vector<32x192xf32>
    %19 = arith.mulf %13, %18 : vector<32x192xf32>
    %20 = vector.broadcast %16 : vector<1x192xf32> to vector<32x192xf32>
    %21 = arith.addf %19, %20 : vector<32x192xf32>
    %cst_14 = arith.constant 0.000000e+00 : f32
    %22 = vector.broadcast %cst_14 : f32 to vector<32x192xf32>
    %23 = arith.cmpf oge, %21, %22 : vector<32x192xf32>
    %24 = vector.broadcast %17 : vector<1x192xf32> to vector<32x192xf32>
    %25 = arith.mulf %24, %21 : vector<32x192xf32>
    %26 = arith.select %23, %21, %25 : vector<32x192xi1>, vector<32x192xf32>
    %c0_15 = arith.constant 0 : index
    %c0_16 = arith.constant 0 : index
    %27 = vector.load %arg4[%c0_15, %c0_16] : memref<32x192xf32, #tpu.memory_space<vmem>>, vector<32x192xf32>
    tpu.vector_store %arg4[%c0_15, %c0_16], %26 {strides = array<i32>} : memref<32x192xf32, #tpu.memory_space<vmem>>, vector<32x192xf32>,
    return
  }
  func.func @transform_0(%arg0: i32) -> (i32, i32) {
    %c0_i32 = arith.constant 0 : i32
    %c0_i32_0 = arith.constant 0 : i32
    return %arg0, %c0_i32 : i32, i32
  }
  func.func @transform_1(%arg0: i32) -> (i32, i32, i32) {
    %c0_i32 = arith.constant 0 : i32
    %c0_i32_0 = arith.constant 0 : i32
    %c0_i32_1 = arith.constant 0 : i32
    %c0_i32_2 = arith.constant 0 : i32
    return %c0_i32, %c0_i32_0, %c0_i32_1 : i32, i32, i32
  }
  func.func @transform_2(%arg0: i32) -> (i32, i32) {
    %c0_i32 = arith.constant 0 : i32
    %c0_i32_0 = arith.constant 0 : i32
    %c0_i32_1 = arith.constant 0 : i32
    return %c0_i32, %c0_i32_0 : i32, i32
  }
  func.func @transform_3(%arg0: i32) -> (i32, i32) {
    %c0_i32 = arith.constant 0 : i32
    %c0_i32_0 = arith.constant 0 : i32
    return %arg0, %c0_i32 : i32, i32
  }
}

module attributes {stable_mosaic.version = 11 : i64} {
  func.func @_idct_residue_kernel(%arg0: i32, %arg1: memref<32x64xf32, #tpu.memory_space<vmem>>, %arg2: memref<32x64xf32, #tpu.memory_space<vmem>>, %arg3: memref<64x64xf32, #tpu.memory_space<vmem>>, %arg4: memref<32x64xf32, #tpu.memory_space<vmem>>, %arg5: memref<32x64xf32, #tpu.memory_space<vmem>>, %arg6: memref<32x64xf32, #tpu.memory_space<vmem>>) attributes {dimension_semantics = [#tpu.dimension_semantics<parallel>], iteration_bounds = array<i64: 3>, scalar_prefetch = 0 : i64, scratch_operands = 0 : i64, tpu.core_type = #tpu.core_type<tc>, window_params = [{transform_indices = @transform_0, window_bounds = array<i64: 32, 64>}, {transform_indices = @transform_1, window_bounds = array<i64: 32, 64>}, {pipeline_mode = #tpu.pipeline_mode<synchronous>, transform_indices = @transform_2, window_bounds = array<i64: 64, 64>}, {transform_indices = @transform_3, window_bounds = array<i64: 32, 64>}, {transform_indices = @transform_4, window_bounds = array<i64: 32, 64>}, {transform_indices = @transform_5, window_bounds = array<i64: 32, 64>}]} {
    %c0 = arith.constant 0 : index
    %c0_0 = arith.constant 0 : index
    %0 = vector.load %arg1[%c0, %c0_0] : memref<32x64xf32, #tpu.memory_space<vmem>>, vector<32x64xf32>
    %c0_1 = arith.constant 0 : index
    %c0_2 = arith.constant 0 : index
    %1 = vector.load %arg2[%c0_1, %c0_2] : memref<32x64xf32, #tpu.memory_space<vmem>>, vector<32x64xf32>
    %2 = arith.subf %0, %1 : vector<32x64xf32>
    %c0_3 = arith.constant 0 : index
    %c0_4 = arith.constant 0 : index
    %3 = vector.load %arg6[%c0_3, %c0_4] : memref<32x64xf32, #tpu.memory_space<vmem>>, vector<32x64xf32>
    tpu.vector_store %arg6[%c0_3, %c0_4], %2 {strides = array<i32>} : memref<32x64xf32, #tpu.memory_space<vmem>>, vector<32x64xf32>,
    %c0_5 = arith.constant 0 : index
    %c0_6 = arith.constant 0 : index
    %4 = vector.load %arg3[%c0_5, %c0_6] : memref<64x64xf32, #tpu.memory_space<vmem>>, vector<64x64xf32>
    %cst = arith.constant dense<0.000000e+00> : vector<32x64xf32>
    %5 = tpu.matmul %1, %4, %cst {dimension_numbers = #tpu.dot_dimension_numbers<[1], [0], [0], [1], [0, 0, 1, 1], [], []>} : vector<32x64xf32>, vector<64x64xf32>, vector<32x64xf32> -> vector<32x64xf32>
    %cst_7 = arith.constant dense<0.000000e+00> : vector<32x64xf32>
    %6 = tpu.matmul %2, %4, %cst_7 {dimension_numbers = #tpu.dot_dimension_numbers<[1], [0], [0], [1], [0, 0, 1, 1], [], []>} : vector<32x64xf32>, vector<64x64xf32>, vector<32x64xf32> -> vector<32x64xf32>
    %cst_8 = arith.constant 2.000000e+00 : f32
    %7 = vector.broadcast %cst_8 : f32 to vector<32x64xf32>
    %8 = arith.mulf %5, %7 : vector<32x64xf32>
    %cst_9 = arith.constant 1.000000e+00 : f32
    %9 = vector.broadcast %cst_9 : f32 to vector<32x64xf32>
    %10 = arith.subf %8, %9 : vector<32x64xf32>
    %c0_10 = arith.constant 0 : index
    %c0_11 = arith.constant 0 : index
    %11 = vector.load %arg4[%c0_10, %c0_11] : memref<32x64xf32, #tpu.memory_space<vmem>>, vector<32x64xf32>
    tpu.vector_store %arg4[%c0_10, %c0_11], %10 {strides = array<i32>} : memref<32x64xf32, #tpu.memory_space<vmem>>, vector<32x64xf32>,
    %cst_12 = arith.constant 2.000000e+00 : f32
    %12 = vector.broadcast %cst_12 : f32 to vector<32x64xf32>
    %13 = arith.mulf %6, %12 : vector<32x64xf32>
    %cst_13 = arith.constant 1.000000e+00 : f32
    %14 = vector.broadcast %cst_13 : f32 to vector<32x64xf32>
    %15 = arith.subf %13, %14 : vector<32x64xf32>
    %c0_14 = arith.constant 0 : index
    %c0_15 = arith.constant 0 : index
    %16 = vector.load %arg5[%c0_14, %c0_15] : memref<32x64xf32, #tpu.memory_space<vmem>>, vector<32x64xf32>
    tpu.vector_store %arg5[%c0_14, %c0_15], %15 {strides = array<i32>} : memref<32x64xf32, #tpu.memory_space<vmem>>, vector<32x64xf32>,
    return
  }
  func.func @transform_0(%arg0: i32) -> (i32, i32) {
    %c0_i32 = arith.constant 0 : i32
    %c0_i32_0 = arith.constant 0 : i32
    return %arg0, %c0_i32 : i32, i32
  }
  func.func @transform_1(%arg0: i32) -> (i32, i32) {
    %c0_i32 = arith.constant 0 : i32
    %c0_i32_0 = arith.constant 0 : i32
    return %arg0, %c0_i32 : i32, i32
  }
  func.func @transform_2(%arg0: i32) -> (i32, i32) {
    %c0_i32 = arith.constant 0 : i32
    %c0_i32_0 = arith.constant 0 : i32
    %c0_i32_1 = arith.constant 0 : i32
    return %c0_i32, %c0_i32_0 : i32, i32
  }
  func.func @transform_3(%arg0: i32) -> (i32, i32) {
    %c0_i32 = arith.constant 0 : i32
    %c0_i32_0 = arith.constant 0 : i32
    return %arg0, %c0_i32 : i32, i32
  }
  func.func @transform_4(%arg0: i32) -> (i32, i32) {
    %c0_i32 = arith.constant 0 : i32
    %c0_i32_0 = arith.constant 0 : i32
    return %arg0, %c0_i32 : i32, i32
  }
  func.func @transform_5(%arg0: i32) -> (i32, i32) {
    %c0_i32 = arith.constant 0 : i32
    %c0_i32_0 = arith.constant 0 : i32
    return %arg0, %c0_i32 : i32, i32
  }
}

module attributes {stable_mosaic.version = 11 : i64} {
  func.func @kernel(%arg0: i32, %arg1: memref<48x576xbf16, #tpu.memory_space<vmem>>, %arg2: memref<3x576x64xbf16, #tpu.memory_space<vmem>>, %arg3: memref<3x64xf32, #tpu.memory_space<vmem>>, %arg4: memref<32x64xbf16, #tpu.memory_space<vmem>>) attributes {dimension_semantics = [#tpu.dimension_semantics<parallel>], iteration_bounds = array<i64: 2>, scalar_prefetch = 0 : i64, scratch_operands = 0 : i64, tpu.core_type = #tpu.core_type<tc>, window_params = [{transform_indices = @transform_0, window_bounds = array<i64: 48, 576>}, {pipeline_mode = #tpu.pipeline_mode<synchronous>, transform_indices = @transform_1, window_bounds = array<i64: 3, 576, 64>}, {pipeline_mode = #tpu.pipeline_mode<synchronous>, transform_indices = @transform_2, window_bounds = array<i64: 3, 64>}, {transform_indices = @transform_3, window_bounds = array<i64: 32, 64>}]} {
    %c0 = arith.constant 0 : index
    %c0_0 = arith.constant 0 : index
    %0 = vector.load %arg1[%c0, %c0_0] : memref<48x576xbf16, #tpu.memory_space<vmem>>, vector<32x576xbf16>
    %c0_1 = arith.constant 0 : index
    %c0_2 = arith.constant 0 : index
    %c0_3 = arith.constant 0 : index
    %1 = vector.load %arg2[%c0_1, %c0_2, %c0_3] : memref<3x576x64xbf16, #tpu.memory_space<vmem>>, vector<1x576x64xbf16>
    %2 = vector.shape_cast %1 : vector<1x576x64xbf16> to vector<576x64xbf16>
    %cst = arith.constant dense<0.000000e+00> : vector<32x64xf32>
    %3 = tpu.matmul %0, %2, %cst {dimension_numbers = #tpu.dot_dimension_numbers<[1], [0], [0], [1], [0, 0, 1, 1], [], []>} : vector<32x576xbf16>, vector<576x64xbf16>, vector<32x64xf32> -> vector<32x64xf32>
    %c8 = arith.constant 8 : index
    %c0_4 = arith.constant 0 : index
    %4 = vector.load %arg1[%c8, %c0_4] : memref<48x576xbf16, #tpu.memory_space<vmem>>, vector<32x576xbf16>
    %c1 = arith.constant 1 : index
    %c0_5 = arith.constant 0 : index
    %c0_6 = arith.constant 0 : index
    %5 = vector.load %arg2[%c1, %c0_5, %c0_6] : memref<3x576x64xbf16, #tpu.memory_space<vmem>>, vector<1x576x64xbf16>
    %6 = vector.shape_cast %5 : vector<1x576x64xbf16> to vector<576x64xbf16>
    %cst_7 = arith.constant dense<0.000000e+00> : vector<32x64xf32>
    %7 = tpu.matmul %4, %6, %cst_7 {dimension_numbers = #tpu.dot_dimension_numbers<[1], [0], [0], [1], [0, 0, 1, 1], [], []>} : vector<32x576xbf16>, vector<576x64xbf16>, vector<32x64xf32> -> vector<32x64xf32>
    %8 = arith.addf %3, %7 : vector<32x64xf32>
    %c16 = arith.constant 16 : index
    %c0_8 = arith.constant 0 : index
    %9 = vector.load %arg1[%c16, %c0_8] : memref<48x576xbf16, #tpu.memory_space<vmem>>, vector<32x576xbf16>
    %c2 = arith.constant 2 : index
    %c0_9 = arith.constant 0 : index
    %c0_10 = arith.constant 0 : index
    %10 = vector.load %arg2[%c2, %c0_9, %c0_10] : memref<3x576x64xbf16, #tpu.memory_space<vmem>>, vector<1x576x64xbf16>
    %11 = vector.shape_cast %10 : vector<1x576x64xbf16> to vector<576x64xbf16>
    %cst_11 = arith.constant dense<0.000000e+00> : vector<32x64xf32>
    %12 = tpu.matmul %9, %11, %cst_11 {dimension_numbers = #tpu.dot_dimension_numbers<[1], [0], [0], [1], [0, 0, 1, 1], [], []>} : vector<32x576xbf16>, vector<576x64xbf16>, vector<32x64xf32> -> vector<32x64xf32>
    %13 = arith.addf %8, %12 : vector<32x64xf32>
    %c0_12 = arith.constant 0 : index
    %c0_13 = arith.constant 0 : index
    %14 = vector.load %arg3[%c0_12, %c0_13] : memref<3x64xf32, #tpu.memory_space<vmem>>, vector<3x64xf32>
    %15 = vector.extract_strided_slice %14 {offsets = [0, 0], sizes = [1, 64], strides = [1, 1]} : vector<3x64xf32> to vector<1x64xf32>
    %16 = vector.extract_strided_slice %14 {offsets = [1, 0], sizes = [1, 64], strides = [1, 1]} : vector<3x64xf32> to vector<1x64xf32>
    %17 = vector.extract_strided_slice %14 {offsets = [2, 0], sizes = [1, 64], strides = [1, 1]} : vector<3x64xf32> to vector<1x64xf32>
    %18 = vector.broadcast %15 : vector<1x64xf32> to vector<32x64xf32>
    %19 = arith.mulf %13, %18 : vector<32x64xf32>
    %20 = vector.broadcast %16 : vector<1x64xf32> to vector<32x64xf32>
    %21 = arith.addf %19, %20 : vector<32x64xf32>
    %cst_14 = arith.constant 0.000000e+00 : f32
    %22 = vector.broadcast %cst_14 : f32 to vector<32x64xf32>
    %23 = arith.cmpf oge, %21, %22 : vector<32x64xf32>
    %24 = vector.broadcast %17 : vector<1x64xf32> to vector<32x64xf32>
    %25 = arith.mulf %24, %21 : vector<32x64xf32>
    %26 = arith.select %23, %21, %25 : vector<32x64xi1>, vector<32x64xf32>
    %27 = arith.truncf %26 : vector<32x64xf32> to vector<32x64xbf16>
    %c0_15 = arith.constant 0 : index
    %c0_16 = arith.constant 0 : index
    %28 = vector.load %arg4[%c0_15, %c0_16] : memref<32x64xbf16, #tpu.memory_space<vmem>>, vector<32x64xbf16>
    tpu.vector_store %arg4[%c0_15, %c0_16], %27 {strides = array<i32>} : memref<32x64xbf16, #tpu.memory_space<vmem>>, vector<32x64xbf16>,
    return
  }
  func.func @transform_0(%arg0: i32) -> (i32, i32) {
    %c0_i32 = arith.constant 0 : i32
    %c0_i32_0 = arith.constant 0 : i32
    return %arg0, %c0_i32 : i32, i32
  }
  func.func @transform_1(%arg0: i32) -> (i32, i32, i32) {
    %c0_i32 = arith.constant 0 : i32
    %c0_i32_0 = arith.constant 0 : i32
    %c0_i32_1 = arith.constant 0 : i32
    %c0_i32_2 = arith.constant 0 : i32
    return %c0_i32, %c0_i32_0, %c0_i32_1 : i32, i32, i32
  }
  func.func @transform_2(%arg0: i32) -> (i32, i32) {
    %c0_i32 = arith.constant 0 : i32
    %c0_i32_0 = arith.constant 0 : i32
    %c0_i32_1 = arith.constant 0 : i32
    return %c0_i32, %c0_i32_0 : i32, i32
  }
  func.func @transform_3(%arg0: i32) -> (i32, i32) {
    %c0_i32 = arith.constant 0 : i32
    %c0_i32_0 = arith.constant 0 : i32
    return %arg0, %c0_i32 : i32, i32
  }
}

module attributes {stable_mosaic.version = 11 : i64} {
  func.func @_matmul_affine_prelu_kernel(%arg0: i32, %arg1: memref<2x1024xbf16, #tpu.memory_space<vmem>>, %arg2: memref<1024x512xbf16, #tpu.memory_space<vmem>>, %arg3: memref<3x512xf32, #tpu.memory_space<vmem>>, %arg4: memref<2x512xf32, #tpu.memory_space<vmem>>) attributes {dimension_semantics = [#tpu.dimension_semantics<parallel>], iteration_bounds = array<i64: 1>, scalar_prefetch = 0 : i64, scratch_operands = 0 : i64, tpu.core_type = #tpu.core_type<tc>, window_params = [{transform_indices = @transform_0, window_bounds = array<i64: 2, 1024>}, {pipeline_mode = #tpu.pipeline_mode<synchronous>, transform_indices = @transform_1, window_bounds = array<i64: 1024, 512>}, {pipeline_mode = #tpu.pipeline_mode<synchronous>, transform_indices = @transform_2, window_bounds = array<i64: 3, 512>}, {transform_indices = @transform_3, window_bounds = array<i64: 2, 512>}]} {
    %c0 = arith.constant 0 : index
    %c0_0 = arith.constant 0 : index
    %0 = vector.load %arg1[%c0, %c0_0] : memref<2x1024xbf16, #tpu.memory_space<vmem>>, vector<2x1024xbf16>
    %c0_1 = arith.constant 0 : index
    %c0_2 = arith.constant 0 : index
    %1 = vector.load %arg2[%c0_1, %c0_2] : memref<1024x512xbf16, #tpu.memory_space<vmem>>, vector<1024x512xbf16>
    %cst = arith.constant dense<0.000000e+00> : vector<2x512xf32>
    %2 = tpu.matmul %0, %1, %cst {dimension_numbers = #tpu.dot_dimension_numbers<[1], [0], [0], [1], [0, 0, 1, 1], [], []>} : vector<2x1024xbf16>, vector<1024x512xbf16>, vector<2x512xf32> -> vector<2x512xf32>
    %c0_3 = arith.constant 0 : index
    %c0_4 = arith.constant 0 : index
    %3 = vector.load %arg3[%c0_3, %c0_4] : memref<3x512xf32, #tpu.memory_space<vmem>>, vector<3x512xf32>
    %4 = vector.extract_strided_slice %3 {offsets = [0, 0], sizes = [1, 512], strides = [1, 1]} : vector<3x512xf32> to vector<1x512xf32>
    %5 = vector.extract_strided_slice %3 {offsets = [1, 0], sizes = [1, 512], strides = [1, 1]} : vector<3x512xf32> to vector<1x512xf32>
    %6 = vector.extract_strided_slice %3 {offsets = [2, 0], sizes = [1, 512], strides = [1, 1]} : vector<3x512xf32> to vector<1x512xf32>
    %7 = vector.broadcast %4 : vector<1x512xf32> to vector<2x512xf32>
    %8 = arith.mulf %2, %7 : vector<2x512xf32>
    %9 = vector.broadcast %5 : vector<1x512xf32> to vector<2x512xf32>
    %10 = arith.addf %8, %9 : vector<2x512xf32>
    %cst_5 = arith.constant 0.000000e+00 : f32
    %11 = vector.broadcast %cst_5 : f32 to vector<2x512xf32>
    %12 = arith.cmpf oge, %10, %11 : vector<2x512xf32>
    %13 = vector.broadcast %6 : vector<1x512xf32> to vector<2x512xf32>
    %14 = arith.mulf %13, %10 : vector<2x512xf32>
    %15 = arith.select %12, %10, %14 : vector<2x512xi1>, vector<2x512xf32>
    %c0_6 = arith.constant 0 : index
    %c0_7 = arith.constant 0 : index
    %16 = vector.load %arg4[%c0_6, %c0_7] : memref<2x512xf32, #tpu.memory_space<vmem>>, vector<2x512xf32>
    tpu.vector_store %arg4[%c0_6, %c0_7], %15 {strides = array<i32>} : memref<2x512xf32, #tpu.memory_space<vmem>>, vector<2x512xf32>,
    return
  }
  func.func @transform_0(%arg0: i32) -> (i32, i32) {
    %c0_i32 = arith.constant 0 : i32
    %c0_i32_0 = arith.constant 0 : i32
    return %arg0, %c0_i32 : i32, i32
  }
  func.func @transform_1(%arg0: i32) -> (i32, i32) {
    %c0_i32 = arith.constant 0 : i32
    %c0_i32_0 = arith.constant 0 : i32
    %c0_i32_1 = arith.constant 0 : i32
    return %c0_i32, %c0_i32_0 : i32, i32
  }
  func.func @transform_2(%arg0: i32) -> (i32, i32) {
    %c0_i32 = arith.constant 0 : i32
    %c0_i32_0 = arith.constant 0 : i32
    %c0_i32_1 = arith.constant 0 : i32
    return %c0_i32, %c0_i32_0 : i32, i32
  }
  func.func @transform_3(%arg0: i32) -> (i32, i32) {
    %c0_i32 = arith.constant 0 : i32
    %c0_i32_0 = arith.constant 0 : i32
    return %arg0, %c0_i32 : i32, i32
  }
}

</mosaic_0001>

<bundles_post_ra>
// kernel: _lambda_.9
= control target key start
LH: loop header
LB: loop body
LE: loop exit
PB: predicated region body
PF: predicated region fallthrough
CT: control target
= control target key end

     0   :  { %8 = vsyncpa [#allocation3], 0  ;;  %s1059_s0 = inlined_call_operand.hbm [shape: f32[96,64], index: 0, kind: input, shape index: {}]   ;;  %s1060_s1 = inlined_call_operand.hbm [shape: f32[64,64], index: 1, kind: input, shape index: {}]   ;;  %s1061_s2 = inlined_call_operand.hbm [shape: f32[3,64], index: 2, kind: input, shape index: {}]   ;;  %s1062_s3 = inlined_call_operand.hbm [shape: f32[96,64], index: 3, kind: output, shape index: {}]  }
   0x1   :  { %10 = vsyncpa [#allocation3 + $0x1], 0 }
   0x2   :  { %11 = vsyncpa [#allocation6], 0 }
   0x3   :  { %12 = vsyncpa [#allocation4], 0 }
   0x4   :  { %14 = vsyncpa [#allocation4 + $0x1], 0  ;;  %s810_s12 = smov 0   ;;  %s812_s13 = smov 0  }
   0x5   :  { %s814_s14 = smov 0   ;;  %s816_s15 = smov 0  }
   0x6 LB: > { %s831_s16 = sadd.s32 4294967295, %s780_s15   ;;  %s471_s17 = sadd.s32 4294967294, %s780_s15   ;;  %s780_s15 = sphi %s816_s15, %s1081_s15   ;;  %s776_s14 = sphi %s814_s14, %s1080_s14   ;;  %s772_s13 = sphi %s812_s13, %s1079_s13   ;;  %s768_s12 = sphi %s810_s12, %s1078_s12  }
   0x7   : > { %p40_p0 = scmp.ne.s32.totalorder %s772_s13, %s768_s12  ;;  %p1063_p1 = scmp.eq.s32.totalorder %s831_s16, 0 }
   0x8   : > { %p112_p3 = scmp.eq.s32.totalorder %s471_s17, 2  ;;  %p472_p5 = scmp.ge.s32.totalorder %s780_s15, 1 }
   0x9   : > { %p840_p4 = por %p1063_p1, %p40_p0  ;;  %p119_p7 = scmp.lt.s32.totalorder %s780_s15, 4 }
   0xa   : > { %p845_p6 = por %p112_p3, %p40_p0  ;;  %s782_s21 = smov [#allocation5]  }
   0xb   : > { %s1066_s18 = scalar_select %p840_p4, 1, 0 }
   0xc   : > { %s1067_s19 = scalar_select %p845_p6, 1, 0 }
   0xd   : > { %p850_p8 = pnand %p472_p5, %p119_p7  ;;  %s131_s22 = sshll.u32 %s782_s21, 4  ;;  %s132_s22 = int_to_ptr.vmem [resolvable:$true] %s131_s22 }
   0xe   : > { %s783_s24 = smov [#allocation7]   ;;  %s624_s28 = scalar_lea.hbm %s1060_s1, 1024 }
   0xf   : > { %s1068_s20 = scalar_select %p850_p8, 1, 0 }
  0x10   : > { %p565_p9 = pneg %p850_p8  ;;  %s145_s25 = sshll.u32 %s783_s24, 4  ;;  %s862_s25 = int_to_ptr.vmem [resolvable:$true] %s145_s25 }
  0x11   : > { %p625_p11 = scmp.ne.s32.totalorder %s1060_s1, %s624_s28  ;;  %p631_p3 = scmp.lt.u32.totalorder %s624_s28, %s1060_s1 }
  0x12   : > { %p858_p10 = pnand %p565_p9, %p1063_p1 }
  0x14   : > { %p626_p12 = pneg %p858_p10 }
  0x16   : > { %p627_p13 = pnand %p626_p12, %p625_p11 }
  0x18   : > { %p628_p0 = pneg %p627_p13 }
  0x1a   : > { %p633_p5 = pnand %p631_p3, %p628_p0 }
  0x1c   : > { %636 = shalt.err (!%p633_p5)
}
  0x1d   : > { %s637_s6 = scalar_lea.vmem %s132_s22, 1024  ;;  %p645_p2 = scmp.lt.s32.totalorder %s132_s22, %s132_s22 }
  0x1e   : > { %p638_p7 = scmp.ne.s32.totalorder %s132_s22, %s637_s6  ;;  %p646_p6 = scmp.lt.s32.totalorder %s637_s6, %s637_s6 }
  0x20   : > { %p640_p9 = pnand %p638_p7, %p626_p12  ;;  %p647_p4 = por %p646_p6, %p645_p2 }
  0x22   : > { %p641_p1 = pneg %p640_p9 }
  0x24   : > { %p648_p8 = pnand %p647_p4, %p641_p1 }
  0x26   : > { %651 = shalt.err (!%p648_p8)
}
  0x27   : > { %s784_s7 = smov 128   ;;  %s785_s8 = smov 8  }
  0x28   : > { %568 = dma.hbm_to_vmem [thread:$0]  (!%p858_p10), %s1060_s1, 1024, %s132_s22, [#allocation6], %s784_s7, %s784_s7, %s785_s8  }
  0x29   : > { %s652_s21 = scalar_lea.hbm %s1061_s2, 64 }
  0x2a   : > { %p653_p1 = scmp.ne.s32.totalorder %s1061_s2, %s652_s21  ;;  %p659_p6 = scmp.lt.u32.totalorder %s652_s21, %s1061_s2 }
  0x2c   : > { %p655_p2 = pnand %p653_p1, %p626_p12 }
  0x2e   : > { %p656_p4 = pneg %p655_p2 }
  0x30   : > { %p661_p8 = pnand %p659_p6, %p656_p4 }
  0x32   : > { %664 = shalt.err (!%p661_p8)
}
  0x33   : > { %s665_s22 = scalar_lea.vmem %s862_s25, 64  ;;  %p673_p3 = scmp.lt.s32.totalorder %s862_s25, %s862_s25 }
  0x34   : > { %p666_p11 = scmp.ne.s32.totalorder %s862_s25, %s665_s22  ;;  %p674_p5 = scmp.lt.s32.totalorder %s665_s22, %s665_s22 }
  0x36   : > { %p668_p13 = pnand %p666_p11, %p626_p12  ;;  %p675_p7 = por %p674_p5, %p673_p3 }
  0x38   : > { %p669_p0 = pneg %p668_p13 }
  0x3a   : > { %p676_p9 = pnand %p675_p7, %p669_p0 }
  0x3c   : > { %679 = shalt.err (!%p676_p9)
}
  0x3d   : > { %571 = dma.hbm_to_vmem [thread:$0]  (!%p858_p10), %s1061_s2, 64, %s862_s25, [#allocation6]  }
  0x3e   : > { %s915_s4 = sadd.s32 1, %s780_s15   ;;  %s27_s23 = sadd.s32 1, %s776_s14 }
  0x3f   : > { %s24_s5 = ssub.s32 %s780_s15, %s915_s4  ;;  %p34_p12 = scmp.ne.s32.totalorder %s776_s14, %s772_s13 }
  0x40   : > { %p25_p1 = scmp.eq.s32.totalorder %s24_s5, 0  ;;  %p35_p2 = scmp.eq.s32.totalorder %s780_s15, 0 }
  0x41   : > { %p1070_p4 = scmp.eq.s32.totalorder %s831_s16, 2  ;;  %p582_p8 = scmp.lt.s32.totalorder %s780_s15, 3 }
  0x42   : > { %s931_s9 = scalar_select %p25_p1, %s776_s14, %s27_s23  }
  0x43   : > { %p925_p6 = por %p1070_p4, %p34_p12  ;;  %p36_p11 = por %p35_p2, %p34_p12 }
  0x44   : > { %s156_s10 = sand.u32 1, %s776_s14   ;;  %s493_s25 = sshll.u32 %s780_s15, 9 }
  0x45   : > { %s476_s11 = sshll.u32 %s156_s10, 5  ;;  %s938_s24 = scalar_lea.hbm %s1059_s0, %s493_s25 }
  0x46   : > { %s160_s26 = scalar_lea.vmem [#allocation2], %s476_s11  ;;  %p942_p10 = pnand %p582_p8, %p36_p11 }
  0x47   : > { %s167_s27 = sshll.u32 %s160_s26, 4  ;;  %s946_s22 = scalar_lea.sflag [#allocation3], %s156_s10  ;;  %s940_s27 = int_to_ptr.vmem [resolvable:$true] %s167_s27 }
  0x48   : > { %s680_s29 = scalar_lea.hbm %s938_s24, 512  ;;  %p682_p0 = pneg %p942_p10 }
  0x49   : > { %p681_p13 = scmp.ne.s32.totalorder %s938_s24, %s680_s29  ;;  %s685_s5 = scalar_lea.hbm %s1059_s0, 1536 }
  0x4a   : > { %p686_p7 = scmp.lt.u32.totalorder %s938_s24, %s1059_s0  ;;  %p687_p9 = scmp.lt.u32.totalorder %s685_s5, %s680_s29 }
  0x4b   : > { %p683_p3 = pnand %p682_p0, %p681_p13  ;;  %p689_p1 = scmp.lt.u32.totalorder %s680_s29, %s938_s24 }
  0x4c   : > { %p688_p12 = por %p687_p9, %p686_p7 }
  0x4d   : > { %p684_p5 = pneg %p683_p3 }
  0x4e   : > { %p690_p2 = por %p689_p1, %p688_p12 }
  0x50   : > { %p691_p4 = pnand %p690_p2, %p684_p5 }
  0x52   : > { %694 = shalt.err (!%p691_p4)
}
  0x53   : > { %s695_s10 = scalar_lea.vmem %s940_s27, 512  ;;  %s786_s17 = smov [#allocation2]  }
  0x54   : > { %p696_p8 = scmp.ne.s32.totalorder %s940_s27, %s695_s10  ;;  %s700_s21 = sshll.u32 %s786_s17, 4  ;;  %s701_s21 = int_to_ptr.vmem [resolvable:$false] %s700_s21 }
  0x55   : > { %s702_s26 = scalar_lea.vmem %s701_s21, 1024  ;;  %p703_p3 = scmp.lt.s32.totalorder %s940_s27, %s701_s21 }
  0x56   : > { %p698_p11 = pnand %p696_p8, %p682_p0  ;;  %p704_p7 = scmp.lt.s32.totalorder %s702_s26, %s695_s10 }
  0x58   : > { %p699_p13 = pneg %p698_p11  ;;  %p705_p9 = por %p704_p7, %p703_p3 }
  0x5a   : > { %p706_p12 = pnand %p705_p9, %p699_p13 }
  0x5c   : > { %709 = shalt.err (!%p706_p12)
}
  0x5d   : > { %575 = dma.hbm_to_vmem [thread:$0]  (!%p942_p10), %s938_s24, 512, %s940_s27, %s946_s22, %s784_s7, %s784_s7, %s785_s8  }
  0x5e   : > { %p1073_p0 = scmp.ne.s32.totalorder %s1068_s20, 0 }
  0x5f   : > { %s980_s29 = sand.u32 (!%p1073_p0), 1, %s772_s13   ;;  %p1074_p5 = scmp.ne.s32.totalorder (!%p1073_p0), %s1066_s18, 0 }
  0x60   : > { %179 = sbr.rel (%p1073_p0) target bundleno = 361 (0x169), region = 32  ;;  %s480_s30 = sshll.u32 (!%p1073_p0), %s980_s29, 5 }
  0x61   : > { %s182_s23 = scalar_lea.sflag (!%p1073_p0), [#allocation3], %s980_s29  ;;  %s986_s28 = scalar_lea.vmem (!%p1073_p0), [#allocation2], %s480_s30 }
  0x67   : > { %755 = dma.done.wait (%p1074_p5), %s182_s23, 512  }
  0x68   : > { %757 = vsyncadd (%p1074_p5), %s182_s23, 4294966784  ;;  %p1075_p10 = scmp.eq.s32.totalorder %s831_s16, 0 }
  0x6a   : > { %759 = dma.done.wait (%p1075_p10), [#allocation6], 1088   ;;  %p1076_p1 = pmov %p1075_p10 }
  0x6b   : > { %v222_v0 = vld [vmem:[#allocation5] sm:$0xff]  ;;  %v223_v1 = vld [vmem:[#allocation5 + $0x8] sm:$0xff]  ;;  %v224_v2 = vld [vmem:[#allocation5 + $0x10] sm:$0xff]  ;;  %vm230_vm0 = vcmask 523264   ;;  %v329_v16 = vlaneseq  ;;  %s215_s18 = scalar_lea.vmem [#allocation8], %s480_s30  ;;  %s494_s7 = sshll.u32 %s831_s16, 9 }
  0x6c   : > { %761 = vsyncadd (%p1076_p1), [#allocation6], 4294966208  ;;  %v529_v3 = vpack.c.bf16 %v223_v1, %v222_v0  ;;  %v225_v4 = vld [vmem:[#allocation5 + $0x18] sm:$0xff]  ;;  %v226_v6 = vld [vmem:[#allocation5 + $0x20] sm:$0xff]  ;;  %s379_s20 = sshll.u32 %s215_s18, 4  ;;  %s1012_s16 = scalar_lea.hbm %s1062_s3, %s494_s7  ;;  %s1007_s20 = int_to_ptr.vmem [resolvable:$true] %s379_s20 }
  0x6d   : > { %v533_v5 = vpack.c.bf16 %v225_v4, %v224_v2  ;;  %v227_v7 = vld [vmem:[#allocation5 + $0x28] sm:$0xff]  ;;  %v218_v8 = vld [vmem:[%s986_s28] sm:$0xff]  ;;  %v220_v9 = vld [vmem:[%s986_s28 + $0x10] sm:$0xff]  ;;  %v330_v17 = vshrl.u32 %v329_v16, 7  ;;  %s366_s27 = scalar_lea.sflag [#allocation4], %s980_s29  ;;  %s710_s22 = scalar_lea.vmem %s1007_s20, 512 }
  0x6e   : > { %530 = vmatprep.subr.bf16.mxu0 %v529_v3  ;;  %545 = vmatprep.subr.bf16.mxu1 %v529_v3  ;;  %v537_v10 = vpack.c.bf16 %v227_v7, %v226_v6  ;;  %v228_v11 = vld [vmem:[#allocation5 + $0x30] sm:$0xff]  ;;  %v229_v12 = vld [vmem:[#allocation5 + $0x38] sm:$0xff]  ;;  %v219_v14 = vld [vmem:[%s986_s28 + $0x8] sm:$0xff]  ;;  %p711_p2 = scmp.ne.s32.totalorder %s1007_s20, %s710_s22  ;;  %s787_s5 = smov [#allocation8]  }
  0x6f   : > { %532 = vmatpush3.bf16.msra.mxu0 %v529_v3  ;;  %549 = vmatpush3.bf16.msra.mxu1 %v529_v3  ;;  %v541_v13 = vpack.c.bf16 %v229_v12, %v228_v11  ;;  %v221_v15 = vld [vmem:[%s986_s28 + $0x18] sm:$0xff]  ;;  %v331_v18 = vsub.s32 0, %v330_v17  ;;  %v328_v19 = vld [vmem:[#allocation7] sm:$0x7]  ;;  %v339_v20 = vsub.s32 1, %v330_v17  ;;  %v351_v22 = vsub.s32 2, %v330_v17 }
  0x70   : > { %534 = vmatprep.subr.bf16.mxu0 %v533_v5  ;;  %546 = vmatprep.subr.bf16.mxu1 %v533_v5  ;;  %p712_p4 = pnand %p711_p2, %p925_p6  ;;  %s714_s11 = sshll.u32 %s787_s5, 4  ;;  %s715_s11 = int_to_ptr.vmem [resolvable:$false] %s714_s11 }
  0x71   : > { %523 = vmatprep.mubr.msk.f32.mxu0 %vm230_vm0, %v218_v8  ;;  %526 = vmatprep.mubr.msk.f32.mxu1 %vm230_vm0, %v220_v9  ;;  %v332_v21 = vrot.slane %v328_v19, %v331_v18  ;;  %v340_v23 = vrot.slane %v328_v19, %v339_v20  ;;  %v352_v27 = vrot.slane %v328_v19, %v351_v22  ;;  %s716_s25 = scalar_lea.vmem %s715_s11, 1024  ;;  %p717_p11 = scmp.lt.s32.totalorder %s1007_s20, %s715_s11 }
  0x72   : > { %p713_p8 = pneg %p712_p4  ;;  %p718_p13 = scmp.lt.s32.totalorder %s716_s25, %s710_s22 }
  0x73   : > { %536 = vmatpush3.bf16.msra.mxu0 %v533_v5  ;;  %550 = vmatpush3.bf16.msra.mxu1 %v533_v5 }
  0x74   : > { %538 = vmatprep.subr.bf16.mxu0 %v537_v10  ;;  %547 = vmatprep.subr.bf16.mxu1 %v537_v10  ;;  %p719_p3 = por %p718_p13, %p717_p11 }
  0x76   : > { %p720_p7 = pnand %p719_p3, %p713_p8 }
  0x77   : > { %540 = vmatpush3.bf16.msra.mxu0 %v537_v10  ;;  %551 = vmatpush3.bf16.msra.mxu1 %v537_v10 }
  0x78   : > { %542 = vmatprep.subr.bf16.mxu0 %v541_v13  ;;  %548 = vmatprep.subr.bf16.mxu1 %v541_v13 }
  0x7b   : > { %544 = vmatpush3.bf16.msra.mxu0 %v541_v13  ;;  %552 = vmatpush3.bf16.msra.mxu1 %v541_v13 }
  0x7e   : > { %524 = vmatmul.mubr.msk.f32.vlgmr.msra.gmra.mrb[0].mxu0 %vm230_vm0, %v219_v14  ;;  %527 = vmatmul.mubr.msk.f32.vlgmr.msra.gmra.mrb[0].mxu1 %vm230_vm0, %v221_v15 }
 0x151   : > { %v525_v24 = vpop.f32.mrb[0].mxu0  ;;  %v528_v25 = vpop.f32.mrb[0].mxu1 }
 0x152   : > { %v334_v26 = vmul.f32 %v525_v24, %v332_v21  ;;  %v336_v28 = vmul.f32 %v528_v25, %v332_v21  ;;  %v309_v29 = vpop.f32.mrb[1].mxu0  ;;  %v319_v30 = vpop.f32.mrb[1].mxu1 }
 0x153   : > { %v333_v31 = vmul.f32 %v332_v21, %v309_v29  ;;  %v335_v32 = vmul.f32 %v332_v21, %v319_v30 }
 0x154   : > { %v342_v33 = vadd.f32 %v340_v23, %v334_v26  ;;  %v344_v34 = vadd.f32 %v340_v23, %v336_v28 }
 0x155   : > { %v341_v35 = vadd.f32 %v340_v23, %v333_v31  ;;  %v343_v36 = vadd.f32 %v340_v23, %v335_v32 }
 0x156   : > { %vm346_vm1 = vcmp.ge.f32.partialorder %v342_v33, 0.0  ;;  %v354_v37 = vmul.f32 %v352_v27, %v342_v33  ;;  %vm348_vm2 = vcmp.ge.f32.partialorder %v344_v34, 0.0  ;;  %v356_v38 = vmul.f32 %v352_v27, %v344_v34 }
 0x157   : > { %vm345_vm3 = vcmp.ge.f32.partialorder %v341_v35, 0.0  ;;  %v353_v39 = vmul.f32 %v352_v27, %v341_v35  ;;  %vm347_vm4 = vcmp.ge.f32.partialorder %v343_v36, 0.0  ;;  %v355_v40 = vmul.f32 %v352_v27, %v343_v36 }
 0x158   : > { %v358_v41 = vsel %vm346_vm1, %v342_v33, %v354_v37  ;;  %v360_v42 = vsel %vm348_vm2, %v344_v34, %v356_v38 }
 0x159   : > { %362 = vst.msk [vmem:[%s215_s18 + $0x8] sm:$0xff] %vm230_vm0, %v358_v41  ;;  %364 = vst.msk [vmem:[%s215_s18 + $0x18] sm:$0xff] %vm230_vm0, %v360_v42  ;;  %v357_v43 = vsel %vm345_vm3, %v341_v35, %v353_v39  ;;  %v359_v44 = vsel %vm347_vm4, %v343_v36, %v355_v40 }
 0x15a   : > { %361 = vst.msk [vmem:[%s215_s18] sm:$0xff] %vm230_vm0, %v357_v43  ;;  %363 = vst.msk [vmem:[%s215_s18 + $0x10] sm:$0xff] %vm230_vm0, %v359_v44 }
 0x15b   : > { %723 = shalt.err (!%p720_p7)
}
 0x15c   : > { %s724_s10 = scalar_lea.hbm %s1012_s16, 512  ;;  %s728_s26 = scalar_lea.hbm %s1062_s3, 1536 }
 0x15d   : > { %p725_p9 = scmp.ne.s32.totalorder %s1012_s16, %s724_s10  ;;  %p729_p5 = scmp.lt.u32.totalorder %s1012_s16, %s1062_s3 }
 0x15e   : > { %p730_p10 = scmp.lt.u32.totalorder %s728_s26, %s724_s10  ;;  %p732_p2 = scmp.lt.u32.totalorder %s724_s10, %s1012_s16 }
 0x15f   : > { %p726_p12 = pnand %p725_p9, %p925_p6 }
 0x160   : > { %p731_p1 = por %p730_p10, %p729_p5 }
 0x161   : > { %p727_p0 = pneg %p726_p12 }
 0x162   : > { %p733_p4 = por %p732_p2, %p731_p1 }
 0x164   : > { %p734_p8 = pnand %p733_p4, %p727_p0 }
 0x166   : > { %737 = shalt.err (!%p734_p8)
}
 0x167   : > { %s788_s28 = smov 128   ;;  %s789_s18 = smov 8  }
 0x168   : > { %563 = dma.vmem_to_hbm [thread:$0]  (%p925_p6), %s1007_s20, 512, %s1012_s16, %s366_s27, %s788_s28, %s788_s28, %s789_s18  }
 0x169 PF: > { %p585_p11 = scmp.ge.s32.totalorder %s780_s15, 2  ;;  %s394_s7 = sand.u32 1, %s768_s12  }
 0x16a   : > { %p1077_p13 = scmp.ne.s32.totalorder %s1067_s19, 0  ;;  %s395_s8 = scalar_lea.sflag [#allocation4], %s394_s7 }
 0x16c   : > { %p577_p3 = pnand %p585_p11, %p1077_p13 }
 0x16e   : > { %763 = dma.done.wait (!%p577_p3), %s395_s8, 512  }
 0x16f   : > { %765 = vsyncadd (!%p577_p3), %s395_s8, 4294966784  ;;  %p17_p7 = scmp.ge.s32.totalorder %s915_s4, 5   ;;  %s1078_s12 = smov %s772_s13 }
 0x170   : > { %s1079_s13 = smov %s776_s14  ;;  %s1080_s14 = smov %s931_s9 }
 0x171   : > { %s1081_s15 = smov %s915_s4  ;;  %19 = sbr.rel (!%p17_p7) target bundleno = 6 (0x6), region = 85 }
 0x178   :  { %400 = vsyncpa [#allocation3], 1 }
 0x179   :  { %402 = vsyncpa [#allocation3 + $0x1], 1 }
 0x17a   :  { %403 = vsyncpa [#allocation6], 1 }
 0x17b   :  { %404 = vsyncpa [#allocation4], 1 }
 0x17c   :  { %406 = vsyncpa [#allocation4 + $0x1], 1 }

// kernel: _lambda_.11
= control target key start
LH: loop header
LB: loop body
LE: loop exit
PB: predicated region body
PF: predicated region fallthrough
CT: control target
= control target key end

     0   :  { %9 = vsyncpa [#allocation3], 0  ;;  %s309_s0 = inlined_call_operand.hbm [shape: bf16[8,32], index: 0, kind: input, shape index: {}]   ;;  %s310_s1 = inlined_call_operand.hbm [shape: bf16[8,32], index: 1, kind: input, shape index: {}]   ;;  %s311_s2 = inlined_call_operand.hbm [shape: bf16[8,32], index: 2, kind: input, shape index: {}]   ;;  %s312_s3 = inlined_call_operand.hbm [shape: bf16[8,32], index: 3, kind: input, shape index: {}]   ;;  %s313_s4 = inlined_call_operand.hbm [shape: bf16[8,32], index: 4, kind: output, shape index: {}]  }
   0x1   :  { %10 = vsyncpa [#allocation6], 0 }
   0x2   :  { %11 = vsyncpa [#allocation9], 0 }
   0x3   :  { %12 = vsyncpa [#allocation4], 0  ;;  %s219_s15 = smov [#allocation5]   ;;  %s220_s17 = smov [#allocation2]  }
   0x4   :  { %s29_s16 = sshll.u32 %s219_s15, 4  ;;  %s19_s18 = sshll.u32 %s220_s17, 4  ;;  %s30_s16 = int_to_ptr.vmem [resolvable:$true] %s29_s16  ;;  %s20_s18 = int_to_ptr.vmem [resolvable:$true] %s19_s18 }
   0x5   :  { %s101_s21 = scalar_lea.hbm %s310_s1, 64 }
   0x6   :  { %p102_p0 = scmp.ne.s32.totalorder %s310_s1, %s101_s21  ;;  %p105_p1 = scmp.lt.u32.totalorder %s101_s21, %s310_s1 }
   0x8   :  { %p107_p2 = pnand %p105_p1, %p102_p0 }
   0xa   :  { %110 = shalt.err (!%p107_p2)
}
   0xb   :  { %s111_s26 = scalar_lea.vmem %s30_s16, 64  ;;  %p116_p4 = scmp.lt.s32.totalorder %s30_s16, %s30_s16 }
   0xc   :  { %p112_p3 = scmp.ne.s32.totalorder %s30_s16, %s111_s26  ;;  %p117_p5 = scmp.lt.s32.totalorder %s111_s26, %s111_s26 }
   0xe   :  { %p118_p6 = por %p117_p5, %p116_p4 }
  0x10   :  { %p119_p7 = pnand %p118_p6, %p112_p3 }
  0x12   :  { %122 = shalt.err (!%p119_p7)
}
  0x13   :  { %32 = dma.hbm_to_vmem [thread:$0]  %s310_s1, 64, %s30_s16, [#allocation6]  }
  0x14   :  { %s123_s5 = scalar_lea.hbm %s309_s0, 64 }
  0x15   :  { %p124_p8 = scmp.ne.s32.totalorder %s309_s0, %s123_s5  ;;  %p127_p9 = scmp.lt.u32.totalorder %s123_s5, %s309_s0 }
  0x17   :  { %p129_p10 = pnand %p127_p9, %p124_p8 }
  0x19   :  { %132 = shalt.err (!%p129_p10)
}
  0x1a   :  { %s133_s10 = scalar_lea.vmem %s20_s18, 64  ;;  %p138_p12 = scmp.lt.s32.totalorder %s20_s18, %s20_s18 }
  0x1b   :  { %p134_p11 = scmp.ne.s32.totalorder %s20_s18, %s133_s10  ;;  %p139_p13 = scmp.lt.s32.totalorder %s133_s10, %s133_s10 }
  0x1d   :  { %p140_p0 = por %p139_p13, %p138_p12 }
  0x1f   :  { %p141_p1 = pnand %p140_p0, %p134_p11 }
  0x21   :  { %144 = shalt.err (!%p141_p1)
}
  0x22   :  { %22 = dma.hbm_to_vmem [thread:$0]  %s309_s0, 64, %s20_s18, [#allocation3]  }
  0x23   :  { %s221_s12 = smov [#allocation7]   ;;  %s222_s14 = smov [#allocation8]  }
  0x24   :  { %s39_s13 = sshll.u32 %s221_s12, 4  ;;  %s49_s15 = sshll.u32 %s222_s14, 4  ;;  %s40_s13 = int_to_ptr.vmem [resolvable:$true] %s39_s13  ;;  %s50_s15 = int_to_ptr.vmem [resolvable:$true] %s49_s15 }
  0x25   :  { %s145_s19 = scalar_lea.hbm %s311_s2, 64 }
  0x26   :  { %p146_p2 = scmp.ne.s32.totalorder %s311_s2, %s145_s19  ;;  %p149_p3 = scmp.lt.u32.totalorder %s145_s19, %s311_s2 }
  0x28   :  { %p151_p4 = pnand %p149_p3, %p146_p2 }
  0x2a   :  { %154 = shalt.err (!%p151_p4)
}
  0x2b   :  { %s155_s0 = scalar_lea.vmem %s40_s13, 64  ;;  %p160_p6 = scmp.lt.s32.totalorder %s40_s13, %s40_s13 }
  0x2c   :  { %p156_p5 = scmp.ne.s32.totalorder %s40_s13, %s155_s0  ;;  %p161_p7 = scmp.lt.s32.totalorder %s155_s0, %s155_s0 }
  0x2e   :  { %p162_p8 = por %p161_p7, %p160_p6 }
  0x30   :  { %p163_p9 = pnand %p162_p8, %p156_p5 }
  0x32   :  { %166 = shalt.err (!%p163_p9)
}
  0x33   :  { %42 = dma.hbm_to_vmem [thread:$0]  %s311_s2, 64, %s40_s13, [#allocation6]  }
  0x34   :  { %s167_s27 = scalar_lea.hbm %s312_s3, 64 }
  0x35   :  { %p168_p10 = scmp.ne.s32.totalorder %s312_s3, %s167_s27  ;;  %p171_p11 = scmp.lt.u32.totalorder %s167_s27, %s312_s3 }
  0x37   :  { %p173_p12 = pnand %p171_p11, %p168_p10 }
  0x39   :  { %176 = shalt.err (!%p173_p12)
}
  0x3a   :  { %s177_s6 = scalar_lea.vmem %s50_s15, 64  ;;  %p182_p0 = scmp.lt.s32.totalorder %s50_s15, %s50_s15 }
  0x3b   :  { %p178_p13 = scmp.ne.s32.totalorder %s50_s15, %s177_s6  ;;  %p183_p1 = scmp.lt.s32.totalorder %s177_s6, %s177_s6 }
  0x3d   :  { %p184_p2 = por %p183_p1, %p182_p0 }
  0x3f   :  { %p185_p3 = pnand %p184_p2, %p178_p13 }
  0x41   :  { %188 = shalt.err (!%p185_p3)
}
  0x42   :  { %52 = dma.hbm_to_vmem [thread:$0]  %s312_s3, 64, %s50_s15, [#allocation9]  }
  0x43   :  { %211 = dma.done.wait [#allocation3], 64  }
  0x44   :  { %212 = vsyncadd [#allocation3], 4294967232 }
  0x45   :  { %213 = dma.done.wait [#allocation6], 128  }
  0x46   :  { %214 = vsyncadd [#allocation6], 4294967168 }
  0x47   :  { %215 = dma.done.wait [#allocation9], 64  }
  0x48   :  { %216 = vsyncadd [#allocation9], 4294967232  ;;  %v65_v0 = vld [vmem:[#allocation2] sm:$0xf]  ;;  %v67_v1 = vld [vmem:[#allocation5] sm:$0xf] }
  0x49   :  { %v69_v2 = vld [vmem:[#allocation7] sm:$0xf]  ;;  %v66_v3 = vunpack.c.l.bf16 %v65_v0  ;;  %v68_v4 = vunpack.c.l.bf16 %v67_v1  ;;  %v71_v6 = vld [vmem:[#allocation8] sm:$0xf]  ;;  %s223_s8 = smov [#allocation10]   ;;  %vm77_vm0 = vcmask 257024  }
  0x4a   :  { %v70_v5 = vunpack.c.l.bf16 %v69_v2  ;;  %v72_v7 = vunpack.c.l.bf16 %v71_v6  ;;  %s85_s9 = sshll.u32 %s223_s8, 4  ;;  %s86_s9 = int_to_ptr.vmem [resolvable:$true] %s85_s9 }
  0x4b   :  { %v73_v8 = vmax.f32 %v66_v3, %v68_v4  ;;  %s189_s3 = scalar_lea.vmem %s86_s9, 64  ;;  %p194_p5 = scmp.lt.s32.totalorder %s86_s9, %s86_s9 }
  0x4c   :  { %v74_v9 = vmax.f32 %v70_v5, %v72_v7  ;;  %p190_p4 = scmp.ne.s32.totalorder %s86_s9, %s189_s3  ;;  %p195_p6 = scmp.lt.s32.totalorder %s189_s3, %s189_s3 }
  0x4e   :  { %v75_v10 = vmax.f32 %v73_v8, %v74_v9  ;;  %p196_p7 = por %p195_p6, %p194_p5 }
  0x50   :  { %v76_v11 = vpack.c.bf16 %v75_v10, %v75_v10  ;;  %p197_p8 = pnand %p196_p7, %p190_p4 }
  0x52   :  { %78 = vst.msk [vmem:[#allocation10] sm:$0xf] %vm77_vm0, %v76_v11 }
  0x53   :  { %200 = shalt.err (!%p197_p8)
}
  0x54   :  { %s201_s11 = scalar_lea.hbm %s313_s4, 64 }
  0x55   :  { %p202_p9 = scmp.ne.s32.totalorder %s313_s4, %s201_s11  ;;  %p205_p10 = scmp.lt.u32.totalorder %s201_s11, %s313_s4 }
  0x57   :  { %p207_p11 = pnand %p205_p10, %p202_p9 }
  0x59   :  { %210 = shalt.err (!%p207_p11)
}
  0x5a   :  { %88 = dma.vmem_to_hbm [thread:$0]  %s86_s9, 64, %s313_s4, [#allocation4]  }
  0x5b   :  { %217 = dma.done.wait [#allocation4], 64  }
  0x5c   :  { %218 = vsyncadd [#allocation4], 4294967232 }
  0x5d   :  { %92 = vsyncpa [#allocation3], 1 }
  0x5e   :  { %93 = vsyncpa [#allocation6], 1 }
  0x5f   :  { %94 = vsyncpa [#allocation9], 1 }
  0x60   :  { %95 = vsyncpa [#allocation4], 1 }

// kernel: _lambda_.10
= control target key start
LH: loop header
LB: loop body
LE: loop exit
PB: predicated region body
PF: predicated region fallthrough
CT: control target
= control target key end

     0   :  { %8 = vsyncpa [#allocation3], 0  ;;  %s3006_s0 = inlined_call_operand.hbm [shape: bf16[96,576], index: 0, kind: input, shape index: {}]   ;;  %s3007_s1 = inlined_call_operand.hbm [shape: bf16[3,576,32], index: 1, kind: input, shape index: {}]   ;;  %s3008_s2 = inlined_call_operand.hbm [shape: f32[3,32], index: 2, kind: input, shape index: {}]   ;;  %s3009_s3 = inlined_call_operand.hbm [shape: bf16[64,32], index: 3, kind: output, shape index: {}]  }
   0x1   :  { %10 = vsyncpa [#allocation3 + $0x1], 0 }
   0x2   :  { %11 = vsyncpa [#allocation6], 0 }
   0x3   :  { %12 = vsyncpa [#allocation4], 0 }
   0x4   :  { %14 = vsyncpa [#allocation4 + $0x1], 0  ;;  %s2676_s12 = smov 0   ;;  %s2678_s13 = smov 0  }
   0x5   :  { %s2680_s14 = smov 0   ;;  %s2682_s15 = smov 0  }
   0x6 LB: > { %s2697_s16 = sadd.s32 4294967295, %s2644_s15   ;;  %s1863_s17 = sadd.s32 4294967294, %s2644_s15   ;;  %s2644_s15 = sphi %s2682_s15, %s3029_s15   ;;  %s2640_s14 = sphi %s2680_s14, %s3028_s14   ;;  %s2636_s13 = sphi %s2678_s13, %s3027_s13   ;;  %s2632_s12 = sphi %s2676_s12, %s3026_s12  }
   0x7   : > { %p40_p0 = scmp.ne.s32.totalorder %s2636_s13, %s2632_s12  ;;  %p3010_p1 = scmp.eq.s32.totalorder %s2697_s16, 0 }
   0x8   : > { %p112_p3 = scmp.eq.s32.totalorder %s1863_s17, 1  ;;  %p1864_p5 = scmp.ge.s32.totalorder %s2644_s15, 1 }
   0x9   : > { %p2706_p4 = por %p3010_p1, %p40_p0  ;;  %p119_p7 = scmp.lt.s32.totalorder %s2644_s15, 3 }
   0xa   : > { %p2711_p6 = por %p112_p3, %p40_p0  ;;  %s2646_s21 = smov [#allocation5]  }
   0xb   : > { %s3013_s18 = scalar_select %p2706_p4, 1, 0 }
   0xc   : > { %s3014_s19 = scalar_select %p2711_p6, 1, 0 }
   0xd   : > { %p2716_p8 = pnand %p1864_p5, %p119_p7  ;;  %s131_s22 = sshll.u32 %s2646_s21, 4  ;;  %s2720_s22 = int_to_ptr.vmem [resolvable:$true] %s131_s22 }
   0xe   : > { %s2647_s24 = smov [#allocation7]   ;;  %s2488_s28 = scalar_lea.hbm %s3007_s1, 13824 }
   0xf   : > { %p2292_p9 = pneg %p2716_p8  ;;  %s145_s25 = sshll.u32 %s2647_s24, 4  ;;  %s2731_s25 = int_to_ptr.vmem [resolvable:$true] %s145_s25 }
  0x10   : > { %p2489_p12 = scmp.ne.s32.totalorder %s3007_s1, %s2488_s28  ;;  %p2495_p5 = scmp.lt.u32.totalorder %s2488_s28, %s3007_s1 }
  0x11   : > { %p2727_p11 = pnand %p2292_p9, %p3010_p1 }
  0x13   : > { %p2490_p13 = pneg %p2727_p11 }
  0x15   : > { %p2491_p0 = pnand %p2490_p13, %p2489_p12 }
  0x17   : > { %p2492_p3 = pneg %p2491_p0 }
  0x19   : > { %p2497_p7 = pnand %p2495_p5, %p2492_p3 }
  0x1b   : > { %2500 = shalt.err (!%p2497_p7)
}
  0x1c   : > { %s2501_s6 = scalar_lea.vmem %s2720_s22, 13824  ;;  %p2509_p2 = scmp.lt.s32.totalorder %s2720_s22, %s2720_s22 }
  0x1d   : > { %p2502_p9 = scmp.ne.s32.totalorder %s2720_s22, %s2501_s6  ;;  %p2510_p12 = scmp.lt.s32.totalorder %s2501_s6, %s2501_s6 }
  0x1f   : > { %p2504_p10 = pnand %p2502_p9, %p2490_p13  ;;  %p2511_p0 = por %p2510_p12, %p2509_p2 }
  0x21   : > { %p2505_p1 = pneg %p2504_p10 }
  0x23   : > { %p2512_p6 = pnand %p2511_p0, %p2505_p1 }
  0x25   : > { %2515 = shalt.err (!%p2512_p6)
}
  0x26   : > { %s2648_s7 = smov 64   ;;  %s2649_s8 = smov 4  }
  0x27   : > { %2295 = dma.hbm_to_vmem [thread:$0]  (!%p2727_p11), %s3007_s1, 13824, %s2720_s22, [#allocation6], %s2648_s7, %s2648_s7, %s2649_s8  }
  0x28   : > { %s2516_s21 = scalar_lea.hbm %s3008_s2, 64 }
  0x29   : > { %p2517_p2 = scmp.ne.s32.totalorder %s3008_s2, %s2516_s21  ;;  %p2523_p10 = scmp.lt.u32.totalorder %s2516_s21, %s3008_s2 }
  0x2b   : > { %p2519_p1 = pnand %p2517_p2, %p2490_p13 }
  0x2d   : > { %p2520_p6 = pneg %p2519_p1 }
  0x2f   : > { %p2525_p3 = pnand %p2523_p10, %p2520_p6 }
  0x31   : > { %2528 = shalt.err (!%p2525_p3)
}
  0x32   : > { %s2529_s22 = scalar_lea.vmem %s2731_s25, 64  ;;  %p2537_p12 = scmp.lt.s32.totalorder %s2731_s25, %s2731_s25 }
  0x33   : > { %p2530_p5 = scmp.ne.s32.totalorder %s2731_s25, %s2529_s22  ;;  %p2538_p0 = scmp.lt.s32.totalorder %s2529_s22, %s2529_s22 }
  0x35   : > { %p2532_p7 = pnand %p2530_p5, %p2490_p13  ;;  %p2539_p2 = por %p2538_p0, %p2537_p12 }
  0x37   : > { %p2533_p9 = pneg %p2532_p7 }
  0x39   : > { %p2540_p1 = pnand %p2539_p2, %p2533_p9 }
  0x3b   : > { %2543 = shalt.err (!%p2540_p1)
}
  0x3c   : > { %2298 = dma.hbm_to_vmem [thread:$0]  (!%p2727_p11), %s3008_s2, 64, %s2731_s25, [#allocation6]  }
  0x3d   : > { %s2786_s4 = sadd.s32 1, %s2644_s15   ;;  %s27_s5 = sadd.s32 1, %s2640_s14 }
  0x3e   : > { %s24_s23 = ssub.s32 %s2644_s15, %s2786_s4  ;;  %p34_p6 = scmp.ne.s32.totalorder %s2640_s14, %s2636_s13 }
  0x3f   : > { %p25_p13 = scmp.eq.s32.totalorder %s24_s23, 0  ;;  %p35_p10 = scmp.eq.s32.totalorder %s2644_s15, 0 }
  0x40   : > { %p2309_p3 = scmp.lt.s32.totalorder %s2644_s15, 2  ;;  %p3017_p7 = scmp.eq.s32.totalorder %s2697_s16, 1 }
  0x41   : > { %s2796_s6 = scalar_select %p25_p13, %s2640_s14, %s27_s5  }
  0x42   : > { %p36_p5 = por %p35_p10, %p34_p6  ;;  %p2800_p9 = por %p3017_p7, %p34_p6 }
  0x43   : > { %s156_s8 = sand.u32 1, %s2640_s14   ;;  %s2310_s9 = smul.u32 1920, %s2644_s15 }
  0x44   : > { %s3018_s7 = scalar_select %p2800_p9, 1, 0 }
  0x45   : > { %s2277_s25 = smul.u32 120, %s156_s8  ;;  %s2809_s17 = scalar_lea.hbm %s3006_s0, %s2310_s9 }
  0x46   : > { %p2811_p11 = pnand %p2309_p3, %p36_p5  ;;  %s2817_s27 = scalar_lea.sflag [#allocation3], %s156_s8 }
  0x47   : > { %s160_s24 = scalar_lea.vmem [#allocation2], %s2277_s25  ;;  %s2544_s28 = scalar_lea.hbm %s2809_s17, 1920 }
  0x48   : > { %s168_s26 = sshll.u32 %s160_s24, 4  ;;  %p2545_p12 = scmp.ne.s32.totalorder %s2809_s17, %s2544_s28  ;;  %s2815_s26 = int_to_ptr.vmem [resolvable:$true] %s168_s26 }
  0x49   : > { %p2546_p0 = pneg %p2811_p11  ;;  %s2549_s30 = scalar_lea.hbm %s3006_s0, 3840 }
  0x4a   : > { %p2550_p13 = scmp.lt.u32.totalorder %s2809_s17, %s3006_s0  ;;  %p2551_p6 = scmp.lt.u32.totalorder %s2549_s30, %s2544_s28 }
  0x4b   : > { %p2547_p2 = pnand %p2546_p0, %p2545_p12  ;;  %p2553_p3 = scmp.lt.u32.totalorder %s2544_s28, %s2809_s17 }
  0x4c   : > { %p2552_p10 = por %p2551_p6, %p2550_p13 }
  0x4d   : > { %p2548_p1 = pneg %p2547_p2 }
  0x4e   : > { %p2554_p5 = por %p2553_p3, %p2552_p10 }
  0x50   : > { %p2555_p7 = pnand %p2554_p5, %p2548_p1 }
  0x52   : > { %2558 = shalt.err (!%p2555_p7)
}
  0x53   : > { %s2559_s8 = scalar_lea.vmem %s2815_s26, 1920  ;;  %s2650_s9 = smov [#allocation2]  }
  0x54   : > { %p2560_p12 = scmp.ne.s32.totalorder %s2815_s26, %s2559_s8  ;;  %s2564_s25 = sshll.u32 %s2650_s9, 4  ;;  %s2565_s25 = int_to_ptr.vmem [resolvable:$false] %s2564_s25 }
  0x55   : > { %s2566_s10 = scalar_lea.vmem %s2565_s25, 3840  ;;  %p2567_p4 = scmp.lt.s32.totalorder %s2815_s26, %s2565_s25 }
  0x56   : > { %p2562_p2 = pnand %p2560_p12, %p2546_p0  ;;  %p2568_p13 = scmp.lt.s32.totalorder %s2566_s10, %s2559_s8 }
  0x58   : > { %p2563_p9 = pneg %p2562_p2  ;;  %p2569_p6 = por %p2568_p13, %p2567_p4 }
  0x5a   : > { %p2570_p10 = pnand %p2569_p6, %p2563_p9 }
  0x5c   : > { %2573 = shalt.err (!%p2570_p10)
}
  0x5d   : > { %s2651_s11 = smov 320   ;;  %s2652_s24 = smov 20  }
  0x5e   : > { %2302 = dma.hbm_to_vmem [thread:$0]  (!%p2811_p11), %s2809_s17, 1920, %s2815_s26, %s2817_s27, %s2651_s11, %s2651_s11, %s2652_s24  }
  0x5f   : > { %180 = sbr.rel (%p2716_p8) target bundleno = 477 (0x1dd), region = 32  ;;  %s2848_s28 = sand.u32 (!%p2716_p8), 1, %s2636_s13  }
  0x60   : > { %s2279_s22 = smul.u32 (!%p2716_p8), 120, %s2848_s28  ;;  %s183_s29 = scalar_lea.sflag (!%p2716_p8), [#allocation3], %s2848_s28 }
  0x61   : > { %p3020_p4 = scmp.ne.s32.totalorder (!%p2716_p8), %s3013_s18, 0 }
  0x62   : > { %s2852_s30 = scalar_lea.vmem (!%p2716_p8), [#allocation2], %s2279_s22 }
  0x66   : > { %2619 = dma.done.wait (%p3020_p4), %s183_s29, 1920  }
  0x67   : > { %2621 = vsyncadd (%p3020_p4), %s183_s29, 4294965376  ;;  %p3021_p9 = scmp.eq.s32.totalorder %s2697_s16, 0 }
  0x69   : > { %2623 = dma.done.wait (%p3021_p9), [#allocation6], 13888   ;;  %p3022_p8 = pmov %p3021_p9 }
  0x6a   : > { %v2354_v0 = vld [vmem:[#allocation5 + $0x160] sm:$0xff]   ;;  %v2358_v4 = vld [vmem:[#allocation5 + $0x168] sm:$0xff]   ;;  %v2362_v8 = vld [vmem:[#allocation5 + $0x170] sm:$0xff]   ;;  %vm646_vm0 = vcmask 523264   ;;  %s1872_s18 = sshll.u32 %s2848_s28, 4  ;;  %vm1752_vm3 = vcmask 257024  }
  0x6b   : > { %2625 = vsyncadd (%p3022_p8), [#allocation6], 4294953408  ;;  %v2355_v1 = vld [vmem:[#allocation5 + $0x1e0] sm:$0xff]   ;;  %2031 = vmatprep.subr.bf16.mxu0 %v2354_v0  ;;  %v2359_v5 = vld [vmem:[#allocation5 + $0x1e8] sm:$0xff]   ;;  %s2030_s20 = sshll.u32 %s2697_s16, 8  ;;  %s216_s17 = scalar_lea.vmem [#allocation8], %s1872_s18 }
  0x6c   : > { %v2356_v2 = vld [vmem:[#allocation5 + $0x120] sm:$0xff]   ;;  %2059 = vmatprep.subr.bf16.mxu1 %v2355_v1  ;;  %v2360_v6 = vld [vmem:[#allocation5 + $0x128] sm:$0xff]   ;;  %v2363_v9 = vld [vmem:[#allocation5 + $0x1f0] sm:$0xff]   ;;  %s1771_s21 = sshll.u32 %s216_s17, 4  ;;  %s2957_s23 = scalar_lea.hbm %s3009_s3, %s2030_s20  ;;  %s2959_s21 = int_to_ptr.vmem [resolvable:$true] %s1771_s21 }
  0x6d   : > { %v2357_v3 = vld [vmem:[#allocation5 + $0x1a0] sm:$0xff]   ;;  %2032 = vmatpush3.bf16.msra.mxu0 %v2356_v2  ;;  %v2361_v7 = vld [vmem:[#allocation5 + $0x1a8] sm:$0xff]   ;;  %v2364_v10 = vld [vmem:[#allocation5 + $0x130] sm:$0xff]   ;;  %s1758_s16 = scalar_lea.sflag [#allocation4], %s2848_s28  ;;  %s2574_s5 = scalar_lea.vmem %s2959_s21, 256 }
  0x6e   : > { %2060 = vmatpush3.bf16.msra.mxu1 %v2357_v3  ;;  %2033 = vmatprep.subr.bf16.mxu0 %v2358_v4  ;;  %v2365_v11 = vld [vmem:[#allocation5 + $0x1b0] sm:$0xff]   ;;  %v2366_v12 = vld [vmem:[#allocation5 + $0x178] sm:$0xff]   ;;  %v2370_v16 = vld [vmem:[#allocation5 + $0x180] sm:$0xff]   ;;  %p2575_p11 = scmp.ne.s32.totalorder %s2959_s21, %s2574_s5  ;;  %p3023_p0 = scmp.ne.s32.totalorder %s3018_s7, 0 }
  0x6f   : > { %2061 = vmatprep.subr.bf16.mxu1 %v2359_v5  ;;  %v2367_v13 = vld [vmem:[#allocation5 + $0x1f8] sm:$0xff]   ;;  %v2371_v17 = vld [vmem:[#allocation5 + $0x200] sm:$0xff]   ;;  %v2374_v20 = vld [vmem:[#allocation5 + $0x188] sm:$0xff]   ;;  %s2653_s8 = smov [#allocation8]  }
  0x70   : > { %v2368_v14 = vld [vmem:[#allocation5 + $0x138] sm:$0xff]   ;;  %v2372_v18 = vld [vmem:[#allocation5 + $0x140] sm:$0xff]   ;;  %v2375_v21 = vld [vmem:[#allocation5 + $0x208] sm:$0xff]   ;;  %p2576_p1 = pnand %p2575_p11, %p3023_p0  ;;  %s2578_s9 = sshll.u32 %s2653_s8, 4  ;;  %s2579_s9 = int_to_ptr.vmem [resolvable:$false] %s2578_s9 }
  0x71   : > { %2034 = vmatpush3.bf16.msra.mxu0 %v2360_v6  ;;  %v2369_v15 = vld [vmem:[#allocation5 + $0x1b8] sm:$0xff]   ;;  %v2373_v19 = vld [vmem:[#allocation5 + $0x1c0] sm:$0xff]   ;;  %v2376_v22 = vld [vmem:[#allocation5 + $0x148] sm:$0xff]   ;;  %s2580_s25 = scalar_lea.vmem %s2579_s9, 512  ;;  %p2581_p5 = scmp.lt.s32.totalorder %s2959_s21, %s2579_s9 }
  0x72   : > { %2062 = vmatpush3.bf16.msra.mxu1 %v2361_v7  ;;  %2035 = vmatprep.subr.bf16.mxu0 %v2362_v8  ;;  %v2377_v23 = vld [vmem:[#allocation5 + $0x1c8] sm:$0xff]   ;;  %v2378_v24 = vld [vmem:[#allocation5 + $0x190] sm:$0xff]   ;;  %v2382_v28 = vld [vmem:[#allocation5 + $0x198] sm:$0xff]   ;;  %p2577_p3 = pneg %p2576_p1  ;;  %p2582_p7 = scmp.lt.s32.totalorder %s2580_s25, %s2574_s5 }
  0x73   : > { %2063 = vmatprep.subr.bf16.mxu1 %v2363_v9  ;;  %v2379_v25 = vld [vmem:[#allocation5 + $0x210] sm:$0xff]   ;;  %v2383_v29 = vld [vmem:[#allocation5 + $0x218] sm:$0xff]   ;;  %v2390_v40 = vld [vmem:[#allocation5 + $0x220] sm:$0xff]  }
  0x74   : > { %v2380_v26 = vld [vmem:[#allocation5 + $0x150] sm:$0xff]   ;;  %v2384_v30 = vld [vmem:[#allocation5 + $0x158] sm:$0xff]   ;;  %v2391_v41 = vld [vmem:[#allocation5 + $0xc0] sm:$0xff]   ;;  %p2583_p12 = por %p2582_p7, %p2581_p5 }
  0x75   : > { %2036 = vmatpush3.bf16.msra.mxu0 %v2364_v10  ;;  %v2381_v27 = vld [vmem:[#allocation5 + $0x1d0] sm:$0xff]   ;;  %v2385_v31 = vld [vmem:[#allocation5 + $0x1d8] sm:$0xff]   ;;  %v2392_v42 = vld [vmem:[#allocation5 + $0x80] sm:$0xff]  }
  0x76   : > { %2064 = vmatpush3.bf16.msra.mxu1 %v2365_v11  ;;  %2037 = vmatprep.subr.bf16.mxu0 %v2366_v12  ;;  %v2863_v32 = vld [vmem:[%s2852_s30 + $0x14] sm:$0xff]  ;;  %v2866_v33 = vld [vmem:[%s2852_s30 + $0x28] sm:$0xff]  ;;  %v2869_v34 = vld [vmem:[%s2852_s30 + $0x1c] sm:$0xff]  ;;  %p2584_p2 = pnand %p2583_p12, %p2577_p3 }
  0x77   : > { %2065 = vmatprep.subr.bf16.mxu1 %v2367_v13  ;;  %v1874_v35 = vcombine.high %v2863_v32, %v2866_v33  ;;  %v2874_v36 = vld [vmem:[%s2852_s30 + $0x30] sm:$0xff]  ;;  %v1873_v37 = vcombine.low %v2863_v32, %v2866_v33  ;;  %v2393_v43 = vld [vmem:[#allocation5 + $0x228] sm:$0xff]   ;;  %v2399_v53 = vld [vmem:[#allocation5 + $0x230] sm:$0xff]  }
  0x78   : > { %v1876_v38 = vcombine.high %v2869_v34, %v2874_v36  ;;  %v1875_v39 = vcombine.low %v2869_v34, %v2874_v36  ;;  %v2394_v44 = vld [vmem:[#allocation5 + $0xc8] sm:$0xff]   ;;  %v2894_v50 = vld [vmem:[%s2852_s30 + $0x50] sm:$0xff]  ;;  %v2400_v55 = vld [vmem:[#allocation5 + $0xd0] sm:$0xff]  }
  0x79   : > { %2038 = vmatpush3.bf16.msra.mxu0 %v2368_v14  ;;  %685 = vmatprep.mubr.bf16.mxu0 %v1874_v35  ;;  %v2395_v45 = vld [vmem:[#allocation5 + $0x88] sm:$0xff]   ;;  %v2402_v56 = vld [vmem:[#allocation5 + $0x90] sm:$0xff]   ;;  %v2403_v57 = vld [vmem:[#allocation5 + $0x238] sm:$0xff]  }
  0x7a   : > { %2066 = vmatpush3.bf16.msra.mxu1 %v2369_v15  ;;  %2039 = vmatprep.subr.bf16.mxu0 %v2370_v16  ;;  %v2883_v46 = vld [vmem:[%s2852_s30 + $0x44] sm:$0xff]  ;;  %v2886_v47 = vld [vmem:[%s2852_s30 + $0x58] sm:$0xff]  ;;  %v2909_v62 = vld [vmem:[%s2852_s30 + $0x4c] sm:$0xf] }
  0x7b   : > { %2067 = vmatprep.subr.bf16.mxu1 %v2371_v17  ;;  %734 = vmatprep.mubr.bf16.mxu1 %v1876_v38  ;;  %v1881_v48 = vcombine.high %v2883_v46, %v2886_v47  ;;  %v2891_v49 = vld [vmem:[%s2852_s30 + $0x3c] sm:$0xff]  ;;  %v1880_v52 = vcombine.low %v2883_v46, %v2886_v47  ;;  %v2404_v58 = vld [vmem:[#allocation5 + $0xd8] sm:$0xff]   ;;  %v2903_v60 = vld [vmem:[%s2852_s30 + $0x24] sm:$0xf] }
  0x7c   : > { %v1879_v51 = vcombine.high %v2891_v49, %v2894_v50  ;;  %v1878_v54 = vcombine.low %v2891_v49, %v2894_v50  ;;  %v2405_v59 = vld [vmem:[#allocation5 + $0x98] sm:$0xff]   ;;  %v2906_v61 = vld [vmem:[%s2852_s30 + $0x38] sm:$0xf]  ;;  %v306_v63 = vld [vmem:[%s2852_s30 + $0x60] sm:$0xf] }
  0x7d   : > { %2040 = vmatpush3.bf16.msra.mxu0 %v2372_v18  ;;  %v1877_v0 = vcombine.low %v2903_v60, %v2906_v61  ;;  %v2409_v1 = vld [vmem:[#allocation5 + $0x40] sm:$0xff]   ;;  %v1882_v2 = vcombine.low %v2909_v62, %v306_v63  ;;  %v2413_v6 = vld [vmem:[#allocation5 + $0x48] sm:$0xff]   ;;  %v2417_v10 = vld [vmem:[#allocation5 + $0x50] sm:$0xff]  }
  0x7e   : > { %2068 = vmatpush3.bf16.msra.mxu1 %v2373_v19  ;;  %2041 = vmatprep.subr.bf16.mxu0 %v2374_v20  ;;  %v2410_v3 = vld [vmem:[#allocation5 + $0xe0] sm:$0xff]   ;;  %v2414_v7 = vld [vmem:[#allocation5 + $0xe8] sm:$0xff]   ;;  %v2418_v11 = vld [vmem:[#allocation5 + $0xf0] sm:$0xff]  }
  0x7f   : > { %2069 = vmatprep.subr.bf16.mxu1 %v2375_v21  ;;  %v2411_v4 = vld [vmem:[#allocation5] sm:$0xff]   ;;  %v2415_v8 = vld [vmem:[#allocation5 + $0x8] sm:$0xff]   ;;  %v2419_v12 = vld [vmem:[#allocation5 + $0x10] sm:$0xff]  }
  0x80   : > { %v2412_v5 = vld [vmem:[#allocation5 + $0xa0] sm:$0xff]   ;;  %v2416_v9 = vld [vmem:[#allocation5 + $0xa8] sm:$0xff]   ;;  %v2420_v13 = vld [vmem:[#allocation5 + $0xb0] sm:$0xff]  }
  0x81   : > { %2042 = vmatpush3.bf16.msra.mxu0 %v2376_v22  ;;  %v2421_v14 = vld [vmem:[#allocation5 + $0x58] sm:$0xff]   ;;  %v2427_v20 = vld [vmem:[#allocation5 + $0x60] sm:$0xff]  }
  0x82   : > { %2070 = vmatpush3.bf16.msra.mxu1 %v2377_v23  ;;  %2043 = vmatprep.subr.bf16.mxu0 %v2378_v24  ;;  %v2422_v15 = vld [vmem:[#allocation5 + $0xf8] sm:$0xff]   ;;  %v2428_v22 = vld [vmem:[#allocation5 + $0x100] sm:$0xff]   ;;  %v2430_v24 = vld [vmem:[#allocation5 + $0x68] sm:$0xff]  }
  0x83   : > { %2071 = vmatprep.subr.bf16.mxu1 %v2379_v25  ;;  %v2423_v16 = vld [vmem:[#allocation5 + $0x18] sm:$0xff]   ;;  %v2429_v23 = vld [vmem:[#allocation5 + $0x20] sm:$0xff]   ;;  %v1929_v25 = vcombine.high %v2874_v36, %v2883_v46 }
  0x84   : > { %v2424_v17 = vld [vmem:[#allocation5 + $0xb8] sm:$0xff]   ;;  %v2462_v63 = vld [vmem:[#allocation5 + $0x2a0] sm:$0xff]  }
  0x85   : > { %2044 = vmatpush3.bf16.msra.mxu0 %v2380_v26  ;;  %v221_v18 = vld [vmem:[%s2852_s30 + $0x8] sm:$0xff]  ;;  %v2431_v26 = vld [vmem:[#allocation5 + $0x108] sm:$0xff]   ;;  %v222_v38 = vld [vmem:[%s2852_s30 + $0x10] sm:$0xf] }
  0x86   : > { %2072 = vmatpush3.bf16.msra.mxu1 %v2381_v27  ;;  %2045 = vmatprep.subr.bf16.mxu0 %v2382_v28  ;;  %v1924_v19 = vcombine.high %v221_v18, %v2869_v34  ;;  %v1923_v21 = vcombine.low %v221_v18, %v2869_v34  ;;  %v2432_v27 = vld [vmem:[#allocation5 + $0x28] sm:$0xff]   ;;  %v2434_v28 = vld [vmem:[#allocation5 + $0x70] sm:$0xff]   ;;  %v2438_v34 = vld [vmem:[#allocation5 + $0x78] sm:$0xff]  }
  0x87   : > { %2073 = vmatprep.subr.bf16.mxu1 %v2383_v29  ;;  %v2436_v29 = vld [vmem:[#allocation5 + $0x110] sm:$0xff]   ;;  %v2439_v35 = vld [vmem:[#allocation5 + $0x118] sm:$0xff]   ;;  %v2479_v18 = vld [vmem:[#allocation5 + $0x348] sm:$0xff]  }
  0x89   : > { %2046 = vmatpush3.bf16.msra.mxu0 %v2384_v30  ;;  %v2924_v30 = vcombine.low %v2874_v36, %v2883_v46  ;;  %v2444_v36 = vld [vmem:[#allocation5 + $0x280] sm:$0xff]  }
  0x8a   : > { %2074 = vmatpush3.bf16.msra.mxu1 %v2385_v31  ;;  %2121 = vmatprep.subr.bf16.mxu0 %v2391_v41  ;;  %v2437_v31 = vld [vmem:[#allocation5 + $0x30] sm:$0xff]   ;;  %v2440_v41 = vld [vmem:[#allocation5 + $0x38] sm:$0xff]   ;;  %v2447_v46 = vld [vmem:[#allocation5 + $0x2c0] sm:$0xff]  }
  0x8b   : > { %2217 = vmatprep.subr.bf16.mxu1 %v2390_v40 }
  0x8c   : > { %686 = vmatmul.mubr.bf16.vlgmr.msra.gmra.mrb[0].mxu0 %v1873_v37  ;;  %v220_v37 = vld [vmem:[%s2852_s30] sm:$0xff] }
  0x8d   : > { %735 = vmatmul.mubr.bf16.vlgmr.msra.gmra.mrb[0].mxu1 %v1875_v39  ;;  %2122 = vmatpush3.bf16.msra.mxu0 %v2392_v42  ;;  %v1922_v39 = vcombine.high %v220_v37, %v2863_v32  ;;  %v2445_v42 = vld [vmem:[#allocation5 + $0x300] sm:$0xff]  }
  0x8e   : > { %2218 = vmatpush3.bf16.msra.mxu1 %v2390_v40  ;;  %2123 = vmatprep.subr.bf16.mxu0 %v2394_v44  ;;  %v1925_v40 = vcombine.low %v222_v38, %v2903_v60  ;;  %v2446_v44 = vld [vmem:[#allocation5 + $0x240] sm:$0xff]   ;;  %v2459_v60 = vld [vmem:[#allocation5 + $0x318] sm:$0xff]  }
  0x8f   : > { %2219 = vmatprep.subr.bf16.mxu1 %v2393_v43  ;;  %742 = vmatprep.mubr.bf16.mxu1 %v1881_v48  ;;  %v2448_v48 = vld [vmem:[#allocation5 + $0x288] sm:$0xff]  }
  0x90   : > { %693 = vmatprep.mubr.bf16.mxu0 %v1879_v51  ;;  %v2449_v51 = vld [vmem:[#allocation5 + $0x308] sm:$0xff]  }
  0x91   : > { %2124 = vmatpush3.bf16.msra.mxu0 %v2395_v45  ;;  %v1930_v45 = vcombine.low %v2906_v61, %v2909_v62  ;;  %v2460_v61 = vld [vmem:[#allocation5 + $0x258] sm:$0xff]  }
  0x92   : > { %2220 = vmatpush3.bf16.msra.mxu1 %v2393_v43  ;;  %2125 = vmatprep.subr.bf16.mxu0 %v2400_v55  ;;  %v1921_v43 = vcombine.low %v220_v37, %v2863_v32  ;;  %v2451_v32 = vld [vmem:[#allocation5 + $0x2c8] sm:$0xff]   ;;  %v2455_v55 = vld [vmem:[#allocation5 + $0x310] sm:$0xff]   ;;  %v2461_v62 = vld [vmem:[#allocation5 + $0x2d8] sm:$0xff]  }
  0x93   : > { %2221 = vmatprep.subr.bf16.mxu1 %v2399_v53 }
  0x94   : > { %694 = vmatmul.mubr.bf16.gmra.mrb[4].mxu0 %v1878_v54  ;;  %v2454_v54 = vld [vmem:[#allocation5 + $0x290] sm:$0xff]  }
  0x95   : > { %743 = vmatmul.mubr.bf16.gmra.mrb[4].mxu1 %v1880_v52  ;;  %2126 = vmatpush3.bf16.msra.mxu0 %v2402_v56  ;;  %v1927_v52 = vcombine.high %v2866_v33, %v2891_v49  ;;  %v1926_v56 = vcombine.low %v2866_v33, %v2891_v49  ;;  %v2464_v33 = vld [vmem:[#allocation5 + $0x260] sm:$0xff]  }
  0x96   : > { %2222 = vmatpush3.bf16.msra.mxu1 %v2399_v53  ;;  %2127 = vmatprep.subr.bf16.mxu0 %v2404_v58  ;;  %v2450_v53 = vld [vmem:[#allocation5 + $0x248] sm:$0xff]   ;;  %v2457_v58 = vld [vmem:[#allocation5 + $0x2d0] sm:$0xff]   ;;  %v2465_v49 = vld [vmem:[#allocation5 + $0x2e0] sm:$0xff]  }
  0x97   : > { %2223 = vmatprep.subr.bf16.mxu1 %v2403_v57  ;;  %2225 = vmatprep.mubr.msk.bf16.mxu1 %vm646_vm0, %v1877_v0  ;;  %v2463_v0 = vld [vmem:[#allocation5 + $0x320] sm:$0xff]  }
  0x98   : > { %1129 = vmatprep.mubr.bf16.mxu0 %v1924_v19  ;;  %v2484_v19 = vld [vmem:[#allocation5 + $0x350] sm:$0xff]  }
  0x99   : > { %2128 = vmatpush3.bf16.msra.mxu0 %v2405_v59  ;;  %v2458_v59 = vld [vmem:[#allocation5 + $0x298] sm:$0xff]  }
  0x9a   : > { %2224 = vmatpush3.bf16.msra.mxu1 %v2403_v57  ;;  %2129 = vmatprep.subr.bf16.mxu0 %v2410_v3  ;;  %v2456_v57 = vld [vmem:[#allocation5 + $0x250] sm:$0xff]   ;;  %v2468_v3 = vld [vmem:[#allocation5 + $0x268] sm:$0xff]  }
  0x9b   : > { %2093 = vmatprep.subr.bf16.mxu1 %v2409_v1  ;;  %v2466_v1 = vld [vmem:[#allocation5 + $0x2a8] sm:$0xff]  }
  0x9d   : > { %2226 = vmatmul.mubr.msk.bf16.vlgmr.msra.gmra.mrb[8].mxu1 %vm646_vm0, %v1882_v2  ;;  %2130 = vmatpush3.bf16.msra.mxu0 %v2412_v5  ;;  %v2467_v2 = vld [vmem:[#allocation5 + $0x328] sm:$0xff]   ;;  %v2470_v5 = vld [vmem:[#allocation5 + $0x2b0] sm:$0xff]  }
  0x9e   : > { %2094 = vmatpush3.bf16.msra.mxu1 %v2411_v4  ;;  %2131 = vmatprep.subr.bf16.mxu0 %v2414_v7  ;;  %v2469_v4 = vld [vmem:[#allocation5 + $0x2e8] sm:$0xff]   ;;  %v2472_v7 = vld [vmem:[#allocation5 + $0x270] sm:$0xff]  }
  0x9f   : > { %2095 = vmatprep.subr.bf16.mxu1 %v2413_v6  ;;  %1080 = vmatprep.mubr.bf16.mxu1 %v1922_v39  ;;  %v2471_v6 = vld [vmem:[#allocation5 + $0x330] sm:$0xff]  }
  0xa1   : > { %2132 = vmatpush3.bf16.msra.mxu0 %v2416_v9  ;;  %v2474_v9 = vld [vmem:[#allocation5 + $0x2b8] sm:$0xff]  }
  0xa2   : > { %2096 = vmatpush3.bf16.msra.mxu1 %v2415_v8  ;;  %2133 = vmatprep.subr.bf16.mxu0 %v2418_v11  ;;  %v2473_v8 = vld [vmem:[#allocation5 + $0x2f0] sm:$0xff]   ;;  %v2476_v11 = vld [vmem:[#allocation5 + $0x278] sm:$0xff]  }
  0xa3   : > { %2097 = vmatprep.subr.bf16.mxu1 %v2417_v10  ;;  %v2475_v10 = vld [vmem:[#allocation5 + $0x338] sm:$0xff]  }
  0xa5   : > { %2134 = vmatpush3.bf16.msra.mxu0 %v2420_v13  ;;  %v2478_v13 = vld [vmem:[#allocation5 + $0x340] sm:$0xff]  }
  0xa6   : > { %2098 = vmatpush3.bf16.msra.mxu1 %v2419_v12  ;;  %2135 = vmatprep.subr.bf16.mxu0 %v2422_v15  ;;  %v2477_v12 = vld [vmem:[#allocation5 + $0x2f8] sm:$0xff]  }
  0xa7   : > { %2099 = vmatprep.subr.bf16.mxu1 %v2421_v14  ;;  %v1204_v14 = vld [vmem:[%s2852_s30 + $0x64] sm:$0xff]  ;;  %v1205_v15 = vld [vmem:[%s2852_s30 + $0x6c] sm:$0xff] }
  0xa9   : > { %2136 = vmatpush3.bf16.msra.mxu0 %v2424_v17  ;;  %v1977_v17 = vcombine.high %v2886_v47, %v1205_v15 }
  0xaa   : > { %2100 = vmatpush3.bf16.msra.mxu1 %v2423_v16  ;;  %2229 = vmatprep.subr.bf16.mxu0 %v2428_v22  ;;  %v1975_v16 = vcombine.high %v2894_v50, %v1204_v14 }
  0xab   : > { %2101 = vmatprep.subr.bf16.mxu1 %v2427_v20  ;;  %v1974_v20 = vcombine.low %v2894_v50, %v1204_v14 }
  0xac   : > { %1130 = vmatmul.mubr.bf16.vlgmr.msra.gmra.mrb[8].mxu0 %v1923_v21  ;;  %v1976_v21 = vcombine.low %v2886_v47, %v1205_v15 }
  0xad   : > { %2230 = vmatpush3.bf16.msra.mxu0 %v2428_v22  ;;  %1137 = vmatprep.mubr.bf16.mxu0 %v1929_v25  ;;  %v2486_v22 = vld [vmem:[%s2852_s30 + $0x38] ss:$20 sps:$4 sm:$0xff]  }
  0xae   : > { %2102 = vmatpush3.bf16.msra.mxu1 %v2429_v23  ;;  %2231 = vmatprep.subr.bf16.mxu0 %v2431_v26  ;;  %v2485_v23 = vld [vmem:[#allocation5 + $0x358] sm:$0xff]  }
  0xaf   : > { %2103 = vmatprep.subr.bf16.mxu1 %v2430_v24  ;;  %v2487_v24 = vld [vmem:[%s2852_s30 + $0x60] ss:$20 sps:$4 sm:$0xff]  }
  0xb1   : > { %2232 = vmatpush3.bf16.msra.mxu0 %v2431_v26 }
  0xb2   : > { %2104 = vmatpush3.bf16.msra.mxu1 %v2432_v27  ;;  %2233 = vmatprep.subr.bf16.mxu0 %v2436_v29 }
  0xb3   : > { %2105 = vmatprep.subr.bf16.mxu1 %v2434_v28 }
  0xb4   : > { %1138 = vmatmul.mubr.bf16.gmra.mrb[12].mxu0 %v2924_v30 }
  0xb5   : > { %2234 = vmatpush3.bf16.msra.mxu0 %v2436_v29  ;;  %2237 = vmatprep.mubr.msk.bf16.mxu0 %vm646_vm0, %v1925_v40 }
  0xb6   : > { %2106 = vmatpush3.bf16.msra.mxu1 %v2437_v31  ;;  %2235 = vmatprep.subr.bf16.mxu0 %v2439_v35 }
  0xb7   : > { %2107 = vmatprep.subr.bf16.mxu1 %v2438_v34 }
  0xb9   : > { %2236 = vmatpush3.bf16.msra.mxu0 %v2439_v35 }
  0xba   : > { %2108 = vmatpush3.bf16.msra.mxu1 %v2440_v41  ;;  %2183 = vmatprep.subr.bf16.mxu0 %v2445_v42 }
  0xbb   : > { %2155 = vmatprep.subr.bf16.mxu1 %v2444_v36 }
  0xbc   : > { %2238 = vmatmul.mubr.msk.bf16.vlgmr.msra.gmra.mrb[16].mxu0 %vm646_vm0, %v1930_v45 }
  0xbd   : > { %1081 = vmatmul.mubr.bf16.vlgmr.msra.gmra.mrb[12].mxu1 %v1921_v43  ;;  %2184 = vmatpush3.bf16.msra.mxu0 %v2447_v46 }
  0xbe   : > { %2156 = vmatpush3.bf16.msra.mxu1 %v2446_v44  ;;  %2185 = vmatprep.subr.bf16.mxu0 %v2449_v51 }
  0xbf   : > { %2157 = vmatprep.subr.bf16.mxu1 %v2448_v48  ;;  %1088 = vmatprep.mubr.bf16.mxu1 %v1927_v52 }
  0xc0   : > { %1633 = vmatprep.mubr.bf16.mxu0 %v1929_v25 }
  0xc1   : > { %2186 = vmatpush3.bf16.msra.mxu0 %v2451_v32 }
  0xc2   : > { %2158 = vmatpush3.bf16.msra.mxu1 %v2450_v53  ;;  %2187 = vmatprep.subr.bf16.mxu0 %v2455_v55 }
  0xc3   : > { %2159 = vmatprep.subr.bf16.mxu1 %v2454_v54 }
  0xc5   : > { %1089 = vmatmul.mubr.bf16.gmra.mrb[16].mxu1 %v1926_v56  ;;  %2188 = vmatpush3.bf16.msra.mxu0 %v2457_v58 }
  0xc6   : > { %2160 = vmatpush3.bf16.msra.mxu1 %v2456_v57  ;;  %1584 = vmatprep.mubr.bf16.mxu1 %v1927_v52 }
  0xc7   : > { %2161 = vmatprep.subr.bf16.mxu1 %v2458_v59  ;;  %2189 = vmatprep.subr.bf16.mxu0 %v2459_v60 }
  0xc9   : > { %2190 = vmatpush3.bf16.msra.mxu0 %v2461_v62 }
  0xca   : > { %2162 = vmatpush3.bf16.msra.mxu1 %v2460_v61  ;;  %2191 = vmatprep.subr.bf16.mxu0 %v2463_v0 }
  0xcb   : > { %2163 = vmatprep.subr.bf16.mxu1 %v2462_v63 }
  0xcd   : > { %2192 = vmatpush3.bf16.msra.mxu0 %v2465_v49 }
  0xce   : > { %2164 = vmatpush3.bf16.msra.mxu1 %v2464_v33  ;;  %2193 = vmatprep.subr.bf16.mxu0 %v2467_v2 }
  0xcf   : > { %2165 = vmatprep.subr.bf16.mxu1 %v2466_v1 }
  0xd1   : > { %2194 = vmatpush3.bf16.msra.mxu0 %v2469_v4 }
  0xd2   : > { %2166 = vmatpush3.bf16.msra.mxu1 %v2468_v3  ;;  %2195 = vmatprep.subr.bf16.mxu0 %v2471_v6 }
  0xd3   : > { %2167 = vmatprep.subr.bf16.mxu1 %v2470_v5 }
  0xd5   : > { %2196 = vmatpush3.bf16.msra.mxu0 %v2473_v8 }
  0xd6   : > { %2168 = vmatpush3.bf16.msra.mxu1 %v2472_v7  ;;  %2197 = vmatprep.subr.bf16.mxu0 %v2475_v10 }
  0xd7   : > { %2169 = vmatprep.subr.bf16.mxu1 %v2474_v9 }
  0xd9   : > { %2198 = vmatpush3.bf16.msra.mxu0 %v2477_v12 }
  0xda   : > { %2170 = vmatpush3.bf16.msra.mxu1 %v2476_v11  ;;  %2241 = vmatprep.subr.bf16.mxu0 %v2478_v13 }
  0xdc   : > { %1634 = vmatmul.mubr.bf16.vlgmr.msra.gmra.mrb[20].mxu0 %v2924_v30 }
  0xdd   : > { %1585 = vmatmul.mubr.bf16.vlgmr.msra.gmra.mrb[20].mxu1 %v1926_v56  ;;  %2242 = vmatpush3.bf16.msra.mxu0 %v2478_v13 }
  0xde   : > { %1592 = vmatprep.mubr.bf16.mxu1 %v1975_v16  ;;  %1641 = vmatprep.mubr.bf16.mxu0 %v1977_v17 }
  0xdf   : > { %2243 = vmatprep.subr.bf16.mxu0 %v2479_v18 }
  0xe1   : > { %2244 = vmatpush3.bf16.msra.mxu0 %v2479_v18 }
  0xe2   : > { %2245 = vmatprep.subr.bf16.mxu0 %v2484_v19 }
  0xe4   : > { %1642 = vmatmul.mubr.bf16.gmra.mrb[24].mxu0 %v1976_v21 }
  0xe5   : > { %1593 = vmatmul.mubr.bf16.gmra.mrb[24].mxu1 %v1974_v20  ;;  %2246 = vmatpush3.bf16.msra.mxu0 %v2484_v19 }
  0xe6   : > { %2249 = vmatprep.mubr.msk.bf16.mxu0 %vm646_vm0, %v2486_v22  ;;  %2247 = vmatprep.subr.bf16.mxu0 %v2485_v23 }
  0xe9   : > { %2248 = vmatpush3.bf16.msra.mxu0 %v2485_v23 }
  0xec   : > { %2250 = vmatmul.mubr.msk.bf16.vlgmr.msra.gmra.mrb[16].mxu0 %vm646_vm0, %v2487_v24 }
 0x15f   : > { %v2047_v25 = vpop.f32.mrb[0].mxu0 }
 0x160   : > { %v2075_v26 = vpop.f32.mrb[0].mxu1  ;;  %v2048_v27 = vpop.f32.mrb[1].mxu0 }
 0x161   : > { %v2049_v50 = vadd.f32 %v2048_v27, %v2047_v25  ;;  %v2076_v28 = vpop.f32.mrb[1].mxu1  ;;  %v2050_v47 = vpop.f32.mrb[2].mxu0 }
 0x162   : > { %v2077_v29 = vadd.f32 %v2076_v28, %v2075_v26  ;;  %v2078_v30 = vpop.f32.mrb[2].mxu1  ;;  %v2051_v31 = vpop.f32.mrb[3].mxu0 }
 0x163   : > { %v2052_v34 = vadd.f32 %v2051_v31, %v2050_v47  ;;  %v2079_v35 = vpop.f32.mrb[3].mxu1 }
 0x164   : > { %v2080_v37 = vadd.f32 %v2079_v35, %v2078_v30  ;;  %v737_v38 = vadd.f32 %v2077_v29, %v2049_v50 }
 0x166   : > { %v740_v39 = vadd.f32 %v2080_v37, %v2052_v34 }
 0x167   : > { %v2053_v40 = vpop.f32.mrb[4].mxu0 }
 0x168   : > { %v2081_v41 = vpop.f32.mrb[4].mxu1  ;;  %v2054_v36 = vpop.f32.mrb[5].mxu0 }
 0x169   : > { %v2082_v42 = vpop.f32.mrb[5].mxu1  ;;  %v2055_v43 = vadd.f32 %v2054_v36, %v2053_v40  ;;  %v2056_v45 = vpop.f32.mrb[6].mxu0 }
 0x16a   : > { %v2083_v44 = vadd.f32 %v2082_v42, %v2081_v41  ;;  %v2084_v46 = vpop.f32.mrb[6].mxu1  ;;  %v2057_v48 = vpop.f32.mrb[7].mxu0  ;;  %v1704_v41 = vlaneseq }
 0x16b   : > { %v2085_v51 = vpop.f32.mrb[7].mxu1  ;;  %v2058_v52 = vadd.f32 %v2057_v48, %v2056_v45 }
 0x16c   : > { %v2086_v53 = vadd.f32 %v2085_v51, %v2084_v46  ;;  %v745_v32 = vadd.f32 %v2083_v44, %v2055_v43  ;;  %v1705_v46 = vshrl.u32 %v1704_v41, 7 }
 0x16e   : > { %v748_v54 = vadd.f32 %v2086_v53, %v2058_v52 }
 0x170   : > { %v2227_v55 = vpop.f32.mrb[8].mxu1 }
 0x171   : > { %v794_v56 = vadd.f32 %v2227_v55, %v745_v32  ;;  %v785_v57 = vpop.f32.mrb[9].mxu1 }
 0x172   : > { %v786_v58 = vadd.f32 %v785_v57, %v737_v38  ;;  %v2228_v59 = vpop.f32.mrb[10].mxu1 }
 0x173   : > { %v797_v60 = vadd.f32 %v2228_v59, %v748_v54  ;;  %v788_v61 = vpop.f32.mrb[11].mxu1 }
 0x174   : > { %v789_v62 = vadd.f32 %v788_v61, %v740_v39 }
 0x17f   : > { %v2137_v63 = vpop.f32.mrb[8].mxu0 }
 0x180   : > { %v2138_v0 = vpop.f32.mrb[9].mxu0 }
 0x181   : > { %v2139_v33 = vadd.f32 %v2138_v0, %v2137_v63  ;;  %v2140_v49 = vpop.f32.mrb[10].mxu0  ;;  %v1703_v63 = vld [vmem:[#allocation7] sm:$0x7]  ;;  %v1714_v0 = vsub.s32 1, %v1705_v46 }
 0x182   : > { %v2141_v1 = vpop.f32.mrb[11].mxu0 }
 0x183   : > { %v2142_v2 = vadd.f32 %v2141_v1, %v2140_v49 }
 0x187   : > { %v2143_v3 = vpop.f32.mrb[12].mxu0 }
 0x188   : > { %v2144_v4 = vpop.f32.mrb[13].mxu0 }
 0x189   : > { %v2145_v5 = vadd.f32 %v2144_v4, %v2143_v3  ;;  %v2146_v6 = vpop.f32.mrb[14].mxu0 }
 0x18a   : > { %v2147_v7 = vpop.f32.mrb[15].mxu0 }
 0x18b   : > { %v2148_v8 = vadd.f32 %v2147_v7, %v2146_v6  ;;  %v1715_v6 = vrot.slane %v1703_v63, %v1714_v0 }
 0x190   : > { %v2109_v9 = vpop.f32.mrb[12].mxu1 }
 0x191   : > { %v2110_v10 = vpop.f32.mrb[13].mxu1 }
 0x192   : > { %v2111_v11 = vadd.f32 %v2110_v10, %v2109_v9  ;;  %v2112_v12 = vpop.f32.mrb[14].mxu1 }
 0x193   : > { %v2113_v13 = vpop.f32.mrb[15].mxu1 }
 0x194   : > { %v1083_v14 = vadd.f32 %v2111_v11, %v786_v58  ;;  %v2114_v15 = vadd.f32 %v2113_v13, %v2112_v12 }
 0x196   : > { %v1086_v16 = vadd.f32 %v2114_v15, %v789_v62  ;;  %v1132_v17 = vadd.f32 %v2139_v33, %v1083_v14 }
 0x198   : > { %v2115_v18 = vpop.f32.mrb[16].mxu1  ;;  %v1135_v19 = vadd.f32 %v2142_v2, %v1086_v16  ;;  %v1726_v2 = vsub.s32 2, %v1705_v46 }
 0x199   : > { %v2116_v20 = vpop.f32.mrb[17].mxu1 }
 0x19a   : > { %v2117_v21 = vadd.f32 %v2116_v20, %v2115_v18  ;;  %v2118_v22 = vpop.f32.mrb[18].mxu1  ;;  %v1727_v11 = vrot.slane %v1703_v63, %v1726_v2 }
 0x19b   : > { %v2119_v23 = vpop.f32.mrb[19].mxu1 }
 0x19c   : > { %v1091_v24 = vadd.f32 %v2117_v21, %v794_v56  ;;  %v2120_v25 = vadd.f32 %v2119_v23, %v2118_v22 }
 0x19e   : > { %v1094_v26 = vadd.f32 %v2120_v25, %v797_v60  ;;  %v1140_v27 = vadd.f32 %v2145_v5, %v1091_v24  ;;  %v1706_v60 = vsub.s32 0, %v1705_v46 }
 0x1a0   : > { %v1143_v50 = vadd.f32 %v2148_v8, %v1094_v26  ;;  %v1707_v1 = vrot.slane %v1703_v63, %v1706_v60 }
 0x1af   : > { %v2199_v47 = vpop.f32.mrb[20].mxu0 }
 0x1b0   : > { %v2171_v28 = vpop.f32.mrb[20].mxu1  ;;  %v2200_v31 = vpop.f32.mrb[21].mxu0 }
 0x1b1   : > { %v2172_v29 = vpop.f32.mrb[21].mxu1  ;;  %v2201_v35 = vadd.f32 %v2200_v31, %v2199_v47  ;;  %v2202_v37 = vpop.f32.mrb[22].mxu0 }
 0x1b2   : > { %v2173_v30 = vadd.f32 %v2172_v29, %v2171_v28  ;;  %v2174_v34 = vpop.f32.mrb[22].mxu1  ;;  %v2203_v40 = vpop.f32.mrb[23].mxu0 }
 0x1b3   : > { %v2175_v38 = vpop.f32.mrb[23].mxu1  ;;  %v2204_v42 = vadd.f32 %v2203_v40, %v2202_v37 }
 0x1b4   : > { %v2176_v39 = vadd.f32 %v2175_v38, %v2174_v34  ;;  %v1636_v36 = vadd.f32 %v2201_v35, %v2173_v30 }
 0x1b6   : > { %v1639_v43 = vadd.f32 %v2204_v42, %v2176_v39  ;;  %v2261_v44 = vadd.f32 %v1636_v36, %v1132_v17 }
 0x1b7   : > { %v2205_v48 = vpop.f32.mrb[24].mxu0 }
 0x1b8   : > { %v2177_v45 = vpop.f32.mrb[24].mxu1  ;;  %v2271_v52 = vadd.f32 %v1639_v43, %v1135_v19  ;;  %v2206_v32 = vpop.f32.mrb[25].mxu0 }
 0x1b9   : > { %v2178_v51 = vpop.f32.mrb[25].mxu1  ;;  %v2207_v55 = vadd.f32 %v2206_v32, %v2205_v48  ;;  %v2208_v56 = vpop.f32.mrb[26].mxu0 }
 0x1ba   : > { %v2179_v53 = vadd.f32 %v2178_v51, %v2177_v45  ;;  %v2180_v54 = vpop.f32.mrb[26].mxu1  ;;  %v2209_v59 = vpop.f32.mrb[27].mxu0 }
 0x1bb   : > { %v2181_v57 = vpop.f32.mrb[27].mxu1  ;;  %v2210_v62 = vadd.f32 %v2209_v59, %v2208_v56 }
 0x1bc   : > { %v2182_v58 = vadd.f32 %v2181_v57, %v2180_v54  ;;  %v1644_v61 = vadd.f32 %v2207_v55, %v2179_v53 }
 0x1be   : > { %v1647_v33 = vadd.f32 %v2210_v62, %v2182_v58  ;;  %v2256_v49 = vadd.f32 %v1644_v61, %v1140_v27 }
 0x1bf   : > { %v2251_v3 = vpop.f32.mrb[16].mxu0 }
 0x1c0   : > { %v2266_v4 = vadd.f32 %v1647_v33, %v1143_v50  ;;  %v2257_v5 = vadd.f32 %v2256_v49, %v2251_v3  ;;  %v1684_v7 = vpop.f32.mrb[17].mxu0 }
 0x1c1   : > { %v2262_v8 = vadd.f32 %v2261_v44, %v1684_v7  ;;  %v2252_v9 = vpop.f32.mrb[18].mxu0 }
 0x1c2   : > { %v1710_v10 = vmul.f32 %v2257_v5, %v1707_v1  ;;  %v2267_v12 = vadd.f32 %v2266_v4, %v2252_v9  ;;  %v1687_v13 = vpop.f32.mrb[19].mxu0 }
 0x1c3   : > { %v1708_v14 = vmul.f32 %v2262_v8, %v1707_v1  ;;  %v2272_v15 = vadd.f32 %v2271_v52, %v1687_v13 }
 0x1c4   : > { %v1718_v16 = vadd.f32 %v1715_v6, %v1710_v10  ;;  %v1711_v17 = vmul.f32 %v2267_v12, %v1707_v1 }
 0x1c5   : > { %v1716_v18 = vadd.f32 %v1715_v6, %v1708_v14  ;;  %v1709_v19 = vmul.f32 %v2272_v15, %v1707_v1 }
 0x1c6   : > { %vm1722_vm1 = vcmp.ge.f32.partialorder %v1718_v16, 0.0  ;;  %v1730_v20 = vmul.f32 %v1727_v11, %v1718_v16  ;;  %v1719_v21 = vadd.f32 %v1715_v6, %v1711_v17 }
 0x1c7   : > { %vm1720_vm2 = vcmp.ge.f32.partialorder %v1716_v18, 0.0  ;;  %v1728_v22 = vmul.f32 %v1727_v11, %v1716_v18  ;;  %v1717_v23 = vadd.f32 %v1715_v6, %v1709_v19 }
 0x1c8   : > { %v1734_v24 = vsel %vm1722_vm1, %v1718_v16, %v1730_v20  ;;  %vm1723_vm4 = vcmp.ge.f32.partialorder %v1719_v21, 0.0  ;;  %v1731_v25 = vmul.f32 %v1727_v11, %v1719_v21 }
 0x1c9   : > { %v2028_v26 = vpack.c.bf16 %v1734_v24, %v1734_v24  ;;  %v1732_v27 = vsel %vm1720_vm2, %v1716_v18, %v1728_v22  ;;  %vm1721_vm5 = vcmp.ge.f32.partialorder %v1717_v23, 0.0  ;;  %v1729_v50 = vmul.f32 %v1727_v11, %v1717_v23 }
 0x1ca   : > { %v2026_v28 = vpack.c.bf16 %v1732_v27, %v1732_v27  ;;  %v1735_v47 = vsel %vm1723_vm4, %v1719_v21, %v1731_v25 }
 0x1cb   : > { %1755 = vst.msk [vmem:[%s216_s17 + $0x8] sm:$0xf] %vm1752_vm3, %v2028_v26  ;;  %v2029_v29 = vpack.c.bf16 %v1735_v47, %v1735_v47  ;;  %v1733_v30 = vsel %vm1721_vm5, %v1717_v23, %v1729_v50 }
 0x1cc   : > { %1753 = vst.msk [vmem:[%s216_s17] sm:$0xf] %vm1752_vm3, %v2026_v28  ;;  %v2027_v31 = vpack.c.bf16 %v1733_v30, %v1733_v30 }
 0x1cd   : > { %1756 = vst.msk [vmem:[%s216_s17 + $0xc] sm:$0xf] %vm1752_vm3, %v2029_v29 }
 0x1ce   : > { %1754 = vst.msk [vmem:[%s216_s17 + $0x4] sm:$0xf] %vm1752_vm3, %v2027_v31 }
 0x1cf   : > { %2587 = shalt.err (!%p2584_p2)
}
 0x1d0   : > { %s2588_s10 = scalar_lea.hbm %s2957_s23, 256  ;;  %s2592_s22 = scalar_lea.hbm %s3009_s3, 512 }
 0x1d1   : > { %p2589_p13 = scmp.ne.s32.totalorder %s2957_s23, %s2588_s10  ;;  %p2593_p4 = scmp.lt.u32.totalorder %s2957_s23, %s3009_s3 }
 0x1d2   : > { %p2594_p9 = scmp.lt.u32.totalorder %s2592_s22, %s2588_s10  ;;  %p2596_p11 = scmp.lt.u32.totalorder %s2588_s10, %s2957_s23 }
 0x1d3   : > { %p2590_p6 = pnand %p2589_p13, %p3023_p0 }
 0x1d4   : > { %p2595_p8 = por %p2594_p9, %p2593_p4 }
 0x1d5   : > { %p2591_p10 = pneg %p2590_p6 }
 0x1d6   : > { %p2597_p1 = por %p2596_p11, %p2595_p8 }
 0x1d8   : > { %p2598_p3 = pnand %p2597_p1, %p2591_p10 }
 0x1da   : > { %2601 = shalt.err (!%p2598_p3)
}
 0x1db   : > { %s2654_s18 = smov 64   ;;  %s2655_s20 = smov 4  }
 0x1dc   : > { %2290 = dma.vmem_to_hbm [thread:$0]  (%p3023_p0), %s2959_s21, 256, %s2957_s23, %s1758_s16, %s2654_s18, %s2654_s18, %s2655_s20  }
 0x1dd PF: > { %s1786_s17 = sand.u32 1, %s2632_s12   ;;  %p3024_p5 = scmp.ne.s32.totalorder %s3014_s19, 0 }
 0x1de   : > { %p3025_p7 = scmp.ge.s32.totalorder %s2644_s15, 2  ;;  %s1787_s26 = scalar_lea.sflag [#allocation4], %s1786_s17 }
 0x1e0   : > { %p2304_p12 = pnand %p3025_p7, %p3024_p5 }
 0x1e2   : > { %2627 = dma.done.wait (!%p2304_p12), %s1787_s26, 256  }
 0x1e3   : > { %2629 = vsyncadd (!%p2304_p12), %s1787_s26, 4294967040  ;;  %p17_p2 = scmp.ge.s32.totalorder %s2786_s4, 4   ;;  %s3026_s12 = smov %s2636_s13 }
 0x1e4   : > { %s3027_s13 = smov %s2640_s14  ;;  %s3028_s14 = smov %s2796_s6 }
 0x1e5   : > { %s3029_s15 = smov %s2786_s4  ;;  %19 = sbr.rel (!%p17_p2) target bundleno = 6 (0x6), region = 87 }
 0x1ec   :  { %1792 = vsyncpa [#allocation3], 1 }
 0x1ed   :  { %1794 = vsyncpa [#allocation3 + $0x1], 1 }
 0x1ee   :  { %1795 = vsyncpa [#allocation6], 1 }
 0x1ef   :  { %1796 = vsyncpa [#allocation4], 1 }
 0x1f0   :  { %1798 = vsyncpa [#allocation4 + $0x1], 1 }

// kernel: _lambda_.12
= control target key start
LH: loop header
LB: loop body
LE: loop exit
PB: predicated region body
PF: predicated region fallthrough
CT: control target
= control target key end

     0   :  { %8 = vsyncpa [#allocation3], 0  ;;  %s1337_s0 = inlined_call_operand.hbm [shape: bf16[64,96], index: 0, kind: input, shape index: {}]   ;;  %s1338_s1 = inlined_call_operand.hbm [shape: bf16[3,96,64], index: 1, kind: input, shape index: {}]   ;;  %s1339_s2 = inlined_call_operand.hbm [shape: f32[3,64], index: 2, kind: input, shape index: {}]   ;;  %s1340_s3 = inlined_call_operand.hbm [shape: bf16[32,64], index: 3, kind: output, shape index: {}]  }
   0x1   :  { %10 = vsyncpa [#allocation3 + $0x1], 0 }
   0x2   :  { %11 = vsyncpa [#allocation6], 0 }
   0x3   :  { %12 = vsyncpa [#allocation4], 0 }
   0x4   :  { %14 = vsyncpa [#allocation4 + $0x1], 0  ;;  %s1063_s12 = smov 0   ;;  %s1065_s13 = smov 0  }
   0x5   :  { %s1067_s14 = smov 0   ;;  %s1069_s15 = smov 0  }
   0x6 LB: > { %s1084_s16 = sadd.s32 4294967295, %s1031_s15   ;;  %s658_s17 = sadd.s32 4294967294, %s1031_s15   ;;  %s1031_s15 = sphi %s1069_s15, %s1360_s15   ;;  %s1027_s14 = sphi %s1067_s14, %s1359_s14   ;;  %s1023_s13 = sphi %s1065_s13, %s1358_s13   ;;  %s1019_s12 = sphi %s1063_s12, %s1357_s12  }
   0x7   : > { %p40_p0 = scmp.ne.s32.totalorder %s1023_s13, %s1019_s12  ;;  %p1341_p1 = scmp.eq.s32.totalorder %s1084_s16, 0 }
   0x8   : > { %p112_p3 = scmp.eq.s32.totalorder %s658_s17, 1  ;;  %p659_p5 = scmp.ge.s32.totalorder %s1031_s15, 1 }
   0x9   : > { %p1093_p4 = por %p1341_p1, %p40_p0  ;;  %p119_p7 = scmp.lt.s32.totalorder %s1031_s15, 3 }
   0xa   : > { %p1098_p6 = por %p112_p3, %p40_p0  ;;  %s1033_s21 = smov [#allocation5]  }
   0xb   : > { %s1344_s18 = scalar_select %p1093_p4, 1, 0 }
   0xc   : > { %s1345_s19 = scalar_select %p1098_p6, 1, 0 }
   0xd   : > { %p1103_p8 = pnand %p659_p5, %p119_p7  ;;  %s131_s22 = sshll.u32 %s1033_s21, 4  ;;  %s1107_s22 = int_to_ptr.vmem [resolvable:$true] %s131_s22 }
   0xe   : > { %s1034_s24 = smov [#allocation7]   ;;  %s875_s28 = scalar_lea.hbm %s1338_s1, 2304 }
   0xf   : > { %p793_p9 = pneg %p1103_p8  ;;  %s145_s25 = sshll.u32 %s1034_s24, 4  ;;  %s1118_s25 = int_to_ptr.vmem [resolvable:$true] %s145_s25 }
  0x10   : > { %p876_p12 = scmp.ne.s32.totalorder %s1338_s1, %s875_s28  ;;  %p882_p5 = scmp.lt.u32.totalorder %s875_s28, %s1338_s1 }
  0x11   : > { %p1114_p11 = pnand %p793_p9, %p1341_p1 }
  0x13   : > { %p877_p13 = pneg %p1114_p11 }
  0x15   : > { %p878_p0 = pnand %p877_p13, %p876_p12 }
  0x17   : > { %p879_p3 = pneg %p878_p0 }
  0x19   : > { %p884_p7 = pnand %p882_p5, %p879_p3 }
  0x1b   : > { %887 = shalt.err (!%p884_p7)
}
  0x1c   : > { %s888_s6 = scalar_lea.vmem %s1107_s22, 2304  ;;  %p896_p2 = scmp.lt.s32.totalorder %s1107_s22, %s1107_s22 }
  0x1d   : > { %p889_p9 = scmp.ne.s32.totalorder %s1107_s22, %s888_s6  ;;  %p897_p12 = scmp.lt.s32.totalorder %s888_s6, %s888_s6 }
  0x1f   : > { %p891_p10 = pnand %p889_p9, %p877_p13  ;;  %p898_p0 = por %p897_p12, %p896_p2 }
  0x21   : > { %p892_p1 = pneg %p891_p10 }
  0x23   : > { %p899_p6 = pnand %p898_p0, %p892_p1 }
  0x25   : > { %902 = shalt.err (!%p899_p6)
}
  0x26   : > { %s1035_s7 = smov 64   ;;  %s1036_s8 = smov 4  }
  0x27   : > { %796 = dma.hbm_to_vmem [thread:$0]  (!%p1114_p11), %s1338_s1, 2304, %s1107_s22, [#allocation6], %s1035_s7, %s1035_s7, %s1036_s8  }
  0x28   : > { %s903_s21 = scalar_lea.hbm %s1339_s2, 64 }
  0x29   : > { %p904_p1 = scmp.ne.s32.totalorder %s1339_s2, %s903_s21  ;;  %p910_p10 = scmp.lt.u32.totalorder %s903_s21, %s1339_s2 }
  0x2b   : > { %p906_p2 = pnand %p904_p1, %p877_p13 }
  0x2d   : > { %p907_p6 = pneg %p906_p2 }
  0x2f   : > { %p912_p3 = pnand %p910_p10, %p907_p6 }
  0x31   : > { %915 = shalt.err (!%p912_p3)
}
  0x32   : > { %s916_s22 = scalar_lea.vmem %s1118_s25, 64  ;;  %p924_p12 = scmp.lt.s32.totalorder %s1118_s25, %s1118_s25 }
  0x33   : > { %p917_p5 = scmp.ne.s32.totalorder %s1118_s25, %s916_s22  ;;  %p925_p0 = scmp.lt.s32.totalorder %s916_s22, %s916_s22 }
  0x35   : > { %p919_p7 = pnand %p917_p5, %p877_p13  ;;  %p926_p1 = por %p925_p0, %p924_p12 }
  0x37   : > { %p920_p9 = pneg %p919_p7 }
  0x39   : > { %p927_p2 = pnand %p926_p1, %p920_p9 }
  0x3b   : > { %930 = shalt.err (!%p927_p2)
}
  0x3c   : > { %799 = dma.hbm_to_vmem [thread:$0]  (!%p1114_p11), %s1339_s2, 64, %s1118_s25, [#allocation6]  }
  0x3d   : > { %s1176_s4 = sadd.s32 1, %s1031_s15   ;;  %s27_s23 = sadd.s32 1, %s1027_s14 }
  0x3e   : > { %s24_s5 = ssub.s32 %s1031_s15, %s1176_s4  ;;  %p34_p13 = scmp.ne.s32.totalorder %s1027_s14, %s1023_s13 }
  0x3f   : > { %p25_p6 = scmp.eq.s32.totalorder %s24_s5, 0  ;;  %p35_p10 = scmp.eq.s32.totalorder %s1031_s15, 0 }
  0x40   : > { %p1348_p3 = scmp.eq.s32.totalorder %s1084_s16, 1  ;;  %p810_p7 = scmp.lt.s32.totalorder %s1031_s15, 2 }
  0x41   : > { %s1192_s9 = scalar_select %p25_p6, %s1027_s14, %s27_s23  }
  0x42   : > { %p1186_p5 = por %p1348_p3, %p34_p13  ;;  %p36_p9 = por %p35_p10, %p34_p13 }
  0x43   : > { %s156_s10 = sand.u32 1, %s1027_s14   ;;  %s702_s25 = sshll.u32 %s1031_s15, 8 }
  0x44   : > { %s1349_s6 = scalar_select %p1186_p5, 1, 0 }
  0x45   : > { %s663_s11 = sshll.u32 %s156_s10, 4  ;;  %s1199_s24 = scalar_lea.hbm %s1337_s0, %s702_s25 }
  0x46   : > { %s160_s26 = scalar_lea.vmem [#allocation2], %s663_s11  ;;  %p1203_p11 = pnand %p810_p7, %p36_p9 }
  0x47   : > { %s167_s27 = sshll.u32 %s160_s26, 4  ;;  %s1207_s22 = scalar_lea.sflag [#allocation3], %s156_s10  ;;  %s1201_s27 = int_to_ptr.vmem [resolvable:$true] %s167_s27 }
  0x48   : > { %s931_s29 = scalar_lea.hbm %s1199_s24, 256  ;;  %p933_p0 = pneg %p1203_p11 }
  0x49   : > { %p932_p12 = scmp.ne.s32.totalorder %s1199_s24, %s931_s29  ;;  %s936_s5 = scalar_lea.hbm %s1337_s0, 512 }
  0x4a   : > { %p937_p13 = scmp.lt.u32.totalorder %s1199_s24, %s1337_s0  ;;  %p938_p6 = scmp.lt.u32.totalorder %s936_s5, %s931_s29 }
  0x4b   : > { %p934_p1 = pnand %p933_p0, %p932_p12  ;;  %p940_p3 = scmp.lt.u32.totalorder %s931_s29, %s1199_s24 }
  0x4c   : > { %p939_p10 = por %p938_p6, %p937_p13 }
  0x4d   : > { %p935_p2 = pneg %p934_p1 }
  0x4e   : > { %p941_p7 = por %p940_p3, %p939_p10 }
  0x50   : > { %p942_p9 = pnand %p941_p7, %p935_p2 }
  0x52   : > { %945 = shalt.err (!%p942_p9)
}
  0x53   : > { %s946_s10 = scalar_lea.vmem %s1201_s27, 256  ;;  %s1037_s17 = smov [#allocation2]  }
  0x54   : > { %p947_p12 = scmp.ne.s32.totalorder %s1201_s27, %s946_s10  ;;  %s951_s21 = sshll.u32 %s1037_s17, 4  ;;  %s952_s21 = int_to_ptr.vmem [resolvable:$false] %s951_s21 }
  0x55   : > { %s953_s26 = scalar_lea.vmem %s952_s21, 512  ;;  %p954_p4 = scmp.lt.s32.totalorder %s1201_s27, %s952_s21 }
  0x56   : > { %p949_p1 = pnand %p947_p12, %p933_p0  ;;  %p955_p13 = scmp.lt.s32.totalorder %s953_s26, %s946_s10 }
  0x58   : > { %p950_p5 = pneg %p949_p1  ;;  %p956_p6 = por %p955_p13, %p954_p4 }
  0x5a   : > { %p957_p10 = pnand %p956_p6, %p950_p5 }
  0x5c   : > { %960 = shalt.err (!%p957_p10)
}
  0x5d   : > { %803 = dma.hbm_to_vmem [thread:$0]  (!%p1203_p11), %s1199_s24, 256, %s1201_s27, %s1207_s22, %s1035_s7, %s1035_s7, %s1036_s8  }
  0x5e   : > { %179 = sbr.rel (%p1103_p8) target bundleno = 395 (0x18b), region = 32  ;;  %s1241_s29 = sand.u32 (!%p1103_p8), 1, %s1023_s13  }
  0x5f   : > { %s667_s30 = sshll.u32 (!%p1103_p8), %s1241_s29, 4  ;;  %s182_s23 = scalar_lea.sflag (!%p1103_p8), [#allocation3], %s1241_s29 }
  0x60   : > { %s1245_s5 = scalar_lea.vmem (!%p1103_p8), [#allocation2], %s667_s30  ;;  %p1351_p4 = scmp.ne.s32.totalorder (!%p1103_p8), %s1344_s18, 0 }
  0x65   : > { %1006 = dma.done.wait (%p1351_p4), %s182_s23, 256  }
  0x66   : > { %1008 = vsyncadd (%p1351_p4), %s182_s23, 4294967040  ;;  %p1352_p5 = scmp.eq.s32.totalorder %s1084_s16, 0 }
  0x68   : > { %1010 = dma.done.wait (%p1352_p5), [#allocation6], 2368   ;;  %p1353_p8 = pmov %p1352_p5 }
  0x69   : > { %v1038_v0 = vmov 0.0   ;;  %vm1039_vm0 = vmmov 0   ;;  %v854_v1 = vld [vmem:[#allocation5] sm:$0xff]   ;;  %v855_v2 = vld [vmem:[#allocation5 + $0x8] sm:$0xff]   ;;  %v856_v3 = vld [vmem:[#allocation5 + $0x10] sm:$0xff]   ;;  %vm288_vm1 = vcmask 785408   ;;  %v519_v29 = vlaneseq }
  0x6a   : > { %1012 = vsyncadd (%p1353_p8), [#allocation6], 4294964928  ;;  %743 = vmatprep.subr.bf16.mxu0 %v1038_v0  ;;  %727 = vmatprep.subr.bf16.mxu1 %v1038_v0  ;;  %v860_v4 = vld [vmem:[#allocation5 + $0x30] sm:$0xff]   ;;  %v863_v5 = vld [vmem:[#allocation5 + $0x38] sm:$0xff]   ;;  %s670_s18 = sshll.u32 %s1241_s29, 3  ;;  %s705_s20 = sshll.u32 %s1084_s16, 7 }
  0x6b   : > { %755 = vmatprep.mubr.msk.bf16.mxu0 %vm1039_vm0, %v1038_v0  ;;  %739 = vmatprep.mubr.msk.bf16.mxu1 %vm1039_vm0, %v1038_v0  ;;  %v857_v6 = vld [vmem:[#allocation5 + $0x18] sm:$0xff]   ;;  %v865_v7 = vld [vmem:[#allocation5 + $0x40] sm:$0xff]   ;;  %v867_v9 = vld [vmem:[#allocation5 + $0x48] sm:$0xff]   ;;  %v520_v30 = vshrl.u32 %v519_v29, 7  ;;  %s215_s7 = scalar_lea.vmem [#allocation8], %s670_s18  ;;  %vm549_vm4 = vcmask 519168   ;;  %s1291_s28 = scalar_lea.hbm %s1340_s3, %s705_s20 }
  0x6c   : > { %744 = vmatpush3.bf16.msra.mxu0 %v854_v1  ;;  %728 = vmatpush3.bf16.msra.mxu1 %v860_v4  ;;  %v858_v8 = vld [vmem:[#allocation5 + $0x20] sm:$0xff]   ;;  %v859_v10 = vld [vmem:[#allocation5 + $0x28] sm:$0xff]   ;;  %v869_v13 = vld [vmem:[#allocation5 + $0x50] sm:$0xff]   ;;  %s566_s8 = sshll.u32 %s215_s7, 4  ;;  %s553_s16 = scalar_lea.sflag [#allocation4], %s1241_s29  ;;  %s1293_s8 = int_to_ptr.vmem [resolvable:$true] %s566_s8 }
  0x6d   : > { %745 = vmatprep.subr.bf16.mxu0 %v1038_v0  ;;  %729 = vmatprep.subr.bf16.mxu1 %v1038_v0  ;;  %v219_v11 = vld [vmem:[%s1245_s5] sm:$0xf]  ;;  %v220_v12 = vld [vmem:[%s1245_s5 + $0x4] sm:$0xf]  ;;  %v871_v16 = vld [vmem:[#allocation5 + $0x58] sm:$0xff]   ;;  %v521_v31 = vsub.s32 0, %v520_v30 }
  0x6e   : > { %v679_v14 = vcombine.low %v219_v11, %v220_v12  ;;  %v862_v15 = vld [vmem:[#allocation5 + $0x60] sm:$0xff]   ;;  %v233_v17 = vld [vmem:[%s1245_s5 + $0x8] sm:$0xf]  ;;  %v866_v20 = vld [vmem:[#allocation5 + $0x70] sm:$0xff]   ;;  %v527_v33 = vsub.s32 1, %v520_v30  ;;  %v535_v35 = vsub.s32 2, %v520_v30 }
  0x6f   : > { %v864_v18 = vld [vmem:[#allocation5 + $0x68] sm:$0xff]   ;;  %v671_v19 = vcombine.low %v220_v12, %v233_v17  ;;  %v868_v21 = vld [vmem:[#allocation5 + $0x78] sm:$0xff]   ;;  %v870_v22 = vld [vmem:[#allocation5 + $0x80] sm:$0xff]   ;;  %s961_s22 = scalar_lea.vmem %s1293_s8, 128  ;;  %p1354_p0 = scmp.ne.s32.totalorder %s1349_s6, 0 }
  0x70   : > { %746 = vmatpush3.bf16.msra.mxu0 %v855_v2  ;;  %730 = vmatpush3.bf16.msra.mxu1 %v863_v5  ;;  %v873_v23 = vld [vmem:[#allocation5 + $0x88] sm:$0xff]   ;;  %v518_v32 = vld [vmem:[#allocation7] sm:$0x7]  ;;  %p962_p11 = scmp.ne.s32.totalorder %s1293_s8, %s961_s22  ;;  %s1040_s11 = smov [#allocation8]  }
  0x71   : > { %747 = vmatprep.subr.bf16.mxu0 %v1038_v0  ;;  %731 = vmatprep.subr.bf16.mxu1 %v1038_v0  ;;  %v874_v24 = vld [vmem:[%s1245_s5 + $0x8] sm:$0xff]   ;;  %v522_v34 = vrot.slane %v518_v32, %v521_v31  ;;  %v528_v38 = vrot.slane %v518_v32, %v527_v33  ;;  %v536_v42 = vrot.slane %v518_v32, %v535_v35  ;;  %s965_s25 = sshll.u32 %s1040_s11, 4  ;;  %s966_s25 = int_to_ptr.vmem [resolvable:$false] %s965_s25 }
  0x72   : > { %p963_p2 = pnand %p962_p11, %p1354_p0  ;;  %s967_s10 = scalar_lea.vmem %s966_s25, 256 }
  0x73   : > { %p968_p7 = scmp.lt.s32.totalorder %s1293_s8, %s966_s25  ;;  %p969_p9 = scmp.lt.s32.totalorder %s967_s10, %s961_s22 }
  0x74   : > { %748 = vmatpush3.bf16.msra.mxu0 %v856_v3  ;;  %732 = vmatpush3.bf16.msra.mxu1 %v865_v7  ;;  %p964_p3 = pneg %p963_p2 }
  0x75   : > { %749 = vmatprep.subr.bf16.mxu0 %v1038_v0  ;;  %733 = vmatprep.subr.bf16.mxu1 %v1038_v0  ;;  %p970_p12 = por %p969_p9, %p968_p7 }
  0x77   : > { %p971_p1 = pnand %p970_p12, %p964_p3 }
  0x78   : > { %750 = vmatpush3.bf16.msra.mxu0 %v857_v6  ;;  %734 = vmatpush3.bf16.msra.mxu1 %v867_v9 }
  0x79   : > { %751 = vmatprep.subr.bf16.mxu0 %v1038_v0  ;;  %735 = vmatprep.subr.bf16.mxu1 %v1038_v0 }
  0x7c   : > { %752 = vmatpush3.bf16.msra.mxu0 %v858_v8  ;;  %736 = vmatpush3.bf16.msra.mxu1 %v869_v13 }
  0x7d   : > { %753 = vmatprep.subr.bf16.mxu0 %v1038_v0  ;;  %737 = vmatprep.subr.bf16.mxu1 %v1038_v0 }
  0x80   : > { %754 = vmatpush3.bf16.msra.mxu0 %v859_v10  ;;  %738 = vmatpush3.bf16.msra.mxu1 %v871_v16 }
  0x81   : > { %759 = vmatprep.subr.bf16.mxu0 %v1038_v0 }
  0x83   : > { %756 = vmatmul.mubr.msk.bf16.vlgmr.msra.gmra.mrb[0].mxu0 %vm288_vm1, %v679_v14  ;;  %740 = vmatmul.mubr.msk.bf16.vlgmr.msra.gmra.mrb[0].mxu1 %vm288_vm1, %v671_v19 }
  0x84   : > { %760 = vmatpush3.bf16.msra.mxu0 %v862_v15  ;;  %771 = vmatprep.mubr.msk.bf16.mxu0 %vm1039_vm0, %v1038_v0 }
  0x85   : > { %761 = vmatprep.subr.bf16.mxu0 %v1038_v0 }
  0x88   : > { %762 = vmatpush3.bf16.msra.mxu0 %v864_v18 }
  0x89   : > { %763 = vmatprep.subr.bf16.mxu0 %v1038_v0 }
  0x8c   : > { %764 = vmatpush3.bf16.msra.mxu0 %v866_v20 }
  0x8d   : > { %765 = vmatprep.subr.bf16.mxu0 %v1038_v0 }
  0x90   : > { %766 = vmatpush3.bf16.msra.mxu0 %v868_v21 }
  0x91   : > { %767 = vmatprep.subr.bf16.mxu0 %v1038_v0 }
  0x94   : > { %768 = vmatpush3.bf16.msra.mxu0 %v870_v22 }
  0x95   : > { %769 = vmatprep.subr.bf16.mxu0 %v1038_v0 }
  0x98   : > { %770 = vmatpush3.bf16.msra.mxu0 %v873_v23 }
  0x9b   : > { %772 = vmatmul.mubr.msk.bf16.vlgmr.msra.gmra.mrb[0].mxu0 %vm288_vm1, %v874_v24 }
 0x156   : > { %v326_v25 = vpop.f32.mrb[0].mxu1 }
 0x157   : > { %v741_v26 = vpop.f32.mrb[1].mxu1 }
 0x158   : > { %v329_v27 = vpop.f32.mrb[2].mxu1 }
 0x159   : > { %v742_v28 = vpop.f32.mrb[3].mxu1 }
 0x16e   : > { %v509_v36 = vpop.f32.mrb[0].mxu0 }
 0x16f   : > { %v775_v37 = vadd.f32 %v509_v36, %v326_v25  ;;  %v773_v39 = vpop.f32.mrb[1].mxu0 }
 0x170   : > { %v512_v40 = vpop.f32.mrb[2].mxu0 }
 0x171   : > { %v523_v41 = vmul.f32 %v775_v37, %v522_v34  ;;  %v776_v43 = vadd.f32 %v512_v40, %v329_v27  ;;  %v774_v44 = vpop.f32.mrb[3].mxu0 }
 0x173   : > { %v529_v45 = vadd.f32 %v528_v38, %v523_v41  ;;  %v524_v46 = vmul.f32 %v776_v43, %v522_v34 }
 0x175   : > { %vm531_vm2 = vcmp.ge.f32.partialorder %v529_v45, 0.0  ;;  %v537_v47 = vmul.f32 %v536_v42, %v529_v45  ;;  %v530_v48 = vadd.f32 %v528_v38, %v524_v46 }
 0x177   : > { %v539_v49 = vsel %vm531_vm2, %v529_v45, %v537_v47  ;;  %vm532_vm3 = vcmp.ge.f32.partialorder %v530_v48, 0.0  ;;  %v538_v50 = vmul.f32 %v536_v42, %v530_v48 }
 0x178   : > { %v703_v51 = vpack.c.bf16 %v539_v49, %v539_v49 }
 0x179   : > { %v540_v52 = vsel %vm532_vm3, %v530_v48, %v538_v50 }
 0x17a   : > { %v704_v53 = vpack.c.bf16 %v540_v52, %v540_v52  ;;  %550 = vst.msk [vmem:[%s215_s7] sm:$0xf] %vm549_vm4, %v703_v51 }
 0x17c   : > { %551 = vst.msk [vmem:[%s215_s7 + $0x4] sm:$0xf] %vm549_vm4, %v704_v53 }
 0x17d   : > { %974 = shalt.err (!%p971_p1)
}
 0x17e   : > { %s975_s17 = scalar_lea.hbm %s1291_s28, 128  ;;  %s979_s30 = scalar_lea.hbm %s1340_s3, 256 }
 0x17f   : > { %p976_p13 = scmp.ne.s32.totalorder %s1291_s28, %s975_s17  ;;  %p980_p4 = scmp.lt.u32.totalorder %s1291_s28, %s1340_s3 }
 0x180   : > { %p981_p5 = scmp.lt.u32.totalorder %s979_s30, %s975_s17  ;;  %p983_p11 = scmp.lt.u32.totalorder %s975_s17, %s1291_s28 }
 0x181   : > { %p977_p6 = pnand %p976_p13, %p1354_p0 }
 0x182   : > { %p982_p8 = por %p981_p5, %p980_p4 }
 0x183   : > { %p978_p10 = pneg %p977_p6 }
 0x184   : > { %p984_p2 = por %p983_p11, %p982_p8 }
 0x186   : > { %p985_p3 = pnand %p984_p2, %p978_p10 }
 0x188   : > { %988 = shalt.err (!%p985_p3)
}
 0x189   : > { %s1041_s18 = smov 64   ;;  %s1042_s20 = smov 4  }
 0x18a   : > { %791 = dma.vmem_to_hbm [thread:$0]  (%p1354_p0), %s1293_s8, 128, %s1291_s28, %s553_s16, %s1041_s18, %s1041_s18, %s1042_s20  }
 0x18b PF: > { %s581_s7 = sand.u32 1, %s1019_s12   ;;  %p1355_p7 = scmp.ne.s32.totalorder %s1345_s19, 0 }
 0x18c   : > { %p1356_p9 = scmp.ge.s32.totalorder %s1031_s15, 2  ;;  %s582_s24 = scalar_lea.sflag [#allocation4], %s581_s7 }
 0x18e   : > { %p805_p12 = pnand %p1356_p9, %p1355_p7 }
 0x190   : > { %1014 = dma.done.wait (!%p805_p12), %s582_s24, 128  }
 0x191   : > { %1016 = vsyncadd (!%p805_p12), %s582_s24, 4294967168  ;;  %p17_p1 = scmp.ge.s32.totalorder %s1176_s4, 4   ;;  %s1357_s12 = smov %s1023_s13 }
 0x192   : > { %s1358_s13 = smov %s1027_s14  ;;  %s1359_s14 = smov %s1192_s9 }
 0x193   : > { %s1360_s15 = smov %s1176_s4  ;;  %19 = sbr.rel (!%p17_p1) target bundleno = 6 (0x6), region = 87 }
 0x19a   :  { %587 = vsyncpa [#allocation3], 1 }
 0x19b   :  { %589 = vsyncpa [#allocation3 + $0x1], 1 }
 0x19c   :  { %590 = vsyncpa [#allocation6], 1 }
 0x19d   :  { %591 = vsyncpa [#allocation4], 1 }
 0x19e   :  { %593 = vsyncpa [#allocation4 + $0x1], 1 }

// kernel: _lambda_.15
= control target key start
LH: loop header
LB: loop body
LE: loop exit
PB: predicated region body
PF: predicated region fallthrough
CT: control target
= control target key end

     0   :  { %s1655_s0 = inlined_call_operand.hbm [shape: f32[96,64], index: 0, kind: input, shape index: {}]   ;;  %s1656_s1 = inlined_call_operand.hbm [shape: f32[96,64], index: 1, kind: input, shape index: {}]   ;;  %s1657_s2 = inlined_call_operand.hbm [shape: f32[64,64], index: 2, kind: input, shape index: {}]   ;;  %s1658_s3 = inlined_call_operand.hbm [shape: f32[96,64], index: 3, kind: output, shape index: {0}]   ;;  %s1659_s4 = inlined_call_operand.hbm [shape: f32[96,64], index: 4, kind: output, shape index: {1}]   ;;  %s1660_s5 = inlined_call_operand.hbm [shape: f32[96,64], index: 5, kind: output, shape index: {2}]  }
   0x1   :  { %1670 = sst [smem:[#allocation19_spill]] %s1655_s0 }
   0x2   :  { %1671 = sst [smem:[#allocation20_spill]] %s1657_s2 }
   0x3   :  { %11 = vsyncpa [#allocation3], 0 }
   0x4   :  { %13 = vsyncpa [#allocation3 + $0x1], 0 }
   0x5   :  { %14 = vsyncpa [#allocation6], 0 }
   0x6   :  { %16 = vsyncpa [#allocation6 + $0x1], 0 }
   0x7   :  { %17 = vsyncpa [#allocation4], 0 }
   0x8   :  { %19 = vsyncpa [#allocation4 + $0x1], 0 }
   0x9   :  { %20 = vsyncpa [#allocation10], 0 }
   0xa   :  { %22 = vsyncpa [#allocation10 + $0x1], 0  ;;  %s1274_s18 = smov 0   ;;  %s1276_s19 = smov 0  }
   0xb   :  { %s1278_s20 = smov 0   ;;  %s1280_s21 = smov 0  }
   0xc LB: > { %1672 = sst [smem:[#allocation17_spill]] %s1228_s20  ;;  %s1295_s22 = sadd.s32 4294967295, %s1232_s21   ;;  %s1232_s21 = sphi %s1280_s21, %s1695_s21   ;;  %s1228_s20 = sphi %s1278_s20, %s1692_s20   ;;  %s1224_s19 = sphi %s1276_s19, %s1694_s19   ;;  %s1220_s18 = sphi %s1274_s18, %s1693_s18  }
   0xd   : > { %s1664_s23 = sadd.s32 4294967294, %s1232_s21   ;;  %p48_p0 = scmp.ne.s32.totalorder %s1224_s19, %s1220_s18 }
   0xe   : > { %p1661_p1 = scmp.eq.s32.totalorder %s1295_s22, 0  ;;  %p125_p3 = scmp.eq.s32.totalorder %s1664_s23, 2 }
   0xf   : > { %p786_p5 = scmp.ge.s32.totalorder %s1232_s21, 1  ;;  %p184_p7 = scmp.lt.s32.totalorder %s1232_s21, 4 }
  0x10   : > { %p1306_p4 = por %p1661_p1, %p48_p0  ;;  %p1311_p6 = por %p125_p3, %p48_p0 }
  0x11   : > { %p1316_p8 = pnand %p786_p5, %p184_p7  ;;  %s1234_s27 = smov [#allocation7]  }
  0x12   : > { %s1673_s24 = scalar_select %p1306_p4, 1, 0 }
  0x13   : > { %s1674_s25 = scalar_select %p1311_p6, 1, 0 }
  0x14   : > { %s1675_s26 = scalar_select %p1316_p8, 1, 0 }
  0x15   : > { %s196_s28 = sshll.u32 %s1234_s27, 4  ;;  %p948_p9 = pneg %p1316_p8  ;;  %s197_s28 = int_to_ptr.vmem [resolvable:$true] %s196_s28 }
  0x16   : > { %s1329_s30 = sadd.s32 1, %s1232_s21   ;;  %s35_s6 = sadd.s32 1, %s1228_s20 }
  0x17   : > { %p1324_p10 = pnand %p948_p9, %p1661_p1  ;;  %s32_s7 = ssub.s32 %s1232_s21, %s1329_s30 }
  0x18   : > { %s1677_s2 = sld [smem:[#allocation20_spill]] }
  0x19   : > { %p1012_p12 = pneg %p1324_p10 }
  0x1e   : > { %s1010_s10 = scalar_lea.hbm %s1677_s2, 1024 }
  0x1f   : > { %p1011_p11 = scmp.ne.s32.totalorder %s1677_s2, %s1010_s10  ;;  %p1017_p3 = scmp.lt.u32.totalorder %s1010_s10, %s1677_s2 }
  0x21   : > { %p1013_p13 = pnand %p1012_p12, %p1011_p11 }
  0x23   : > { %p1014_p0 = pneg %p1013_p13 }
  0x25   : > { %p1019_p5 = pnand %p1017_p3, %p1014_p0 }
  0x27   : > { %1022 = shalt.err (!%p1019_p5)
}
  0x28   : > { %s1023_s15 = scalar_lea.vmem %s197_s28, 1024  ;;  %p1031_p2 = scmp.lt.s32.totalorder %s197_s28, %s197_s28 }
  0x29   : > { %p1024_p7 = scmp.ne.s32.totalorder %s197_s28, %s1023_s15  ;;  %p1032_p6 = scmp.lt.s32.totalorder %s1023_s15, %s1023_s15 }
  0x2b   : > { %p1026_p9 = pnand %p1024_p7, %p1012_p12  ;;  %p1033_p4 = por %p1032_p6, %p1031_p2 }
  0x2d   : > { %p1027_p1 = pneg %p1026_p9 }
  0x2f   : > { %p1034_p8 = pnand %p1033_p4, %p1027_p1 }
  0x31   : > { %1037 = shalt.err (!%p1034_p8)
}
  0x32   : > { %s1665_s16 = smov 128   ;;  %s1667_s17 = smov 8  }
  0x33   : > { %951 = dma.hbm_to_vmem [thread:$0]  (!%p1324_p10), %s1677_s2, 1024, %s197_s28, [#allocation6], %s1665_s16, %s1665_s16, %s1667_s17  }
  0x34   : > { %p33_p1 = scmp.eq.s32.totalorder %s32_s7, 0  ;;  %p42_p2 = scmp.ne.s32.totalorder %s1228_s20, %s1224_s19 }
  0x35   : > { %p43_p4 = scmp.eq.s32.totalorder %s1232_s21, 0  ;;  %p970_p6 = scmp.lt.s32.totalorder %s1232_s21, 3 }
  0x36   : > { %s1358_s9 = scalar_select %p33_p1, %s1228_s20, %s35_s6  }
  0x37   : > { %p44_p8 = por %p43_p4, %p42_p2  ;;  %p1679_p11 = scmp.eq.s32.totalorder %s1295_s22, 2 }
  0x38   : > { %1678 = sst [smem:[#allocation18_spill]] %s1358_s9  ;;  %s210_s29 = sand.u32 1, %s1228_s20  }
  0x39   : > { %p1362_p12 = por %p1679_p11, %p42_p2  ;;  %s829_s11 = sshll.u32 %s1232_s21, 9 }
  0x3a   : > { %s1368_s12 = sshll.u32 %s210_s29, 5  ;;  %s1681_s0 = sld [smem:[#allocation19_spill]] }
  0x3b   : > { %s214_s6 = scalar_lea.vmem [#allocation2], %s1368_s12  ;;  %p1376_p10 = pnand %p970_p6, %p44_p8 }
  0x3c   : > { %s221_s7 = sshll.u32 %s214_s6, 4  ;;  %s1385_s13 = scalar_lea.hbm %s1656_s1, %s829_s11  ;;  %s1380_s7 = int_to_ptr.vmem [resolvable:$true] %s221_s7 }
  0x3d   : > { %s1387_s14 = scalar_lea.sflag [#allocation3], %s210_s29  ;;  %p1040_p0 = pneg %p1376_p10 }
  0x40   : > { %s1373_s28 = scalar_lea.hbm %s1681_s0, %s829_s11  ;;  %s1043_s17 = scalar_lea.hbm %s1681_s0, 1536 }
  0x41   : > { %s1038_s23 = scalar_lea.hbm %s1373_s28, 512  ;;  %p1044_p7 = scmp.lt.u32.totalorder %s1373_s28, %s1681_s0 }
  0x42   : > { %p1039_p13 = scmp.ne.s32.totalorder %s1373_s28, %s1038_s23  ;;  %p1045_p9 = scmp.lt.u32.totalorder %s1043_s17, %s1038_s23 }
  0x43   : > { %p1047_p2 = scmp.lt.u32.totalorder %s1038_s23, %s1373_s28 }
  0x44   : > { %p1041_p3 = pnand %p1040_p0, %p1039_p13  ;;  %p1046_p1 = por %p1045_p9, %p1044_p7 }
  0x46   : > { %p1042_p5 = pneg %p1041_p3  ;;  %p1048_p4 = por %p1047_p2, %p1046_p1 }
  0x48   : > { %p1049_p6 = pnand %p1048_p4, %p1042_p5 }
  0x4a   : > { %1052 = shalt.err (!%p1049_p6)
}
  0x4b   : > { %s1053_s29 = scalar_lea.vmem %s1380_s7, 512  ;;  %s1237_s16 = smov [#allocation2]  }
  0x4c   : > { %p1054_p8 = scmp.ne.s32.totalorder %s1380_s7, %s1053_s29  ;;  %s1058_s11 = sshll.u32 %s1237_s16, 4  ;;  %s1059_s11 = int_to_ptr.vmem [resolvable:$false] %s1058_s11 }
  0x4d   : > { %s1060_s2 = scalar_lea.vmem %s1059_s11, 1024  ;;  %p1061_p3 = scmp.lt.s32.totalorder %s1380_s7, %s1059_s11 }
  0x4e   : > { %p1056_p11 = pnand %p1054_p8, %p1040_p0  ;;  %p1062_p7 = scmp.lt.s32.totalorder %s1060_s2, %s1053_s29 }
  0x50   : > { %p1057_p13 = pneg %p1056_p11  ;;  %p1063_p9 = por %p1062_p7, %p1061_p3 }
  0x52   : > { %p1064_p1 = pnand %p1063_p9, %p1057_p13 }
  0x54   : > { %1067 = shalt.err (!%p1064_p1)
}
  0x55   : > { %s1683_s23 = smov 8   ;;  %s1684_s17 = smov 128  }
  0x56   : > { %955 = dma.hbm_to_vmem [thread:$0]  (!%p1376_p10), %s1373_s28, 512, %s1380_s7, %s1387_s14, %s1684_s17, %s1684_s17, %s1683_s23  }
  0x57   : > { %s235_s9 = scalar_lea.vmem [#allocation5], %s1368_s12  ;;  %s231_s8 = sand.u32 1, %s1232_s21  }
  0x58   : > { %s242_s27 = sshll.u32 %s235_s9, 4  ;;  %s1422_s6 = scalar_lea.sflag [#allocation6], %s231_s8  ;;  %s1420_s27 = int_to_ptr.vmem [resolvable:$true] %s242_s27 }
  0x59   : > { %s1068_s29 = scalar_lea.hbm %s1385_s13, 512  ;;  %s1073_s2 = scalar_lea.hbm %s1656_s1, 1536 }
  0x5a   : > { %p1069_p5 = scmp.ne.s32.totalorder %s1385_s13, %s1068_s29  ;;  %p1074_p6 = scmp.lt.u32.totalorder %s1385_s13, %s1656_s1 }
  0x5b   : > { %p1075_p8 = scmp.lt.u32.totalorder %s1073_s2, %s1068_s29  ;;  %p1077_p13 = scmp.lt.u32.totalorder %s1068_s29, %s1385_s13 }
  0x5c   : > { %p1071_p2 = pnand %p1069_p5, %p1040_p0 }
  0x5d   : > { %p1076_p11 = por %p1075_p8, %p1074_p6 }
  0x5e   : > { %p1072_p4 = pneg %p1071_p2 }
  0x5f   : > { %p1078_p3 = por %p1077_p13, %p1076_p11 }
  0x61   : > { %p1079_p7 = pnand %p1078_p3, %p1072_p4 }
  0x63   : > { %1082 = shalt.err (!%p1079_p7)
}
  0x64   : > { %s1083_s12 = scalar_lea.vmem %s1420_s27, 512  ;;  %s1238_s28 = smov [#allocation5]  }
  0x65   : > { %p1084_p9 = scmp.ne.s32.totalorder %s1420_s27, %s1083_s12  ;;  %s1088_s7 = sshll.u32 %s1238_s28, 4  ;;  %s1089_s7 = int_to_ptr.vmem [resolvable:$false] %s1088_s7 }
  0x66   : > { %s1090_s0 = scalar_lea.vmem %s1089_s7, 1024  ;;  %p1091_p2 = scmp.lt.s32.totalorder %s1420_s27, %s1089_s7 }
  0x67   : > { %p1086_p1 = pnand %p1084_p9, %p1040_p0  ;;  %p1092_p6 = scmp.lt.s32.totalorder %s1090_s0, %s1083_s12 }
  0x69   : > { %p1087_p5 = pneg %p1086_p1  ;;  %p1093_p8 = por %p1092_p6, %p1091_p2 }
  0x6b   : > { %p1094_p11 = pnand %p1093_p8, %p1087_p5 }
  0x6d   : > { %1097 = shalt.err (!%p1094_p11)
}
  0x6e   : > { %958 = dma.hbm_to_vmem [thread:$0]  (!%p1376_p10), %s1385_s13, 512, %s1420_s27, %s1422_s6, %s1684_s17, %s1684_s17, %s1683_s23  }
  0x6f   : > { %p1685_p0 = scmp.ne.s32.totalorder %s1675_s26, 0 }
  0x70   : > { %s1454_s20 = sand.u32 (!%p1685_p0), 1, %s1224_s19   ;;  %p1686_p4 = scmp.ne.s32.totalorder (!%p1685_p0), %s1673_s24, 0 }
  0x71   : > { %254 = sbr.rel (%p1685_p0) target bundleno = 427 (0x1ab), region = 32  ;;  %s1457_s14 = sshll.u32 (!%p1685_p0), %s1454_s20, 5 }
  0x72   : > { %s257_s15 = scalar_lea.sflag (!%p1685_p0), [#allocation3], %s1454_s20  ;;  %s1461_s9 = scalar_lea.vmem (!%p1685_p0), [#allocation2], %s1457_s14 }
  0x78   : > { %1199 = dma.done.wait (%p1686_p4), %s257_s15, 512  }
  0x79   : > { %1201 = vsyncadd (%p1686_p4), %s257_s15, 4294966784  ;;  %s265_s26 = sand.u32 1, %s1295_s22   ;;  %s1471_s23 = scalar_lea.vmem [#allocation5], %s1457_s14 }
  0x7a   : > { %s266_s13 = scalar_lea.sflag [#allocation6], %s265_s26 }
  0x7b   : > { %1203 = dma.done.wait (%p1686_p4), %s266_s13, 512  }
  0x7c   : > { %1205 = vsyncadd (%p1686_p4), %s266_s13, 4294966784  ;;  %p1687_p10 = scmp.eq.s32.totalorder %s1295_s22, 0 }
  0x7e   : > { %1207 = dma.done.wait (%p1687_p10), [#allocation6], 1024   ;;  %p1688_p13 = pmov %p1687_p10 }
  0x7f   : > { %v337_v0 = vld [vmem:[#allocation7] sm:$0xff]  ;;  %v338_v1 = vld [vmem:[#allocation7 + $0x8] sm:$0xff]  ;;  %v339_v2 = vld [vmem:[#allocation7 + $0x10] sm:$0xff]  ;;  %vm332_vm0 = vcmask 523264   ;;  %s1491_s24 = scalar_lea.vmem [#allocation11], %s1457_s14  ;;  %s1509_s17 = scalar_lea.vmem [#allocation8], %s1457_s14 }
  0x80   : > { %1209 = vsyncadd (%p1688_p13), [#allocation6], 4294966272  ;;  %v902_v3 = vpack.c.bf16 %v338_v1, %v337_v0  ;;  %v340_v4 = vld [vmem:[#allocation7 + $0x18] sm:$0xff]  ;;  %v341_v6 = vld [vmem:[#allocation7 + $0x20] sm:$0xff]  ;;  %s587_s27 = sshll.u32 %s1509_s17, 4  ;;  %s1513_s8 = scalar_lea.vmem [#allocation9], %s1457_s14  ;;  %s1522_s27 = int_to_ptr.vmem [resolvable:$true] %s587_s27 }
  0x81   : > { %v906_v5 = vpack.c.bf16 %v340_v4, %v339_v2  ;;  %v342_v7 = vld [vmem:[#allocation7 + $0x28] sm:$0xff]  ;;  %v324_v8 = vld [vmem:[%s1471_s23] sm:$0xff]  ;;  %v322_v14 = vld [vmem:[%s1461_s9 + $0x10] sm:$0xff]  ;;  %s603_s6 = sshll.u32 %s1513_s8, 4  ;;  %s619_s29 = sshll.u32 %s1491_s24, 4  ;;  %s1524_s6 = int_to_ptr.vmem [resolvable:$true] %s603_s6  ;;  %s1544_s29 = int_to_ptr.vmem [resolvable:$true] %s619_s29 }
  0x82   : > { %903 = vmatprep.subr.bf16.mxu0 %v902_v3  ;;  %919 = vmatprep.subr.bf16.mxu1 %v902_v3  ;;  %v320_v9 = vld [vmem:[%s1461_s9] sm:$0xff]  ;;  %v321_v10 = vld [vmem:[%s1461_s9 + $0x8] sm:$0xff]  ;;  %v326_v15 = vld [vmem:[%s1471_s23 + $0x10] sm:$0xff]  ;;  %v910_v17 = vpack.c.bf16 %v342_v7, %v341_v6  ;;  %s831_s16 = sshll.u32 %s1295_s22, 9  ;;  %s1557_s13 = scalar_lea.sflag [#allocation10], %s265_s26 }
  0x83   : > { %v325_v11 = vld [vmem:[%s1471_s23 + $0x8] sm:$0xff]  ;;  %905 = vmatpush3.bf16.msra.mxu0 %v902_v3  ;;  %921 = vmatpush3.bf16.msra.mxu1 %v902_v3  ;;  %v328_v12 = vsub.f32 %v320_v9, %v324_v8  ;;  %v323_v16 = vld [vmem:[%s1461_s9 + $0x18] sm:$0xff]  ;;  %v330_v18 = vsub.f32 %v322_v14, %v326_v15  ;;  %v343_v20 = vld [vmem:[#allocation7 + $0x30] sm:$0xff]  ;;  %s1533_s12 = scalar_lea.hbm %s1659_s4, %s831_s16  ;;  %s1542_s0 = scalar_lea.hbm %s1658_s3, %s831_s16 }
  0x84   : > { %v329_v13 = vsub.f32 %v321_v10, %v325_v11  ;;  %907 = vmatprep.subr.bf16.mxu0 %v906_v5  ;;  %923 = vmatprep.subr.bf16.mxu1 %v906_v5  ;;  %v327_v19 = vld [vmem:[%s1471_s23 + $0x18] sm:$0xff]  ;;  %s1553_s9 = scalar_lea.hbm %s1660_s5, %s831_s16  ;;  %s1098_s23 = scalar_lea.vmem %s1524_s6, 512 }
  0x85   : > { %v344_v21 = vld [vmem:[#allocation7 + $0x38] sm:$0xff]  ;;  %874 = vmatprep.mubr.msk.f32.mxu0 %vm332_vm0, %v324_v8  ;;  %333 = vst.msk [vmem:[%s1491_s24] sm:$0xff] %vm332_vm0, %v328_v12  ;;  %896 = vmatprep.mubr.msk.f32.mxu1 %vm332_vm0, %v328_v12  ;;  %v331_v22 = vsub.f32 %v323_v16, %v327_v19  ;;  %335 = vst.msk [vmem:[%s1491_s24 + $0x10] sm:$0xff] %vm332_vm0, %v330_v18  ;;  %p1099_p3 = scmp.ne.s32.totalorder %s1524_s6, %s1098_s23 }
  0x86   : > { %334 = vst.msk [vmem:[%s1491_s24 + $0x8] sm:$0xff] %vm332_vm0, %v329_v13  ;;  %v914_v23 = vpack.c.bf16 %v344_v21, %v343_v20 }
  0x87   : > { %909 = vmatpush3.bf16.msra.mxu0 %v906_v5  ;;  %925 = vmatpush3.bf16.msra.mxu1 %v906_v5  ;;  %336 = vst.msk [vmem:[%s1491_s24 + $0x18] sm:$0xff] %vm332_vm0, %v331_v22  ;;  %p1100_p7 = pnand %p1099_p3, %p1362_p12  ;;  %s1239_s24 = smov [#allocation9]  }
  0x88   : > { %911 = vmatprep.subr.bf16.mxu0 %v910_v17  ;;  %927 = vmatprep.subr.bf16.mxu1 %v910_v17  ;;  %s1102_s11 = sshll.u32 %s1239_s24, 4  ;;  %s1103_s11 = int_to_ptr.vmem [resolvable:$false] %s1102_s11 }
  0x89   : > { %p1101_p9 = pneg %p1100_p7  ;;  %s1104_s2 = scalar_lea.vmem %s1103_s11, 1024 }
  0x8a   : > { %p1105_p1 = scmp.lt.s32.totalorder %s1524_s6, %s1103_s11  ;;  %p1106_p5 = scmp.lt.s32.totalorder %s1104_s2, %s1098_s23 }
  0x8b   : > { %913 = vmatpush3.bf16.msra.mxu0 %v910_v17  ;;  %929 = vmatpush3.bf16.msra.mxu1 %v910_v17 }
  0x8c   : > { %915 = vmatprep.subr.bf16.mxu0 %v914_v23  ;;  %931 = vmatprep.subr.bf16.mxu1 %v914_v23  ;;  %p1107_p2 = por %p1106_p5, %p1105_p1 }
  0x8e   : > { %p1108_p6 = pnand %p1107_p2, %p1101_p9 }
  0x8f   : > { %917 = vmatpush3.bf16.msra.mxu0 %v914_v23  ;;  %933 = vmatpush3.bf16.msra.mxu1 %v914_v23 }
  0x92   : > { %875 = vmatmul.mubr.msk.f32.vlgmr.msra.gmra.mrb[0].mxu0 %vm332_vm0, %v325_v11  ;;  %897 = vmatmul.mubr.msk.f32.vlgmr.msra.gmra.mrb[0].mxu1 %vm332_vm0, %v329_v13 }
  0x93   : > { %877 = vmatprep.mubr.msk.f32.mxu0 %vm332_vm0, %v326_v15  ;;  %899 = vmatprep.mubr.msk.f32.mxu1 %vm332_vm0, %v330_v18 }
  0x96   : > { %878 = vmatmul.mubr.msk.f32.gmra.mrb[2].mxu0 %vm332_vm0, %v327_v19  ;;  %900 = vmatmul.mubr.msk.f32.gmra.mrb[2].mxu1 %vm332_vm0, %v331_v22 }
 0x165   : > { %v876_v24 = vpop.f32.mrb[0].mxu0  ;;  %v898_v25 = vpop.f32.mrb[0].mxu1 }
 0x166   : > { %v540_v26 = vmul.f32 2.0, %v876_v24  ;;  %v552_v27 = vmul.f32 2.0, %v898_v25  ;;  %v423_v28 = vpop.f32.mrb[1].mxu0  ;;  %v520_v29 = vpop.f32.mrb[1].mxu1 }
 0x167   : > { %v539_v30 = vmul.f32 2.0, %v423_v28  ;;  %v551_v31 = vmul.f32 2.0, %v520_v29 }
 0x168   : > { %v811_v32 = vadd.f32 -1.0, %v540_v26  ;;  %v815_v33 = vadd.f32 -1.0, %v552_v27 }
 0x169   : > { %v810_v34 = vadd.f32 -1.0, %v539_v30  ;;  %v814_v35 = vadd.f32 -1.0, %v551_v31  ;;  %v879_v36 = vpop.f32.mrb[2].mxu0  ;;  %v901_v37 = vpop.f32.mrb[2].mxu1 }
 0x16a   : > { %548 = vst.msk [vmem:[%s1509_s17 + $0x8] sm:$0xff] %vm332_vm0, %v811_v32  ;;  %560 = vst.msk [vmem:[%s1513_s8 + $0x8] sm:$0xff] %vm332_vm0, %v815_v33  ;;  %v542_v38 = vmul.f32 2.0, %v879_v36  ;;  %v554_v39 = vmul.f32 2.0, %v901_v37  ;;  %v433_v40 = vpop.f32.mrb[3].mxu0  ;;  %v530_v41 = vpop.f32.mrb[3].mxu1 }
 0x16b   : > { %547 = vst.msk [vmem:[%s1509_s17] sm:$0xff] %vm332_vm0, %v810_v34  ;;  %559 = vst.msk [vmem:[%s1513_s8] sm:$0xff] %vm332_vm0, %v814_v35  ;;  %v541_v42 = vmul.f32 2.0, %v433_v40  ;;  %v553_v43 = vmul.f32 2.0, %v530_v41 }
 0x16c   : > { %v813_v44 = vadd.f32 -1.0, %v542_v38  ;;  %v817_v45 = vadd.f32 -1.0, %v554_v39 }
 0x16d   : > { %v812_v46 = vadd.f32 -1.0, %v541_v42  ;;  %v816_v47 = vadd.f32 -1.0, %v553_v43 }
 0x16e   : > { %550 = vst.msk [vmem:[%s1509_s17 + $0x18] sm:$0xff] %vm332_vm0, %v813_v44  ;;  %562 = vst.msk [vmem:[%s1513_s8 + $0x18] sm:$0xff] %vm332_vm0, %v817_v45 }
 0x16f   : > { %549 = vst.msk [vmem:[%s1509_s17 + $0x10] sm:$0xff] %vm332_vm0, %v812_v46  ;;  %561 = vst.msk [vmem:[%s1513_s8 + $0x10] sm:$0xff] %vm332_vm0, %v816_v47 }
 0x170   : > { %1111 = shalt.err (!%p1108_p6)
}
 0x171   : > { %s1112_s22 = scalar_lea.hbm %s1533_s12, 512  ;;  %s1116_s8 = scalar_lea.hbm %s1659_s4, 1536 }
 0x172   : > { %p1113_p8 = scmp.ne.s32.totalorder %s1533_s12, %s1112_s22  ;;  %p1117_p4 = scmp.lt.u32.totalorder %s1533_s12, %s1659_s4 }
 0x173   : > { %p1118_p10 = scmp.lt.u32.totalorder %s1116_s8, %s1112_s22  ;;  %p1120_p3 = scmp.lt.u32.totalorder %s1112_s22, %s1533_s12 }
 0x174   : > { %p1114_p11 = pnand %p1113_p8, %p1362_p12 }
 0x175   : > { %p1119_p13 = por %p1118_p10, %p1117_p4 }
 0x176   : > { %p1115_p0 = pneg %p1114_p11 }
 0x177   : > { %p1121_p7 = por %p1120_p3, %p1119_p13 }
 0x179   : > { %p1122_p9 = pnand %p1121_p7, %p1115_p0 }
 0x17b   : > { %1125 = shalt.err (!%p1122_p9)
}
 0x17c   : > { %s1240_s7 = smov 128   ;;  %s1241_s14 = smov 8  }
 0x17d   : > { %943 = dma.vmem_to_hbm [thread:$0]  (%p1362_p12), %s1524_s6, 512, %s1533_s12, %s1557_s13, %s1240_s7, %s1240_s7, %s1241_s14  }
 0x17e   : > { %s564_s15 = scalar_lea.sflag [#allocation4], %s1454_s20  ;;  %s1126_s23 = scalar_lea.vmem %s1522_s27, 512 }
 0x17f   : > { %p1127_p1 = scmp.ne.s32.totalorder %s1522_s27, %s1126_s23  ;;  %s1242_s24 = smov [#allocation8]  }
 0x180   : > { %s1130_s11 = sshll.u32 %s1242_s24, 4  ;;  %s1131_s11 = int_to_ptr.vmem [resolvable:$false] %s1130_s11 }
 0x181   : > { %p1128_p5 = pnand %p1127_p1, %p1362_p12  ;;  %s1132_s2 = scalar_lea.vmem %s1131_s11, 1024 }
 0x182   : > { %p1133_p6 = scmp.lt.s32.totalorder %s1522_s27, %s1131_s11  ;;  %p1134_p8 = scmp.lt.s32.totalorder %s1132_s2, %s1126_s23 }
 0x183   : > { %p1129_p2 = pneg %p1128_p5 }
 0x184   : > { %p1135_p11 = por %p1134_p8, %p1133_p6 }
 0x186   : > { %p1136_p0 = pnand %p1135_p11, %p1129_p2 }
 0x188   : > { %1139 = shalt.err (!%p1136_p0)
}
 0x189   : > { %s1140_s6 = scalar_lea.hbm %s1542_s0, 512  ;;  %s1144_s26 = scalar_lea.hbm %s1658_s3, 1536 }
 0x18a   : > { %p1141_p4 = scmp.ne.s32.totalorder %s1542_s0, %s1140_s6  ;;  %p1145_p3 = scmp.lt.u32.totalorder %s1542_s0, %s1658_s3 }
 0x18b   : > { %p1146_p7 = scmp.lt.u32.totalorder %s1144_s26, %s1140_s6  ;;  %p1148_p1 = scmp.lt.u32.totalorder %s1140_s6, %s1542_s0 }
 0x18c   : > { %p1142_p10 = pnand %p1141_p4, %p1362_p12 }
 0x18d   : > { %p1147_p9 = por %p1146_p7, %p1145_p3 }
 0x18e   : > { %p1143_p13 = pneg %p1142_p10 }
 0x18f   : > { %p1149_p5 = por %p1148_p1, %p1147_p9 }
 0x191   : > { %p1150_p2 = pnand %p1149_p5, %p1143_p13 }
 0x193   : > { %1153 = shalt.err (!%p1150_p2)
}
 0x194   : > { %942 = dma.vmem_to_hbm [thread:$0]  (%p1362_p12), %s1522_s27, 512, %s1542_s0, %s564_s15, %s1240_s7, %s1240_s7, %s1241_s14  }
 0x195   : > { %s1154_s16 = scalar_lea.vmem %s1544_s29, 512  ;;  %s1243_s28 = smov [#allocation11]  }
 0x196   : > { %p1155_p6 = scmp.ne.s32.totalorder %s1544_s29, %s1154_s16  ;;  %s1158_s23 = sshll.u32 %s1243_s28, 4  ;;  %s1159_s23 = int_to_ptr.vmem [resolvable:$false] %s1158_s23 }
 0x197   : > { %s1160_s24 = scalar_lea.vmem %s1159_s23, 1024  ;;  %p1161_p0 = scmp.lt.s32.totalorder %s1544_s29, %s1159_s23 }
 0x198   : > { %p1156_p8 = pnand %p1155_p6, %p1362_p12  ;;  %p1162_p4 = scmp.lt.s32.totalorder %s1160_s24, %s1154_s16 }
 0x19a   : > { %p1157_p11 = pneg %p1156_p8  ;;  %p1163_p10 = por %p1162_p4, %p1161_p0 }
 0x19c   : > { %p1164_p13 = pnand %p1163_p10, %p1157_p11 }
 0x19e   : > { %1167 = shalt.err (!%p1164_p13)
}
 0x19f   : > { %s1168_s20 = scalar_lea.hbm %s1553_s9, 512  ;;  %s1172_s15 = scalar_lea.hbm %s1660_s5, 1536 }
 0x1a0   : > { %p1169_p3 = scmp.ne.s32.totalorder %s1553_s9, %s1168_s20  ;;  %p1173_p1 = scmp.lt.u32.totalorder %s1553_s9, %s1660_s5 }
 0x1a1   : > { %p1174_p5 = scmp.lt.u32.totalorder %s1172_s15, %s1168_s20  ;;  %p1176_p6 = scmp.lt.u32.totalorder %s1168_s20, %s1553_s9 }
 0x1a2   : > { %p1170_p7 = pnand %p1169_p3, %p1362_p12 }
 0x1a3   : > { %p1175_p2 = por %p1174_p5, %p1173_p1 }
 0x1a4   : > { %p1171_p9 = pneg %p1170_p7 }
 0x1a5   : > { %p1177_p8 = por %p1176_p6, %p1175_p2 }
 0x1a7   : > { %p1178_p11 = pnand %p1177_p8, %p1171_p9 }
 0x1a9   : > { %1181 = shalt.err (!%p1178_p11)
}
 0x1aa   : > { %944 = dma.vmem_to_hbm [thread:$0]  (%p1362_p12), %s1544_s29, 512, %s1553_s9, %s1557_s13, %s1240_s7, %s1240_s7, %s1241_s14  }
 0x1ab PF: > { %p972_p0 = scmp.ge.s32.totalorder %s1232_s21, 2  ;;  %s634_s6 = sand.u32 1, %s1220_s18  }
 0x1ac   : > { %p1689_p4 = scmp.ne.s32.totalorder %s1674_s25, 0  ;;  %s635_s12 = scalar_lea.sflag [#allocation4], %s634_s6 }
 0x1ae   : > { %p960_p10 = pnand %p972_p0, %p1689_p4 }
 0x1b0   : > { %1211 = dma.done.wait (!%p960_p10), %s635_s12, 512  }
 0x1b1   : > { %1213 = vsyncadd (!%p960_p10), %s635_s12, 4294966784  ;;  %s1690_s10 = sadd.s32 4294967294, %s1232_s21  }
 0x1b2   : > { %s643_s22 = sand.u32 1, %s1690_s10  }
 0x1b3   : > { %s644_s26 = scalar_lea.sflag [#allocation10], %s643_s22 }
 0x1b4   : > { %1215 = dma.done.wait (!%p960_p10), %s644_s26, 1024  }
 0x1b5   : > { %1217 = vsyncadd (!%p960_p10), %s644_s26, 4294966272  ;;  %s1691_s29 = sld [smem:[#allocation17_spill]]  ;;  %s1692_s20 = sld [smem:[#allocation18_spill]] }
 0x1b6   : > { %p25_p12 = scmp.ge.s32.totalorder %s1329_s30, 5   ;;  %s1693_s18 = smov %s1224_s19 }
 0x1b7   : > { %s1695_s21 = smov %s1329_s30 }
 0x1b8   :  { %27 = sbr.rel (!%p25_p12) target bundleno = 12 (0xc), region = 126 }
 0x1bb   : > { %s1694_s19 = smov %s1691_s29 }
 0x1bf   :  { %658 = vsyncpa [#allocation3], 1 }
 0x1c0   :  { %660 = vsyncpa [#allocation3 + $0x1], 1 }
 0x1c1   :  { %661 = vsyncpa [#allocation6], 1 }
 0x1c2   :  { %663 = vsyncpa [#allocation6 + $0x1], 1 }
 0x1c3   :  { %664 = vsyncpa [#allocation4], 1 }
 0x1c4   :  { %666 = vsyncpa [#allocation4 + $0x1], 1 }
 0x1c5   :  { %667 = vsyncpa [#allocation10], 1 }
 0x1c6   :  { %669 = vsyncpa [#allocation10 + $0x1], 1 }

// kernel: _lambda_.13
= control target key start
LH: loop header
LB: loop body
LE: loop exit
PB: predicated region body
PF: predicated region fallthrough
CT: control target
= control target key end

     0   :  { %8 = vsyncpa [#allocation3], 0  ;;  %s2073_s0 = inlined_call_operand.hbm [shape: bf16[96,288], index: 0, kind: input, shape index: {}]   ;;  %s2074_s1 = inlined_call_operand.hbm [shape: bf16[3,288,32], index: 1, kind: input, shape index: {}]   ;;  %s2075_s2 = inlined_call_operand.hbm [shape: f32[3,32], index: 2, kind: input, shape index: {}]   ;;  %s2076_s3 = inlined_call_operand.hbm [shape: bf16[64,32], index: 3, kind: output, shape index: {}]  }
   0x1   :  { %10 = vsyncpa [#allocation3 + $0x1], 0 }
   0x2   :  { %11 = vsyncpa [#allocation6], 0 }
   0x3   :  { %12 = vsyncpa [#allocation4], 0 }
   0x4   :  { %14 = vsyncpa [#allocation4 + $0x1], 0  ;;  %s1801_s12 = smov 0   ;;  %s1803_s13 = smov 0  }
   0x5   :  { %s1805_s14 = smov 0   ;;  %s1807_s15 = smov 0  }
   0x6 LB: > { %s1822_s16 = sadd.s32 4294967295, %s1769_s15   ;;  %s1224_s17 = sadd.s32 4294967294, %s1769_s15   ;;  %s1769_s15 = sphi %s1807_s15, %s2096_s15   ;;  %s1765_s14 = sphi %s1805_s14, %s2095_s14   ;;  %s1761_s13 = sphi %s1803_s13, %s2094_s13   ;;  %s1757_s12 = sphi %s1801_s12, %s2093_s12  }
   0x7   : > { %p40_p0 = scmp.ne.s32.totalorder %s1761_s13, %s1757_s12  ;;  %p2077_p1 = scmp.eq.s32.totalorder %s1822_s16, 0 }
   0x8   : > { %p112_p3 = scmp.eq.s32.totalorder %s1224_s17, 1  ;;  %p1225_p5 = scmp.ge.s32.totalorder %s1769_s15, 1 }
   0x9   : > { %p1831_p4 = por %p2077_p1, %p40_p0  ;;  %p119_p7 = scmp.lt.s32.totalorder %s1769_s15, 3 }
   0xa   : > { %p1836_p6 = por %p112_p3, %p40_p0  ;;  %s1771_s21 = smov [#allocation5]  }
   0xb   : > { %s2080_s18 = scalar_select %p1831_p4, 1, 0 }
   0xc   : > { %s2081_s19 = scalar_select %p1836_p6, 1, 0 }
   0xd   : > { %p1841_p8 = pnand %p1225_p5, %p119_p7  ;;  %s131_s22 = sshll.u32 %s1771_s21, 4  ;;  %s1845_s22 = int_to_ptr.vmem [resolvable:$true] %s131_s22 }
   0xe   : > { %s1772_s24 = smov [#allocation7]   ;;  %s1613_s28 = scalar_lea.hbm %s2074_s1, 6912 }
   0xf   : > { %p1481_p9 = pneg %p1841_p8  ;;  %s145_s25 = sshll.u32 %s1772_s24, 4  ;;  %s1856_s25 = int_to_ptr.vmem [resolvable:$true] %s145_s25 }
  0x10   : > { %p1614_p12 = scmp.ne.s32.totalorder %s2074_s1, %s1613_s28  ;;  %p1620_p5 = scmp.lt.u32.totalorder %s1613_s28, %s2074_s1 }
  0x11   : > { %p1852_p11 = pnand %p1481_p9, %p2077_p1 }
  0x13   : > { %p1615_p13 = pneg %p1852_p11 }
  0x15   : > { %p1616_p0 = pnand %p1615_p13, %p1614_p12 }
  0x17   : > { %p1617_p3 = pneg %p1616_p0 }
  0x19   : > { %p1622_p7 = pnand %p1620_p5, %p1617_p3 }
  0x1b   : > { %1625 = shalt.err (!%p1622_p7)
}
  0x1c   : > { %s1626_s6 = scalar_lea.vmem %s1845_s22, 6912  ;;  %p1634_p2 = scmp.lt.s32.totalorder %s1845_s22, %s1845_s22 }
  0x1d   : > { %p1627_p9 = scmp.ne.s32.totalorder %s1845_s22, %s1626_s6  ;;  %p1635_p12 = scmp.lt.s32.totalorder %s1626_s6, %s1626_s6 }
  0x1f   : > { %p1629_p10 = pnand %p1627_p9, %p1615_p13  ;;  %p1636_p0 = por %p1635_p12, %p1634_p2 }
  0x21   : > { %p1630_p1 = pneg %p1629_p10 }
  0x23   : > { %p1637_p6 = pnand %p1636_p0, %p1630_p1 }
  0x25   : > { %1640 = shalt.err (!%p1637_p6)
}
  0x26   : > { %s1773_s7 = smov 64   ;;  %s1774_s8 = smov 4  }
  0x27   : > { %1484 = dma.hbm_to_vmem [thread:$0]  (!%p1852_p11), %s2074_s1, 6912, %s1845_s22, [#allocation6], %s1773_s7, %s1773_s7, %s1774_s8  }
  0x28   : > { %s1641_s21 = scalar_lea.hbm %s2075_s2, 64 }
  0x29   : > { %p1642_p2 = scmp.ne.s32.totalorder %s2075_s2, %s1641_s21  ;;  %p1648_p10 = scmp.lt.u32.totalorder %s1641_s21, %s2075_s2 }
  0x2b   : > { %p1644_p1 = pnand %p1642_p2, %p1615_p13 }
  0x2d   : > { %p1645_p6 = pneg %p1644_p1 }
  0x2f   : > { %p1650_p3 = pnand %p1648_p10, %p1645_p6 }
  0x31   : > { %1653 = shalt.err (!%p1650_p3)
}
  0x32   : > { %s1654_s22 = scalar_lea.vmem %s1856_s25, 64  ;;  %p1662_p12 = scmp.lt.s32.totalorder %s1856_s25, %s1856_s25 }
  0x33   : > { %p1655_p5 = scmp.ne.s32.totalorder %s1856_s25, %s1654_s22  ;;  %p1663_p0 = scmp.lt.s32.totalorder %s1654_s22, %s1654_s22 }
  0x35   : > { %p1657_p7 = pnand %p1655_p5, %p1615_p13  ;;  %p1664_p2 = por %p1663_p0, %p1662_p12 }
  0x37   : > { %p1658_p9 = pneg %p1657_p7 }
  0x39   : > { %p1665_p1 = pnand %p1664_p2, %p1658_p9 }
  0x3b   : > { %1668 = shalt.err (!%p1665_p1)
}
  0x3c   : > { %1487 = dma.hbm_to_vmem [thread:$0]  (!%p1852_p11), %s2075_s2, 64, %s1856_s25, [#allocation6]  }
  0x3d   : > { %s1911_s4 = sadd.s32 1, %s1769_s15   ;;  %s27_s5 = sadd.s32 1, %s1765_s14 }
  0x3e   : > { %s24_s23 = ssub.s32 %s1769_s15, %s1911_s4  ;;  %p34_p6 = scmp.ne.s32.totalorder %s1765_s14, %s1761_s13 }
  0x3f   : > { %p25_p13 = scmp.eq.s32.totalorder %s24_s23, 0  ;;  %p35_p10 = scmp.eq.s32.totalorder %s1769_s15, 0 }
  0x40   : > { %p1498_p3 = scmp.lt.s32.totalorder %s1769_s15, 2  ;;  %p2084_p7 = scmp.eq.s32.totalorder %s1822_s16, 1 }
  0x41   : > { %s1921_s6 = scalar_select %p25_p13, %s1765_s14, %s27_s5  }
  0x42   : > { %p36_p5 = por %p35_p10, %p34_p6  ;;  %p1925_p9 = por %p2084_p7, %p34_p6 }
  0x43   : > { %s156_s8 = sand.u32 1, %s1765_s14   ;;  %s1499_s9 = smul.u32 1152, %s1769_s15 }
  0x44   : > { %s2085_s7 = scalar_select %p1925_p9, 1, 0 }
  0x45   : > { %s1466_s25 = smul.u32 72, %s156_s8  ;;  %s1934_s17 = scalar_lea.hbm %s2073_s0, %s1499_s9 }
  0x46   : > { %p1936_p11 = pnand %p1498_p3, %p36_p5  ;;  %s1942_s27 = scalar_lea.sflag [#allocation3], %s156_s8 }
  0x47   : > { %s160_s24 = scalar_lea.vmem [#allocation2], %s1466_s25  ;;  %s1669_s28 = scalar_lea.hbm %s1934_s17, 1152 }
  0x48   : > { %s168_s26 = sshll.u32 %s160_s24, 4  ;;  %p1670_p12 = scmp.ne.s32.totalorder %s1934_s17, %s1669_s28  ;;  %s1940_s26 = int_to_ptr.vmem [resolvable:$true] %s168_s26 }
  0x49   : > { %p1671_p0 = pneg %p1936_p11  ;;  %s1674_s30 = scalar_lea.hbm %s2073_s0, 2304 }
  0x4a   : > { %p1675_p13 = scmp.lt.u32.totalorder %s1934_s17, %s2073_s0  ;;  %p1676_p6 = scmp.lt.u32.totalorder %s1674_s30, %s1669_s28 }
  0x4b   : > { %p1672_p2 = pnand %p1671_p0, %p1670_p12  ;;  %p1678_p3 = scmp.lt.u32.totalorder %s1669_s28, %s1934_s17 }
  0x4c   : > { %p1677_p10 = por %p1676_p6, %p1675_p13 }
  0x4d   : > { %p1673_p1 = pneg %p1672_p2 }
  0x4e   : > { %p1679_p5 = por %p1678_p3, %p1677_p10 }
  0x50   : > { %p1680_p7 = pnand %p1679_p5, %p1673_p1 }
  0x52   : > { %1683 = shalt.err (!%p1680_p7)
}
  0x53   : > { %s1684_s8 = scalar_lea.vmem %s1940_s26, 1152  ;;  %s1775_s9 = smov [#allocation2]  }
  0x54   : > { %p1685_p12 = scmp.ne.s32.totalorder %s1940_s26, %s1684_s8  ;;  %s1689_s25 = sshll.u32 %s1775_s9, 4  ;;  %s1690_s25 = int_to_ptr.vmem [resolvable:$false] %s1689_s25 }
  0x55   : > { %s1691_s10 = scalar_lea.vmem %s1690_s25, 2304  ;;  %p1692_p4 = scmp.lt.s32.totalorder %s1940_s26, %s1690_s25 }
  0x56   : > { %p1687_p2 = pnand %p1685_p12, %p1671_p0  ;;  %p1693_p13 = scmp.lt.s32.totalorder %s1691_s10, %s1684_s8 }
  0x58   : > { %p1688_p9 = pneg %p1687_p2  ;;  %p1694_p6 = por %p1693_p13, %p1692_p4 }
  0x5a   : > { %p1695_p10 = pnand %p1694_p6, %p1688_p9 }
  0x5c   : > { %1698 = shalt.err (!%p1695_p10)
}
  0x5d   : > { %s1776_s11 = smov 192   ;;  %s1777_s24 = smov 12  }
  0x5e   : > { %1491 = dma.hbm_to_vmem [thread:$0]  (!%p1936_p11), %s1934_s17, 1152, %s1940_s26, %s1942_s27, %s1776_s11, %s1776_s11, %s1777_s24  }
  0x5f   : > { %180 = sbr.rel (%p1841_p8) target bundleno = 427 (0x1ab), region = 32  ;;  %s1973_s28 = sand.u32 (!%p1841_p8), 1, %s1761_s13  }
  0x60   : > { %s1468_s22 = smul.u32 (!%p1841_p8), 72, %s1973_s28  ;;  %s183_s29 = scalar_lea.sflag (!%p1841_p8), [#allocation3], %s1973_s28 }
  0x61   : > { %p2087_p4 = scmp.ne.s32.totalorder (!%p1841_p8), %s2080_s18, 0 }
  0x62   : > { %s1977_s30 = scalar_lea.vmem (!%p1841_p8), [#allocation2], %s1468_s22 }
  0x66   : > { %1744 = dma.done.wait (%p2087_p4), %s183_s29, 1152  }
  0x67   : > { %1746 = vsyncadd (%p2087_p4), %s183_s29, 4294966144  ;;  %p2088_p9 = scmp.eq.s32.totalorder %s1822_s16, 0 }
  0x69   : > { %1748 = dma.done.wait (%p2088_p9), [#allocation6], 6976   ;;  %p2089_p8 = pmov %p2088_p9 }
  0x6a   : > { %v1543_v0 = vld [vmem:[#allocation5 + $0xd0] sm:$0xff]   ;;  %v1546_v3 = vld [vmem:[#allocation5 + $0xd8] sm:$0xff]   ;;  %v1549_v6 = vld [vmem:[#allocation5 + $0xe0] sm:$0xff]   ;;  %vm441_vm0 = vcmask 261120   ;;  %s1233_s18 = sshll.u32 %s1973_s28, 4  ;;  %vm1113_vm2 = vcmask 257024  }
  0x6b   : > { %1750 = vsyncadd (%p2089_p8), [#allocation6], 4294960320  ;;  %v1544_v1 = vld [vmem:[#allocation5 + $0x110] sm:$0xff]   ;;  %1326 = vmatprep.subr.bf16.mxu0 %v1543_v0  ;;  %v1547_v4 = vld [vmem:[#allocation5 + $0x118] sm:$0xff]   ;;  %s216_s20 = scalar_lea.vmem [#allocation8], %s1233_s18  ;;  %s1325_s17 = sshll.u32 %s1822_s16, 8 }
  0x6c   : > { %v1545_v2 = vld [vmem:[#allocation5 + $0x90] sm:$0xff]   ;;  %1422 = vmatprep.subr.bf16.mxu1 %v1544_v1  ;;  %v1548_v5 = vld [vmem:[#allocation5 + $0x98] sm:$0xff]   ;;  %v1988_v7 = vld [vmem:[%s1977_s30 + $0x14] sm:$0xf]  ;;  %s1132_s21 = sshll.u32 %s216_s20, 4  ;;  %s2026_s23 = scalar_lea.hbm %s2076_s3, %s1325_s17  ;;  %s2028_s21 = int_to_ptr.vmem [resolvable:$true] %s1132_s21 }
  0x6d   : > { %1327 = vmatpush3.bf16.msra.mxu0 %v1545_v2  ;;  %1423 = vmatpush3.bf16.msra.mxu1 %v1544_v1  ;;  %v1991_v8 = vld [vmem:[%s1977_s30 + $0x20] sm:$0xf]  ;;  %v1994_v9 = vld [vmem:[%s1977_s30 + $0x2c] sm:$0xf]  ;;  %v265_v10 = vld [vmem:[%s1977_s30 + $0x38] sm:$0xf] }
  0x6e   : > { %1328 = vmatprep.subr.bf16.mxu0 %v1546_v3  ;;  %1424 = vmatprep.subr.bf16.mxu1 %v1547_v4  ;;  %v1236_v11 = vcombine.low %v1988_v7, %v1991_v8  ;;  %v1239_v12 = vcombine.low %v1994_v9, %v265_v10  ;;  %v1554_v13 = vld [vmem:[#allocation5 + $0x40] sm:$0xff]   ;;  %v1557_v16 = vld [vmem:[#allocation5 + $0xe8] sm:$0xff]   ;;  %v1561_v20 = vld [vmem:[#allocation5 + $0xf0] sm:$0xff]   ;;  %s1119_s16 = scalar_lea.sflag [#allocation4], %s1973_s28  ;;  %s1699_s5 = scalar_lea.vmem %s2028_s21, 256 }
  0x6f   : > { %v1555_v14 = vld [vmem:[#allocation5 + $0xa0] sm:$0xff]   ;;  %v1558_v17 = vld [vmem:[#allocation5 + $0x48] sm:$0xff]   ;;  %v1562_v21 = vld [vmem:[#allocation5 + $0x50] sm:$0xff]   ;;  %p1700_p11 = scmp.ne.s32.totalorder %s2028_s21, %s1699_s5  ;;  %p2090_p0 = scmp.ne.s32.totalorder %s2085_s7, 0 }
  0x70   : > { %1426 = vmatprep.mubr.msk.bf16.mxu1 %vm441_vm0, %v1236_v11  ;;  %v1556_v15 = vld [vmem:[#allocation5] sm:$0xff]   ;;  %v1559_v18 = vld [vmem:[#allocation5 + $0xa8] sm:$0xff]   ;;  %v1563_v22 = vld [vmem:[#allocation5 + $0xb0] sm:$0xff]   ;;  %s1778_s8 = smov [#allocation8]  }
  0x71   : > { %1329 = vmatpush3.bf16.msra.mxu0 %v1548_v5  ;;  %1425 = vmatpush3.bf16.msra.mxu1 %v1547_v4  ;;  %v1560_v19 = vld [vmem:[#allocation5 + $0x8] sm:$0xff]   ;;  %v1564_v23 = vld [vmem:[#allocation5 + $0x10] sm:$0xff]   ;;  %v1565_v24 = vld [vmem:[#allocation5 + $0xf8] sm:$0xff]   ;;  %p1701_p1 = pnand %p1700_p11, %p2090_p0  ;;  %s1703_s9 = sshll.u32 %s1778_s8, 4  ;;  %s1704_s9 = int_to_ptr.vmem [resolvable:$false] %s1703_s9 }
  0x72   : > { %1330 = vmatprep.subr.bf16.mxu0 %v1549_v6  ;;  %1358 = vmatprep.subr.bf16.mxu1 %v1554_v13  ;;  %v1566_v25 = vld [vmem:[#allocation5 + $0x58] sm:$0xff]   ;;  %v1569_v28 = vld [vmem:[#allocation5 + $0x100] sm:$0xff]   ;;  %v1573_v32 = vld [vmem:[#allocation5 + $0x108] sm:$0xff]   ;;  %s1705_s25 = scalar_lea.vmem %s1704_s9, 512  ;;  %p1706_p5 = scmp.lt.s32.totalorder %s2028_s21, %s1704_s9 }
  0x73   : > { %v1567_v26 = vld [vmem:[#allocation5 + $0xb8] sm:$0xff]   ;;  %v1570_v29 = vld [vmem:[#allocation5 + $0x60] sm:$0xff]   ;;  %v1574_v33 = vld [vmem:[#allocation5 + $0x68] sm:$0xff]   ;;  %p1702_p3 = pneg %p1701_p1  ;;  %p1707_p7 = scmp.lt.s32.totalorder %s1705_s25, %s1699_s5 }
  0x74   : > { %1427 = vmatmul.mubr.msk.bf16.vlgmr.msra.gmra.mrb[0].mxu1 %vm441_vm0, %v1239_v12  ;;  %v1568_v27 = vld [vmem:[#allocation5 + $0x18] sm:$0xff]   ;;  %v1571_v30 = vld [vmem:[#allocation5 + $0xc0] sm:$0xff]   ;;  %v1575_v34 = vld [vmem:[#allocation5 + $0xc8] sm:$0xff]  }
  0x75   : > { %1331 = vmatpush3.bf16.msra.mxu0 %v1555_v14  ;;  %1359 = vmatpush3.bf16.msra.mxu1 %v1556_v15  ;;  %v1572_v31 = vld [vmem:[#allocation5 + $0x20] sm:$0xff]   ;;  %v1576_v35 = vld [vmem:[#allocation5 + $0x28] sm:$0xff]   ;;  %v1579_v40 = vld [vmem:[#allocation5 + $0x70] sm:$0xff]   ;;  %p1708_p12 = por %p1707_p7, %p1706_p5 }
  0x76   : > { %1332 = vmatprep.subr.bf16.mxu0 %v1557_v16  ;;  %1360 = vmatprep.subr.bf16.mxu1 %v1558_v17  ;;  %v222_v36 = vld [vmem:[%s1977_s30 + $0xc] sm:$0xff]  ;;  %v224_v37 = vld [vmem:[%s1977_s30 + $0x18] sm:$0xff]  ;;  %v220_v48 = vld [vmem:[%s1977_s30] sm:$0xff] }
  0x77   : > { %v1235_v38 = vcombine.high %v222_v36, %v224_v37  ;;  %v1234_v39 = vcombine.low %v222_v36, %v224_v37  ;;  %v1580_v41 = vld [vmem:[#allocation5 + $0x160] sm:$0xff]   ;;  %v1581_v42 = vld [vmem:[#allocation5 + $0x30] sm:$0xff]   ;;  %v1583_v44 = vld [vmem:[#allocation5 + $0x78] sm:$0xff]   ;;  %v1260_v49 = vcombine.low %v220_v48, %v222_v36  ;;  %v1261_v50 = vcombine.high %v220_v48, %v222_v36  ;;  %p1709_p2 = pnand %p1708_p12, %p1702_p3 }
  0x78   : > { %v1582_v43 = vld [vmem:[#allocation5 + $0x120] sm:$0xff]   ;;  %v1584_v45 = vld [vmem:[#allocation5 + $0x168] sm:$0xff]   ;;  %v1585_v46 = vld [vmem:[#allocation5 + $0x38] sm:$0xff]  }
  0x79   : > { %1333 = vmatpush3.bf16.msra.mxu0 %v1559_v18  ;;  %1361 = vmatpush3.bf16.msra.mxu1 %v1560_v19  ;;  %v1586_v47 = vld [vmem:[#allocation5 + $0x128] sm:$0xff]   ;;  %v1589_v51 = vld [vmem:[#allocation5 + $0x170] sm:$0xff]   ;;  %v1591_v53 = vld [vmem:[#allocation5 + $0x178] sm:$0xff]  }
  0x7a   : > { %1334 = vmatprep.subr.bf16.mxu0 %v1561_v20  ;;  %1362 = vmatprep.subr.bf16.mxu1 %v1562_v21  ;;  %v1590_v52 = vld [vmem:[#allocation5 + $0x130] sm:$0xff]   ;;  %v221_v55 = vld [vmem:[%s1977_s30 + $0x8] sm:$0xf]  ;;  %v264_v61 = vld [vmem:[%s1977_s30 + $0x30] sm:$0xff] }
  0x7b   : > { %480 = vmatprep.mubr.bf16.mxu0 %v1235_v38  ;;  %707 = vmatprep.mubr.bf16.mxu1 %v1261_v50  ;;  %v226_v54 = vld [vmem:[%s1977_s30 + $0x24] sm:$0xff]  ;;  %v1599_v63 = vld [vmem:[#allocation5 + $0x88] sm:$0xff]   ;;  %v1262_v1 = vcombine.low %v221_v55, %v1988_v7  ;;  %v1265_v7 = vcombine.low %v1991_v8, %v1994_v9  ;;  %v1609_v12 = vld [vmem:[%s1977_s30 + $0x20] ss:$12 sps:$4 sm:$0xff]  }
  0x7c   : > { %v1264_v56 = vcombine.high %v224_v37, %v226_v54  ;;  %v1594_v57 = vld [vmem:[#allocation5 + $0x80] sm:$0xff]   ;;  %v1592_v58 = vld [vmem:[#allocation5 + $0x138] sm:$0xff]   ;;  %v1263_v60 = vcombine.low %v224_v37, %v226_v54  ;;  %v1238_v62 = vcombine.high %v226_v54, %v264_v61  ;;  %v1237_v0 = vcombine.low %v226_v54, %v264_v61  ;;  %v1600_v3 = vld [vmem:[#allocation5 + $0x188] sm:$0xff]  }
  0x7d   : > { %1335 = vmatpush3.bf16.msra.mxu0 %v1563_v22  ;;  %1363 = vmatpush3.bf16.msra.mxu1 %v1564_v23  ;;  %v1596_v59 = vld [vmem:[#allocation5 + $0x180] sm:$0xff]   ;;  %v1602_v4 = vld [vmem:[#allocation5 + $0x148] sm:$0xff]   ;;  %v1603_v5 = vld [vmem:[#allocation5 + $0x190] sm:$0xff]  }
  0x7e   : > { %1336 = vmatprep.subr.bf16.mxu0 %v1565_v24  ;;  %1364 = vmatprep.subr.bf16.mxu1 %v1566_v25  ;;  %v1597_v2 = vld [vmem:[#allocation5 + $0x140] sm:$0xff]   ;;  %v1604_v10 = vld [vmem:[#allocation5 + $0x150] sm:$0xff]   ;;  %v1608_v11 = vld [vmem:[#allocation5 + $0x1a8] sm:$0xff]  }
  0x7f   : > { %v1606_v6 = vld [vmem:[#allocation5 + $0x1a0] sm:$0xff]   ;;  %v1605_v13 = vld [vmem:[#allocation5 + $0x198] sm:$0xff]   ;;  %v1064_v50 = vld [vmem:[#allocation7] sm:$0x7] }
  0x80   : > { %v1607_v14 = vld [vmem:[#allocation5 + $0x158] sm:$0xff]  }
  0x81   : > { %1337 = vmatpush3.bf16.msra.mxu0 %v1567_v26  ;;  %1365 = vmatpush3.bf16.msra.mxu1 %v1568_v27  ;;  %v779_v15 = vld [vmem:[%s1977_s30 + $0x3c] sm:$0xff]  ;;  %v1610_v9 = vld [vmem:[%s1977_s30 + $0x38] ss:$12 sps:$4 sm:$0xff]  }
  0x82   : > { %1338 = vmatprep.subr.bf16.mxu0 %v1569_v28  ;;  %1366 = vmatprep.subr.bf16.mxu1 %v1570_v29  ;;  %v1290_v8 = vcombine.high %v264_v61, %v779_v15  ;;  %v1289_v16 = vcombine.low %v264_v61, %v779_v15 }
  0x85   : > { %1339 = vmatpush3.bf16.msra.mxu0 %v1571_v30  ;;  %1367 = vmatpush3.bf16.msra.mxu1 %v1572_v31 }
  0x86   : > { %1340 = vmatprep.subr.bf16.mxu0 %v1573_v32  ;;  %1368 = vmatprep.subr.bf16.mxu1 %v1574_v33 }
  0x89   : > { %1341 = vmatpush3.bf16.msra.mxu0 %v1575_v34  ;;  %1369 = vmatpush3.bf16.msra.mxu1 %v1576_v35 }
  0x8a   : > { %1370 = vmatprep.subr.bf16.mxu1 %v1579_v40  ;;  %1390 = vmatprep.subr.bf16.mxu0 %v1580_v41 }
  0x8c   : > { %481 = vmatmul.mubr.bf16.vlgmr.msra.gmra.mrb[0].mxu0 %v1234_v39 }
  0x8d   : > { %1371 = vmatpush3.bf16.msra.mxu1 %v1581_v42  ;;  %1391 = vmatpush3.bf16.msra.mxu0 %v1582_v43 }
  0x8e   : > { %1372 = vmatprep.subr.bf16.mxu1 %v1583_v44  ;;  %1392 = vmatprep.subr.bf16.mxu0 %v1584_v45  ;;  %v1065_v45 = vlaneseq }
  0x8f   : > { %488 = vmatprep.mubr.bf16.mxu0 %v1238_v62 }
  0x91   : > { %1373 = vmatpush3.bf16.msra.mxu1 %v1585_v46  ;;  %1393 = vmatpush3.bf16.msra.mxu0 %v1586_v47  ;;  %v1066_v46 = vshrl.u32 %v1065_v45, 7 }
  0x92   : > { %1394 = vmatprep.subr.bf16.mxu0 %v1589_v51  ;;  %1430 = vmatprep.subr.bf16.mxu1 %v1594_v57 }
  0x93   : > { %v1067_v48 = vsub.s32 0, %v1066_v46 }
  0x94   : > { %708 = vmatmul.mubr.bf16.vlgmr.msra.gmra.mrb[4].mxu1 %v1260_v49  ;;  %489 = vmatmul.mubr.bf16.gmra.mrb[4].mxu0 %v1237_v0 }
  0x95   : > { %1395 = vmatpush3.bf16.msra.mxu0 %v1590_v52  ;;  %715 = vmatprep.mubr.bf16.mxu1 %v1264_v56 }
  0x96   : > { %1396 = vmatprep.subr.bf16.mxu0 %v1591_v53  ;;  %1431 = vmatpush3.bf16.msra.mxu1 %v1594_v57  ;;  %v1075_v53 = vsub.s32 1, %v1066_v46 }
  0x97   : > { %1432 = vmatprep.subr.bf16.mxu1 %v1599_v63  ;;  %994 = vmatprep.mubr.bf16.mxu0 %v1264_v56 }
  0x99   : > { %1397 = vmatpush3.bf16.msra.mxu0 %v1592_v58 }
  0x9a   : > { %1398 = vmatprep.subr.bf16.mxu0 %v1596_v59  ;;  %1433 = vmatpush3.bf16.msra.mxu1 %v1599_v63  ;;  %v1068_v59 = vrot.slane %v1064_v50, %v1067_v48  ;;  %v1076_v63 = vrot.slane %v1064_v50, %v1075_v53 }
  0x9b   : > { %1438 = vmatprep.subr.bf16.mxu1 %v1606_v6 }
  0x9c   : > { %716 = vmatmul.mubr.bf16.gmra.mrb[8].mxu1 %v1263_v60 }
  0x9d   : > { %1399 = vmatpush3.bf16.msra.mxu0 %v1597_v2  ;;  %1434 = vmatprep.mubr.msk.bf16.mxu1 %vm441_vm0, %v1262_v1 }
  0x9e   : > { %1400 = vmatprep.subr.bf16.mxu0 %v1600_v3 }
  0xa1   : > { %1401 = vmatpush3.bf16.msra.mxu0 %v1602_v4 }
  0xa2   : > { %1402 = vmatprep.subr.bf16.mxu0 %v1603_v5 }
  0xa4   : > { %1435 = vmatmul.mubr.msk.bf16.vlgmr.msra.gmra.mrb[0].mxu1 %vm441_vm0, %v1265_v7 }
  0xa5   : > { %1439 = vmatpush3.bf16.msra.mxu1 %v1606_v6  ;;  %1442 = vmatprep.mubr.msk.bf16.mxu1 %vm441_vm0, %v1609_v12 }
  0xa6   : > { %1403 = vmatpush3.bf16.msra.mxu0 %v1604_v10  ;;  %1440 = vmatprep.subr.bf16.mxu1 %v1608_v11 }
  0xa7   : > { %1404 = vmatprep.subr.bf16.mxu0 %v1605_v13 }
  0xa9   : > { %1441 = vmatpush3.bf16.msra.mxu1 %v1608_v11 }
  0xaa   : > { %1405 = vmatpush3.bf16.msra.mxu0 %v1607_v14 }
  0xad   : > { %995 = vmatmul.mubr.bf16.vlgmr.msra.gmra.mrb[8].mxu0 %v1263_v60  ;;  %v1087_v60 = vsub.s32 2, %v1066_v46 }
  0xae   : > { %1002 = vmatprep.mubr.bf16.mxu0 %v1290_v8 }
  0xaf   : > { %v1088_v3 = vrot.slane %v1064_v50, %v1087_v60 }
  0xb0   : > { %1443 = vmatmul.mubr.msk.bf16.vlgmr.msra.gmra.mrb[0].mxu1 %vm441_vm0, %v1610_v9 }
  0xb5   : > { %1003 = vmatmul.mubr.bf16.gmra.mrb[12].mxu0 %v1289_v16 }
 0x15f   : > { %v1342_v17 = vpop.f32.mrb[0].mxu0 }
 0x160   : > { %v1343_v18 = vpop.f32.mrb[1].mxu0 }
 0x161   : > { %v1344_v19 = vadd.f32 %v1343_v18, %v1342_v17  ;;  %v1345_v20 = vpop.f32.mrb[2].mxu0 }
 0x162   : > { %v1346_v21 = vpop.f32.mrb[3].mxu0 }
 0x163   : > { %v1347_v22 = vadd.f32 %v1346_v21, %v1345_v20 }
 0x167   : > { %v1374_v23 = vpop.f32.mrb[4].mxu1  ;;  %v1348_v32 = vpop.f32.mrb[4].mxu0 }
 0x168   : > { %v1375_v24 = vpop.f32.mrb[5].mxu1  ;;  %v1349_v34 = vpop.f32.mrb[5].mxu0 }
 0x169   : > { %v1376_v25 = vadd.f32 %v1375_v24, %v1374_v23  ;;  %v1377_v26 = vpop.f32.mrb[6].mxu1  ;;  %v1350_v37 = vadd.f32 %v1349_v34, %v1348_v32  ;;  %v1351_v38 = vpop.f32.mrb[6].mxu0 }
 0x16a   : > { %v1378_v27 = vpop.f32.mrb[7].mxu1  ;;  %v1352_v40 = vpop.f32.mrb[7].mxu0 }
 0x16b   : > { %v1449_v28 = vadd.f32 %v1376_v25, %v1344_v19  ;;  %v1379_v29 = vadd.f32 %v1378_v27, %v1377_v26  ;;  %v1353_v43 = vadd.f32 %v1352_v40, %v1351_v38 }
 0x16d   : > { %v1455_v30 = vadd.f32 %v1379_v29, %v1347_v22 }
 0x16f   : > { %v1380_v31 = vpop.f32.mrb[8].mxu1 }
 0x170   : > { %v1381_v33 = vpop.f32.mrb[9].mxu1 }
 0x171   : > { %v1382_v35 = vadd.f32 %v1381_v33, %v1380_v31  ;;  %v1383_v36 = vpop.f32.mrb[10].mxu1 }
 0x172   : > { %v1384_v39 = vpop.f32.mrb[11].mxu1 }
 0x173   : > { %v1385_v41 = vadd.f32 %v1384_v39, %v1383_v36  ;;  %v1446_v42 = vadd.f32 %v1382_v35, %v1350_v37 }
 0x175   : > { %v1452_v44 = vadd.f32 %v1385_v41, %v1353_v43 }
 0x180   : > { %v1406_v47 = vpop.f32.mrb[8].mxu0 }
 0x181   : > { %v1407_v49 = vpop.f32.mrb[9].mxu0 }
 0x182   : > { %v1408_v51 = vadd.f32 %v1407_v49, %v1406_v47  ;;  %v1409_v52 = vpop.f32.mrb[10].mxu0 }
 0x183   : > { %v1410_v54 = vpop.f32.mrb[11].mxu0  ;;  %v1444_v55 = vpop.f32.mrb[0].mxu1 }
 0x184   : > { %v1411_v56 = vadd.f32 %v1410_v54, %v1409_v52  ;;  %v1045_v57 = vpop.f32.mrb[1].mxu1  ;;  %v1450_v58 = vadd.f32 %v1449_v28, %v1408_v51 }
 0x185   : > { %v1445_v61 = vpop.f32.mrb[2].mxu1 }
 0x186   : > { %v1451_v62 = vadd.f32 %v1450_v58, %v1045_v57  ;;  %v1048_v0 = vpop.f32.mrb[3].mxu1  ;;  %v1456_v1 = vadd.f32 %v1455_v30, %v1411_v56 }
 0x188   : > { %v1069_v2 = vmul.f32 %v1451_v62, %v1068_v59  ;;  %v1457_v4 = vadd.f32 %v1456_v1, %v1048_v0  ;;  %v1412_v5 = vpop.f32.mrb[12].mxu0 }
 0x189   : > { %v1413_v6 = vpop.f32.mrb[13].mxu0 }
 0x18a   : > { %v1077_v7 = vadd.f32 %v1076_v63, %v1069_v2  ;;  %v1070_v10 = vmul.f32 %v1457_v4, %v1068_v59  ;;  %v1414_v11 = vadd.f32 %v1413_v6, %v1412_v5  ;;  %v1415_v12 = vpop.f32.mrb[14].mxu0 }
 0x18b   : > { %v1416_v13 = vpop.f32.mrb[15].mxu0 }
 0x18c   : > { %vm1081_vm1 = vcmp.ge.f32.partialorder %v1077_v7, 0.0  ;;  %v1089_v14 = vmul.f32 %v1088_v3, %v1077_v7  ;;  %v1078_v15 = vadd.f32 %v1076_v63, %v1070_v10  ;;  %v1447_v8 = vadd.f32 %v1446_v42, %v1414_v11 }
 0x18d   : > { %v1417_v9 = vadd.f32 %v1416_v13, %v1415_v12 }
 0x18e   : > { %v1093_v16 = vsel %vm1081_vm1, %v1077_v7, %v1089_v14  ;;  %vm1082_vm3 = vcmp.ge.f32.partialorder %v1078_v15, 0.0  ;;  %v1090_v17 = vmul.f32 %v1088_v3, %v1078_v15  ;;  %v1448_v18 = vadd.f32 %v1447_v8, %v1444_v55 }
 0x18f   : > { %v1321_v19 = vpack.c.bf16 %v1093_v16, %v1093_v16  ;;  %v1453_v20 = vadd.f32 %v1452_v44, %v1417_v9 }
 0x190   : > { %v1094_v21 = vsel %vm1082_vm3, %v1078_v15, %v1090_v17  ;;  %v1071_v22 = vmul.f32 %v1448_v18, %v1068_v59 }
 0x191   : > { %1114 = vst.msk [vmem:[%s216_s20] sm:$0xf] %vm1113_vm2, %v1321_v19  ;;  %v1322_v23 = vpack.c.bf16 %v1094_v21, %v1094_v21  ;;  %v1454_v24 = vadd.f32 %v1453_v20, %v1445_v61 }
 0x192   : > { %v1079_v25 = vadd.f32 %v1076_v63, %v1071_v22 }
 0x193   : > { %1115 = vst.msk [vmem:[%s216_s20 + $0x4] sm:$0xf] %vm1113_vm2, %v1322_v23  ;;  %v1072_v26 = vmul.f32 %v1454_v24, %v1068_v59 }
 0x194   : > { %vm1083_vm4 = vcmp.ge.f32.partialorder %v1079_v25, 0.0  ;;  %v1091_v27 = vmul.f32 %v1088_v3, %v1079_v25 }
 0x195   : > { %v1080_v28 = vadd.f32 %v1076_v63, %v1072_v26 }
 0x196   : > { %v1095_v29 = vsel %vm1083_vm4, %v1079_v25, %v1091_v27 }
 0x197   : > { %v1323_v30 = vpack.c.bf16 %v1095_v29, %v1095_v29  ;;  %vm1084_vm5 = vcmp.ge.f32.partialorder %v1080_v28, 0.0  ;;  %v1092_v31 = vmul.f32 %v1088_v3, %v1080_v28 }
 0x199   : > { %1116 = vst.msk [vmem:[%s216_s20 + $0x8] sm:$0xf] %vm1113_vm2, %v1323_v30  ;;  %v1096_v32 = vsel %vm1084_vm5, %v1080_v28, %v1092_v31 }
 0x19a   : > { %v1324_v33 = vpack.c.bf16 %v1096_v32, %v1096_v32 }
 0x19c   : > { %1117 = vst.msk [vmem:[%s216_s20 + $0xc] sm:$0xf] %vm1113_vm2, %v1324_v33 }
 0x19d   : > { %1712 = shalt.err (!%p1709_p2)
}
 0x19e   : > { %s1713_s10 = scalar_lea.hbm %s2026_s23, 256  ;;  %s1717_s22 = scalar_lea.hbm %s2076_s3, 512 }
 0x19f   : > { %p1714_p13 = scmp.ne.s32.totalorder %s2026_s23, %s1713_s10  ;;  %p1718_p4 = scmp.lt.u32.totalorder %s2026_s23, %s2076_s3 }
 0x1a0   : > { %p1719_p9 = scmp.lt.u32.totalorder %s1717_s22, %s1713_s10  ;;  %p1721_p11 = scmp.lt.u32.totalorder %s1713_s10, %s2026_s23 }
 0x1a1   : > { %p1715_p6 = pnand %p1714_p13, %p2090_p0 }
 0x1a2   : > { %p1720_p8 = por %p1719_p9, %p1718_p4 }
 0x1a3   : > { %p1716_p10 = pneg %p1715_p6 }
 0x1a4   : > { %p1722_p1 = por %p1721_p11, %p1720_p8 }
 0x1a6   : > { %p1723_p3 = pnand %p1722_p1, %p1716_p10 }
 0x1a8   : > { %1726 = shalt.err (!%p1723_p3)
}
 0x1a9   : > { %s1779_s18 = smov 64   ;;  %s1780_s20 = smov 4  }
 0x1aa   : > { %1479 = dma.vmem_to_hbm [thread:$0]  (%p2090_p0), %s2028_s21, 256, %s2026_s23, %s1119_s16, %s1779_s18, %s1779_s18, %s1780_s20  }
 0x1ab PF: > { %s1147_s17 = sand.u32 1, %s1757_s12   ;;  %p2091_p5 = scmp.ne.s32.totalorder %s2081_s19, 0 }
 0x1ac   : > { %p2092_p7 = scmp.ge.s32.totalorder %s1769_s15, 2  ;;  %s1148_s26 = scalar_lea.sflag [#allocation4], %s1147_s17 }
 0x1ae   : > { %p1493_p12 = pnand %p2092_p7, %p2091_p5 }
 0x1b0   : > { %1752 = dma.done.wait (!%p1493_p12), %s1148_s26, 256  }
 0x1b1   : > { %1754 = vsyncadd (!%p1493_p12), %s1148_s26, 4294967040  ;;  %p17_p2 = scmp.ge.s32.totalorder %s1911_s4, 4   ;;  %s2093_s12 = smov %s1761_s13 }
 0x1b2   : > { %s2094_s13 = smov %s1765_s14  ;;  %s2095_s14 = smov %s1921_s6 }
 0x1b3   : > { %s2096_s15 = smov %s1911_s4  ;;  %19 = sbr.rel (!%p17_p2) target bundleno = 6 (0x6), region = 87 }
 0x1ba   :  { %1153 = vsyncpa [#allocation3], 1 }
 0x1bb   :  { %1155 = vsyncpa [#allocation3 + $0x1], 1 }
 0x1bc   :  { %1156 = vsyncpa [#allocation6], 1 }
 0x1bd   :  { %1157 = vsyncpa [#allocation4], 1 }
 0x1be   :  { %1159 = vsyncpa [#allocation4 + $0x1], 1 }

// kernel: _lambda_.14
= control target key start
LH: loop header
LB: loop body
LE: loop exit
PB: predicated region body
PF: predicated region fallthrough
CT: control target
= control target key end

     0   :  { %8 = vsyncpa [#allocation3], 0  ;;  %s1548_s0 = inlined_call_operand.hbm [shape: bf16[96,96], index: 0, kind: input, shape index: {}]   ;;  %s1549_s1 = inlined_call_operand.hbm [shape: bf16[3,96,192], index: 1, kind: input, shape index: {}]   ;;  %s1550_s2 = inlined_call_operand.hbm [shape: f32[3,192], index: 2, kind: input, shape index: {}]   ;;  %s1551_s3 = inlined_call_operand.hbm [shape: f32[64,192], index: 3, kind: output, shape index: {}]  }
   0x1   :  { %10 = vsyncpa [#allocation3 + $0x1], 0 }
   0x2   :  { %11 = vsyncpa [#allocation6], 0 }
   0x3   :  { %12 = vsyncpa [#allocation4], 0 }
   0x4   :  { %14 = vsyncpa [#allocation4 + $0x1], 0  ;;  %s1288_s12 = smov 0   ;;  %s1290_s13 = smov 0  }
   0x5   :  { %s1292_s14 = smov 0   ;;  %s1294_s15 = smov 0  }
   0x6 LB: > { %s1309_s16 = sadd.s32 4294967295, %s1255_s15   ;;  %s868_s17 = sadd.s32 4294967294, %s1255_s15   ;;  %s1255_s15 = sphi %s1294_s15, %s1571_s15   ;;  %s1251_s14 = sphi %s1292_s14, %s1570_s14   ;;  %s1247_s13 = sphi %s1290_s13, %s1569_s13   ;;  %s1243_s12 = sphi %s1288_s12, %s1568_s12  }
   0x7   : > { %p40_p0 = scmp.ne.s32.totalorder %s1247_s13, %s1243_s12  ;;  %p1552_p1 = scmp.eq.s32.totalorder %s1309_s16, 0 }
   0x8   : > { %p112_p3 = scmp.eq.s32.totalorder %s868_s17, 1  ;;  %p869_p5 = scmp.ge.s32.totalorder %s1255_s15, 1 }
   0x9   : > { %p1318_p4 = por %p1552_p1, %p40_p0  ;;  %p119_p7 = scmp.lt.s32.totalorder %s1255_s15, 3 }
   0xa   : > { %p1323_p6 = por %p112_p3, %p40_p0  ;;  %s1257_s21 = smov [#allocation5]  }
   0xb   : > { %s1555_s18 = scalar_select %p1318_p4, 1, 0 }
   0xc   : > { %s1556_s19 = scalar_select %p1323_p6, 1, 0 }
   0xd   : > { %p1328_p8 = pnand %p869_p5, %p119_p7  ;;  %s131_s22 = sshll.u32 %s1257_s21, 4  ;;  %s1332_s22 = int_to_ptr.vmem [resolvable:$true] %s131_s22 }
   0xe   : > { %s1258_s24 = smov [#allocation7]   ;;  %s1099_s28 = scalar_lea.hbm %s1549_s1, 4608 }
   0xf   : > { %p977_p9 = pneg %p1328_p8  ;;  %s145_s25 = sshll.u32 %s1258_s24, 4  ;;  %s1343_s25 = int_to_ptr.vmem [resolvable:$true] %s145_s25 }
  0x10   : > { %p1100_p12 = scmp.ne.s32.totalorder %s1549_s1, %s1099_s28  ;;  %p1106_p5 = scmp.lt.u32.totalorder %s1099_s28, %s1549_s1 }
  0x11   : > { %p1339_p11 = pnand %p977_p9, %p1552_p1 }
  0x13   : > { %p1101_p13 = pneg %p1339_p11 }
  0x15   : > { %p1102_p0 = pnand %p1101_p13, %p1100_p12 }
  0x17   : > { %p1103_p3 = pneg %p1102_p0 }
  0x19   : > { %p1108_p7 = pnand %p1106_p5, %p1103_p3 }
  0x1b   : > { %1111 = shalt.err (!%p1108_p7)
}
  0x1c   : > { %s1112_s6 = scalar_lea.vmem %s1332_s22, 4608  ;;  %p1120_p2 = scmp.lt.s32.totalorder %s1332_s22, %s1332_s22 }
  0x1d   : > { %p1113_p9 = scmp.ne.s32.totalorder %s1332_s22, %s1112_s6  ;;  %p1121_p12 = scmp.lt.s32.totalorder %s1112_s6, %s1112_s6 }
  0x1f   : > { %p1115_p10 = pnand %p1113_p9, %p1101_p13  ;;  %p1122_p0 = por %p1121_p12, %p1120_p2 }
  0x21   : > { %p1116_p1 = pneg %p1115_p10 }
  0x23   : > { %p1123_p6 = pnand %p1122_p0, %p1116_p1 }
  0x25   : > { %1126 = shalt.err (!%p1123_p6)
}
  0x26   : > { %s1259_s7 = smov 128   ;;  %s1260_s8 = smov 8  }
  0x27   : > { %980 = dma.hbm_to_vmem [thread:$0]  (!%p1339_p11), %s1549_s1, 4608, %s1332_s22, [#allocation6], %s1259_s7, %s1259_s7, %s1260_s8  }
  0x28   : > { %s1127_s21 = scalar_lea.hbm %s1550_s2, 128 }
  0x29   : > { %p1128_p2 = scmp.ne.s32.totalorder %s1550_s2, %s1127_s21  ;;  %p1134_p10 = scmp.lt.u32.totalorder %s1127_s21, %s1550_s2 }
  0x2b   : > { %p1130_p1 = pnand %p1128_p2, %p1101_p13 }
  0x2d   : > { %p1131_p6 = pneg %p1130_p1 }
  0x2f   : > { %p1136_p3 = pnand %p1134_p10, %p1131_p6 }
  0x31   : > { %1139 = shalt.err (!%p1136_p3)
}
  0x32   : > { %s1140_s22 = scalar_lea.vmem %s1343_s25, 128  ;;  %p1148_p12 = scmp.lt.s32.totalorder %s1343_s25, %s1343_s25 }
  0x33   : > { %p1141_p5 = scmp.ne.s32.totalorder %s1343_s25, %s1140_s22  ;;  %p1149_p0 = scmp.lt.s32.totalorder %s1140_s22, %s1140_s22 }
  0x35   : > { %p1143_p7 = pnand %p1141_p5, %p1101_p13  ;;  %p1150_p2 = por %p1149_p0, %p1148_p12 }
  0x37   : > { %p1144_p9 = pneg %p1143_p7 }
  0x39   : > { %p1151_p1 = pnand %p1150_p2, %p1144_p9 }
  0x3b   : > { %1154 = shalt.err (!%p1151_p1)
}
  0x3c   : > { %983 = dma.hbm_to_vmem [thread:$0]  (!%p1339_p11), %s1550_s2, 128, %s1343_s25, [#allocation6]  }
  0x3d   : > { %s1398_s4 = sadd.s32 1, %s1255_s15   ;;  %s27_s23 = sadd.s32 1, %s1251_s14 }
  0x3e   : > { %s24_s5 = ssub.s32 %s1255_s15, %s1398_s4  ;;  %p34_p13 = scmp.ne.s32.totalorder %s1251_s14, %s1247_s13 }
  0x3f   : > { %p25_p6 = scmp.eq.s32.totalorder %s24_s5, 0  ;;  %p35_p10 = scmp.eq.s32.totalorder %s1255_s15, 0 }
  0x40   : > { %p1559_p3 = scmp.eq.s32.totalorder %s1309_s16, 1  ;;  %p994_p7 = scmp.lt.s32.totalorder %s1255_s15, 2 }
  0x41   : > { %s1414_s7 = scalar_select %p25_p6, %s1251_s14, %s27_s23  }
  0x42   : > { %p1408_p5 = por %p1559_p3, %p34_p13  ;;  %p36_p9 = por %p35_p10, %p34_p13 }
  0x43   : > { %s156_s8 = sand.u32 1, %s1251_s14   ;;  %s932_s25 = smul.u32 384, %s1255_s15 }
  0x44   : > { %s1560_s6 = scalar_select %p1408_p5, 1, 0 }
  0x45   : > { %s963_s9 = smul.u32 24, %s156_s8  ;;  %p1418_p11 = pnand %p994_p7, %p36_p9 }
  0x46   : > { %s1425_s21 = scalar_lea.hbm %s1548_s0, %s932_s25  ;;  %s1429_s27 = scalar_lea.sflag [#allocation3], %s156_s8 }
  0x47   : > { %s160_s24 = scalar_lea.vmem [#allocation2], %s963_s9  ;;  %s1155_s28 = scalar_lea.hbm %s1425_s21, 384 }
  0x48   : > { %s167_s26 = sshll.u32 %s160_s24, 4  ;;  %p1156_p12 = scmp.ne.s32.totalorder %s1425_s21, %s1155_s28  ;;  %s1427_s26 = int_to_ptr.vmem [resolvable:$true] %s167_s26 }
  0x49   : > { %p1157_p0 = pneg %p1418_p11  ;;  %s1160_s30 = scalar_lea.hbm %s1548_s0, 768 }
  0x4a   : > { %p1161_p13 = scmp.lt.u32.totalorder %s1425_s21, %s1548_s0  ;;  %p1162_p6 = scmp.lt.u32.totalorder %s1160_s30, %s1155_s28 }
  0x4b   : > { %p1158_p2 = pnand %p1157_p0, %p1156_p12  ;;  %p1164_p3 = scmp.lt.u32.totalorder %s1155_s28, %s1425_s21 }
  0x4c   : > { %p1163_p10 = por %p1162_p6, %p1161_p13 }
  0x4d   : > { %p1159_p1 = pneg %p1158_p2 }
  0x4e   : > { %p1165_p7 = por %p1164_p3, %p1163_p10 }
  0x50   : > { %p1166_p9 = pnand %p1165_p7, %p1159_p1 }
  0x52   : > { %1169 = shalt.err (!%p1166_p9)
}
  0x53   : > { %s1170_s8 = scalar_lea.vmem %s1427_s26, 384  ;;  %s1261_s9 = smov [#allocation2]  }
  0x54   : > { %p1171_p12 = scmp.ne.s32.totalorder %s1427_s26, %s1170_s8  ;;  %s1175_s25 = sshll.u32 %s1261_s9, 4  ;;  %s1176_s25 = int_to_ptr.vmem [resolvable:$false] %s1175_s25 }
  0x55   : > { %s1177_s11 = scalar_lea.vmem %s1176_s25, 768  ;;  %p1178_p4 = scmp.lt.s32.totalorder %s1427_s26, %s1176_s25 }
  0x56   : > { %p1173_p2 = pnand %p1171_p12, %p1157_p0  ;;  %p1179_p13 = scmp.lt.s32.totalorder %s1177_s11, %s1170_s8 }
  0x58   : > { %p1174_p5 = pneg %p1173_p2  ;;  %p1180_p6 = por %p1179_p13, %p1178_p4 }
  0x5a   : > { %p1181_p10 = pnand %p1180_p6, %p1174_p5 }
  0x5c   : > { %1184 = shalt.err (!%p1181_p10)
}
  0x5d   : > { %s1262_s17 = smov 64   ;;  %s1263_s24 = smov 4  }
  0x5e   : > { %987 = dma.hbm_to_vmem [thread:$0]  (!%p1418_p11), %s1425_s21, 384, %s1427_s26, %s1429_s27, %s1262_s17, %s1262_s17, %s1263_s24  }
  0x5f   : > { %179 = sbr.rel (%p1328_p8) target bundleno = 398 (0x18e), region = 32  ;;  %s1460_s28 = sand.u32 (!%p1328_p8), 1, %s1247_s13  }
  0x60   : > { %s964_s22 = smul.u32 (!%p1328_p8), 24, %s1460_s28  ;;  %s182_s29 = scalar_lea.sflag (!%p1328_p8), [#allocation3], %s1460_s28 }
  0x61   : > { %p1562_p4 = scmp.ne.s32.totalorder (!%p1328_p8), %s1555_s18, 0 }
  0x62   : > { %s1464_s30 = scalar_lea.vmem (!%p1328_p8), [#allocation2], %s964_s22 }
  0x66   : > { %1230 = dma.done.wait (%p1562_p4), %s182_s29, 384  }
  0x67   : > { %1232 = vsyncadd (%p1562_p4), %s182_s29, 4294966912  ;;  %p1563_p5 = scmp.eq.s32.totalorder %s1309_s16, 0 }
  0x69   : > { %1234 = dma.done.wait (%p1563_p5), [#allocation6], 4736   ;;  %p1564_p8 = pmov %p1563_p5 }
  0x6a   : > { %v1264_v0 = vmov 0   ;;  %v1039_v1 = vld [vmem:[#allocation5 + $0x64] ss:$8 sps:$4 sm:$0xff]   ;;  %v1043_v3 = vld [vmem:[#allocation5 + $0x60] ss:$8 sps:$4 sm:$0xff]   ;;  %vm319_vm0 = vcmask 785408   ;;  %v658_v52 = vlaneseq }
  0x6b   : > { %1236 = vsyncadd (%p1564_p8), [#allocation6], 4294962560  ;;  %358 = vmatprep.mubr.bf16.mxu1 %v1264_v0  ;;  %481 = vmatprep.mubr.bf16.mxu0 %v1264_v0  ;;  %v1041_v2 = vld [vmem:[#allocation5 + $0x4] ss:$8 sps:$4 sm:$0xff]   ;;  %v1044_v4 = vld [vmem:[#allocation5] ss:$8 sps:$4 sm:$0xff]  }
  0x6c   : > { %326 = vmatprep.subr.bf16.mxu1 %v1039_v1  ;;  %449 = vmatprep.subr.bf16.mxu0 %v1041_v2  ;;  %v1045_v5 = vld [vmem:[#allocation5 + $0x74] ss:$8 sps:$4 sm:$0xff]   ;;  %v1049_v7 = vld [vmem:[#allocation5 + $0x70] ss:$8 sps:$4 sm:$0xff]   ;;  %v1051_v9 = vld [vmem:[#allocation5 + $0x84] ss:$8 sps:$4 sm:$0xff]  }
  0x6d   : > { %327 = vmatpush1.bf16.msra.mxu1 %v1043_v3  ;;  %450 = vmatpush1.bf16.msra.mxu0 %v1044_v4  ;;  %v1047_v6 = vld [vmem:[#allocation5 + $0x14] ss:$8 sps:$4 sm:$0xff]   ;;  %v1050_v8 = vld [vmem:[#allocation5 + $0x10] ss:$8 sps:$4 sm:$0xff]   ;;  %v1053_v10 = vld [vmem:[#allocation5 + $0x24] ss:$8 sps:$4 sm:$0xff]  }
  0x6e   : > { %328 = vmatprep.subr.bf16.mxu1 %v1045_v5  ;;  %451 = vmatprep.subr.bf16.mxu0 %v1047_v6  ;;  %v1055_v11 = vld [vmem:[#allocation5 + $0x80] ss:$8 sps:$4 sm:$0xff]   ;;  %v1057_v13 = vld [vmem:[#allocation5 + $0x94] ss:$8 sps:$4 sm:$0xff]   ;;  %v1061_v15 = vld [vmem:[#allocation5 + $0x90] ss:$8 sps:$4 sm:$0xff]  }
  0x6f   : > { %v1056_v12 = vld [vmem:[#allocation5 + $0x20] ss:$8 sps:$4 sm:$0xff]   ;;  %v1059_v14 = vld [vmem:[#allocation5 + $0x34] ss:$8 sps:$4 sm:$0xff]   ;;  %v1062_v16 = vld [vmem:[#allocation5 + $0x30] ss:$8 sps:$4 sm:$0xff]  }
  0x70   : > { %v1063_v17 = vld [vmem:[#allocation5 + $0xa4] ss:$8 sps:$4 sm:$0xff]   ;;  %v1067_v19 = vld [vmem:[#allocation5 + $0xa0] ss:$8 sps:$4 sm:$0xff]   ;;  %v1069_v21 = vld [vmem:[#allocation5 + $0xb4] ss:$8 sps:$4 sm:$0xff]  }
  0x71   : > { %329 = vmatpush1.bf16.msra.mxu1 %v1049_v7  ;;  %452 = vmatpush1.bf16.msra.mxu0 %v1050_v8  ;;  %v1065_v18 = vld [vmem:[#allocation5 + $0x44] ss:$8 sps:$4 sm:$0xff]   ;;  %v1068_v20 = vld [vmem:[#allocation5 + $0x40] ss:$8 sps:$4 sm:$0xff]   ;;  %v1071_v22 = vld [vmem:[#allocation5 + $0x54] ss:$8 sps:$4 sm:$0xff]  }
  0x72   : > { %330 = vmatprep.subr.bf16.mxu1 %v1051_v9  ;;  %453 = vmatprep.subr.bf16.mxu0 %v1053_v10  ;;  %v1073_v23 = vld [vmem:[#allocation5 + $0xb0] ss:$8 sps:$4 sm:$0xff]   ;;  %v220_v25 = vld [vmem:[%s1464_s30 + $0x4] sm:$0xf]  ;;  %v1076_v31 = vld [vmem:[#allocation5 + $0xc0] ss:$8 sps:$4 sm:$0xff]  }
  0x73   : > { %v1074_v24 = vld [vmem:[#allocation5 + $0x50] ss:$8 sps:$4 sm:$0xff]   ;;  %v1078_v28 = vld [vmem:[#allocation5 + $0xc4] ss:$8 sps:$4 sm:$0xff]   ;;  %v1082_v32 = vld [vmem:[#allocation5 + $0xd4] ss:$8 sps:$4 sm:$0xff]  }
  0x74   : > { %v221_v26 = vld [vmem:[%s1464_s30 + $0x8] sm:$0xf]  ;;  %v219_v27 = vld [vmem:[%s1464_s30] sm:$0xf]  ;;  %v222_v34 = vld [vmem:[%s1464_s30 + $0xc] sm:$0xf] }
  0x75   : > { %331 = vmatpush1.bf16.msra.mxu1 %v1055_v11  ;;  %454 = vmatpush1.bf16.msra.mxu0 %v1056_v12  ;;  %v878_v29 = vcombine.low %v220_v25, %v221_v26  ;;  %v894_v30 = vcombine.low %v219_v27, %v220_v25  ;;  %v1080_v33 = vld [vmem:[#allocation5 + $0xd0] ss:$8 sps:$4 sm:$0xff]   ;;  %v1085_v36 = vld [vmem:[#allocation5 + $0xe4] ss:$8 sps:$4 sm:$0xff]   ;;  %v895_v38 = vcombine.low %v221_v26, %v222_v34  ;;  %v1083_v39 = vld [vmem:[#allocation5 + $0xe0] ss:$8 sps:$4 sm:$0xff]  }
  0x76   : > { %332 = vmatprep.subr.bf16.mxu1 %v1057_v13  ;;  %455 = vmatprep.subr.bf16.mxu0 %v1059_v14  ;;  %v235_v35 = vld [vmem:[%s1464_s30 + $0x10] sm:$0xf]  ;;  %v1088_v40 = vld [vmem:[#allocation5 + $0xf4] ss:$8 sps:$4 sm:$0xff]   ;;  %v1093_v42 = vld [vmem:[#allocation5 + $0x104] ss:$8 sps:$4 sm:$0xff]  }
  0x77   : > { %v879_v37 = vcombine.low %v222_v34, %v235_v35  ;;  %v1086_v41 = vld [vmem:[#allocation5 + $0xf0] ss:$8 sps:$4 sm:$0xff]   ;;  %v1091_v43 = vld [vmem:[#allocation5 + $0x100] ss:$8 sps:$4 sm:$0xff]   ;;  %v1096_v44 = vld [vmem:[#allocation5 + $0x114] ss:$8 sps:$4 sm:$0xff]  }
  0x78   : > { %v1094_v45 = vld [vmem:[#allocation5 + $0x110] ss:$8 sps:$4 sm:$0xff]   ;;  %v656_v3 = vld [vmem:[#allocation7] sm:$0x77]  ;;  %vm753_vm1 = vcmask 523264   ;;  %s877_s18 = sshll.u32 %s1460_s28, 6 }
  0x79   : > { %333 = vmatpush1.bf16.msra.mxu1 %v1061_v15  ;;  %456 = vmatpush1.bf16.msra.mxu0 %v1062_v16  ;;  %v1097_v46 = vld [vmem:[%s1464_s30 + $0x8] sm:$0xff]   ;;  %v1098_v47 = vld [vmem:[%s1464_s30 + $0x10] sm:$0xff]   ;;  %s934_s20 = sshll.u32 %s1309_s16, 10  ;;  %s215_s10 = scalar_lea.vmem [#allocation8], %s877_s18 }
  0x7a   : > { %334 = vmatprep.subr.bf16.mxu1 %v1063_v17  ;;  %457 = vmatprep.subr.bf16.mxu0 %v1065_v18  ;;  %s776_s21 = sshll.u32 %s215_s10, 4  ;;  %s1500_s27 = scalar_lea.hbm %s1551_s3, %s934_s20  ;;  %s1502_s21 = int_to_ptr.vmem [resolvable:$true] %s776_s21 }
  0x7b   : > { %s762_s23 = scalar_lea.sflag [#allocation4], %s1460_s28  ;;  %s1185_s5 = scalar_lea.vmem %s1502_s21, 1024 }
  0x7c   : > { %p1186_p11 = scmp.ne.s32.totalorder %s1502_s21, %s1185_s5  ;;  %p1565_p0 = scmp.ne.s32.totalorder %s1560_s6, 0 }
  0x7d   : > { %335 = vmatpush1.bf16.msra.mxu1 %v1067_v19  ;;  %458 = vmatpush1.bf16.msra.mxu0 %v1068_v20  ;;  %s1265_s8 = smov [#allocation8]  }
  0x7e   : > { %336 = vmatprep.subr.bf16.mxu1 %v1069_v21  ;;  %459 = vmatprep.subr.bf16.mxu0 %v1071_v22  ;;  %p1187_p1 = pnand %p1186_p11, %p1565_p0  ;;  %s1189_s9 = sshll.u32 %s1265_s8, 4  ;;  %s1190_s9 = int_to_ptr.vmem [resolvable:$false] %s1189_s9 }
  0x7f   : > { %s1191_s25 = scalar_lea.vmem %s1190_s9, 2048  ;;  %p1192_p7 = scmp.lt.s32.totalorder %s1502_s21, %s1190_s9 }
  0x80   : > { %p1188_p3 = pneg %p1187_p1  ;;  %p1193_p9 = scmp.lt.s32.totalorder %s1191_s25, %s1185_s5 }
  0x81   : > { %337 = vmatpush1.bf16.msra.mxu1 %v1073_v23  ;;  %460 = vmatpush1.bf16.msra.mxu0 %v1074_v24 }
  0x82   : > { %595 = vmatprep.subr.bf16.mxu0 %v1078_v28  ;;  %935 = vmatprep.subr.bf16.mxu1 %v1078_v28  ;;  %p1194_p12 = por %p1193_p9, %p1192_p7 }
  0x84   : > { %892 = vmatmul.mubr.msk.bf16.vlgmr.msra.gmra.mrb[0].mxu1 %vm319_vm0, %v878_v29  ;;  %908 = vmatmul.mubr.msk.bf16.vlgmr.msra.gmra.mrb[0].mxu0 %vm319_vm0, %v894_v30  ;;  %p1195_p2 = pnand %p1194_p12, %p1188_p3 }
  0x85   : > { %596 = vmatpush1.bf16.msra.mxu0 %v1076_v31  ;;  %941 = vmatpush1.bf16.msra.mxu1 %v1076_v31 }
  0x86   : > { %597 = vmatprep.subr.bf16.mxu0 %v1082_v32  ;;  %936 = vmatprep.subr.bf16.mxu1 %v1082_v32 }
  0x87   : > { %368 = vmatprep.mubr.bf16.mxu1 %v1264_v0  ;;  %491 = vmatprep.mubr.bf16.mxu0 %v1264_v0 }
  0x89   : > { %598 = vmatpush1.bf16.msra.mxu0 %v1080_v33  ;;  %942 = vmatpush1.bf16.msra.mxu1 %v1080_v33 }
  0x8a   : > { %599 = vmatprep.subr.bf16.mxu0 %v1085_v36  ;;  %937 = vmatprep.subr.bf16.mxu1 %v1085_v36 }
  0x8c   : > { %893 = vmatmul.mubr.msk.bf16.gmra.mrb[4].mxu1 %vm319_vm0, %v879_v37  ;;  %909 = vmatmul.mubr.msk.bf16.gmra.mrb[4].mxu0 %vm319_vm0, %v895_v38 }
  0x8d   : > { %600 = vmatpush1.bf16.msra.mxu0 %v1083_v39  ;;  %943 = vmatpush1.bf16.msra.mxu1 %v1083_v39 }
  0x8e   : > { %601 = vmatprep.subr.bf16.mxu0 %v1088_v40  ;;  %938 = vmatprep.subr.bf16.mxu1 %v1088_v40 }
  0x8f   : > { %627 = vmatprep.mubr.bf16.mxu0 %v1264_v0  ;;  %637 = vmatprep.mubr.bf16.mxu1 %v1264_v0  ;;  %v659_v0 = vshrl.u32 %v658_v52, 7 }
  0x91   : > { %602 = vmatpush1.bf16.msra.mxu0 %v1086_v41  ;;  %944 = vmatpush1.bf16.msra.mxu1 %v1086_v41  ;;  %v660_v2 = vsub.s32 0, %v659_v0  ;;  %v686_v4 = vsub.s32 1, %v659_v0  ;;  %v664_v5 = vsub.s32 4, %v659_v0  ;;  %v720_v6 = vsub.s32 2, %v659_v0 }
  0x92   : > { %603 = vmatprep.subr.bf16.mxu0 %v1093_v42  ;;  %939 = vmatprep.subr.bf16.mxu1 %v1093_v42  ;;  %v690_v7 = vsub.s32 5, %v659_v0  ;;  %v724_v8 = vsub.s32 6, %v659_v0 }
  0x93   : > { %v661_v9 = vrot.slane %v656_v3, %v660_v2  ;;  %v687_v10 = vrot.slane %v656_v3, %v686_v4  ;;  %v665_v11 = vrot.slane %v656_v3, %v664_v5  ;;  %v721_v12 = vrot.slane %v656_v3, %v720_v6 }
  0x94   : > { %v691_v13 = vrot.slane %v656_v3, %v690_v7  ;;  %v725_v14 = vrot.slane %v656_v3, %v724_v8 }
  0x95   : > { %604 = vmatpush1.bf16.msra.mxu0 %v1091_v43  ;;  %945 = vmatpush1.bf16.msra.mxu1 %v1091_v43  ;;  %v671_v15 = vrot.slane %v661_v9, %v660_v2  ;;  %v697_v17 = vrot.slane %v687_v10, %v686_v4  ;;  %v675_v19 = vrot.slane %v665_v11, %v660_v2 }
  0x96   : > { %605 = vmatprep.subr.bf16.mxu0 %v1096_v44  ;;  %940 = vmatprep.subr.bf16.mxu1 %v1096_v44  ;;  %v731_v21 = vrot.slane %v721_v12, %v720_v6  ;;  %v701_v24 = vrot.slane %v691_v13, %v686_v4  ;;  %v735_v27 = vrot.slane %v725_v14, %v720_v6 }
  0x99   : > { %606 = vmatpush1.bf16.msra.mxu0 %v1094_v45  ;;  %946 = vmatpush1.bf16.msra.mxu1 %v1094_v45 }
  0x9c   : > { %924 = vmatmul.mubr.msk.bf16.vlgmr.msra.gmra.mrb[0].mxu0 %vm319_vm0, %v1097_v46  ;;  %925 = vmatmul.mubr.msk.bf16.vlgmr.msra.gmra.mrb[8].mxu1 %vm319_vm0, %v1098_v47 }
 0x157   : > { %v360_v48 = vpop.f32.mrb[0].mxu1 }
 0x158   : > { %v362_v49 = vpop.f32.mrb[1].mxu1 }
 0x159   : > { %v364_v50 = vpop.f32.mrb[2].mxu1 }
 0x15a   : > { %v366_v51 = vpop.f32.mrb[3].mxu1 }
 0x15f   : > { %v370_v53 = vpop.f32.mrb[4].mxu1  ;;  %v493_v54 = vpop.f32.mrb[4].mxu0 }
 0x160   : > { %v494_v55 = vadd.f32 %v493_v54, %v370_v53  ;;  %v372_v56 = vpop.f32.mrb[5].mxu1  ;;  %v495_v57 = vpop.f32.mrb[5].mxu0 }
 0x161   : > { %v496_v58 = vadd.f32 %v495_v57, %v372_v56  ;;  %v374_v59 = vpop.f32.mrb[6].mxu1  ;;  %v497_v60 = vpop.f32.mrb[6].mxu0 }
 0x162   : > { %v498_v61 = vadd.f32 %v497_v60, %v374_v59  ;;  %v376_v62 = vpop.f32.mrb[7].mxu1  ;;  %v499_v63 = vpop.f32.mrb[7].mxu0 }
 0x163   : > { %v500_v1 = vadd.f32 %v499_v63, %v376_v62 }
 0x16f   : > { %v629_v16 = vpop.f32.mrb[0].mxu0  ;;  %v639_v18 = vpop.f32.mrb[8].mxu1 }
 0x170   : > { %v947_v20 = vadd.f32 %v629_v16, %v360_v48  ;;  %v652_v22 = vadd.f32 %v639_v18, %v494_v55  ;;  %v631_v23 = vpop.f32.mrb[1].mxu0  ;;  %v641_v25 = vpop.f32.mrb[9].mxu1 }
 0x171   : > { %v948_v26 = vadd.f32 %v631_v23, %v362_v49  ;;  %v653_v28 = vadd.f32 %v641_v25, %v496_v58  ;;  %v633_v29 = vpop.f32.mrb[2].mxu0  ;;  %v643_v30 = vpop.f32.mrb[10].mxu1 }
 0x172   : > { %v676_v31 = vmul.f32 %v947_v20, %v671_v15  ;;  %v680_v32 = vmul.f32 %v671_v15, %v652_v22  ;;  %v949_v33 = vadd.f32 %v633_v29, %v364_v50  ;;  %v654_v34 = vadd.f32 %v643_v30, %v498_v61  ;;  %v635_v35 = vpop.f32.mrb[3].mxu0  ;;  %v645_v36 = vpop.f32.mrb[11].mxu1 }
 0x173   : > { %v677_v37 = vmul.f32 %v948_v26, %v675_v19  ;;  %v681_v38 = vmul.f32 %v675_v19, %v653_v28  ;;  %v950_v39 = vadd.f32 %v635_v35, %v366_v51  ;;  %v655_v40 = vadd.f32 %v645_v36, %v500_v1 }
 0x174   : > { %v702_v41 = vadd.f32 %v697_v17, %v676_v31  ;;  %v706_v42 = vadd.f32 %v697_v17, %v680_v32  ;;  %v678_v43 = vmul.f32 %v949_v33, %v671_v15  ;;  %v682_v44 = vmul.f32 %v671_v15, %v654_v34 }
 0x175   : > { %v703_v45 = vadd.f32 %v701_v24, %v677_v37  ;;  %v707_v46 = vadd.f32 %v701_v24, %v681_v38  ;;  %v679_v47 = vmul.f32 %v950_v39, %v675_v19  ;;  %v683_v48 = vmul.f32 %v675_v19, %v655_v40 }
 0x176   : > { %vm710_vm2 = vcmp.ge.f32.partialorder %v702_v41, 0.0  ;;  %v736_v49 = vmul.f32 %v731_v21, %v702_v41  ;;  %vm714_vm3 = vcmp.ge.f32.partialorder %v706_v42, 0.0  ;;  %v740_v50 = vmul.f32 %v731_v21, %v706_v42 }
 0x177   : > { %vm711_vm4 = vcmp.ge.f32.partialorder %v703_v45, 0.0  ;;  %v737_v52 = vmul.f32 %v735_v27, %v703_v45  ;;  %vm715_vm5 = vcmp.ge.f32.partialorder %v707_v46, 0.0  ;;  %v741_v53 = vmul.f32 %v735_v27, %v707_v46 }
 0x178   : > { %v744_v54 = vsel %vm710_vm2, %v702_v41, %v736_v49  ;;  %v748_v51 = vsel %vm714_vm3, %v706_v42, %v740_v50  ;;  %v704_v55 = vadd.f32 %v697_v17, %v678_v43  ;;  %v708_v56 = vadd.f32 %v697_v17, %v682_v44 }
 0x179   : > { %752 = vst [vmem:[%s215_s10] sm:$0xff] %v744_v54  ;;  %757 = vst [vmem:[%s215_s10 + $0x20] sm:$0xff] %v748_v51  ;;  %v745_v57 = vsel %vm711_vm4, %v703_v45, %v737_v52  ;;  %v749_v58 = vsel %vm715_vm5, %v707_v46, %v741_v53  ;;  %v705_v59 = vadd.f32 %v701_v24, %v679_v47 }
 0x17a   : > { %v709_v60 = vadd.f32 %v701_v24, %v683_v48  ;;  %754 = vst.msk [vmem:[%s215_s10 + $0x8] sm:$0xff] %vm753_vm1, %v745_v57  ;;  %758 = vst.msk [vmem:[%s215_s10 + $0x28] sm:$0xff] %vm753_vm1, %v749_v58  ;;  %vm712_vm6 = vcmp.ge.f32.partialorder %v704_v55, 0.0  ;;  %v738_v61 = vmul.f32 %v731_v21, %v704_v55  ;;  %vm716_vm7 = vcmp.ge.f32.partialorder %v708_v56, 0.0 }
 0x17b   : > { %v742_v62 = vmul.f32 %v731_v21, %v708_v56  ;;  %vm713_vm8 = vcmp.ge.f32.partialorder %v705_v59, 0.0  ;;  %v739_v63 = vmul.f32 %v735_v27, %v705_v59 }
 0x17c   : > { %vm717_vm9 = vcmp.ge.f32.partialorder %v709_v60, 0.0  ;;  %v743_v0 = vmul.f32 %v735_v27, %v709_v60  ;;  %v746_v1 = vsel %vm712_vm6, %v704_v55, %v738_v61 }
 0x17d   : > { %v750_v2 = vsel %vm716_vm7, %v708_v56, %v742_v62  ;;  %755 = vst [vmem:[%s215_s10 + $0x10] sm:$0xff] %v746_v1  ;;  %v747_v3 = vsel %vm713_vm8, %v705_v59, %v739_v63 }
 0x17e   : > { %759 = vst [vmem:[%s215_s10 + $0x30] sm:$0xff] %v750_v2  ;;  %v751_v4 = vsel %vm717_vm9, %v709_v60, %v743_v0  ;;  %756 = vst.msk [vmem:[%s215_s10 + $0x18] sm:$0xff] %vm753_vm1, %v747_v3 }
 0x17f   : > { %760 = vst.msk [vmem:[%s215_s10 + $0x38] sm:$0xff] %vm753_vm1, %v751_v4 }
 0x180   : > { %1198 = shalt.err (!%p1195_p2)
}
 0x181   : > { %s1199_s11 = scalar_lea.hbm %s1500_s27, 1024  ;;  %s1203_s22 = scalar_lea.hbm %s1551_s3, 2048 }
 0x182   : > { %p1200_p13 = scmp.ne.s32.totalorder %s1500_s27, %s1199_s11  ;;  %p1204_p4 = scmp.lt.u32.totalorder %s1500_s27, %s1551_s3 }
 0x183   : > { %p1205_p5 = scmp.lt.u32.totalorder %s1203_s22, %s1199_s11  ;;  %p1207_p11 = scmp.lt.u32.totalorder %s1199_s11, %s1500_s27 }
 0x184   : > { %p1201_p6 = pnand %p1200_p13, %p1565_p0 }
 0x185   : > { %p1206_p8 = por %p1205_p5, %p1204_p4 }
 0x186   : > { %p1202_p10 = pneg %p1201_p6 }
 0x187   : > { %p1208_p1 = por %p1207_p11, %p1206_p8 }
 0x189   : > { %p1209_p3 = pnand %p1208_p1, %p1202_p10 }
 0x18b   : > { %1212 = shalt.err (!%p1209_p3)
}
 0x18c   : > { %s1266_s18 = smov 256   ;;  %s1267_s20 = smov 16  }
 0x18d   : > { %975 = dma.vmem_to_hbm [thread:$0]  (%p1565_p0), %s1502_s21, 1024, %s1500_s27, %s762_s23, %s1266_s18, %s1266_s18, %s1267_s20  }
 0x18e PF: > { %s791_s10 = sand.u32 1, %s1243_s12   ;;  %p1566_p7 = scmp.ne.s32.totalorder %s1556_s19, 0 }
 0x18f   : > { %p1567_p9 = scmp.ge.s32.totalorder %s1255_s15, 2  ;;  %s792_s16 = scalar_lea.sflag [#allocation4], %s791_s10 }
 0x191   : > { %p989_p12 = pnand %p1567_p9, %p1566_p7 }
 0x193   : > { %1238 = dma.done.wait (!%p989_p12), %s792_s16, 1024  }
 0x194   : > { %1240 = vsyncadd (!%p989_p12), %s792_s16, 4294966272  ;;  %p17_p2 = scmp.ge.s32.totalorder %s1398_s4, 4   ;;  %s1568_s12 = smov %s1247_s13 }
 0x195   : > { %s1569_s13 = smov %s1251_s14  ;;  %s1570_s14 = smov %s1414_s7 }
 0x196   : > { %s1571_s15 = smov %s1398_s4  ;;  %19 = sbr.rel (!%p17_p2) target bundleno = 6 (0x6), region = 87 }
 0x19d   :  { %797 = vsyncpa [#allocation3], 1 }
 0x19e   :  { %799 = vsyncpa [#allocation3 + $0x1], 1 }
 0x19f   :  { %800 = vsyncpa [#allocation6], 1 }
 0x1a0   :  { %801 = vsyncpa [#allocation4], 1 }
 0x1a1   :  { %803 = vsyncpa [#allocation4 + $0x1], 1 }

// kernel: _lambda_.16
= control target key start
LH: loop header
LB: loop body
LE: loop exit
PB: predicated region body
PF: predicated region fallthrough
CT: control target
= control target key end

     0   :  { %8 = vsyncpa [#allocation3], 0  ;;  %s3006_s0 = inlined_call_operand.hbm [shape: bf16[96,576], index: 0, kind: input, shape index: {}]   ;;  %s3007_s1 = inlined_call_operand.hbm [shape: bf16[3,576,64], index: 1, kind: input, shape index: {}]   ;;  %s3008_s2 = inlined_call_operand.hbm [shape: f32[3,64], index: 2, kind: input, shape index: {}]   ;;  %s3009_s3 = inlined_call_operand.hbm [shape: bf16[64,64], index: 3, kind: output, shape index: {}]  }
   0x1   :  { %10 = vsyncpa [#allocation3 + $0x1], 0 }
   0x2   :  { %11 = vsyncpa [#allocation6], 0 }
   0x3   :  { %12 = vsyncpa [#allocation4], 0 }
   0x4   :  { %14 = vsyncpa [#allocation4 + $0x1], 0  ;;  %s2676_s12 = smov 0   ;;  %s2678_s13 = smov 0  }
   0x5   :  { %s2680_s14 = smov 0   ;;  %s2682_s15 = smov 0  }
   0x6 LB: > { %s2697_s16 = sadd.s32 4294967295, %s2644_s15   ;;  %s1863_s17 = sadd.s32 4294967294, %s2644_s15   ;;  %s2644_s15 = sphi %s2682_s15, %s3029_s15   ;;  %s2640_s14 = sphi %s2680_s14, %s3028_s14   ;;  %s2636_s13 = sphi %s2678_s13, %s3027_s13   ;;  %s2632_s12 = sphi %s2676_s12, %s3026_s12  }
   0x7   : > { %p40_p0 = scmp.ne.s32.totalorder %s2636_s13, %s2632_s12  ;;  %p3010_p1 = scmp.eq.s32.totalorder %s2697_s16, 0 }
   0x8   : > { %p112_p3 = scmp.eq.s32.totalorder %s1863_s17, 1  ;;  %p1864_p5 = scmp.ge.s32.totalorder %s2644_s15, 1 }
   0x9   : > { %p2706_p4 = por %p3010_p1, %p40_p0  ;;  %p119_p7 = scmp.lt.s32.totalorder %s2644_s15, 3 }
   0xa   : > { %p2711_p6 = por %p112_p3, %p40_p0  ;;  %s2646_s21 = smov [#allocation5]  }
   0xb   : > { %s3013_s18 = scalar_select %p2706_p4, 1, 0 }
   0xc   : > { %s3014_s19 = scalar_select %p2711_p6, 1, 0 }
   0xd   : > { %p2716_p8 = pnand %p1864_p5, %p119_p7  ;;  %s131_s22 = sshll.u32 %s2646_s21, 4  ;;  %s2720_s22 = int_to_ptr.vmem [resolvable:$true] %s131_s22 }
   0xe   : > { %s2647_s24 = smov [#allocation7]   ;;  %s2488_s28 = scalar_lea.hbm %s3007_s1, 13824 }
   0xf   : > { %p2292_p9 = pneg %p2716_p8  ;;  %s145_s25 = sshll.u32 %s2647_s24, 4  ;;  %s2731_s25 = int_to_ptr.vmem [resolvable:$true] %s145_s25 }
  0x10   : > { %p2489_p12 = scmp.ne.s32.totalorder %s3007_s1, %s2488_s28  ;;  %p2495_p5 = scmp.lt.u32.totalorder %s2488_s28, %s3007_s1 }
  0x11   : > { %p2727_p11 = pnand %p2292_p9, %p3010_p1 }
  0x13   : > { %p2490_p13 = pneg %p2727_p11 }
  0x15   : > { %p2491_p0 = pnand %p2490_p13, %p2489_p12 }
  0x17   : > { %p2492_p3 = pneg %p2491_p0 }
  0x19   : > { %p2497_p7 = pnand %p2495_p5, %p2492_p3 }
  0x1b   : > { %2500 = shalt.err (!%p2497_p7)
}
  0x1c   : > { %s2501_s6 = scalar_lea.vmem %s2720_s22, 13824  ;;  %p2509_p2 = scmp.lt.s32.totalorder %s2720_s22, %s2720_s22 }
  0x1d   : > { %p2502_p9 = scmp.ne.s32.totalorder %s2720_s22, %s2501_s6  ;;  %p2510_p12 = scmp.lt.s32.totalorder %s2501_s6, %s2501_s6 }
  0x1f   : > { %p2504_p10 = pnand %p2502_p9, %p2490_p13  ;;  %p2511_p0 = por %p2510_p12, %p2509_p2 }
  0x21   : > { %p2505_p1 = pneg %p2504_p10 }
  0x23   : > { %p2512_p6 = pnand %p2511_p0, %p2505_p1 }
  0x25   : > { %2515 = shalt.err (!%p2512_p6)
}
  0x26   : > { %s2648_s7 = smov 64   ;;  %s2649_s8 = smov 4  }
  0x27   : > { %2295 = dma.hbm_to_vmem [thread:$0]  (!%p2727_p11), %s3007_s1, 13824, %s2720_s22, [#allocation6], %s2648_s7, %s2648_s7, %s2649_s8  }
  0x28   : > { %s2516_s21 = scalar_lea.hbm %s3008_s2, 64 }
  0x29   : > { %p2517_p2 = scmp.ne.s32.totalorder %s3008_s2, %s2516_s21  ;;  %p2523_p10 = scmp.lt.u32.totalorder %s2516_s21, %s3008_s2 }
  0x2b   : > { %p2519_p1 = pnand %p2517_p2, %p2490_p13 }
  0x2d   : > { %p2520_p6 = pneg %p2519_p1 }
  0x2f   : > { %p2525_p3 = pnand %p2523_p10, %p2520_p6 }
  0x31   : > { %2528 = shalt.err (!%p2525_p3)
}
  0x32   : > { %s2529_s22 = scalar_lea.vmem %s2731_s25, 64  ;;  %p2537_p12 = scmp.lt.s32.totalorder %s2731_s25, %s2731_s25 }
  0x33   : > { %p2530_p5 = scmp.ne.s32.totalorder %s2731_s25, %s2529_s22  ;;  %p2538_p0 = scmp.lt.s32.totalorder %s2529_s22, %s2529_s22 }
  0x35   : > { %p2532_p7 = pnand %p2530_p5, %p2490_p13  ;;  %p2539_p2 = por %p2538_p0, %p2537_p12 }
  0x37   : > { %p2533_p9 = pneg %p2532_p7 }
  0x39   : > { %p2540_p1 = pnand %p2539_p2, %p2533_p9 }
  0x3b   : > { %2543 = shalt.err (!%p2540_p1)
}
  0x3c   : > { %2298 = dma.hbm_to_vmem [thread:$0]  (!%p2727_p11), %s3008_s2, 64, %s2731_s25, [#allocation6]  }
  0x3d   : > { %s2786_s4 = sadd.s32 1, %s2644_s15   ;;  %s27_s5 = sadd.s32 1, %s2640_s14 }
  0x3e   : > { %s24_s23 = ssub.s32 %s2644_s15, %s2786_s4  ;;  %p34_p6 = scmp.ne.s32.totalorder %s2640_s14, %s2636_s13 }
  0x3f   : > { %p25_p13 = scmp.eq.s32.totalorder %s24_s23, 0  ;;  %p35_p10 = scmp.eq.s32.totalorder %s2644_s15, 0 }
  0x40   : > { %p2309_p3 = scmp.lt.s32.totalorder %s2644_s15, 2  ;;  %p3017_p7 = scmp.eq.s32.totalorder %s2697_s16, 1 }
  0x41   : > { %s2796_s6 = scalar_select %p25_p13, %s2640_s14, %s27_s5  }
  0x42   : > { %p36_p5 = por %p35_p10, %p34_p6  ;;  %p2800_p9 = por %p3017_p7, %p34_p6 }
  0x43   : > { %s156_s8 = sand.u32 1, %s2640_s14   ;;  %s2310_s9 = smul.u32 1920, %s2644_s15 }
  0x44   : > { %s3018_s7 = scalar_select %p2800_p9, 1, 0 }
  0x45   : > { %s2277_s25 = smul.u32 120, %s156_s8  ;;  %s2809_s17 = scalar_lea.hbm %s3006_s0, %s2310_s9 }
  0x46   : > { %p2811_p11 = pnand %p2309_p3, %p36_p5  ;;  %s2817_s27 = scalar_lea.sflag [#allocation3], %s156_s8 }
  0x47   : > { %s160_s24 = scalar_lea.vmem [#allocation2], %s2277_s25  ;;  %s2544_s28 = scalar_lea.hbm %s2809_s17, 1920 }
  0x48   : > { %s168_s26 = sshll.u32 %s160_s24, 4  ;;  %p2545_p12 = scmp.ne.s32.totalorder %s2809_s17, %s2544_s28  ;;  %s2815_s26 = int_to_ptr.vmem [resolvable:$true] %s168_s26 }
  0x49   : > { %p2546_p0 = pneg %p2811_p11  ;;  %s2549_s30 = scalar_lea.hbm %s3006_s0, 3840 }
  0x4a   : > { %p2550_p13 = scmp.lt.u32.totalorder %s2809_s17, %s3006_s0  ;;  %p2551_p6 = scmp.lt.u32.totalorder %s2549_s30, %s2544_s28 }
  0x4b   : > { %p2547_p2 = pnand %p2546_p0, %p2545_p12  ;;  %p2553_p3 = scmp.lt.u32.totalorder %s2544_s28, %s2809_s17 }
  0x4c   : > { %p2552_p10 = por %p2551_p6, %p2550_p13 }
  0x4d   : > { %p2548_p1 = pneg %p2547_p2 }
  0x4e   : > { %p2554_p5 = por %p2553_p3, %p2552_p10 }
  0x50   : > { %p2555_p7 = pnand %p2554_p5, %p2548_p1 }
  0x52   : > { %2558 = shalt.err (!%p2555_p7)
}
  0x53   : > { %s2559_s8 = scalar_lea.vmem %s2815_s26, 1920  ;;  %s2650_s9 = smov [#allocation2]  }
  0x54   : > { %p2560_p12 = scmp.ne.s32.totalorder %s2815_s26, %s2559_s8  ;;  %s2564_s25 = sshll.u32 %s2650_s9, 4  ;;  %s2565_s25 = int_to_ptr.vmem [resolvable:$false] %s2564_s25 }
  0x55   : > { %s2566_s10 = scalar_lea.vmem %s2565_s25, 3840  ;;  %p2567_p4 = scmp.lt.s32.totalorder %s2815_s26, %s2565_s25 }
  0x56   : > { %p2562_p2 = pnand %p2560_p12, %p2546_p0  ;;  %p2568_p13 = scmp.lt.s32.totalorder %s2566_s10, %s2559_s8 }
  0x58   : > { %p2563_p9 = pneg %p2562_p2  ;;  %p2569_p6 = por %p2568_p13, %p2567_p4 }
  0x5a   : > { %p2570_p10 = pnand %p2569_p6, %p2563_p9 }
  0x5c   : > { %2573 = shalt.err (!%p2570_p10)
}
  0x5d   : > { %s2651_s11 = smov 320   ;;  %s2652_s24 = smov 20  }
  0x5e   : > { %2302 = dma.hbm_to_vmem [thread:$0]  (!%p2811_p11), %s2809_s17, 1920, %s2815_s26, %s2817_s27, %s2651_s11, %s2651_s11, %s2652_s24  }
  0x5f   : > { %180 = sbr.rel (%p2716_p8) target bundleno = 477 (0x1dd), region = 32  ;;  %s2848_s28 = sand.u32 (!%p2716_p8), 1, %s2636_s13  }
  0x60   : > { %s2279_s22 = smul.u32 (!%p2716_p8), 120, %s2848_s28  ;;  %s183_s29 = scalar_lea.sflag (!%p2716_p8), [#allocation3], %s2848_s28 }
  0x61   : > { %p3020_p4 = scmp.ne.s32.totalorder (!%p2716_p8), %s3013_s18, 0 }
  0x62   : > { %s2852_s30 = scalar_lea.vmem (!%p2716_p8), [#allocation2], %s2279_s22 }
  0x66   : > { %2619 = dma.done.wait (%p3020_p4), %s183_s29, 1920  }
  0x67   : > { %2621 = vsyncadd (%p3020_p4), %s183_s29, 4294965376  ;;  %p3021_p9 = scmp.eq.s32.totalorder %s2697_s16, 0 }
  0x69   : > { %2623 = dma.done.wait (%p3021_p9), [#allocation6], 13888   ;;  %p3022_p8 = pmov %p3021_p9 }
  0x6a   : > { %v2354_v0 = vld [vmem:[#allocation5 + $0x160] sm:$0xff]   ;;  %v2358_v4 = vld [vmem:[#allocation5 + $0x168] sm:$0xff]   ;;  %v2362_v8 = vld [vmem:[#allocation5 + $0x170] sm:$0xff]   ;;  %vm646_vm0 = vcmask 523264   ;;  %s1872_s18 = sshll.u32 %s2848_s28, 4  ;;  %vm1752_vm3 = vcmask 519168  }
  0x6b   : > { %2625 = vsyncadd (%p3022_p8), [#allocation6], 4294953408  ;;  %v2355_v1 = vld [vmem:[#allocation5 + $0x1e0] sm:$0xff]   ;;  %2031 = vmatprep.subr.bf16.mxu0 %v2354_v0  ;;  %v2359_v5 = vld [vmem:[#allocation5 + $0x1e8] sm:$0xff]   ;;  %s2030_s20 = sshll.u32 %s2697_s16, 8  ;;  %s216_s17 = scalar_lea.vmem [#allocation8], %s1872_s18 }
  0x6c   : > { %v2356_v2 = vld [vmem:[#allocation5 + $0x120] sm:$0xff]   ;;  %2059 = vmatprep.subr.bf16.mxu1 %v2355_v1  ;;  %v2360_v6 = vld [vmem:[#allocation5 + $0x128] sm:$0xff]   ;;  %v2363_v9 = vld [vmem:[#allocation5 + $0x1f0] sm:$0xff]   ;;  %s1771_s21 = sshll.u32 %s216_s17, 4  ;;  %s2957_s23 = scalar_lea.hbm %s3009_s3, %s2030_s20  ;;  %s2959_s21 = int_to_ptr.vmem [resolvable:$true] %s1771_s21 }
  0x6d   : > { %v2357_v3 = vld [vmem:[#allocation5 + $0x1a0] sm:$0xff]   ;;  %2032 = vmatpush3.bf16.msra.mxu0 %v2356_v2  ;;  %v2361_v7 = vld [vmem:[#allocation5 + $0x1a8] sm:$0xff]   ;;  %v2364_v10 = vld [vmem:[#allocation5 + $0x130] sm:$0xff]   ;;  %s1758_s16 = scalar_lea.sflag [#allocation4], %s2848_s28  ;;  %s2574_s5 = scalar_lea.vmem %s2959_s21, 256 }
  0x6e   : > { %2060 = vmatpush3.bf16.msra.mxu1 %v2357_v3  ;;  %2033 = vmatprep.subr.bf16.mxu0 %v2358_v4  ;;  %v2365_v11 = vld [vmem:[#allocation5 + $0x1b0] sm:$0xff]   ;;  %v2366_v12 = vld [vmem:[#allocation5 + $0x178] sm:$0xff]   ;;  %v2370_v16 = vld [vmem:[#allocation5 + $0x180] sm:$0xff]   ;;  %p2575_p11 = scmp.ne.s32.totalorder %s2959_s21, %s2574_s5  ;;  %p3023_p0 = scmp.ne.s32.totalorder %s3018_s7, 0 }
  0x6f   : > { %2061 = vmatprep.subr.bf16.mxu1 %v2359_v5  ;;  %v2367_v13 = vld [vmem:[#allocation5 + $0x1f8] sm:$0xff]   ;;  %v2371_v17 = vld [vmem:[#allocation5 + $0x200] sm:$0xff]   ;;  %v2374_v20 = vld [vmem:[#allocation5 + $0x188] sm:$0xff]   ;;  %s2653_s8 = smov [#allocation8]  }
  0x70   : > { %v2368_v14 = vld [vmem:[#allocation5 + $0x138] sm:$0xff]   ;;  %v2372_v18 = vld [vmem:[#allocation5 + $0x140] sm:$0xff]   ;;  %v2375_v21 = vld [vmem:[#allocation5 + $0x208] sm:$0xff]   ;;  %p2576_p1 = pnand %p2575_p11, %p3023_p0  ;;  %s2578_s9 = sshll.u32 %s2653_s8, 4  ;;  %s2579_s9 = int_to_ptr.vmem [resolvable:$false] %s2578_s9 }
  0x71   : > { %2034 = vmatpush3.bf16.msra.mxu0 %v2360_v6  ;;  %v2369_v15 = vld [vmem:[#allocation5 + $0x1b8] sm:$0xff]   ;;  %v2373_v19 = vld [vmem:[#allocation5 + $0x1c0] sm:$0xff]   ;;  %v2376_v22 = vld [vmem:[#allocation5 + $0x148] sm:$0xff]   ;;  %s2580_s25 = scalar_lea.vmem %s2579_s9, 512  ;;  %p2581_p5 = scmp.lt.s32.totalorder %s2959_s21, %s2579_s9 }
  0x72   : > { %2062 = vmatpush3.bf16.msra.mxu1 %v2361_v7  ;;  %2035 = vmatprep.subr.bf16.mxu0 %v2362_v8  ;;  %v2377_v23 = vld [vmem:[#allocation5 + $0x1c8] sm:$0xff]   ;;  %v2378_v24 = vld [vmem:[#allocation5 + $0x190] sm:$0xff]   ;;  %v2382_v28 = vld [vmem:[#allocation5 + $0x198] sm:$0xff]   ;;  %p2577_p3 = pneg %p2576_p1  ;;  %p2582_p7 = scmp.lt.s32.totalorder %s2580_s25, %s2574_s5 }
  0x73   : > { %2063 = vmatprep.subr.bf16.mxu1 %v2363_v9  ;;  %v2379_v25 = vld [vmem:[#allocation5 + $0x210] sm:$0xff]   ;;  %v2383_v29 = vld [vmem:[#allocation5 + $0x218] sm:$0xff]   ;;  %v2390_v40 = vld [vmem:[#allocation5 + $0x220] sm:$0xff]  }
  0x74   : > { %v2380_v26 = vld [vmem:[#allocation5 + $0x150] sm:$0xff]   ;;  %v2384_v30 = vld [vmem:[#allocation5 + $0x158] sm:$0xff]   ;;  %v2391_v41 = vld [vmem:[#allocation5 + $0xc0] sm:$0xff]   ;;  %p2583_p12 = por %p2582_p7, %p2581_p5 }
  0x75   : > { %2036 = vmatpush3.bf16.msra.mxu0 %v2364_v10  ;;  %v2381_v27 = vld [vmem:[#allocation5 + $0x1d0] sm:$0xff]   ;;  %v2385_v31 = vld [vmem:[#allocation5 + $0x1d8] sm:$0xff]   ;;  %v2392_v42 = vld [vmem:[#allocation5 + $0x80] sm:$0xff]  }
  0x76   : > { %2064 = vmatpush3.bf16.msra.mxu1 %v2365_v11  ;;  %2037 = vmatprep.subr.bf16.mxu0 %v2366_v12  ;;  %v2863_v32 = vld [vmem:[%s2852_s30 + $0x14] sm:$0xff]  ;;  %v2866_v33 = vld [vmem:[%s2852_s30 + $0x28] sm:$0xff]  ;;  %v2869_v34 = vld [vmem:[%s2852_s30 + $0x1c] sm:$0xff]  ;;  %p2584_p2 = pnand %p2583_p12, %p2577_p3 }
  0x77   : > { %2065 = vmatprep.subr.bf16.mxu1 %v2367_v13  ;;  %v1874_v35 = vcombine.high %v2863_v32, %v2866_v33  ;;  %v2874_v36 = vld [vmem:[%s2852_s30 + $0x30] sm:$0xff]  ;;  %v1873_v37 = vcombine.low %v2863_v32, %v2866_v33  ;;  %v2393_v43 = vld [vmem:[#allocation5 + $0x228] sm:$0xff]   ;;  %v2399_v53 = vld [vmem:[#allocation5 + $0x230] sm:$0xff]  }
  0x78   : > { %v1876_v38 = vcombine.high %v2869_v34, %v2874_v36  ;;  %v1875_v39 = vcombine.low %v2869_v34, %v2874_v36  ;;  %v2394_v44 = vld [vmem:[#allocation5 + $0xc8] sm:$0xff]   ;;  %v2894_v50 = vld [vmem:[%s2852_s30 + $0x50] sm:$0xff]  ;;  %v2400_v55 = vld [vmem:[#allocation5 + $0xd0] sm:$0xff]  }
  0x79   : > { %2038 = vmatpush3.bf16.msra.mxu0 %v2368_v14  ;;  %685 = vmatprep.mubr.bf16.mxu0 %v1874_v35  ;;  %v2395_v45 = vld [vmem:[#allocation5 + $0x88] sm:$0xff]   ;;  %v2402_v56 = vld [vmem:[#allocation5 + $0x90] sm:$0xff]   ;;  %v2403_v57 = vld [vmem:[#allocation5 + $0x238] sm:$0xff]  }
  0x7a   : > { %2066 = vmatpush3.bf16.msra.mxu1 %v2369_v15  ;;  %2039 = vmatprep.subr.bf16.mxu0 %v2370_v16  ;;  %v2883_v46 = vld [vmem:[%s2852_s30 + $0x44] sm:$0xff]  ;;  %v2886_v47 = vld [vmem:[%s2852_s30 + $0x58] sm:$0xff]  ;;  %v2909_v62 = vld [vmem:[%s2852_s30 + $0x4c] sm:$0xf] }
  0x7b   : > { %2067 = vmatprep.subr.bf16.mxu1 %v2371_v17  ;;  %734 = vmatprep.mubr.bf16.mxu1 %v1876_v38  ;;  %v1881_v48 = vcombine.high %v2883_v46, %v2886_v47  ;;  %v2891_v49 = vld [vmem:[%s2852_s30 + $0x3c] sm:$0xff]  ;;  %v1880_v52 = vcombine.low %v2883_v46, %v2886_v47  ;;  %v2404_v58 = vld [vmem:[#allocation5 + $0xd8] sm:$0xff]   ;;  %v2903_v60 = vld [vmem:[%s2852_s30 + $0x24] sm:$0xf] }
  0x7c   : > { %v1879_v51 = vcombine.high %v2891_v49, %v2894_v50  ;;  %v1878_v54 = vcombine.low %v2891_v49, %v2894_v50  ;;  %v2405_v59 = vld [vmem:[#allocation5 + $0x98] sm:$0xff]   ;;  %v2906_v61 = vld [vmem:[%s2852_s30 + $0x38] sm:$0xf]  ;;  %v306_v63 = vld [vmem:[%s2852_s30 + $0x60] sm:$0xf] }
  0x7d   : > { %2040 = vmatpush3.bf16.msra.mxu0 %v2372_v18  ;;  %v1877_v0 = vcombine.low %v2903_v60, %v2906_v61  ;;  %v2409_v1 = vld [vmem:[#allocation5 + $0x40] sm:$0xff]   ;;  %v1882_v2 = vcombine.low %v2909_v62, %v306_v63  ;;  %v2413_v6 = vld [vmem:[#allocation5 + $0x48] sm:$0xff]   ;;  %v2417_v10 = vld [vmem:[#allocation5 + $0x50] sm:$0xff]  }
  0x7e   : > { %2068 = vmatpush3.bf16.msra.mxu1 %v2373_v19  ;;  %2041 = vmatprep.subr.bf16.mxu0 %v2374_v20  ;;  %v2410_v3 = vld [vmem:[#allocation5 + $0xe0] sm:$0xff]   ;;  %v2414_v7 = vld [vmem:[#allocation5 + $0xe8] sm:$0xff]   ;;  %v2418_v11 = vld [vmem:[#allocation5 + $0xf0] sm:$0xff]  }
  0x7f   : > { %2069 = vmatprep.subr.bf16.mxu1 %v2375_v21  ;;  %v2411_v4 = vld [vmem:[#allocation5] sm:$0xff]   ;;  %v2415_v8 = vld [vmem:[#allocation5 + $0x8] sm:$0xff]   ;;  %v2419_v12 = vld [vmem:[#allocation5 + $0x10] sm:$0xff]  }
  0x80   : > { %v2412_v5 = vld [vmem:[#allocation5 + $0xa0] sm:$0xff]   ;;  %v2416_v9 = vld [vmem:[#allocation5 + $0xa8] sm:$0xff]   ;;  %v2420_v13 = vld [vmem:[#allocation5 + $0xb0] sm:$0xff]  }
  0x81   : > { %2042 = vmatpush3.bf16.msra.mxu0 %v2376_v22  ;;  %v2421_v14 = vld [vmem:[#allocation5 + $0x58] sm:$0xff]   ;;  %v2427_v20 = vld [vmem:[#allocation5 + $0x60] sm:$0xff]  }
  0x82   : > { %2070 = vmatpush3.bf16.msra.mxu1 %v2377_v23  ;;  %2043 = vmatprep.subr.bf16.mxu0 %v2378_v24  ;;  %v2422_v15 = vld [vmem:[#allocation5 + $0xf8] sm:$0xff]   ;;  %v2428_v22 = vld [vmem:[#allocation5 + $0x100] sm:$0xff]   ;;  %v2430_v24 = vld [vmem:[#allocation5 + $0x68] sm:$0xff]  }
  0x83   : > { %2071 = vmatprep.subr.bf16.mxu1 %v2379_v25  ;;  %v2423_v16 = vld [vmem:[#allocation5 + $0x18] sm:$0xff]   ;;  %v2429_v23 = vld [vmem:[#allocation5 + $0x20] sm:$0xff]   ;;  %v1929_v25 = vcombine.high %v2874_v36, %v2883_v46 }
  0x84   : > { %v2424_v17 = vld [vmem:[#allocation5 + $0xb8] sm:$0xff]   ;;  %v2462_v63 = vld [vmem:[#allocation5 + $0x2a0] sm:$0xff]  }
  0x85   : > { %2044 = vmatpush3.bf16.msra.mxu0 %v2380_v26  ;;  %v221_v18 = vld [vmem:[%s2852_s30 + $0x8] sm:$0xff]  ;;  %v2431_v26 = vld [vmem:[#allocation5 + $0x108] sm:$0xff]   ;;  %v222_v38 = vld [vmem:[%s2852_s30 + $0x10] sm:$0xf] }
  0x86   : > { %2072 = vmatpush3.bf16.msra.mxu1 %v2381_v27  ;;  %2045 = vmatprep.subr.bf16.mxu0 %v2382_v28  ;;  %v1924_v19 = vcombine.high %v221_v18, %v2869_v34  ;;  %v1923_v21 = vcombine.low %v221_v18, %v2869_v34  ;;  %v2432_v27 = vld [vmem:[#allocation5 + $0x28] sm:$0xff]   ;;  %v2434_v28 = vld [vmem:[#allocation5 + $0x70] sm:$0xff]   ;;  %v2438_v34 = vld [vmem:[#allocation5 + $0x78] sm:$0xff]  }
  0x87   : > { %2073 = vmatprep.subr.bf16.mxu1 %v2383_v29  ;;  %v2436_v29 = vld [vmem:[#allocation5 + $0x110] sm:$0xff]   ;;  %v2439_v35 = vld [vmem:[#allocation5 + $0x118] sm:$0xff]   ;;  %v2479_v18 = vld [vmem:[#allocation5 + $0x348] sm:$0xff]  }
  0x89   : > { %2046 = vmatpush3.bf16.msra.mxu0 %v2384_v30  ;;  %v2924_v30 = vcombine.low %v2874_v36, %v2883_v46  ;;  %v2444_v36 = vld [vmem:[#allocation5 + $0x280] sm:$0xff]  }
  0x8a   : > { %2074 = vmatpush3.bf16.msra.mxu1 %v2385_v31  ;;  %2121 = vmatprep.subr.bf16.mxu0 %v2391_v41  ;;  %v2437_v31 = vld [vmem:[#allocation5 + $0x30] sm:$0xff]   ;;  %v2440_v41 = vld [vmem:[#allocation5 + $0x38] sm:$0xff]   ;;  %v2447_v46 = vld [vmem:[#allocation5 + $0x2c0] sm:$0xff]  }
  0x8b   : > { %2217 = vmatprep.subr.bf16.mxu1 %v2390_v40 }
  0x8c   : > { %686 = vmatmul.mubr.bf16.vlgmr.msra.gmra.mrb[0].mxu0 %v1873_v37  ;;  %v220_v37 = vld [vmem:[%s2852_s30] sm:$0xff] }
  0x8d   : > { %735 = vmatmul.mubr.bf16.vlgmr.msra.gmra.mrb[0].mxu1 %v1875_v39  ;;  %2122 = vmatpush3.bf16.msra.mxu0 %v2392_v42  ;;  %v1922_v39 = vcombine.high %v220_v37, %v2863_v32  ;;  %v2445_v42 = vld [vmem:[#allocation5 + $0x300] sm:$0xff]  }
  0x8e   : > { %2218 = vmatpush3.bf16.msra.mxu1 %v2390_v40  ;;  %2123 = vmatprep.subr.bf16.mxu0 %v2394_v44  ;;  %v1925_v40 = vcombine.low %v222_v38, %v2903_v60  ;;  %v2446_v44 = vld [vmem:[#allocation5 + $0x240] sm:$0xff]   ;;  %v2459_v60 = vld [vmem:[#allocation5 + $0x318] sm:$0xff]  }
  0x8f   : > { %2219 = vmatprep.subr.bf16.mxu1 %v2393_v43  ;;  %742 = vmatprep.mubr.bf16.mxu1 %v1881_v48  ;;  %v2448_v48 = vld [vmem:[#allocation5 + $0x288] sm:$0xff]  }
  0x90   : > { %693 = vmatprep.mubr.bf16.mxu0 %v1879_v51  ;;  %v2449_v51 = vld [vmem:[#allocation5 + $0x308] sm:$0xff]  }
  0x91   : > { %2124 = vmatpush3.bf16.msra.mxu0 %v2395_v45  ;;  %v1930_v45 = vcombine.low %v2906_v61, %v2909_v62  ;;  %v2460_v61 = vld [vmem:[#allocation5 + $0x258] sm:$0xff]  }
  0x92   : > { %2220 = vmatpush3.bf16.msra.mxu1 %v2393_v43  ;;  %2125 = vmatprep.subr.bf16.mxu0 %v2400_v55  ;;  %v1921_v43 = vcombine.low %v220_v37, %v2863_v32  ;;  %v2451_v32 = vld [vmem:[#allocation5 + $0x2c8] sm:$0xff]   ;;  %v2455_v55 = vld [vmem:[#allocation5 + $0x310] sm:$0xff]   ;;  %v2461_v62 = vld [vmem:[#allocation5 + $0x2d8] sm:$0xff]  }
  0x93   : > { %2221 = vmatprep.subr.bf16.mxu1 %v2399_v53 }
  0x94   : > { %694 = vmatmul.mubr.bf16.gmra.mrb[4].mxu0 %v1878_v54  ;;  %v2454_v54 = vld [vmem:[#allocation5 + $0x290] sm:$0xff]  }
  0x95   : > { %743 = vmatmul.mubr.bf16.gmra.mrb[4].mxu1 %v1880_v52  ;;  %2126 = vmatpush3.bf16.msra.mxu0 %v2402_v56  ;;  %v1927_v52 = vcombine.high %v2866_v33, %v2891_v49  ;;  %v1926_v56 = vcombine.low %v2866_v33, %v2891_v49  ;;  %v2464_v33 = vld [vmem:[#allocation5 + $0x260] sm:$0xff]  }
  0x96   : > { %2222 = vmatpush3.bf16.msra.mxu1 %v2399_v53  ;;  %2127 = vmatprep.subr.bf16.mxu0 %v2404_v58  ;;  %v2450_v53 = vld [vmem:[#allocation5 + $0x248] sm:$0xff]   ;;  %v2457_v58 = vld [vmem:[#allocation5 + $0x2d0] sm:$0xff]   ;;  %v2465_v49 = vld [vmem:[#allocation5 + $0x2e0] sm:$0xff]  }
  0x97   : > { %2223 = vmatprep.subr.bf16.mxu1 %v2403_v57  ;;  %2225 = vmatprep.mubr.msk.bf16.mxu1 %vm646_vm0, %v1877_v0  ;;  %v2463_v0 = vld [vmem:[#allocation5 + $0x320] sm:$0xff]  }
  0x98   : > { %1129 = vmatprep.mubr.bf16.mxu0 %v1924_v19  ;;  %v2484_v19 = vld [vmem:[#allocation5 + $0x350] sm:$0xff]  }
  0x99   : > { %2128 = vmatpush3.bf16.msra.mxu0 %v2405_v59  ;;  %v2458_v59 = vld [vmem:[#allocation5 + $0x298] sm:$0xff]  }
  0x9a   : > { %2224 = vmatpush3.bf16.msra.mxu1 %v2403_v57  ;;  %2129 = vmatprep.subr.bf16.mxu0 %v2410_v3  ;;  %v2456_v57 = vld [vmem:[#allocation5 + $0x250] sm:$0xff]   ;;  %v2468_v3 = vld [vmem:[#allocation5 + $0x268] sm:$0xff]  }
  0x9b   : > { %2093 = vmatprep.subr.bf16.mxu1 %v2409_v1  ;;  %v2466_v1 = vld [vmem:[#allocation5 + $0x2a8] sm:$0xff]  }
  0x9d   : > { %2226 = vmatmul.mubr.msk.bf16.vlgmr.msra.gmra.mrb[8].mxu1 %vm646_vm0, %v1882_v2  ;;  %2130 = vmatpush3.bf16.msra.mxu0 %v2412_v5  ;;  %v2467_v2 = vld [vmem:[#allocation5 + $0x328] sm:$0xff]   ;;  %v2470_v5 = vld [vmem:[#allocation5 + $0x2b0] sm:$0xff]  }
  0x9e   : > { %2094 = vmatpush3.bf16.msra.mxu1 %v2411_v4  ;;  %2131 = vmatprep.subr.bf16.mxu0 %v2414_v7  ;;  %v2469_v4 = vld [vmem:[#allocation5 + $0x2e8] sm:$0xff]   ;;  %v2472_v7 = vld [vmem:[#allocation5 + $0x270] sm:$0xff]  }
  0x9f   : > { %2095 = vmatprep.subr.bf16.mxu1 %v2413_v6  ;;  %1080 = vmatprep.mubr.bf16.mxu1 %v1922_v39  ;;  %v2471_v6 = vld [vmem:[#allocation5 + $0x330] sm:$0xff]  }
  0xa1   : > { %2132 = vmatpush3.bf16.msra.mxu0 %v2416_v9  ;;  %v2474_v9 = vld [vmem:[#allocation5 + $0x2b8] sm:$0xff]  }
  0xa2   : > { %2096 = vmatpush3.bf16.msra.mxu1 %v2415_v8  ;;  %2133 = vmatprep.subr.bf16.mxu0 %v2418_v11  ;;  %v2473_v8 = vld [vmem:[#allocation5 + $0x2f0] sm:$0xff]   ;;  %v2476_v11 = vld [vmem:[#allocation5 + $0x278] sm:$0xff]  }
  0xa3   : > { %2097 = vmatprep.subr.bf16.mxu1 %v2417_v10  ;;  %v2475_v10 = vld [vmem:[#allocation5 + $0x338] sm:$0xff]  }
  0xa5   : > { %2134 = vmatpush3.bf16.msra.mxu0 %v2420_v13  ;;  %v2478_v13 = vld [vmem:[#allocation5 + $0x340] sm:$0xff]  }
  0xa6   : > { %2098 = vmatpush3.bf16.msra.mxu1 %v2419_v12  ;;  %2135 = vmatprep.subr.bf16.mxu0 %v2422_v15  ;;  %v2477_v12 = vld [vmem:[#allocation5 + $0x2f8] sm:$0xff]  }
  0xa7   : > { %2099 = vmatprep.subr.bf16.mxu1 %v2421_v14  ;;  %v1204_v14 = vld [vmem:[%s2852_s30 + $0x64] sm:$0xff]  ;;  %v1205_v15 = vld [vmem:[%s2852_s30 + $0x6c] sm:$0xff] }
  0xa9   : > { %2136 = vmatpush3.bf16.msra.mxu0 %v2424_v17  ;;  %v1977_v17 = vcombine.high %v2886_v47, %v1205_v15 }
  0xaa   : > { %2100 = vmatpush3.bf16.msra.mxu1 %v2423_v16  ;;  %2229 = vmatprep.subr.bf16.mxu0 %v2428_v22  ;;  %v1975_v16 = vcombine.high %v2894_v50, %v1204_v14 }
  0xab   : > { %2101 = vmatprep.subr.bf16.mxu1 %v2427_v20  ;;  %v1974_v20 = vcombine.low %v2894_v50, %v1204_v14 }
  0xac   : > { %1130 = vmatmul.mubr.bf16.vlgmr.msra.gmra.mrb[8].mxu0 %v1923_v21  ;;  %v1976_v21 = vcombine.low %v2886_v47, %v1205_v15 }
  0xad   : > { %2230 = vmatpush3.bf16.msra.mxu0 %v2428_v22  ;;  %1137 = vmatprep.mubr.bf16.mxu0 %v1929_v25  ;;  %v2486_v22 = vld [vmem:[%s2852_s30 + $0x38] ss:$20 sps:$4 sm:$0xff]  }
  0xae   : > { %2102 = vmatpush3.bf16.msra.mxu1 %v2429_v23  ;;  %2231 = vmatprep.subr.bf16.mxu0 %v2431_v26  ;;  %v2485_v23 = vld [vmem:[#allocation5 + $0x358] sm:$0xff]  }
  0xaf   : > { %2103 = vmatprep.subr.bf16.mxu1 %v2430_v24  ;;  %v2487_v24 = vld [vmem:[%s2852_s30 + $0x60] ss:$20 sps:$4 sm:$0xff]  }
  0xb1   : > { %2232 = vmatpush3.bf16.msra.mxu0 %v2431_v26 }
  0xb2   : > { %2104 = vmatpush3.bf16.msra.mxu1 %v2432_v27  ;;  %2233 = vmatprep.subr.bf16.mxu0 %v2436_v29 }
  0xb3   : > { %2105 = vmatprep.subr.bf16.mxu1 %v2434_v28 }
  0xb4   : > { %1138 = vmatmul.mubr.bf16.gmra.mrb[12].mxu0 %v2924_v30 }
  0xb5   : > { %2234 = vmatpush3.bf16.msra.mxu0 %v2436_v29  ;;  %2237 = vmatprep.mubr.msk.bf16.mxu0 %vm646_vm0, %v1925_v40 }
  0xb6   : > { %2106 = vmatpush3.bf16.msra.mxu1 %v2437_v31  ;;  %2235 = vmatprep.subr.bf16.mxu0 %v2439_v35 }
  0xb7   : > { %2107 = vmatprep.subr.bf16.mxu1 %v2438_v34 }
  0xb9   : > { %2236 = vmatpush3.bf16.msra.mxu0 %v2439_v35 }
  0xba   : > { %2108 = vmatpush3.bf16.msra.mxu1 %v2440_v41  ;;  %2183 = vmatprep.subr.bf16.mxu0 %v2445_v42 }
  0xbb   : > { %2155 = vmatprep.subr.bf16.mxu1 %v2444_v36 }
  0xbc   : > { %2238 = vmatmul.mubr.msk.bf16.vlgmr.msra.gmra.mrb[16].mxu0 %vm646_vm0, %v1930_v45 }
  0xbd   : > { %1081 = vmatmul.mubr.bf16.vlgmr.msra.gmra.mrb[12].mxu1 %v1921_v43  ;;  %2184 = vmatpush3.bf16.msra.mxu0 %v2447_v46 }
  0xbe   : > { %2156 = vmatpush3.bf16.msra.mxu1 %v2446_v44  ;;  %2185 = vmatprep.subr.bf16.mxu0 %v2449_v51 }
  0xbf   : > { %2157 = vmatprep.subr.bf16.mxu1 %v2448_v48  ;;  %1088 = vmatprep.mubr.bf16.mxu1 %v1927_v52 }
  0xc0   : > { %1633 = vmatprep.mubr.bf16.mxu0 %v1929_v25 }
  0xc1   : > { %2186 = vmatpush3.bf16.msra.mxu0 %v2451_v32 }
  0xc2   : > { %2158 = vmatpush3.bf16.msra.mxu1 %v2450_v53  ;;  %2187 = vmatprep.subr.bf16.mxu0 %v2455_v55 }
  0xc3   : > { %2159 = vmatprep.subr.bf16.mxu1 %v2454_v54 }
  0xc5   : > { %1089 = vmatmul.mubr.bf16.gmra.mrb[16].mxu1 %v1926_v56  ;;  %2188 = vmatpush3.bf16.msra.mxu0 %v2457_v58 }
  0xc6   : > { %2160 = vmatpush3.bf16.msra.mxu1 %v2456_v57  ;;  %1584 = vmatprep.mubr.bf16.mxu1 %v1927_v52 }
  0xc7   : > { %2161 = vmatprep.subr.bf16.mxu1 %v2458_v59  ;;  %2189 = vmatprep.subr.bf16.mxu0 %v2459_v60 }
  0xc9   : > { %2190 = vmatpush3.bf16.msra.mxu0 %v2461_v62 }
  0xca   : > { %2162 = vmatpush3.bf16.msra.mxu1 %v2460_v61  ;;  %2191 = vmatprep.subr.bf16.mxu0 %v2463_v0 }
  0xcb   : > { %2163 = vmatprep.subr.bf16.mxu1 %v2462_v63 }
  0xcd   : > { %2192 = vmatpush3.bf16.msra.mxu0 %v2465_v49 }
  0xce   : > { %2164 = vmatpush3.bf16.msra.mxu1 %v2464_v33  ;;  %2193 = vmatprep.subr.bf16.mxu0 %v2467_v2 }
  0xcf   : > { %2165 = vmatprep.subr.bf16.mxu1 %v2466_v1 }
  0xd1   : > { %2194 = vmatpush3.bf16.msra.mxu0 %v2469_v4 }
  0xd2   : > { %2166 = vmatpush3.bf16.msra.mxu1 %v2468_v3  ;;  %2195 = vmatprep.subr.bf16.mxu0 %v2471_v6 }
  0xd3   : > { %2167 = vmatprep.subr.bf16.mxu1 %v2470_v5 }
  0xd5   : > { %2196 = vmatpush3.bf16.msra.mxu0 %v2473_v8 }
  0xd6   : > { %2168 = vmatpush3.bf16.msra.mxu1 %v2472_v7  ;;  %2197 = vmatprep.subr.bf16.mxu0 %v2475_v10 }
  0xd7   : > { %2169 = vmatprep.subr.bf16.mxu1 %v2474_v9 }
  0xd9   : > { %2198 = vmatpush3.bf16.msra.mxu0 %v2477_v12 }
  0xda   : > { %2170 = vmatpush3.bf16.msra.mxu1 %v2476_v11  ;;  %2241 = vmatprep.subr.bf16.mxu0 %v2478_v13 }
  0xdc   : > { %1634 = vmatmul.mubr.bf16.vlgmr.msra.gmra.mrb[20].mxu0 %v2924_v30 }
  0xdd   : > { %1585 = vmatmul.mubr.bf16.vlgmr.msra.gmra.mrb[20].mxu1 %v1926_v56  ;;  %2242 = vmatpush3.bf16.msra.mxu0 %v2478_v13 }
  0xde   : > { %1592 = vmatprep.mubr.bf16.mxu1 %v1975_v16  ;;  %1641 = vmatprep.mubr.bf16.mxu0 %v1977_v17 }
  0xdf   : > { %2243 = vmatprep.subr.bf16.mxu0 %v2479_v18 }
  0xe1   : > { %2244 = vmatpush3.bf16.msra.mxu0 %v2479_v18 }
  0xe2   : > { %2245 = vmatprep.subr.bf16.mxu0 %v2484_v19 }
  0xe4   : > { %1642 = vmatmul.mubr.bf16.gmra.mrb[24].mxu0 %v1976_v21 }
  0xe5   : > { %1593 = vmatmul.mubr.bf16.gmra.mrb[24].mxu1 %v1974_v20  ;;  %2246 = vmatpush3.bf16.msra.mxu0 %v2484_v19 }
  0xe6   : > { %2249 = vmatprep.mubr.msk.bf16.mxu0 %vm646_vm0, %v2486_v22  ;;  %2247 = vmatprep.subr.bf16.mxu0 %v2485_v23 }
  0xe9   : > { %2248 = vmatpush3.bf16.msra.mxu0 %v2485_v23 }
  0xec   : > { %2250 = vmatmul.mubr.msk.bf16.vlgmr.msra.gmra.mrb[16].mxu0 %vm646_vm0, %v2487_v24 }
 0x15f   : > { %v2047_v25 = vpop.f32.mrb[0].mxu0 }
 0x160   : > { %v2075_v26 = vpop.f32.mrb[0].mxu1  ;;  %v2048_v27 = vpop.f32.mrb[1].mxu0 }
 0x161   : > { %v2049_v50 = vadd.f32 %v2048_v27, %v2047_v25  ;;  %v2076_v28 = vpop.f32.mrb[1].mxu1  ;;  %v2050_v47 = vpop.f32.mrb[2].mxu0 }
 0x162   : > { %v2077_v29 = vadd.f32 %v2076_v28, %v2075_v26  ;;  %v2078_v30 = vpop.f32.mrb[2].mxu1  ;;  %v2051_v31 = vpop.f32.mrb[3].mxu0 }
 0x163   : > { %v2052_v34 = vadd.f32 %v2051_v31, %v2050_v47  ;;  %v2079_v35 = vpop.f32.mrb[3].mxu1 }
 0x164   : > { %v2080_v37 = vadd.f32 %v2079_v35, %v2078_v30  ;;  %v737_v38 = vadd.f32 %v2077_v29, %v2049_v50 }
 0x166   : > { %v740_v39 = vadd.f32 %v2080_v37, %v2052_v34 }
 0x167   : > { %v2053_v40 = vpop.f32.mrb[4].mxu0 }
 0x168   : > { %v2081_v41 = vpop.f32.mrb[4].mxu1  ;;  %v2054_v36 = vpop.f32.mrb[5].mxu0 }
 0x169   : > { %v2082_v42 = vpop.f32.mrb[5].mxu1  ;;  %v2055_v43 = vadd.f32 %v2054_v36, %v2053_v40  ;;  %v2056_v45 = vpop.f32.mrb[6].mxu0 }
 0x16a   : > { %v2083_v44 = vadd.f32 %v2082_v42, %v2081_v41  ;;  %v2084_v46 = vpop.f32.mrb[6].mxu1  ;;  %v2057_v48 = vpop.f32.mrb[7].mxu0  ;;  %v1704_v41 = vlaneseq }
 0x16b   : > { %v2085_v51 = vpop.f32.mrb[7].mxu1  ;;  %v2058_v52 = vadd.f32 %v2057_v48, %v2056_v45 }
 0x16c   : > { %v2086_v53 = vadd.f32 %v2085_v51, %v2084_v46  ;;  %v745_v32 = vadd.f32 %v2083_v44, %v2055_v43  ;;  %v1705_v46 = vshrl.u32 %v1704_v41, 7 }
 0x16e   : > { %v748_v54 = vadd.f32 %v2086_v53, %v2058_v52 }
 0x170   : > { %v2227_v55 = vpop.f32.mrb[8].mxu1 }
 0x171   : > { %v794_v56 = vadd.f32 %v2227_v55, %v745_v32  ;;  %v785_v57 = vpop.f32.mrb[9].mxu1 }
 0x172   : > { %v786_v58 = vadd.f32 %v785_v57, %v737_v38  ;;  %v2228_v59 = vpop.f32.mrb[10].mxu1 }
 0x173   : > { %v797_v60 = vadd.f32 %v2228_v59, %v748_v54  ;;  %v788_v61 = vpop.f32.mrb[11].mxu1 }
 0x174   : > { %v789_v62 = vadd.f32 %v788_v61, %v740_v39 }
 0x17f   : > { %v2137_v63 = vpop.f32.mrb[8].mxu0 }
 0x180   : > { %v2138_v0 = vpop.f32.mrb[9].mxu0 }
 0x181   : > { %v2139_v33 = vadd.f32 %v2138_v0, %v2137_v63  ;;  %v2140_v49 = vpop.f32.mrb[10].mxu0  ;;  %v1703_v63 = vld [vmem:[#allocation7] sm:$0x7]  ;;  %v1714_v0 = vsub.s32 1, %v1705_v46 }
 0x182   : > { %v2141_v1 = vpop.f32.mrb[11].mxu0 }
 0x183   : > { %v2142_v2 = vadd.f32 %v2141_v1, %v2140_v49 }
 0x187   : > { %v2143_v3 = vpop.f32.mrb[12].mxu0 }
 0x188   : > { %v2144_v4 = vpop.f32.mrb[13].mxu0 }
 0x189   : > { %v2145_v5 = vadd.f32 %v2144_v4, %v2143_v3  ;;  %v2146_v6 = vpop.f32.mrb[14].mxu0 }
 0x18a   : > { %v2147_v7 = vpop.f32.mrb[15].mxu0 }
 0x18b   : > { %v2148_v8 = vadd.f32 %v2147_v7, %v2146_v6  ;;  %v1715_v6 = vrot.slane %v1703_v63, %v1714_v0 }
 0x190   : > { %v2109_v9 = vpop.f32.mrb[12].mxu1 }
 0x191   : > { %v2110_v10 = vpop.f32.mrb[13].mxu1 }
 0x192   : > { %v2111_v11 = vadd.f32 %v2110_v10, %v2109_v9  ;;  %v2112_v12 = vpop.f32.mrb[14].mxu1 }
 0x193   : > { %v2113_v13 = vpop.f32.mrb[15].mxu1 }
 0x194   : > { %v1083_v14 = vadd.f32 %v2111_v11, %v786_v58  ;;  %v2114_v15 = vadd.f32 %v2113_v13, %v2112_v12 }
 0x196   : > { %v1086_v16 = vadd.f32 %v2114_v15, %v789_v62  ;;  %v1132_v17 = vadd.f32 %v2139_v33, %v1083_v14 }
 0x198   : > { %v2115_v18 = vpop.f32.mrb[16].mxu1  ;;  %v1135_v19 = vadd.f32 %v2142_v2, %v1086_v16  ;;  %v1726_v2 = vsub.s32 2, %v1705_v46 }
 0x199   : > { %v2116_v20 = vpop.f32.mrb[17].mxu1 }
 0x19a   : > { %v2117_v21 = vadd.f32 %v2116_v20, %v2115_v18  ;;  %v2118_v22 = vpop.f32.mrb[18].mxu1  ;;  %v1727_v11 = vrot.slane %v1703_v63, %v1726_v2 }
 0x19b   : > { %v2119_v23 = vpop.f32.mrb[19].mxu1 }
 0x19c   : > { %v1091_v24 = vadd.f32 %v2117_v21, %v794_v56  ;;  %v2120_v25 = vadd.f32 %v2119_v23, %v2118_v22 }
 0x19e   : > { %v1094_v26 = vadd.f32 %v2120_v25, %v797_v60  ;;  %v1140_v27 = vadd.f32 %v2145_v5, %v1091_v24  ;;  %v1706_v60 = vsub.s32 0, %v1705_v46 }
 0x1a0   : > { %v1143_v50 = vadd.f32 %v2148_v8, %v1094_v26  ;;  %v1707_v1 = vrot.slane %v1703_v63, %v1706_v60 }
 0x1af   : > { %v2199_v47 = vpop.f32.mrb[20].mxu0 }
 0x1b0   : > { %v2171_v28 = vpop.f32.mrb[20].mxu1  ;;  %v2200_v31 = vpop.f32.mrb[21].mxu0 }
 0x1b1   : > { %v2172_v29 = vpop.f32.mrb[21].mxu1  ;;  %v2201_v35 = vadd.f32 %v2200_v31, %v2199_v47  ;;  %v2202_v37 = vpop.f32.mrb[22].mxu0 }
 0x1b2   : > { %v2173_v30 = vadd.f32 %v2172_v29, %v2171_v28  ;;  %v2174_v34 = vpop.f32.mrb[22].mxu1  ;;  %v2203_v40 = vpop.f32.mrb[23].mxu0 }
 0x1b3   : > { %v2175_v38 = vpop.f32.mrb[23].mxu1  ;;  %v2204_v42 = vadd.f32 %v2203_v40, %v2202_v37 }
 0x1b4   : > { %v2176_v39 = vadd.f32 %v2175_v38, %v2174_v34  ;;  %v1636_v36 = vadd.f32 %v2201_v35, %v2173_v30 }
 0x1b6   : > { %v1639_v43 = vadd.f32 %v2204_v42, %v2176_v39  ;;  %v2261_v44 = vadd.f32 %v1636_v36, %v1132_v17 }
 0x1b7   : > { %v2205_v48 = vpop.f32.mrb[24].mxu0 }
 0x1b8   : > { %v2177_v45 = vpop.f32.mrb[24].mxu1  ;;  %v2271_v52 = vadd.f32 %v1639_v43, %v1135_v19  ;;  %v2206_v32 = vpop.f32.mrb[25].mxu0 }
 0x1b9   : > { %v2178_v51 = vpop.f32.mrb[25].mxu1  ;;  %v2207_v55 = vadd.f32 %v2206_v32, %v2205_v48  ;;  %v2208_v56 = vpop.f32.mrb[26].mxu0 }
 0x1ba   : > { %v2179_v53 = vadd.f32 %v2178_v51, %v2177_v45  ;;  %v2180_v54 = vpop.f32.mrb[26].mxu1  ;;  %v2209_v59 = vpop.f32.mrb[27].mxu0 }
 0x1bb   : > { %v2181_v57 = vpop.f32.mrb[27].mxu1  ;;  %v2210_v62 = vadd.f32 %v2209_v59, %v2208_v56 }
 0x1bc   : > { %v2182_v58 = vadd.f32 %v2181_v57, %v2180_v54  ;;  %v1644_v61 = vadd.f32 %v2207_v55, %v2179_v53 }
 0x1be   : > { %v1647_v33 = vadd.f32 %v2210_v62, %v2182_v58  ;;  %v2256_v49 = vadd.f32 %v1644_v61, %v1140_v27 }
 0x1bf   : > { %v2251_v3 = vpop.f32.mrb[16].mxu0 }
 0x1c0   : > { %v2266_v4 = vadd.f32 %v1647_v33, %v1143_v50  ;;  %v2257_v5 = vadd.f32 %v2256_v49, %v2251_v3  ;;  %v1684_v7 = vpop.f32.mrb[17].mxu0 }
 0x1c1   : > { %v2262_v8 = vadd.f32 %v2261_v44, %v1684_v7  ;;  %v2252_v9 = vpop.f32.mrb[18].mxu0 }
 0x1c2   : > { %v1710_v10 = vmul.f32 %v2257_v5, %v1707_v1  ;;  %v2267_v12 = vadd.f32 %v2266_v4, %v2252_v9  ;;  %v1687_v13 = vpop.f32.mrb[19].mxu0 }
 0x1c3   : > { %v1708_v14 = vmul.f32 %v2262_v8, %v1707_v1  ;;  %v2272_v15 = vadd.f32 %v2271_v52, %v1687_v13 }
 0x1c4   : > { %v1718_v16 = vadd.f32 %v1715_v6, %v1710_v10  ;;  %v1711_v17 = vmul.f32 %v2267_v12, %v1707_v1 }
 0x1c5   : > { %v1716_v18 = vadd.f32 %v1715_v6, %v1708_v14  ;;  %v1709_v19 = vmul.f32 %v2272_v15, %v1707_v1 }
 0x1c6   : > { %vm1722_vm1 = vcmp.ge.f32.partialorder %v1718_v16, 0.0  ;;  %v1730_v20 = vmul.f32 %v1727_v11, %v1718_v16  ;;  %v1719_v21 = vadd.f32 %v1715_v6, %v1711_v17 }
 0x1c7   : > { %vm1720_vm2 = vcmp.ge.f32.partialorder %v1716_v18, 0.0  ;;  %v1728_v22 = vmul.f32 %v1727_v11, %v1716_v18  ;;  %v1717_v23 = vadd.f32 %v1715_v6, %v1709_v19 }
 0x1c8   : > { %v1734_v24 = vsel %vm1722_vm1, %v1718_v16, %v1730_v20  ;;  %vm1723_vm4 = vcmp.ge.f32.partialorder %v1719_v21, 0.0  ;;  %v1731_v25 = vmul.f32 %v1727_v11, %v1719_v21 }
 0x1c9   : > { %v2028_v26 = vpack.c.bf16 %v1734_v24, %v1734_v24  ;;  %v1732_v27 = vsel %vm1720_vm2, %v1716_v18, %v1728_v22  ;;  %vm1721_vm5 = vcmp.ge.f32.partialorder %v1717_v23, 0.0  ;;  %v1729_v50 = vmul.f32 %v1727_v11, %v1717_v23 }
 0x1ca   : > { %v2026_v28 = vpack.c.bf16 %v1732_v27, %v1732_v27  ;;  %v1735_v47 = vsel %vm1723_vm4, %v1719_v21, %v1731_v25 }
 0x1cb   : > { %1755 = vst.msk [vmem:[%s216_s17 + $0x8] sm:$0xf] %vm1752_vm3, %v2028_v26  ;;  %v2029_v29 = vpack.c.bf16 %v1735_v47, %v1735_v47  ;;  %v1733_v30 = vsel %vm1721_vm5, %v1717_v23, %v1729_v50 }
 0x1cc   : > { %1753 = vst.msk [vmem:[%s216_s17] sm:$0xf] %vm1752_vm3, %v2026_v28  ;;  %v2027_v31 = vpack.c.bf16 %v1733_v30, %v1733_v30 }
 0x1cd   : > { %1756 = vst.msk [vmem:[%s216_s17 + $0xc] sm:$0xf] %vm1752_vm3, %v2029_v29 }
 0x1ce   : > { %1754 = vst.msk [vmem:[%s216_s17 + $0x4] sm:$0xf] %vm1752_vm3, %v2027_v31 }
 0x1cf   : > { %2587 = shalt.err (!%p2584_p2)
}
 0x1d0   : > { %s2588_s10 = scalar_lea.hbm %s2957_s23, 256  ;;  %s2592_s22 = scalar_lea.hbm %s3009_s3, 512 }
 0x1d1   : > { %p2589_p13 = scmp.ne.s32.totalorder %s2957_s23, %s2588_s10  ;;  %p2593_p4 = scmp.lt.u32.totalorder %s2957_s23, %s3009_s3 }
 0x1d2   : > { %p2594_p9 = scmp.lt.u32.totalorder %s2592_s22, %s2588_s10  ;;  %p2596_p11 = scmp.lt.u32.totalorder %s2588_s10, %s2957_s23 }
 0x1d3   : > { %p2590_p6 = pnand %p2589_p13, %p3023_p0 }
 0x1d4   : > { %p2595_p8 = por %p2594_p9, %p2593_p4 }
 0x1d5   : > { %p2591_p10 = pneg %p2590_p6 }
 0x1d6   : > { %p2597_p1 = por %p2596_p11, %p2595_p8 }
 0x1d8   : > { %p2598_p3 = pnand %p2597_p1, %p2591_p10 }
 0x1da   : > { %2601 = shalt.err (!%p2598_p3)
}
 0x1db   : > { %s2654_s18 = smov 64   ;;  %s2655_s20 = smov 4  }
 0x1dc   : > { %2290 = dma.vmem_to_hbm [thread:$0]  (%p3023_p0), %s2959_s21, 256, %s2957_s23, %s1758_s16, %s2654_s18, %s2654_s18, %s2655_s20  }
 0x1dd PF: > { %s1786_s17 = sand.u32 1, %s2632_s12   ;;  %p3024_p5 = scmp.ne.s32.totalorder %s3014_s19, 0 }
 0x1de   : > { %p3025_p7 = scmp.ge.s32.totalorder %s2644_s15, 2  ;;  %s1787_s26 = scalar_lea.sflag [#allocation4], %s1786_s17 }
 0x1e0   : > { %p2304_p12 = pnand %p3025_p7, %p3024_p5 }
 0x1e2   : > { %2627 = dma.done.wait (!%p2304_p12), %s1787_s26, 256  }
 0x1e3   : > { %2629 = vsyncadd (!%p2304_p12), %s1787_s26, 4294967040  ;;  %p17_p2 = scmp.ge.s32.totalorder %s2786_s4, 4   ;;  %s3026_s12 = smov %s2636_s13 }
 0x1e4   : > { %s3027_s13 = smov %s2640_s14  ;;  %s3028_s14 = smov %s2796_s6 }
 0x1e5   : > { %s3029_s15 = smov %s2786_s4  ;;  %19 = sbr.rel (!%p17_p2) target bundleno = 6 (0x6), region = 87 }
 0x1ec   :  { %1792 = vsyncpa [#allocation3], 1 }
 0x1ed   :  { %1794 = vsyncpa [#allocation3 + $0x1], 1 }
 0x1ee   :  { %1795 = vsyncpa [#allocation6], 1 }
 0x1ef   :  { %1796 = vsyncpa [#allocation4], 1 }
 0x1f0   :  { %1798 = vsyncpa [#allocation4 + $0x1], 1 }

// kernel: _lambda_.17
= control target key start
LH: loop header
LB: loop body
LE: loop exit
PB: predicated region body
PF: predicated region fallthrough
CT: control target
= control target key end

     0   :  { %8 = vsyncpa [#allocation3], 0  ;;  %s3025_s0 = inlined_call_operand.hbm [shape: bf16[2,1024], index: 0, kind: input, shape index: {}]   ;;  %s3026_s1 = inlined_call_operand.hbm [shape: bf16[1024,512], index: 1, kind: input, shape index: {}]   ;;  %s3027_s2 = inlined_call_operand.hbm [shape: f32[3,512], index: 2, kind: input, shape index: {}]   ;;  %s3028_s3 = inlined_call_operand.hbm [shape: f32[2,512], index: 3, kind: output, shape index: {}]  }
   0x1   :  { %9 = vsyncpa [#allocation6], 0 }
   0x2   :  { %10 = vsyncpa [#allocation4], 0  ;;  %s2913_s12 = smov [#allocation5]   ;;  %s2819_s16 = scalar_lea.hbm %s3026_s1, 32768 }
   0x3   :  { %s26_s13 = sshll.u32 %s2913_s12, 4  ;;  %p2820_p0 = scmp.ne.s32.totalorder %s3026_s1, %s2819_s16  ;;  %s27_s13 = int_to_ptr.vmem [resolvable:$true] %s26_s13 }
   0x4   :  { %p2823_p1 = scmp.lt.u32.totalorder %s2819_s16, %s3026_s1 }
   0x6   :  { %p2825_p2 = pnand %p2823_p1, %p2820_p0 }
   0x8   :  { %2828 = shalt.err (!%p2825_p2)
}
   0x9   :  { %s2829_s21 = scalar_lea.vmem %s27_s13, 32768  ;;  %p2834_p4 = scmp.lt.s32.totalorder %s27_s13, %s27_s13 }
   0xa   :  { %p2830_p3 = scmp.ne.s32.totalorder %s27_s13, %s2829_s21  ;;  %p2835_p5 = scmp.lt.s32.totalorder %s2829_s21, %s2829_s21 }
   0xc   :  { %p2836_p6 = por %p2835_p5, %p2834_p4 }
   0xe   :  { %p2837_p7 = pnand %p2836_p6, %p2830_p3 }
  0x10   :  { %2840 = shalt.err (!%p2837_p7)
}
  0x11   :  { %s2914_s22 = smov 256   ;;  %s2915_s23 = smov 16  }
  0x12   :  { %32 = dma.hbm_to_vmem [thread:$0]  %s3026_s1, 32768, %s27_s13, [#allocation6], %s2914_s22, %s2914_s22, %s2915_s23  }
  0x13   :  { %s2916_s26 = smov [#allocation2]   ;;  %s2917_s28 = smov [#allocation7]  }
  0x14   :  { %s17_s27 = sshll.u32 %s2916_s26, 4  ;;  %s39_s29 = sshll.u32 %s2917_s28, 4  ;;  %s18_s27 = int_to_ptr.vmem [resolvable:$true] %s17_s27  ;;  %s40_s29 = int_to_ptr.vmem [resolvable:$true] %s39_s29 }
  0x15   :  { %s2841_s5 = scalar_lea.hbm %s3025_s0, 128 }
  0x16   :  { %p2842_p8 = scmp.ne.s32.totalorder %s3025_s0, %s2841_s5  ;;  %p2845_p9 = scmp.lt.u32.totalorder %s2841_s5, %s3025_s0 }
  0x18   :  { %p2847_p10 = pnand %p2845_p9, %p2842_p8 }
  0x1a   :  { %2850 = shalt.err (!%p2847_p10)
}
  0x1b   :  { %s2851_s1 = scalar_lea.vmem %s18_s27, 128  ;;  %p2856_p12 = scmp.lt.s32.totalorder %s18_s27, %s18_s27 }
  0x1c   :  { %p2852_p11 = scmp.ne.s32.totalorder %s18_s27, %s2851_s1  ;;  %p2857_p13 = scmp.lt.s32.totalorder %s2851_s1, %s2851_s1 }
  0x1e   :  { %p2858_p0 = por %p2857_p13, %p2856_p12 }
  0x20   :  { %p2859_p1 = pnand %p2858_p0, %p2852_p11 }
  0x22   :  { %2862 = shalt.err (!%p2859_p1)
}
  0x23   :  { %20 = dma.hbm_to_vmem [thread:$0]  %s3025_s0, 128, %s18_s27, [#allocation3]  }
  0x24   :  { %s2863_s14 = scalar_lea.hbm %s3027_s2, 256 }
  0x25   :  { %p2864_p2 = scmp.ne.s32.totalorder %s3027_s2, %s2863_s14  ;;  %p2867_p3 = scmp.lt.u32.totalorder %s2863_s14, %s3027_s2 }
  0x27   :  { %p2869_p4 = pnand %p2867_p3, %p2864_p2 }
  0x29   :  { %2872 = shalt.err (!%p2869_p4)
}
  0x2a   :  { %s2873_s19 = scalar_lea.vmem %s40_s29, 256  ;;  %p2878_p6 = scmp.lt.s32.totalorder %s40_s29, %s40_s29 }
  0x2b   :  { %p2874_p5 = scmp.ne.s32.totalorder %s40_s29, %s2873_s19  ;;  %p2879_p7 = scmp.lt.s32.totalorder %s2873_s19, %s2873_s19 }
  0x2d   :  { %p2880_p8 = por %p2879_p7, %p2878_p6 }
  0x2f   :  { %p2881_p9 = pnand %p2880_p8, %p2874_p5 }
  0x31   :  { %2884 = shalt.err (!%p2881_p9)
}
  0x32   :  { %42 = dma.hbm_to_vmem [thread:$0]  %s3027_s2, 256, %s40_s29, [#allocation6]  }
  0x33   :  { %2907 = dma.done.wait [#allocation3], 128  }
  0x34   :  { %2908 = vsyncadd [#allocation3], 4294967168 }
  0x35   :  { %2909 = dma.done.wait [#allocation6], 33024  }
  0x36   :  { %2910 = vsyncadd [#allocation6], 4294934272  ;;  %v2434_v0 = vld [vmem:[#allocation5 + $0x4] ss:$16 sps:$4 sm:$0xff]   ;;  %v2436_v1 = vld [vmem:[#allocation5 + $0xc] ss:$16 sps:$4 sm:$0xff]   ;;  %v314_v38 = vlaneseq }
  0x37   :  { %1647 = vmatprep.subr.bf16.mxu0 %v2434_v0  ;;  %v2438_v2 = vld [vmem:[#allocation5] ss:$16 sps:$4 sm:$0xff]   ;;  %v2439_v3 = vld [vmem:[#allocation5 + $0x8] ss:$16 sps:$4 sm:$0xff]   ;;  %1811 = vmatprep.subr.bf16.mxu1 %v2436_v1  ;;  %v2440_v4 = vld [vmem:[#allocation5 + $0x24] ss:$16 sps:$4 sm:$0xff]  }
  0x38   :  { %1648 = vmatpush1.bf16.msra.mxu0 %v2438_v2  ;;  %1812 = vmatpush1.bf16.msra.mxu1 %v2439_v3  ;;  %v2442_v5 = vld [vmem:[#allocation5 + $0x2c] ss:$16 sps:$4 sm:$0xff]   ;;  %v2444_v6 = vld [vmem:[#allocation5 + $0x20] ss:$16 sps:$4 sm:$0xff]   ;;  %v2445_v7 = vld [vmem:[#allocation5 + $0x28] ss:$16 sps:$4 sm:$0xff]  }
  0x39   :  { %1649 = vmatprep.subr.bf16.mxu0 %v2440_v4  ;;  %1813 = vmatprep.subr.bf16.mxu1 %v2442_v5  ;;  %v2446_v8 = vld [vmem:[#allocation5 + $0x44] ss:$16 sps:$4 sm:$0xff]   ;;  %v2448_v9 = vld [vmem:[#allocation5 + $0x4c] ss:$16 sps:$4 sm:$0xff]   ;;  %v2450_v10 = vld [vmem:[#allocation5 + $0x40] ss:$16 sps:$4 sm:$0xff]  }
  0x3a   :  { %v2451_v11 = vld [vmem:[#allocation5 + $0x48] ss:$16 sps:$4 sm:$0xff]   ;;  %v2452_v12 = vld [vmem:[#allocation5 + $0x64] ss:$16 sps:$4 sm:$0xff]   ;;  %v2454_v13 = vld [vmem:[#allocation5 + $0x6c] ss:$16 sps:$4 sm:$0xff]  }
  0x3b   :  { %v2456_v14 = vld [vmem:[#allocation5 + $0x60] ss:$16 sps:$4 sm:$0xff]   ;;  %v2457_v15 = vld [vmem:[#allocation5 + $0x68] ss:$16 sps:$4 sm:$0xff]   ;;  %v2458_v16 = vld [vmem:[#allocation5 + $0x84] ss:$16 sps:$4 sm:$0xff]  }
  0x3c   :  { %1650 = vmatpush1.bf16.msra.mxu0 %v2444_v6  ;;  %1814 = vmatpush1.bf16.msra.mxu1 %v2445_v7  ;;  %v2460_v17 = vld [vmem:[#allocation5 + $0x8c] ss:$16 sps:$4 sm:$0xff]   ;;  %v2462_v18 = vld [vmem:[#allocation5 + $0x80] ss:$16 sps:$4 sm:$0xff]   ;;  %v2463_v19 = vld [vmem:[#allocation5 + $0x88] ss:$16 sps:$4 sm:$0xff]  }
  0x3d   :  { %1651 = vmatprep.subr.bf16.mxu0 %v2446_v8  ;;  %1815 = vmatprep.subr.bf16.mxu1 %v2448_v9  ;;  %v2464_v20 = vld [vmem:[#allocation5 + $0xa4] ss:$16 sps:$4 sm:$0xff]   ;;  %v2466_v21 = vld [vmem:[#allocation5 + $0xac] ss:$16 sps:$4 sm:$0xff]   ;;  %v2468_v22 = vld [vmem:[#allocation5 + $0xa0] ss:$16 sps:$4 sm:$0xff]  }
  0x3e   :  { %v2469_v23 = vld [vmem:[#allocation5 + $0xa8] ss:$16 sps:$4 sm:$0xff]   ;;  %v2470_v24 = vld [vmem:[#allocation5 + $0xc4] ss:$16 sps:$4 sm:$0xff]   ;;  %v2472_v25 = vld [vmem:[#allocation5 + $0xcc] ss:$16 sps:$4 sm:$0xff]  }
  0x3f   :  { %v2474_v26 = vld [vmem:[#allocation5 + $0xc0] ss:$16 sps:$4 sm:$0xff]   ;;  %v2475_v27 = vld [vmem:[#allocation5 + $0xc8] ss:$16 sps:$4 sm:$0xff]   ;;  %v2476_v28 = vld [vmem:[#allocation5 + $0xe4] ss:$16 sps:$4 sm:$0xff]  }
  0x40   :  { %1652 = vmatpush1.bf16.msra.mxu0 %v2450_v10  ;;  %1816 = vmatpush1.bf16.msra.mxu1 %v2451_v11  ;;  %v2478_v29 = vld [vmem:[#allocation5 + $0xec] ss:$16 sps:$4 sm:$0xff]   ;;  %v2480_v30 = vld [vmem:[#allocation5 + $0xe0] ss:$16 sps:$4 sm:$0xff]   ;;  %v2481_v31 = vld [vmem:[#allocation5 + $0xe8] ss:$16 sps:$4 sm:$0xff]  }
  0x41   :  { %1653 = vmatprep.subr.bf16.mxu0 %v2452_v12  ;;  %1817 = vmatprep.subr.bf16.mxu1 %v2454_v13  ;;  %v2482_v32 = vld [vmem:[#allocation5 + $0x104] ss:$16 sps:$4 sm:$0xff]   ;;  %v2484_v33 = vld [vmem:[#allocation5 + $0x10c] ss:$16 sps:$4 sm:$0xff]   ;;  %v2486_v34 = vld [vmem:[#allocation5 + $0x100] ss:$16 sps:$4 sm:$0xff]  }
  0x42   :  { %v2487_v35 = vld [vmem:[#allocation5 + $0x108] ss:$16 sps:$4 sm:$0xff]   ;;  %v2918_v36 = vmov 1966171168   ;;  %v2488_v39 = vld [vmem:[#allocation5 + $0x124] ss:$16 sps:$4 sm:$0xff]  }
  0x43   :  { %v312_v37 = vunpack.c.l.s4 %v2918_v36  ;;  %v2490_v40 = vld [vmem:[#allocation5 + $0x12c] ss:$16 sps:$4 sm:$0xff]   ;;  %v2492_v41 = vld [vmem:[#allocation5 + $0x120] ss:$16 sps:$4 sm:$0xff]   ;;  %v2977_v43 = vshrl.u32 %v314_v38, 7  ;;  %s2920_s2 = smov [#allocation8]  }
  0x44   :  { %1654 = vmatpush1.bf16.msra.mxu0 %v2456_v14  ;;  %1818 = vmatpush1.bf16.msra.mxu1 %v2457_v15  ;;  %v2493_v44 = vld [vmem:[#allocation5 + $0x128] ss:$16 sps:$4 sm:$0xff]   ;;  %v2494_v45 = vld [vmem:[#allocation5 + $0x144] ss:$16 sps:$4 sm:$0xff]   ;;  %v2496_v46 = vld [vmem:[#allocation5 + $0x14c] ss:$16 sps:$4 sm:$0xff]  }
  0x45   :  { %1655 = vmatprep.subr.bf16.mxu0 %v2458_v16  ;;  %1819 = vmatprep.subr.bf16.mxu1 %v2460_v17  ;;  %v313_v42 = vunpack.c.0.s8 %v312_v37  ;;  %v2498_v47 = vld [vmem:[#allocation5 + $0x140] ss:$16 sps:$4 sm:$0xff]   ;;  %v2499_v48 = vld [vmem:[#allocation5 + $0x148] ss:$16 sps:$4 sm:$0xff]   ;;  %v2500_v50 = vld [vmem:[#allocation5 + $0x164] ss:$16 sps:$4 sm:$0xff]  }
  0x46   :  { %v2502_v51 = vld [vmem:[#allocation5 + $0x16c] ss:$16 sps:$4 sm:$0xff]   ;;  %v2504_v53 = vld [vmem:[#allocation5 + $0x160] ss:$16 sps:$4 sm:$0xff]   ;;  %v2505_v55 = vld [vmem:[#allocation5 + $0x168] ss:$16 sps:$4 sm:$0xff]  }
  0x47   :  { %v2980_v49 = vsub.s32 %v313_v42, %v2977_v43  ;;  %v52_v52 = vld [vmem:[#allocation2] sm:$0xff]  ;;  %v2506_v56 = vld [vmem:[#allocation5 + $0x184] ss:$16 sps:$4 sm:$0xff]   ;;  %v2510_v59 = vld [vmem:[#allocation5 + $0x180] ss:$16 sps:$4 sm:$0xff]   ;;  %s2136_s21 = sshll.u32 %s2920_s2, 4  ;;  %s2137_s21 = int_to_ptr.vmem [resolvable:$true] %s2136_s21 }
  0x48   :  { %1656 = vmatpush1.bf16.msra.mxu0 %v2462_v18  ;;  %1820 = vmatpush1.bf16.msra.mxu1 %v2463_v19  ;;  %v2508_v57 = vld [vmem:[#allocation5 + $0x18c] ss:$16 sps:$4 sm:$0xff]   ;;  %v2511_v61 = vld [vmem:[#allocation5 + $0x188] ss:$16 sps:$4 sm:$0xff]   ;;  %v2512_v62 = vld [vmem:[#allocation5 + $0x1a4] ss:$16 sps:$4 sm:$0xff]   ;;  %v310_v9 = vcombine.high %v52_v52, %v52_v52  ;;  %p2890_p11 = scmp.lt.s32.totalorder %s2137_s21, %s2137_s21 }
  0x49   :  { %1657 = vmatprep.subr.bf16.mxu0 %v2464_v20  ;;  %1821 = vmatprep.subr.bf16.mxu1 %v2466_v21  ;;  %v317_v54 = vrot.slane %v52_v52, %v2980_v49  ;;  %v2514_v63 = vld [vmem:[#allocation5 + $0x1ac] ss:$16 sps:$4 sm:$0xff]   ;;  %v2516_v0 = vld [vmem:[#allocation5 + $0x1a0] ss:$16 sps:$4 sm:$0xff]   ;;  %v2517_v1 = vld [vmem:[#allocation5 + $0x1a8] ss:$16 sps:$4 sm:$0xff]  }
  0x4a   :  { %v2518_v2 = vld [vmem:[#allocation5 + $0x1c4] ss:$16 sps:$4 sm:$0xff]   ;;  %v2520_v3 = vld [vmem:[#allocation5 + $0x1cc] ss:$16 sps:$4 sm:$0xff]   ;;  %v2522_v4 = vld [vmem:[#allocation5 + $0x1c0] ss:$16 sps:$4 sm:$0xff]   ;;  %v324_v13 = vrot.slane %v310_v9, %v2980_v49 }
  0x4b   :  { %v325_v58 = vcombine.high %v317_v54, %v317_v54  ;;  %v2523_v5 = vld [vmem:[#allocation5 + $0x1c8] ss:$16 sps:$4 sm:$0xff]   ;;  %v2524_v6 = vld [vmem:[#allocation5 + $0x1e4] ss:$16 sps:$4 sm:$0xff]   ;;  %v2526_v7 = vld [vmem:[#allocation5 + $0x1ec] ss:$16 sps:$4 sm:$0xff]   ;;  %v2986_v15 = vrot.slane %v317_v54, %v2980_v49 }
  0x4c   :  { %1658 = vmatpush1.bf16.msra.mxu0 %v2468_v22  ;;  %1822 = vmatpush1.bf16.msra.mxu1 %v2469_v23  ;;  %v2528_v8 = vld [vmem:[#allocation5 + $0x1e0] ss:$16 sps:$4 sm:$0xff]   ;;  %v2529_v10 = vld [vmem:[#allocation5 + $0x1e8] ss:$16 sps:$4 sm:$0xff]   ;;  %v2532_v11 = vld [vmem:[#allocation5 + $0x204] ss:$16 sps:$4 sm:$0xff]   ;;  %v326_v16 = vcombine.high %v324_v13, %v324_v13  ;;  %v2992_v21 = vrot.slane %v324_v13, %v2980_v49 }
  0x4d   :  { %1659 = vmatprep.subr.bf16.mxu0 %v2470_v24  ;;  %1823 = vmatprep.subr.bf16.mxu1 %v2472_v25  ;;  %v347_v60 = vrot.slane %v325_v58, %v2980_v49  ;;  %v2535_v12 = vld [vmem:[#allocation5 + $0x20c] ss:$16 sps:$4 sm:$0xff]   ;;  %v2530_v14 = vld [vmem:[#allocation5 + $0x200] ss:$16 sps:$4 sm:$0xff]   ;;  %v2533_v17 = vld [vmem:[#allocation5 + $0x208] ss:$16 sps:$4 sm:$0xff]  }
  0x4e   :  { %v2538_v18 = vld [vmem:[#allocation5 + $0x224] ss:$16 sps:$4 sm:$0xff]   ;;  %v2541_v19 = vld [vmem:[#allocation5 + $0x22c] ss:$16 sps:$4 sm:$0xff]   ;;  %v2989_v20 = vrot.slane %v326_v16, %v2980_v49  ;;  %v2536_v23 = vld [vmem:[#allocation5 + $0x220] ss:$16 sps:$4 sm:$0xff]  }
  0x4f   :  { %1679 = vmatprep.mubr.bf16.mxu0 %v347_v60  ;;  %1843 = vmatprep.mubr.bf16.mxu1 %v347_v60  ;;  %v357_v22 = vcombine.high %v347_v60, %v347_v60  ;;  %v2539_v24 = vld [vmem:[#allocation5 + $0x228] ss:$16 sps:$4 sm:$0xff]   ;;  %v2544_v25 = vld [vmem:[#allocation5 + $0x244] ss:$16 sps:$4 sm:$0xff]   ;;  %v2565_v38 = vld [vmem:[#allocation5 + $0x2ac] ss:$16 sps:$4 sm:$0xff]  }
  0x50   :  { %1660 = vmatpush1.bf16.msra.mxu0 %v2474_v26  ;;  %1824 = vmatpush1.bf16.msra.mxu1 %v2475_v27  ;;  %v2547_v26 = vld [vmem:[#allocation5 + $0x24c] ss:$16 sps:$4 sm:$0xff]   ;;  %v2542_v27 = vld [vmem:[#allocation5 + $0x240] ss:$16 sps:$4 sm:$0xff]   ;;  %v2557_v36 = vld [vmem:[#allocation5 + $0x288] ss:$16 sps:$4 sm:$0xff]  }
  0x51   :  { %1661 = vmatprep.subr.bf16.mxu0 %v2476_v28  ;;  %1825 = vmatprep.subr.bf16.mxu1 %v2478_v29  ;;  %v2545_v28 = vld [vmem:[#allocation5 + $0x248] ss:$16 sps:$4 sm:$0xff]   ;;  %v2550_v29 = vld [vmem:[#allocation5 + $0x264] ss:$16 sps:$4 sm:$0xff]   ;;  %v2571_v42 = vld [vmem:[#allocation5 + $0x2cc] ss:$16 sps:$4 sm:$0xff]  }
  0x52   :  { %v2562_v37 = vld [vmem:[#allocation5 + $0x2a4] ss:$16 sps:$4 sm:$0xff]   ;;  %v2575_v49 = vld [vmem:[#allocation5 + $0x2e8] ss:$16 sps:$4 sm:$0xff]   ;;  %v2578_v52 = vld [vmem:[#allocation5 + $0x300] ss:$16 sps:$4 sm:$0xff]  }
  0x53   :  { %v2586_v54 = vld [vmem:[#allocation5 + $0x324] ss:$16 sps:$4 sm:$0xff]   ;;  %v2590_v60 = vld [vmem:[#allocation5 + $0x340] ss:$16 sps:$4 sm:$0xff]   ;;  %v2611_v9 = vld [vmem:[#allocation5 + $0x3a8] ss:$16 sps:$4 sm:$0xff]  }
  0x54   :  { %1662 = vmatpush1.bf16.msra.mxu0 %v2480_v30  ;;  %1826 = vmatpush1.bf16.msra.mxu1 %v2481_v31  ;;  %v2553_v30 = vld [vmem:[#allocation5 + $0x26c] ss:$16 sps:$4 sm:$0xff]   ;;  %v2548_v31 = vld [vmem:[#allocation5 + $0x260] ss:$16 sps:$4 sm:$0xff]   ;;  %v2592_v58 = vld [vmem:[#allocation5 + $0x344] ss:$16 sps:$4 sm:$0xff]  }
  0x55   :  { %1663 = vmatprep.subr.bf16.mxu0 %v2482_v32  ;;  %1827 = vmatprep.subr.bf16.mxu1 %v2484_v33  ;;  %v2551_v32 = vld [vmem:[#allocation5 + $0x268] ss:$16 sps:$4 sm:$0xff]   ;;  %v2556_v33 = vld [vmem:[#allocation5 + $0x284] ss:$16 sps:$4 sm:$0xff]   ;;  %v2625_v16 = vld [vmem:[#allocation5 + $0x3ec] ss:$16 sps:$4 sm:$0xff]  }
  0x56   :  { %v2617_v13 = vld [vmem:[#allocation5 + $0x3c8] ss:$16 sps:$4 sm:$0xff]   ;;  %s2885_s22 = scalar_lea.vmem %s2137_s21, 128 }
  0x57   :  { %p2886_p10 = scmp.ne.s32.totalorder %s2137_s21, %s2885_s22  ;;  %p2891_p12 = scmp.lt.s32.totalorder %s2885_s22, %s2885_s22 }
  0x58   :  { %1664 = vmatpush1.bf16.msra.mxu0 %v2486_v34  ;;  %1828 = vmatpush1.bf16.msra.mxu1 %v2487_v35  ;;  %v2559_v34 = vld [vmem:[#allocation5 + $0x28c] ss:$16 sps:$4 sm:$0xff]   ;;  %v2554_v35 = vld [vmem:[#allocation5 + $0x280] ss:$16 sps:$4 sm:$0xff]  }
  0x59   :  { %1665 = vmatprep.subr.bf16.mxu0 %v2488_v39  ;;  %1829 = vmatprep.subr.bf16.mxu1 %v2490_v40  ;;  %v2560_v39 = vld [vmem:[#allocation5 + $0x2a0] ss:$16 sps:$4 sm:$0xff]   ;;  %v2563_v40 = vld [vmem:[#allocation5 + $0x2a8] ss:$16 sps:$4 sm:$0xff]   ;;  %p2892_p13 = por %p2891_p12, %p2890_p11 }
  0x5b   :  { %p2893_p0 = pnand %p2892_p13, %p2886_p10 }
  0x5c   :  { %1666 = vmatpush1.bf16.msra.mxu0 %v2492_v41  ;;  %1830 = vmatpush1.bf16.msra.mxu1 %v2493_v44  ;;  %v2568_v41 = vld [vmem:[#allocation5 + $0x2c4] ss:$16 sps:$4 sm:$0xff]   ;;  %v2566_v44 = vld [vmem:[#allocation5 + $0x2c0] ss:$16 sps:$4 sm:$0xff]  }
  0x5d   :  { %1667 = vmatprep.subr.bf16.mxu0 %v2494_v45  ;;  %1831 = vmatprep.subr.bf16.mxu1 %v2496_v46  ;;  %v2569_v45 = vld [vmem:[#allocation5 + $0x2c8] ss:$16 sps:$4 sm:$0xff]   ;;  %v2574_v46 = vld [vmem:[#allocation5 + $0x2e4] ss:$16 sps:$4 sm:$0xff]  }
  0x60   :  { %1668 = vmatpush1.bf16.msra.mxu0 %v2498_v47  ;;  %1832 = vmatpush1.bf16.msra.mxu1 %v2499_v48  ;;  %v2577_v47 = vld [vmem:[#allocation5 + $0x2ec] ss:$16 sps:$4 sm:$0xff]   ;;  %v2572_v48 = vld [vmem:[#allocation5 + $0x2e0] ss:$16 sps:$4 sm:$0xff]  }
  0x61   :  { %1669 = vmatprep.subr.bf16.mxu0 %v2500_v50  ;;  %1833 = vmatprep.subr.bf16.mxu1 %v2502_v51  ;;  %v2580_v50 = vld [vmem:[#allocation5 + $0x304] ss:$16 sps:$4 sm:$0xff]   ;;  %v2583_v51 = vld [vmem:[#allocation5 + $0x30c] ss:$16 sps:$4 sm:$0xff]  }
  0x64   :  { %1670 = vmatpush1.bf16.msra.mxu0 %v2504_v53  ;;  %1834 = vmatpush1.bf16.msra.mxu1 %v2505_v55  ;;  %v2581_v53 = vld [vmem:[#allocation5 + $0x308] ss:$16 sps:$4 sm:$0xff]   ;;  %v2589_v55 = vld [vmem:[#allocation5 + $0x32c] ss:$16 sps:$4 sm:$0xff]  }
  0x65   :  { %1671 = vmatprep.subr.bf16.mxu0 %v2506_v56  ;;  %1835 = vmatprep.subr.bf16.mxu1 %v2508_v57  ;;  %v2584_v56 = vld [vmem:[#allocation5 + $0x320] ss:$16 sps:$4 sm:$0xff]   ;;  %v2587_v57 = vld [vmem:[#allocation5 + $0x328] ss:$16 sps:$4 sm:$0xff]  }
  0x68   :  { %1672 = vmatpush1.bf16.msra.mxu0 %v2510_v59  ;;  %1836 = vmatpush1.bf16.msra.mxu1 %v2511_v61  ;;  %v2595_v59 = vld [vmem:[#allocation5 + $0x34c] ss:$16 sps:$4 sm:$0xff]   ;;  %v2593_v61 = vld [vmem:[#allocation5 + $0x348] ss:$16 sps:$4 sm:$0xff]  }
  0x69   :  { %1673 = vmatprep.subr.bf16.mxu0 %v2512_v62  ;;  %1837 = vmatprep.subr.bf16.mxu1 %v2514_v63  ;;  %v2598_v62 = vld [vmem:[#allocation5 + $0x364] ss:$16 sps:$4 sm:$0xff]   ;;  %v2601_v63 = vld [vmem:[#allocation5 + $0x36c] ss:$16 sps:$4 sm:$0xff]  }
  0x6c   :  { %1674 = vmatpush1.bf16.msra.mxu0 %v2516_v0  ;;  %1838 = vmatpush1.bf16.msra.mxu1 %v2517_v1  ;;  %v2596_v0 = vld [vmem:[#allocation5 + $0x360] ss:$16 sps:$4 sm:$0xff]   ;;  %v2599_v1 = vld [vmem:[#allocation5 + $0x368] ss:$16 sps:$4 sm:$0xff]  }
  0x6d   :  { %1675 = vmatprep.subr.bf16.mxu0 %v2518_v2  ;;  %1839 = vmatprep.subr.bf16.mxu1 %v2520_v3  ;;  %v2604_v2 = vld [vmem:[#allocation5 + $0x384] ss:$16 sps:$4 sm:$0xff]   ;;  %v2607_v3 = vld [vmem:[#allocation5 + $0x38c] ss:$16 sps:$4 sm:$0xff]  }
  0x70   :  { %1676 = vmatpush1.bf16.msra.mxu0 %v2522_v4  ;;  %1840 = vmatpush1.bf16.msra.mxu1 %v2523_v5  ;;  %v2602_v4 = vld [vmem:[#allocation5 + $0x380] ss:$16 sps:$4 sm:$0xff]   ;;  %v2605_v5 = vld [vmem:[#allocation5 + $0x388] ss:$16 sps:$4 sm:$0xff]  }
  0x71   :  { %1677 = vmatprep.subr.bf16.mxu0 %v2524_v6  ;;  %1841 = vmatprep.subr.bf16.mxu1 %v2526_v7  ;;  %v2610_v6 = vld [vmem:[#allocation5 + $0x3a4] ss:$16 sps:$4 sm:$0xff]   ;;  %v2613_v7 = vld [vmem:[#allocation5 + $0x3ac] ss:$16 sps:$4 sm:$0xff]  }
  0x74   :  { %1678 = vmatpush1.bf16.msra.mxu0 %v2528_v8  ;;  %1842 = vmatpush1.bf16.msra.mxu1 %v2529_v10  ;;  %v2608_v8 = vld [vmem:[#allocation5 + $0x3a0] ss:$16 sps:$4 sm:$0xff]   ;;  %v2616_v10 = vld [vmem:[#allocation5 + $0x3c4] ss:$16 sps:$4 sm:$0xff]  }
  0x75   :  { %1688 = vmatprep.subr.bf16.mxu0 %v2532_v11  ;;  %1852 = vmatprep.subr.bf16.mxu1 %v2535_v12  ;;  %v2619_v11 = vld [vmem:[#allocation5 + $0x3cc] ss:$16 sps:$4 sm:$0xff]   ;;  %v2614_v12 = vld [vmem:[#allocation5 + $0x3c0] ss:$16 sps:$4 sm:$0xff]  }
  0x77   :  { %1680 = vmatmul.mubr.bf16.vlgmr.msra.gmra.mrb[0].mxu0 %v2986_v15  ;;  %1844 = vmatmul.mubr.bf16.vlgmr.msra.gmra.mrb[0].mxu1 %v2986_v15 }
  0x78   :  { %1689 = vmatpush1.bf16.msra.mxu0 %v2530_v14  ;;  %1853 = vmatpush1.bf16.msra.mxu1 %v2533_v17  ;;  %v2622_v14 = vld [vmem:[#allocation5 + $0x3e4] ss:$16 sps:$4 sm:$0xff]   ;;  %v2620_v17 = vld [vmem:[#allocation5 + $0x3e0] ss:$16 sps:$4 sm:$0xff]  }
  0x79   :  { %1690 = vmatprep.subr.bf16.mxu0 %v2538_v18  ;;  %1854 = vmatprep.subr.bf16.mxu1 %v2541_v19  ;;  %v2623_v18 = vld [vmem:[#allocation5 + $0x3e8] ss:$16 sps:$4 sm:$0xff]   ;;  %v2628_v19 = vld [vmem:[#allocation5 + $0x404] ss:$16 sps:$4 sm:$0xff]  }
  0x7a   :  { %1720 = vmatprep.mubr.bf16.mxu0 %v357_v22  ;;  %1884 = vmatprep.mubr.bf16.mxu1 %v357_v22  ;;  %v2631_v22 = vld [vmem:[#allocation5 + $0x40c] ss:$16 sps:$4 sm:$0xff]  }
  0x7c   :  { %1691 = vmatpush1.bf16.msra.mxu0 %v2536_v23  ;;  %1855 = vmatpush1.bf16.msra.mxu1 %v2539_v24  ;;  %v2626_v23 = vld [vmem:[#allocation5 + $0x400] ss:$16 sps:$4 sm:$0xff]   ;;  %v355_v24 = vcombine.high %v2986_v15, %v2986_v15 }
  0x7d   :  { %1692 = vmatprep.subr.bf16.mxu0 %v2544_v25  ;;  %1856 = vmatprep.subr.bf16.mxu1 %v2547_v26  ;;  %v2629_v25 = vld [vmem:[#allocation5 + $0x408] ss:$16 sps:$4 sm:$0xff]   ;;  %v2634_v26 = vld [vmem:[#allocation5 + $0x424] ss:$16 sps:$4 sm:$0xff]   ;;  %v2638_v15 = vld [vmem:[#allocation5 + $0x440] ss:$16 sps:$4 sm:$0xff]  }
  0x80   :  { %1693 = vmatpush1.bf16.msra.mxu0 %v2542_v27  ;;  %1857 = vmatpush1.bf16.msra.mxu1 %v2545_v28  ;;  %v2637_v27 = vld [vmem:[#allocation5 + $0x42c] ss:$16 sps:$4 sm:$0xff]   ;;  %v2632_v28 = vld [vmem:[#allocation5 + $0x420] ss:$16 sps:$4 sm:$0xff]  }
  0x81   :  { %1694 = vmatprep.subr.bf16.mxu0 %v2550_v29  ;;  %1858 = vmatprep.subr.bf16.mxu1 %v2553_v30  ;;  %v2635_v29 = vld [vmem:[#allocation5 + $0x428] ss:$16 sps:$4 sm:$0xff]   ;;  %v2640_v30 = vld [vmem:[#allocation5 + $0x444] ss:$16 sps:$4 sm:$0xff]  }
  0x84   :  { %1695 = vmatpush1.bf16.msra.mxu0 %v2548_v31  ;;  %1859 = vmatpush1.bf16.msra.mxu1 %v2551_v32  ;;  %v2643_v31 = vld [vmem:[#allocation5 + $0x44c] ss:$16 sps:$4 sm:$0xff]   ;;  %v2641_v32 = vld [vmem:[#allocation5 + $0x448] ss:$16 sps:$4 sm:$0xff]  }
  0x85   :  { %1696 = vmatprep.subr.bf16.mxu0 %v2556_v33  ;;  %1860 = vmatprep.subr.bf16.mxu1 %v2559_v34  ;;  %v2646_v33 = vld [vmem:[#allocation5 + $0x464] ss:$16 sps:$4 sm:$0xff]   ;;  %v2649_v34 = vld [vmem:[#allocation5 + $0x46c] ss:$16 sps:$4 sm:$0xff]  }
  0x88   :  { %1697 = vmatpush1.bf16.msra.mxu0 %v2554_v35  ;;  %1861 = vmatpush1.bf16.msra.mxu1 %v2557_v36  ;;  %v2644_v35 = vld [vmem:[#allocation5 + $0x460] ss:$16 sps:$4 sm:$0xff]   ;;  %v2647_v36 = vld [vmem:[#allocation5 + $0x468] ss:$16 sps:$4 sm:$0xff]  }
  0x89   :  { %1698 = vmatprep.subr.bf16.mxu0 %v2562_v37  ;;  %1862 = vmatprep.subr.bf16.mxu1 %v2565_v38  ;;  %v2652_v37 = vld [vmem:[#allocation5 + $0x484] ss:$16 sps:$4 sm:$0xff]   ;;  %v2655_v38 = vld [vmem:[#allocation5 + $0x48c] ss:$16 sps:$4 sm:$0xff]  }
  0x8c   :  { %1699 = vmatpush1.bf16.msra.mxu0 %v2560_v39  ;;  %1863 = vmatpush1.bf16.msra.mxu1 %v2563_v40  ;;  %v2650_v39 = vld [vmem:[#allocation5 + $0x480] ss:$16 sps:$4 sm:$0xff]   ;;  %v2653_v40 = vld [vmem:[#allocation5 + $0x488] ss:$16 sps:$4 sm:$0xff]  }
  0x8d   :  { %1700 = vmatprep.subr.bf16.mxu0 %v2568_v41  ;;  %1864 = vmatprep.subr.bf16.mxu1 %v2571_v42  ;;  %v2658_v41 = vld [vmem:[#allocation5 + $0x4a4] ss:$16 sps:$4 sm:$0xff]   ;;  %v2661_v42 = vld [vmem:[#allocation5 + $0x4ac] ss:$16 sps:$4 sm:$0xff]  }
  0x90   :  { %1701 = vmatpush1.bf16.msra.mxu0 %v2566_v44  ;;  %1865 = vmatpush1.bf16.msra.mxu1 %v2569_v45  ;;  %v2656_v44 = vld [vmem:[#allocation5 + $0x4a0] ss:$16 sps:$4 sm:$0xff]   ;;  %v2659_v45 = vld [vmem:[#allocation5 + $0x4a8] ss:$16 sps:$4 sm:$0xff]  }
  0x91   :  { %1702 = vmatprep.subr.bf16.mxu0 %v2574_v46  ;;  %1866 = vmatprep.subr.bf16.mxu1 %v2577_v47  ;;  %v2664_v46 = vld [vmem:[#allocation5 + $0x4c4] ss:$16 sps:$4 sm:$0xff]   ;;  %v2667_v47 = vld [vmem:[#allocation5 + $0x4cc] ss:$16 sps:$4 sm:$0xff]  }
  0x94   :  { %1703 = vmatpush1.bf16.msra.mxu0 %v2572_v48  ;;  %1867 = vmatpush1.bf16.msra.mxu1 %v2575_v49  ;;  %v2662_v48 = vld [vmem:[#allocation5 + $0x4c0] ss:$16 sps:$4 sm:$0xff]   ;;  %v2665_v49 = vld [vmem:[#allocation5 + $0x4c8] ss:$16 sps:$4 sm:$0xff]  }
  0x95   :  { %1704 = vmatprep.subr.bf16.mxu0 %v2580_v50  ;;  %1868 = vmatprep.subr.bf16.mxu1 %v2583_v51  ;;  %v2670_v50 = vld [vmem:[#allocation5 + $0x4e4] ss:$16 sps:$4 sm:$0xff]   ;;  %v2673_v51 = vld [vmem:[#allocation5 + $0x4ec] ss:$16 sps:$4 sm:$0xff]  }
  0x98   :  { %1705 = vmatpush1.bf16.msra.mxu0 %v2578_v52  ;;  %1869 = vmatpush1.bf16.msra.mxu1 %v2581_v53  ;;  %v2668_v52 = vld [vmem:[#allocation5 + $0x4e0] ss:$16 sps:$4 sm:$0xff]   ;;  %v2671_v53 = vld [vmem:[#allocation5 + $0x4e8] ss:$16 sps:$4 sm:$0xff]  }
  0x99   :  { %1706 = vmatprep.subr.bf16.mxu0 %v2586_v54  ;;  %1870 = vmatprep.subr.bf16.mxu1 %v2589_v55  ;;  %v2676_v54 = vld [vmem:[#allocation5 + $0x504] ss:$16 sps:$4 sm:$0xff]   ;;  %v2679_v55 = vld [vmem:[#allocation5 + $0x50c] ss:$16 sps:$4 sm:$0xff]  }
  0x9c   :  { %1707 = vmatpush1.bf16.msra.mxu0 %v2584_v56  ;;  %1871 = vmatpush1.bf16.msra.mxu1 %v2587_v57  ;;  %v2674_v56 = vld [vmem:[#allocation5 + $0x500] ss:$16 sps:$4 sm:$0xff]   ;;  %v2677_v57 = vld [vmem:[#allocation5 + $0x508] ss:$16 sps:$4 sm:$0xff]  }
  0x9d   :  { %1708 = vmatprep.subr.bf16.mxu0 %v2592_v58  ;;  %1872 = vmatprep.subr.bf16.mxu1 %v2595_v59  ;;  %v2682_v58 = vld [vmem:[#allocation5 + $0x524] ss:$16 sps:$4 sm:$0xff]   ;;  %v2685_v59 = vld [vmem:[#allocation5 + $0x52c] ss:$16 sps:$4 sm:$0xff]  }
  0xa0   :  { %1709 = vmatpush1.bf16.msra.mxu0 %v2590_v60  ;;  %1873 = vmatpush1.bf16.msra.mxu1 %v2593_v61  ;;  %v2680_v60 = vld [vmem:[#allocation5 + $0x520] ss:$16 sps:$4 sm:$0xff]   ;;  %v2683_v61 = vld [vmem:[#allocation5 + $0x528] ss:$16 sps:$4 sm:$0xff]  }
  0xa1   :  { %1710 = vmatprep.subr.bf16.mxu0 %v2598_v62  ;;  %1874 = vmatprep.subr.bf16.mxu1 %v2601_v63  ;;  %v2688_v62 = vld [vmem:[#allocation5 + $0x544] ss:$16 sps:$4 sm:$0xff]   ;;  %v2691_v63 = vld [vmem:[#allocation5 + $0x54c] ss:$16 sps:$4 sm:$0xff]  }
  0xa4   :  { %1711 = vmatpush1.bf16.msra.mxu0 %v2596_v0  ;;  %1875 = vmatpush1.bf16.msra.mxu1 %v2599_v1  ;;  %v2686_v0 = vld [vmem:[#allocation5 + $0x540] ss:$16 sps:$4 sm:$0xff]   ;;  %v2689_v1 = vld [vmem:[#allocation5 + $0x548] ss:$16 sps:$4 sm:$0xff]  }
  0xa5   :  { %1712 = vmatprep.subr.bf16.mxu0 %v2604_v2  ;;  %1876 = vmatprep.subr.bf16.mxu1 %v2607_v3  ;;  %v2694_v2 = vld [vmem:[#allocation5 + $0x564] ss:$16 sps:$4 sm:$0xff]   ;;  %v2697_v3 = vld [vmem:[#allocation5 + $0x56c] ss:$16 sps:$4 sm:$0xff]  }
  0xa8   :  { %1713 = vmatpush1.bf16.msra.mxu0 %v2602_v4  ;;  %1877 = vmatpush1.bf16.msra.mxu1 %v2605_v5  ;;  %v2692_v4 = vld [vmem:[#allocation5 + $0x560] ss:$16 sps:$4 sm:$0xff]   ;;  %v2695_v5 = vld [vmem:[#allocation5 + $0x568] ss:$16 sps:$4 sm:$0xff]  }
  0xa9   :  { %1714 = vmatprep.subr.bf16.mxu0 %v2610_v6  ;;  %1878 = vmatprep.subr.bf16.mxu1 %v2613_v7  ;;  %v2700_v6 = vld [vmem:[#allocation5 + $0x584] ss:$16 sps:$4 sm:$0xff]   ;;  %v2703_v7 = vld [vmem:[#allocation5 + $0x58c] ss:$16 sps:$4 sm:$0xff]  }
  0xac   :  { %1715 = vmatpush1.bf16.msra.mxu0 %v2608_v8  ;;  %1879 = vmatpush1.bf16.msra.mxu1 %v2611_v9  ;;  %v2698_v8 = vld [vmem:[#allocation5 + $0x580] ss:$16 sps:$4 sm:$0xff]   ;;  %v2701_v9 = vld [vmem:[#allocation5 + $0x588] ss:$16 sps:$4 sm:$0xff]  }
  0xad   :  { %1716 = vmatprep.subr.bf16.mxu0 %v2616_v10  ;;  %1880 = vmatprep.subr.bf16.mxu1 %v2619_v11  ;;  %v2706_v10 = vld [vmem:[#allocation5 + $0x5a4] ss:$16 sps:$4 sm:$0xff]   ;;  %v2709_v11 = vld [vmem:[#allocation5 + $0x5ac] ss:$16 sps:$4 sm:$0xff]  }
  0xb0   :  { %1717 = vmatpush1.bf16.msra.mxu0 %v2614_v12  ;;  %1881 = vmatpush1.bf16.msra.mxu1 %v2617_v13  ;;  %v2704_v12 = vld [vmem:[#allocation5 + $0x5a0] ss:$16 sps:$4 sm:$0xff]   ;;  %v2707_v13 = vld [vmem:[#allocation5 + $0x5a8] ss:$16 sps:$4 sm:$0xff]  }
  0xb1   :  { %1718 = vmatprep.subr.bf16.mxu0 %v2622_v14  ;;  %1882 = vmatprep.subr.bf16.mxu1 %v2625_v16  ;;  %v2712_v14 = vld [vmem:[#allocation5 + $0x5c4] ss:$16 sps:$4 sm:$0xff]   ;;  %v2715_v16 = vld [vmem:[#allocation5 + $0x5cc] ss:$16 sps:$4 sm:$0xff]  }
  0xb4   :  { %1719 = vmatpush1.bf16.msra.mxu0 %v2620_v17  ;;  %1883 = vmatpush1.bf16.msra.mxu1 %v2623_v18  ;;  %v2710_v17 = vld [vmem:[#allocation5 + $0x5c0] ss:$16 sps:$4 sm:$0xff]   ;;  %v2713_v18 = vld [vmem:[#allocation5 + $0x5c8] ss:$16 sps:$4 sm:$0xff]  }
  0xb5   :  { %1729 = vmatprep.subr.bf16.mxu0 %v2628_v19  ;;  %1893 = vmatprep.subr.bf16.mxu1 %v2631_v22  ;;  %v2718_v19 = vld [vmem:[#allocation5 + $0x5e4] ss:$16 sps:$4 sm:$0xff]   ;;  %v2721_v22 = vld [vmem:[#allocation5 + $0x5ec] ss:$16 sps:$4 sm:$0xff]  }
  0xb7   :  { %1721 = vmatmul.mubr.bf16.vlgmr.msra.gmra.mrb[0].mxu0 %v355_v24  ;;  %1885 = vmatmul.mubr.bf16.vlgmr.msra.gmra.mrb[0].mxu1 %v355_v24  ;;  %v2719_v24 = vld [vmem:[#allocation5 + $0x5e8] ss:$16 sps:$4 sm:$0xff]  }
  0xb8   :  { %1730 = vmatpush1.bf16.msra.mxu0 %v2626_v23  ;;  %1894 = vmatpush1.bf16.msra.mxu1 %v2629_v25  ;;  %v2716_v23 = vld [vmem:[#allocation5 + $0x5e0] ss:$16 sps:$4 sm:$0xff]   ;;  %v2725_v25 = vld [vmem:[#allocation5 + $0x604] ss:$16 sps:$4 sm:$0xff]  }
  0xb9   :  { %1731 = vmatprep.subr.bf16.mxu0 %v2634_v26  ;;  %1895 = vmatprep.subr.bf16.mxu1 %v2637_v27  ;;  %v2728_v26 = vld [vmem:[#allocation5 + $0x60c] ss:$16 sps:$4 sm:$0xff]   ;;  %v2723_v27 = vld [vmem:[#allocation5 + $0x600] ss:$16 sps:$4 sm:$0xff]  }
  0xba   :  { %1761 = vmatprep.mubr.bf16.mxu0 %v2989_v20  ;;  %1925 = vmatprep.mubr.bf16.mxu1 %v2989_v20 }
  0xbc   :  { %1732 = vmatpush1.bf16.msra.mxu0 %v2632_v28  ;;  %1896 = vmatpush1.bf16.msra.mxu1 %v2635_v29  ;;  %v2726_v28 = vld [vmem:[#allocation5 + $0x608] ss:$16 sps:$4 sm:$0xff]   ;;  %v2731_v29 = vld [vmem:[#allocation5 + $0x624] ss:$16 sps:$4 sm:$0xff]  }
  0xbd   :  { %1733 = vmatprep.subr.bf16.mxu0 %v2640_v30  ;;  %1897 = vmatprep.subr.bf16.mxu1 %v2643_v31  ;;  %v2734_v30 = vld [vmem:[#allocation5 + $0x62c] ss:$16 sps:$4 sm:$0xff]   ;;  %v358_v31 = vcombine.high %v2989_v20, %v2989_v20  ;;  %v2743_v20 = vld [vmem:[#allocation5 + $0x664] ss:$16 sps:$4 sm:$0xff]  }
  0xc0   :  { %1734 = vmatpush1.bf16.msra.mxu0 %v2638_v15  ;;  %1898 = vmatpush1.bf16.msra.mxu1 %v2641_v32  ;;  %v2729_v15 = vld [vmem:[#allocation5 + $0x620] ss:$16 sps:$4 sm:$0xff]   ;;  %v2732_v32 = vld [vmem:[#allocation5 + $0x628] ss:$16 sps:$4 sm:$0xff]  }
  0xc1   :  { %1735 = vmatprep.subr.bf16.mxu0 %v2646_v33  ;;  %1899 = vmatprep.subr.bf16.mxu1 %v2649_v34  ;;  %v2737_v33 = vld [vmem:[#allocation5 + $0x644] ss:$16 sps:$4 sm:$0xff]   ;;  %v2740_v34 = vld [vmem:[#allocation5 + $0x64c] ss:$16 sps:$4 sm:$0xff]  }
  0xc4   :  { %1736 = vmatpush1.bf16.msra.mxu0 %v2644_v35  ;;  %1900 = vmatpush1.bf16.msra.mxu1 %v2647_v36  ;;  %v2735_v35 = vld [vmem:[#allocation5 + $0x640] ss:$16 sps:$4 sm:$0xff]   ;;  %v2738_v36 = vld [vmem:[#allocation5 + $0x648] ss:$16 sps:$4 sm:$0xff]  }
  0xc5   :  { %1737 = vmatprep.subr.bf16.mxu0 %v2652_v37  ;;  %1901 = vmatprep.subr.bf16.mxu1 %v2655_v38  ;;  %v2746_v37 = vld [vmem:[#allocation5 + $0x66c] ss:$16 sps:$4 sm:$0xff]   ;;  %v2741_v38 = vld [vmem:[#allocation5 + $0x660] ss:$16 sps:$4 sm:$0xff]  }
  0xc8   :  { %1738 = vmatpush1.bf16.msra.mxu0 %v2650_v39  ;;  %1902 = vmatpush1.bf16.msra.mxu1 %v2653_v40  ;;  %v2744_v39 = vld [vmem:[#allocation5 + $0x668] ss:$16 sps:$4 sm:$0xff]   ;;  %v2749_v40 = vld [vmem:[#allocation5 + $0x684] ss:$16 sps:$4 sm:$0xff]  }
  0xc9   :  { %1739 = vmatprep.subr.bf16.mxu0 %v2658_v41  ;;  %1903 = vmatprep.subr.bf16.mxu1 %v2661_v42  ;;  %v2752_v41 = vld [vmem:[#allocation5 + $0x68c] ss:$16 sps:$4 sm:$0xff]   ;;  %v2747_v42 = vld [vmem:[#allocation5 + $0x680] ss:$16 sps:$4 sm:$0xff]  }
  0xcc   :  { %1740 = vmatpush1.bf16.msra.mxu0 %v2656_v44  ;;  %1904 = vmatpush1.bf16.msra.mxu1 %v2659_v45  ;;  %v2750_v44 = vld [vmem:[#allocation5 + $0x688] ss:$16 sps:$4 sm:$0xff]   ;;  %v2755_v45 = vld [vmem:[#allocation5 + $0x6a4] ss:$16 sps:$4 sm:$0xff]  }
  0xcd   :  { %1741 = vmatprep.subr.bf16.mxu0 %v2664_v46  ;;  %1905 = vmatprep.subr.bf16.mxu1 %v2667_v47  ;;  %v2758_v46 = vld [vmem:[#allocation5 + $0x6ac] ss:$16 sps:$4 sm:$0xff]   ;;  %v2753_v47 = vld [vmem:[#allocation5 + $0x6a0] ss:$16 sps:$4 sm:$0xff]  }
  0xd0   :  { %1742 = vmatpush1.bf16.msra.mxu0 %v2662_v48  ;;  %1906 = vmatpush1.bf16.msra.mxu1 %v2665_v49  ;;  %v2756_v48 = vld [vmem:[#allocation5 + $0x6a8] ss:$16 sps:$4 sm:$0xff]   ;;  %v2761_v49 = vld [vmem:[#allocation5 + $0x6c4] ss:$16 sps:$4 sm:$0xff]  }
  0xd1   :  { %1743 = vmatprep.subr.bf16.mxu0 %v2670_v50  ;;  %1907 = vmatprep.subr.bf16.mxu1 %v2673_v51  ;;  %v2764_v50 = vld [vmem:[#allocation5 + $0x6cc] ss:$16 sps:$4 sm:$0xff]   ;;  %v2759_v51 = vld [vmem:[#allocation5 + $0x6c0] ss:$16 sps:$4 sm:$0xff]  }
  0xd4   :  { %1744 = vmatpush1.bf16.msra.mxu0 %v2668_v52  ;;  %1908 = vmatpush1.bf16.msra.mxu1 %v2671_v53  ;;  %v2762_v52 = vld [vmem:[#allocation5 + $0x6c8] ss:$16 sps:$4 sm:$0xff]   ;;  %v2767_v53 = vld [vmem:[#allocation5 + $0x6e4] ss:$16 sps:$4 sm:$0xff]  }
  0xd5   :  { %1745 = vmatprep.subr.bf16.mxu0 %v2676_v54  ;;  %1909 = vmatprep.subr.bf16.mxu1 %v2679_v55  ;;  %v2770_v54 = vld [vmem:[#allocation5 + $0x6ec] ss:$16 sps:$4 sm:$0xff]   ;;  %v2765_v55 = vld [vmem:[#allocation5 + $0x6e0] ss:$16 sps:$4 sm:$0xff]  }
  0xd8   :  { %1746 = vmatpush1.bf16.msra.mxu0 %v2674_v56  ;;  %1910 = vmatpush1.bf16.msra.mxu1 %v2677_v57  ;;  %v2768_v56 = vld [vmem:[#allocation5 + $0x6e8] ss:$16 sps:$4 sm:$0xff]   ;;  %v2773_v57 = vld [vmem:[#allocation5 + $0x704] ss:$16 sps:$4 sm:$0xff]  }
  0xd9   :  { %1747 = vmatprep.subr.bf16.mxu0 %v2682_v58  ;;  %1911 = vmatprep.subr.bf16.mxu1 %v2685_v59  ;;  %v2776_v58 = vld [vmem:[#allocation5 + $0x70c] ss:$16 sps:$4 sm:$0xff]   ;;  %v2771_v59 = vld [vmem:[#allocation5 + $0x700] ss:$16 sps:$4 sm:$0xff]  }
  0xdc   :  { %1748 = vmatpush1.bf16.msra.mxu0 %v2680_v60  ;;  %1912 = vmatpush1.bf16.msra.mxu1 %v2683_v61  ;;  %v2774_v60 = vld [vmem:[#allocation5 + $0x708] ss:$16 sps:$4 sm:$0xff]   ;;  %v2779_v61 = vld [vmem:[#allocation5 + $0x724] ss:$16 sps:$4 sm:$0xff]  }
  0xdd   :  { %1749 = vmatprep.subr.bf16.mxu0 %v2688_v62  ;;  %1913 = vmatprep.subr.bf16.mxu1 %v2691_v63  ;;  %v2782_v62 = vld [vmem:[#allocation5 + $0x72c] ss:$16 sps:$4 sm:$0xff]   ;;  %v2777_v63 = vld [vmem:[#allocation5 + $0x720] ss:$16 sps:$4 sm:$0xff]  }
  0xe0   :  { %1750 = vmatpush1.bf16.msra.mxu0 %v2686_v0  ;;  %1914 = vmatpush1.bf16.msra.mxu1 %v2689_v1  ;;  %v2780_v0 = vld [vmem:[#allocation5 + $0x728] ss:$16 sps:$4 sm:$0xff]   ;;  %v2785_v1 = vld [vmem:[#allocation5 + $0x744] ss:$16 sps:$4 sm:$0xff]  }
  0xe1   :  { %1751 = vmatprep.subr.bf16.mxu0 %v2694_v2  ;;  %1915 = vmatprep.subr.bf16.mxu1 %v2697_v3  ;;  %v2788_v2 = vld [vmem:[#allocation5 + $0x74c] ss:$16 sps:$4 sm:$0xff]   ;;  %v2783_v3 = vld [vmem:[#allocation5 + $0x740] ss:$16 sps:$4 sm:$0xff]  }
  0xe4   :  { %1752 = vmatpush1.bf16.msra.mxu0 %v2692_v4  ;;  %1916 = vmatpush1.bf16.msra.mxu1 %v2695_v5  ;;  %v2786_v4 = vld [vmem:[#allocation5 + $0x748] ss:$16 sps:$4 sm:$0xff]   ;;  %v2791_v5 = vld [vmem:[#allocation5 + $0x764] ss:$16 sps:$4 sm:$0xff]  }
  0xe5   :  { %1753 = vmatprep.subr.bf16.mxu0 %v2700_v6  ;;  %1917 = vmatprep.subr.bf16.mxu1 %v2703_v7  ;;  %v2794_v6 = vld [vmem:[#allocation5 + $0x76c] ss:$16 sps:$4 sm:$0xff]   ;;  %v2789_v7 = vld [vmem:[#allocation5 + $0x760] ss:$16 sps:$4 sm:$0xff]  }
  0xe8   :  { %1754 = vmatpush1.bf16.msra.mxu0 %v2698_v8  ;;  %1918 = vmatpush1.bf16.msra.mxu1 %v2701_v9  ;;  %v2792_v8 = vld [vmem:[#allocation5 + $0x768] ss:$16 sps:$4 sm:$0xff]   ;;  %v2797_v9 = vld [vmem:[#allocation5 + $0x784] ss:$16 sps:$4 sm:$0xff]  }
  0xe9   :  { %1755 = vmatprep.subr.bf16.mxu0 %v2706_v10  ;;  %1919 = vmatprep.subr.bf16.mxu1 %v2709_v11  ;;  %v2800_v10 = vld [vmem:[#allocation5 + $0x78c] ss:$16 sps:$4 sm:$0xff]   ;;  %v2795_v11 = vld [vmem:[#allocation5 + $0x780] ss:$16 sps:$4 sm:$0xff]  }
  0xec   :  { %1756 = vmatpush1.bf16.msra.mxu0 %v2704_v12  ;;  %1920 = vmatpush1.bf16.msra.mxu1 %v2707_v13  ;;  %v2798_v12 = vld [vmem:[#allocation5 + $0x788] ss:$16 sps:$4 sm:$0xff]   ;;  %v2803_v13 = vld [vmem:[#allocation5 + $0x7a4] ss:$16 sps:$4 sm:$0xff]  }
  0xed   :  { %1757 = vmatprep.subr.bf16.mxu0 %v2712_v14  ;;  %1921 = vmatprep.subr.bf16.mxu1 %v2715_v16  ;;  %v2806_v14 = vld [vmem:[#allocation5 + $0x7ac] ss:$16 sps:$4 sm:$0xff]   ;;  %v2801_v16 = vld [vmem:[#allocation5 + $0x7a0] ss:$16 sps:$4 sm:$0xff]  }
  0xf0   :  { %1758 = vmatpush1.bf16.msra.mxu0 %v2710_v17  ;;  %1922 = vmatpush1.bf16.msra.mxu1 %v2713_v18  ;;  %v2804_v17 = vld [vmem:[#allocation5 + $0x7a8] ss:$16 sps:$4 sm:$0xff]   ;;  %v2809_v18 = vld [vmem:[#allocation5 + $0x7c4] ss:$16 sps:$4 sm:$0xff]  }
  0xf1   :  { %1759 = vmatprep.subr.bf16.mxu0 %v2718_v19  ;;  %1923 = vmatprep.subr.bf16.mxu1 %v2721_v22  ;;  %v2812_v19 = vld [vmem:[#allocation5 + $0x7cc] ss:$16 sps:$4 sm:$0xff]   ;;  %v2807_v22 = vld [vmem:[#allocation5 + $0x7c0] ss:$16 sps:$4 sm:$0xff]  }
  0xf4   :  { %1760 = vmatpush1.bf16.msra.mxu0 %v2716_v23  ;;  %1924 = vmatpush1.bf16.msra.mxu1 %v2719_v24  ;;  %v2810_v23 = vld [vmem:[#allocation5 + $0x7c8] ss:$16 sps:$4 sm:$0xff]   ;;  %v2815_v24 = vld [vmem:[#allocation5 + $0x7e4] ss:$16 sps:$4 sm:$0xff]  }
  0xf5   :  { %1770 = vmatprep.subr.bf16.mxu0 %v2725_v25  ;;  %1934 = vmatprep.subr.bf16.mxu1 %v2728_v26  ;;  %v2818_v25 = vld [vmem:[#allocation5 + $0x7ec] ss:$16 sps:$4 sm:$0xff]   ;;  %v2813_v26 = vld [vmem:[#allocation5 + $0x7e0] ss:$16 sps:$4 sm:$0xff]  }
  0xf7   :  { %1762 = vmatmul.mubr.bf16.vlgmr.msra.gmra.mrb[0].mxu0 %v2992_v21  ;;  %1926 = vmatmul.mubr.bf16.vlgmr.msra.gmra.mrb[0].mxu1 %v2992_v21 }
  0xf8   :  { %1771 = vmatpush1.bf16.msra.mxu0 %v2723_v27  ;;  %1935 = vmatpush1.bf16.msra.mxu1 %v2726_v28  ;;  %v2816_v27 = vld [vmem:[#allocation5 + $0x7e8] ss:$16 sps:$4 sm:$0xff]   ;;  %v356_v28 = vcombine.high %v2992_v21, %v2992_v21  ;;  %v2069_v21 = vsub.s32 6, %v2977_v43 }
  0xf9   :  { %1772 = vmatprep.subr.bf16.mxu0 %v2731_v29  ;;  %1936 = vmatprep.subr.bf16.mxu1 %v2734_v30  ;;  %v1981_v29 = vsub.s32 0, %v2977_v43  ;;  %v1975_v30 = vld [vmem:[#allocation7] sm:$0x77] }
  0xfa   :  { %1802 = vmatprep.mubr.bf16.mxu0 %v358_v31  ;;  %1966 = vmatprep.mubr.bf16.mxu1 %v358_v31  ;;  %v1976_v31 = vld [vmem:[#allocation7 + $0x8] sm:$0x77] }
  0xfc   :  { %1773 = vmatpush1.bf16.msra.mxu0 %v2729_v15  ;;  %1937 = vmatpush1.bf16.msra.mxu1 %v2732_v32  ;;  %v1985_v15 = vsub.s32 4, %v2977_v43  ;;  %v2021_v32 = vsub.s32 1, %v2977_v43 }
  0xfd   :  { %1774 = vmatprep.subr.bf16.mxu0 %v2737_v33  ;;  %1938 = vmatprep.subr.bf16.mxu1 %v2740_v34  ;;  %v2025_v33 = vsub.s32 5, %v2977_v43  ;;  %v1982_v34 = vrot.slane %v1975_v30, %v1981_v29 }
 0x100   :  { %1775 = vmatpush1.bf16.msra.mxu0 %v2735_v35  ;;  %1939 = vmatpush1.bf16.msra.mxu1 %v2738_v36  ;;  %v2065_v35 = vsub.s32 2, %v2977_v43  ;;  %v1990_v36 = vrot.slane %v1976_v31, %v1981_v29 }
 0x101   :  { %1776 = vmatprep.subr.bf16.mxu0 %v2743_v20  ;;  %1940 = vmatprep.subr.bf16.mxu1 %v2746_v37  ;;  %v1986_v20 = vrot.slane %v1975_v30, %v1985_v15  ;;  %v1994_v37 = vrot.slane %v1976_v31, %v1985_v15 }
 0x104   :  { %1777 = vmatpush1.bf16.msra.mxu0 %v2741_v38  ;;  %1941 = vmatpush1.bf16.msra.mxu1 %v2744_v39  ;;  %v2022_v38 = vrot.slane %v1975_v30, %v2021_v32  ;;  %v2030_v39 = vrot.slane %v1976_v31, %v2021_v32 }
 0x105   :  { %1778 = vmatprep.subr.bf16.mxu0 %v2749_v40  ;;  %1942 = vmatprep.subr.bf16.mxu1 %v2752_v41  ;;  %v2026_v40 = vrot.slane %v1975_v30, %v2025_v33  ;;  %v2034_v41 = vrot.slane %v1976_v31, %v2025_v33 }
 0x108   :  { %1779 = vmatpush1.bf16.msra.mxu0 %v2747_v42  ;;  %1943 = vmatpush1.bf16.msra.mxu1 %v2750_v44  ;;  %v2002_v42 = vrot.slane %v1982_v34, %v1981_v29  ;;  %v2066_v44 = vrot.slane %v1975_v30, %v2065_v35 }
 0x109   :  { %1780 = vmatprep.subr.bf16.mxu0 %v2755_v45  ;;  %1944 = vmatprep.subr.bf16.mxu1 %v2758_v46  ;;  %v2010_v45 = vrot.slane %v1990_v36, %v1981_v29  ;;  %v2074_v46 = vrot.slane %v1976_v31, %v2065_v35 }
 0x10c   :  { %1781 = vmatpush1.bf16.msra.mxu0 %v2753_v47  ;;  %1945 = vmatpush1.bf16.msra.mxu1 %v2756_v48  ;;  %v2006_v47 = vrot.slane %v1986_v20, %v1981_v29  ;;  %v2070_v48 = vrot.slane %v1975_v30, %v2069_v21 }
 0x10d   :  { %1782 = vmatprep.subr.bf16.mxu0 %v2761_v49  ;;  %1946 = vmatprep.subr.bf16.mxu1 %v2764_v50  ;;  %v2014_v49 = vrot.slane %v1994_v37, %v1981_v29  ;;  %v2078_v50 = vrot.slane %v1976_v31, %v2069_v21 }
 0x110   :  { %1783 = vmatpush1.bf16.msra.mxu0 %v2759_v51  ;;  %1947 = vmatpush1.bf16.msra.mxu1 %v2762_v52  ;;  %v2042_v51 = vrot.slane %v2022_v38, %v2021_v32  ;;  %v2050_v52 = vrot.slane %v2030_v39, %v2021_v32 }
 0x111   :  { %1784 = vmatprep.subr.bf16.mxu0 %v2767_v53  ;;  %1948 = vmatprep.subr.bf16.mxu1 %v2770_v54  ;;  %v2919_v53 = vmov 1983009808  }
 0x112   :  { %v2114_v54 = vunpack.c.l.s4 %v2919_v53 }
 0x114   :  { %1785 = vmatpush1.bf16.msra.mxu0 %v2765_v55  ;;  %1949 = vmatpush1.bf16.msra.mxu1 %v2768_v56 }
 0x115   :  { %1786 = vmatprep.subr.bf16.mxu0 %v2773_v57  ;;  %1950 = vmatprep.subr.bf16.mxu1 %v2776_v58  ;;  %v2046_v57 = vrot.slane %v2026_v40, %v2021_v32  ;;  %v2054_v58 = vrot.slane %v2034_v41, %v2021_v32 }
 0x118   :  { %1787 = vmatpush1.bf16.msra.mxu0 %v2771_v59  ;;  %1951 = vmatpush1.bf16.msra.mxu1 %v2774_v60  ;;  %v2086_v60 = vrot.slane %v2066_v44, %v2065_v35 }
 0x119   :  { %1788 = vmatprep.subr.bf16.mxu0 %v2779_v61  ;;  %1952 = vmatprep.subr.bf16.mxu1 %v2782_v62  ;;  %v2094_v62 = vrot.slane %v2074_v46, %v2065_v35 }
 0x11c   :  { %1789 = vmatpush1.bf16.msra.mxu0 %v2777_v63  ;;  %1953 = vmatpush1.bf16.msra.mxu1 %v2780_v0 }
 0x11d   :  { %1790 = vmatprep.subr.bf16.mxu0 %v2785_v1  ;;  %1954 = vmatprep.subr.bf16.mxu1 %v2788_v2  ;;  %v2090_v2 = vrot.slane %v2070_v48, %v2065_v35 }
 0x120   :  { %1791 = vmatpush1.bf16.msra.mxu0 %v2783_v3  ;;  %1955 = vmatpush1.bf16.msra.mxu1 %v2786_v4  ;;  %v2098_v4 = vrot.slane %v2078_v50, %v2065_v35 }
 0x121   :  { %1792 = vmatprep.subr.bf16.mxu0 %v2791_v5  ;;  %1956 = vmatprep.subr.bf16.mxu1 %v2794_v6 }
 0x124   :  { %1793 = vmatpush1.bf16.msra.mxu0 %v2789_v7  ;;  %1957 = vmatpush1.bf16.msra.mxu1 %v2792_v8 }
 0x125   :  { %1794 = vmatprep.subr.bf16.mxu0 %v2797_v9  ;;  %1958 = vmatprep.subr.bf16.mxu1 %v2800_v10 }
 0x128   :  { %1795 = vmatpush1.bf16.msra.mxu0 %v2795_v11  ;;  %1959 = vmatpush1.bf16.msra.mxu1 %v2798_v12  ;;  %v2115_v11 = vunpack.c.0.s8 %v2114_v54 }
 0x129   :  { %1796 = vmatprep.subr.bf16.mxu0 %v2803_v13  ;;  %1960 = vmatprep.subr.bf16.mxu1 %v2806_v14 }
 0x12c   :  { %1797 = vmatpush1.bf16.msra.mxu0 %v2801_v16  ;;  %1961 = vmatpush1.bf16.msra.mxu1 %v2804_v17 }
 0x12d   :  { %1798 = vmatprep.subr.bf16.mxu0 %v2809_v18  ;;  %1962 = vmatprep.subr.bf16.mxu1 %v2812_v19 }
 0x130   :  { %1799 = vmatpush1.bf16.msra.mxu0 %v2807_v22  ;;  %1963 = vmatpush1.bf16.msra.mxu1 %v2810_v23  ;;  %v2118_v23 = vsub.s32 %v2115_v11, %v2977_v43 }
 0x131   :  { %1800 = vmatprep.subr.bf16.mxu0 %v2815_v24  ;;  %1964 = vmatprep.subr.bf16.mxu1 %v2818_v25 }
 0x134   :  { %1801 = vmatpush1.bf16.msra.mxu0 %v2813_v26  ;;  %1965 = vmatpush1.bf16.msra.mxu1 %v2816_v27 }
 0x137   :  { %1803 = vmatmul.mubr.bf16.vlgmr.msra.gmra.mrb[0].mxu0 %v356_v28  ;;  %1967 = vmatmul.mubr.bf16.vlgmr.msra.gmra.mrb[0].mxu1 %v356_v28 }
 0x20a   :  { %v1804_v55 = vpop.f32.mrb[0].mxu0  ;;  %v1968_v56 = vpop.f32.mrb[0].mxu1 }
 0x20b   :  { %v2015_v59 = vmul.f32 %v2002_v42, %v1804_v55  ;;  %v2017_v61 = vmul.f32 %v2010_v45, %v1968_v56  ;;  %v1806_v63 = vpop.f32.mrb[1].mxu0  ;;  %v1970_v0 = vpop.f32.mrb[1].mxu1 }
 0x20c   :  { %v2016_v1 = vmul.f32 %v2006_v47, %v1806_v63  ;;  %v2018_v3 = vmul.f32 %v2014_v49, %v1970_v0  ;;  %v1808_v5 = vpop.f32.mrb[2].mxu0  ;;  %v1972_v6 = vpop.f32.mrb[2].mxu1 }
 0x20d   :  { %v2055_v7 = vadd.f32 %v2042_v51, %v2015_v59  ;;  %v2057_v8 = vadd.f32 %v2050_v52, %v2017_v61  ;;  %v1809_v9 = vpop.f32.mrb[3].mxu0  ;;  %v1973_v10 = vpop.f32.mrb[3].mxu1 }
 0x20e   :  { %v2056_v12 = vadd.f32 %v2046_v57, %v2016_v1  ;;  %v2058_v13 = vadd.f32 %v2054_v58, %v2018_v3 }
 0x20f   :  { %vm2059_vm0 = vcmp.ge.f32.partialorder %v2055_v7, 0.0  ;;  %v2099_v14 = vmul.f32 %v2086_v60, %v2055_v7  ;;  %vm2061_vm1 = vcmp.ge.f32.partialorder %v2057_v8, 0.0  ;;  %v2101_v16 = vmul.f32 %v2094_v62, %v2057_v8 }
 0x210   :  { %vm2060_vm2 = vcmp.ge.f32.partialorder %v2056_v12, 0.0  ;;  %v2100_v17 = vmul.f32 %v2090_v2, %v2056_v12  ;;  %vm2062_vm3 = vcmp.ge.f32.partialorder %v2058_v13, 0.0  ;;  %v2102_v18 = vmul.f32 %v2098_v4, %v2058_v13 }
 0x211   :  { %v2103_v19 = vsel %vm2059_vm0, %v2055_v7, %v2099_v14  ;;  %v2105_v22 = vsel %vm2061_vm1, %v2057_v8, %v2101_v16 }
 0x212   :  { %v2104_v24 = vsel %vm2060_vm2, %v2056_v12, %v2100_v17  ;;  %v2106_v25 = vsel %vm2062_vm3, %v2058_v13, %v2102_v18 }
 0x213   :  { %v2111_v26 = vcombine.low %v2103_v19, %v2104_v24  ;;  %v2112_v27 = vcombine.low %v2105_v22, %v2106_v25 }
 0x215   :  { %v2119_v28 = vrot.slane %v2111_v26, %v2118_v23  ;;  %v2126_v29 = vrot.slane %v2112_v27, %v2118_v23 }
 0x217   :  { %v2127_v30 = vcombine.low %v2119_v28, %v2126_v29 }
 0x219   :  { %2129 = vst [vmem:[#allocation8] sm:$0xff] %v2127_v30 }
 0x21a   :  { %2896 = shalt.err (!%p2893_p0)
}
 0x21b   :  { %s2897_s25 = scalar_lea.hbm %s3028_s3, 128 }
 0x21c   :  { %p2898_p1 = scmp.ne.s32.totalorder %s3028_s3, %s2897_s25  ;;  %p2901_p2 = scmp.lt.u32.totalorder %s2897_s25, %s3028_s3 }
 0x21e   :  { %p2903_p3 = pnand %p2901_p2, %p2898_p1 }
 0x220   :  { %2906 = shalt.err (!%p2903_p3)
}
 0x221   :  { %2139 = dma.vmem_to_hbm [thread:$0]  %s2137_s21, 128, %s3028_s3, [#allocation4]  }
 0x222   :  { %2911 = dma.done.wait [#allocation4], 128  }
 0x223   :  { %2912 = vsyncadd [#allocation4], 4294967168 }
 0x224   :  { %2143 = vsyncpa [#allocation3], 1 }
 0x225   :  { %2144 = vsyncpa [#allocation6], 1 }
 0x226   :  { %2145 = vsyncpa [#allocation4], 1 }

</bundles_post_ra>
